<compile_context>
chip_gen: v7x
topology: tpu7x:2x2x1
jax: 0.10.0
libtpu: 0.0.40
codegen_flags: <defaults>
</compile_context>

<pallas_src>
from functools import partial

import jax
import jax.numpy as jnp
import numpy as np
from jax.experimental import pallas as pl
from jax.experimental.pallas import tpu as pltpu

NEG_SLOPE = 0.2          # LeakyReLU negative_slope (module default)
TILE_N = 2048            # node-axis tile; big tiles amortize the ~0.35 us
                         # per-grid-step pipeline overhead (kernel is mem-bound)
PALLAS_MIN_ROWS = 512    # below this, plain XLA beats kernel launch overhead
_ROW_ALIGN = 16          # row padding granularity (bf16 sublane packing)


# ---------------------------------------------------------------------------
# Pallas kernel
# ---------------------------------------------------------------------------
def _make_attn_kernel(R, HD, neg_slope=NEG_SLOPE):
    """Multi-relation attention kernel for one N-tile.

    Ref layout (per N-tile):
      feat_ref : (T, F_in)        wc_ref : (F_in, HD)
      ac_ref   : (HD, R*HD)       at_ref : (R*HD, R*HD)   fused attention mats
      rel_ref  : (T, R*HD)        we_ref : (R*HD, R*HD)   block-diag edge mats
      out_ref  : (T, HD)
    """

    def kernel(feat_ref, wc_ref, ac_ref, at_ref, rel_ref, we_ref, out_ref):
        cdt = rel_ref.dtype
        # Central-node transform, f32 accumulation on the MXU: (T, HD).
        central = jnp.dot(feat_ref[...], wc_ref[...],
                          preferred_element_type=jnp.float32)
        # All R edge-type transforms in one lane-dense block-diagonal matmul.
        types_all = jnp.dot(rel_ref[...], we_ref[...],
                            preferred_element_type=jnp.float32)     # (T, R*HD)
        # Attention logits, already expanded per head and per relation.
        # Operands go through the MXU in compute_dtype, accumulate in f32.
        scores = (jnp.dot(central.astype(cdt), ac_ref[...],
                          preferred_element_type=jnp.float32)
                  + jnp.dot(types_all.astype(cdt), at_ref[...],
                            preferred_element_type=jnp.float32))    # (T, R*HD)
        scores = jnp.where(scores >= 0, scores, neg_slope * scores)  # LeakyReLU

        # Numerically-stable softmax over the R relation lane-groups.
        # All elementwise math stays f32 (v5e-safe).  Two passes keep the live
        # intermediates to ~4 (T, HD) arrays regardless of R.
        m = scores[:, 0:HD]
        for r in range(1, R):
            m = jnp.maximum(m, scores[:, r * HD:(r + 1) * HD])
        denom = jnp.zeros_like(m)
        acc = jnp.zeros_like(m)
        for r in range(R):
            e = jnp.exp(scores[:, r * HD:(r + 1) * HD] - m)
            denom = denom + e
            acc = acc + e * types_all[:, r * HD:(r + 1) * HD]
        inv = pl.reciprocal(denom, approx=True)                      # EUP slot
        out_ref[...] = (acc * inv).astype(out_ref.dtype)

    return kernel


# ---------------------------------------------------------------------------
# Tiling helpers
# ---------------------------------------------------------------------------
def _round_up(x, m):
    return (x + m - 1) // m * m


def _tile_and_pad(n):
    """Pick an N-tile and padded N such that the grid has >= 2 steps."""
    n_aligned = _round_up(max(n, 1), _ROW_ALIGN)
    if n_aligned <= 2 * TILE_N:
        # Two tiles: keeps both v7x TensorCores busy, minimal padding.
        tile = _round_up(-(-n_aligned // 2), _ROW_ALIGN)
        return tile, 2 * tile
    return TILE_N, _round_up(n_aligned, TILE_N)


def _pad_rows(x, n_pad):
    n = x.shape[0]
    return x if n == n_pad else jnp.pad(x, ((0, n_pad - n), (0, 0)))


def _block_diag(mats):
    r, n = len(mats), mats[0].shape[0]
    out = jnp.zeros((r * n, r * n), mats[0].dtype)
    for i, m in enumerate(mats):
        out = out.at[i * n:(i + 1) * n, i * n:(i + 1) * n].set(m)
    return out


# ---------------------------------------------------------------------------
# Wrapper (mirrors MacroConv.forward)
# ---------------------------------------------------------------------------
@partial(jax.jit, static_argnames=("num_dst_nodes", "num_heads", "out_feats",
                                   "compute_dtype", "out_dtype"))
def macro_conv_forward(input_dst, relation_features,
                       edge_type_transformation_weight,
                       central_node_transformation_weight,
                       edge_types_attention_weight,
                       *, num_dst_nodes, num_heads, out_feats,
                       compute_dtype=jnp.bfloat16, out_dtype=jnp.float32):
    """MacroConv.forward.  `num_dst_nodes` is a hashable tuple of
    (ntype, count) pairs; everything after `*` is a static argument."""
    num_dst = dict(num_dst_nodes)
    H, D = num_heads, out_feats
    HD = H * D

    # Fused per-head attention matrices (tiny glue, traced once):
    #   Ac_full[(h,d),(h',d')] = a_c[h,d] * delta(h,h')   (same for At_full)
    # so `central @ Ac_full` is the per-head central score broadcast to every
    # feature of its head (lane-dense).
    a = edge_types_attention_weight.astype(jnp.float32)            # (H, 2*D)
    a_c, a_t = a[:, :D], a[:, D:]
    eye_h = jnp.eye(H, dtype=jnp.float32)
    ones_d = jnp.ones((D,), jnp.float32)
    Ac_full = jnp.einsum('hd,hk,e->hdke', a_c, eye_h, ones_d).reshape(HD, HD)
    At_full = jnp.einsum('hd,hk,e->hdke', a_t, eye_h, ones_d).reshape(HD, HD)

    in_itemsize = jnp.dtype(compute_dtype).itemsize
    out_itemsize = jnp.dtype(out_dtype).itemsize
    output_features = {}

    # TODO(synk): dropout rate is 0.0 -> identity; a nonzero rate would need
    # pltpu.prng_seed + pltpu.stateful_bernoulli inside the kernel.
    for ntype, feat in input_dst.items():
        if num_dst.get(ntype, 0) == 0:
            continue
        rels = [rt for rt in relation_features if rt[2] == ntype]
        if not rels:
            continue
        R = len(rels)
        N, F_in = feat.shape

        # ---- single-relation / tiny ntypes: plain XLA is cheaper ----------
        if R == 1 or N < PALLAS_MIN_ROWS:
            types = jnp.stack(
                [relation_features[rt].astype(jnp.float32)
                 @ edge_type_transformation_weight[rt[1]].astype(jnp.float32)
                 for rt in rels], axis=0)                           # (R, N, HD)
            if R == 1:
                output_features[ntype] = types[0].astype(out_dtype)
                continue
            central = (feat.astype(jnp.float32)
                       @ central_node_transformation_weight[ntype]
                       .astype(jnp.float32)).reshape(-1, H, D)
            types4 = types.reshape(R, -1, H, D)
            score = (jnp.einsum('nhd,hd->nh', central, a_c)[None]
                     + jnp.einsum('rnhd,hd->rnh', types4, a_t))
            score = jnp.where(score >= 0, score, NEG_SLOPE * score)
            w = jax.nn.softmax(score, axis=0)[..., None]
            out = jnp.sum(w * types4, axis=0).reshape(-1, HD)
            output_features[ntype] = out.astype(out_dtype)
            continue

        # ---- Pallas path ---------------------------------------------------
        tile, n_pad = _tile_and_pad(N)
        grid = (n_pad // tile,)

        feat_p = _pad_rows(feat.astype(compute_dtype), n_pad)
        rel_cat = _pad_rows(
            jnp.concatenate([relation_features[rt] for rt in rels], axis=1)
            .astype(compute_dtype), n_pad)                          # (n_pad, R*HD)
        wc = central_node_transformation_weight[ntype].astype(compute_dtype)
        we_bd = _block_diag(
            [edge_type_transformation_weight[rt[1]].astype(jnp.float32)
             for rt in rels]).astype(compute_dtype)                 # (R*HD, R*HD)
        ac_stack = jnp.concatenate([Ac_full] * R, axis=1).astype(compute_dtype)
        at_bd = _block_diag([At_full] * R).astype(compute_dtype)

        in_specs = [
            pl.BlockSpec((tile, F_in), lambda i: (i, 0)),
            pl.BlockSpec((F_in, HD), lambda i: (0, 0)),
            pl.BlockSpec((HD, R * HD), lambda i: (0, 0)),
            pl.BlockSpec((R * HD, R * HD), lambda i: (0, 0)),
            pl.BlockSpec((tile, R * HD), lambda i: (i, 0)),
            pl.BlockSpec((R * HD, R * HD), lambda i: (0, 0)),
        ]
        out_specs = pl.BlockSpec((tile, HD), lambda i: (i, 0))

        flops = 2 * n_pad * (F_in * HD + 2 * (R * HD) * (R * HD)
                             + HD * (R * HD))
        bytes_accessed = (n_pad * (F_in + R * HD) * in_itemsize
                          + (F_in * HD + HD * R * HD
                             + 2 * (R * HD) ** 2) * in_itemsize
                          + n_pad * HD * out_itemsize)

        out = pl.pallas_call(
            _make_attn_kernel(R, HD),
            out_shape=jax.ShapeDtypeStruct((n_pad, HD), out_dtype),
            grid=grid,
            in_specs=in_specs,
            out_specs=out_specs,
            compiler_params=pltpu.CompilerParams(
                dimension_semantics=("parallel",),
                vmem_limit_bytes=32 * 1024 * 1024),
            cost_estimate=pl.CostEstimate(
                flops=flops,
                transcendentals=(R + 1) * n_pad * HD,
                bytes_accessed=bytes_accessed),
        )(feat_p, wc, ac_stack, at_bd, rel_cat, we_bd)
        output_features[ntype] = out[:N]
    return output_features


# ---------------------------------------------------------------------------
# Plain-JAX reference (direct transcription of the PyTorch forward)
# ---------------------------------------------------------------------------
def macro_conv_reference(num_dst_nodes, input_dst, relation_features,
                         edge_w, central_w, attn_w, num_heads, out_feats):
    H, D = num_heads, out_feats
    out = {}
    for ntype, feat in input_dst.items():
        if num_dst_nodes[ntype] == 0:
            continue
        rels = [rt for rt in relation_features if rt[2] == ntype]
        if len(rels) == 0:
            continue
        central = (feat @ central_w[ntype]).reshape(-1, H, D)
        types = jnp.stack(
            [relation_features[rt] @ edge_w[rt[1]] for rt in rels], axis=0)
        if types.shape[0] == 1:
            out[ntype] = types[0]
            continue
        types4 = types.reshape(types.shape[0], -1, H, D)
        stacked_central = jnp.stack([central] * types4.shape[0], axis=0)
        concat = jnp.concatenate([stacked_central, types4], axis=-1)
        scores = jnp.sum(attn_w * concat, axis=-1, keepdims=True)
        scores = jnp.where(scores >= 0, scores, NEG_SLOPE * scores)
        scores = jax.nn.softmax(scores, axis=0)
        o = jnp.sum(scores * types4, axis=0)
        out[ntype] = o.reshape(-1, H * D)
    return out


# ---------------------------------------------------------------------------
if __name__ == "__main__":
    key = jax.random.PRNGKey(0)
    num_heads, out_feats, in_feats = 4, 8, 32
    HD = num_heads * out_feats
    # paper: 1500 nodes, 3 relations -> Pallas path with a 2-step N grid;
    # author: 16 nodes, 1 relation  -> plain XLA fallback path.
    N_paper, N_author = 1500, 16

    ks = jax.random.split(key, 12)
    input_dst = {
        "paper":  jax.random.normal(ks[0], (N_paper, in_feats), jnp.float32),
        "author": jax.random.normal(ks[1], (N_author, in_feats), jnp.float32),
    }
    relation_features = {
        ("author", "writes", "paper"):
            jax.random.normal(ks[2], (N_paper, HD), jnp.float32),
        ("subject", "has", "paper"):
            jax.random.normal(ks[3], (N_paper, HD), jnp.float32),
        ("paper", "cites", "paper"):
            jax.random.normal(ks[4], (N_paper, HD), jnp.float32),
        ("paper", "written_by", "author"):
            jax.random.normal(ks[5], (N_author, HD), jnp.float32),
    }
    edge_type_transformation_weight = {
        "writes":     0.1 * jax.random.normal(ks[6], (HD, HD), jnp.float32),
        "has":        0.1 * jax.random.normal(ks[7], (HD, HD), jnp.float32),
        "cites":      0.1 * jax.random.normal(ks[8], (HD, HD), jnp.float32),
        "written_by": 0.1 * jax.random.normal(ks[9], (HD, HD), jnp.float32),
    }
    central_node_transformation_weight = {
        "paper":  0.1 * jax.random.normal(ks[10], (in_feats, HD), jnp.float32),
        "author": 0.1 * jax.random.normal(ks[11], (in_feats, HD), jnp.float32),
    }
    edge_types_attention_weight = 0.1 * jax.random.normal(
        jax.random.PRNGKey(42), (num_heads, 2 * out_feats), jnp.float32)

    num_dst_nodes = {"paper": N_paper, "author": N_author}
    num_dst_static = tuple(sorted(num_dst_nodes.items()))

    ref = macro_conv_reference(
        num_dst_nodes, input_dst, relation_features,
        edge_type_transformation_weight,
        central_node_transformation_weight,
        edge_types_attention_weight,
        num_heads, out_feats)

    # f32 compute path: deviations vs. the reference come only from the
    # approximate EUP reciprocal and matmul-vs-sum accumulation order.
    out_f32 = macro_conv_forward(
        input_dst, relation_features,
        edge_type_transformation_weight,
        central_node_transformation_weight,
        edge_types_attention_weight,
        num_dst_nodes=num_dst_static, num_heads=num_heads,
        out_feats=out_feats, compute_dtype=jnp.float32)
    out_f32 = jax.tree_util.tree_map(jax.block_until_ready, out_f32)
    for ntype in ref:
        np.testing.assert_allclose(np.asarray(out_f32[ntype]),
                                   np.asarray(ref[ntype]),
                                   rtol=2e-2, atol=2e-2)

    # bf16 matmul-input path (default / recommended on v6e & v7x): inputs are
    # rounded to bf16, so compare with a correspondingly loose tolerance.
    out_bf16 = macro_conv_forward(
        input_dst, relation_features,
        edge_type_transformation_weight,
        central_node_transformation_weight,
        edge_types_attention_weight,
        num_dst_nodes=num_dst_static, num_heads=num_heads,
        out_feats=out_feats, compute_dtype=jnp.bfloat16)
    out_bf16 = jax.tree_util.tree_map(jax.block_until_ready, out_bf16)
    for ntype in ref:
        np.testing.assert_allclose(np.asarray(out_bf16[ntype]),
                                   np.asarray(ref[ntype]),
                                   rtol=6e-2, atol=6e-2)

    print("KERNEL_OK")
</pallas_src>

<mosaic_0001>
module attributes {stable_mosaic.version = 11 : i64} {
  func.func @kernel(%arg0: i32, %arg1: memref<752x32xf32, #tpu.memory_space<vmem>>, %arg2: memref<32x32xf32, #tpu.memory_space<vmem>>, %arg3: memref<32x96xf32, #tpu.memory_space<vmem>>, %arg4: memref<96x96xf32, #tpu.memory_space<vmem>>, %arg5: memref<752x96xf32, #tpu.memory_space<vmem>>, %arg6: memref<96x96xf32, #tpu.memory_space<vmem>>, %arg7: memref<752x32xf32, #tpu.memory_space<vmem>>) attributes {dimension_semantics = [#tpu.dimension_semantics<parallel>], iteration_bounds = array<i64: 2>, scalar_prefetch = 0 : i64, scratch_operands = 0 : i64, tpu.core_type = #tpu.core_type<tc>, window_params = [{transform_indices = @transform_0, window_bounds = array<i64: 752, 32>}, {pipeline_mode = #tpu.pipeline_mode<synchronous>, transform_indices = @transform_1, window_bounds = array<i64: 32, 32>}, {pipeline_mode = #tpu.pipeline_mode<synchronous>, transform_indices = @transform_2, window_bounds = array<i64: 32, 96>}, {pipeline_mode = #tpu.pipeline_mode<synchronous>, transform_indices = @transform_3, window_bounds = array<i64: 96, 96>}, {transform_indices = @transform_4, window_bounds = array<i64: 752, 96>}, {pipeline_mode = #tpu.pipeline_mode<synchronous>, transform_indices = @transform_5, window_bounds = array<i64: 96, 96>}, {transform_indices = @transform_6, window_bounds = array<i64: 752, 32>}]} {
    %c0 = arith.constant 0 : index
    %c0_0 = arith.constant 0 : index
    %0 = vector.load %arg1[%c0, %c0_0] : memref<752x32xf32, #tpu.memory_space<vmem>>, vector<752x32xf32>
    %c0_1 = arith.constant 0 : index
    %c0_2 = arith.constant 0 : index
    %1 = vector.load %arg2[%c0_1, %c0_2] : memref<32x32xf32, #tpu.memory_space<vmem>>, vector<32x32xf32>
    %cst = arith.constant dense<0.000000e+00> : vector<752x32xf32>
    %2 = tpu.matmul %0, %1, %cst {dimension_numbers = #tpu.dot_dimension_numbers<[1], [0], [0], [1], [0, 0, 1, 1], [], []>} : vector<752x32xf32>, vector<32x32xf32>, vector<752x32xf32> -> vector<752x32xf32>
    %c0_3 = arith.constant 0 : index
    %c0_4 = arith.constant 0 : index
    %3 = vector.load %arg5[%c0_3, %c0_4] : memref<752x96xf32, #tpu.memory_space<vmem>>, vector<752x96xf32>
    %c0_5 = arith.constant 0 : index
    %c0_6 = arith.constant 0 : index
    %4 = vector.load %arg6[%c0_5, %c0_6] : memref<96x96xf32, #tpu.memory_space<vmem>>, vector<96x96xf32>
    %cst_7 = arith.constant dense<0.000000e+00> : vector<752x96xf32>
    %5 = tpu.matmul %3, %4, %cst_7 {dimension_numbers = #tpu.dot_dimension_numbers<[1], [0], [0], [1], [0, 0, 1, 1], [], []>} : vector<752x96xf32>, vector<96x96xf32>, vector<752x96xf32> -> vector<752x96xf32>
    %c0_8 = arith.constant 0 : index
    %c0_9 = arith.constant 0 : index
    %6 = vector.load %arg3[%c0_8, %c0_9] : memref<32x96xf32, #tpu.memory_space<vmem>>, vector<32x96xf32>
    %cst_10 = arith.constant dense<0.000000e+00> : vector<752x96xf32>
    %7 = tpu.matmul %2, %6, %cst_10 {dimension_numbers = #tpu.dot_dimension_numbers<[1], [0], [0], [1], [0, 0, 1, 1], [], []>} : vector<752x32xf32>, vector<32x96xf32>, vector<752x96xf32> -> vector<752x96xf32>
    %c0_11 = arith.constant 0 : index
    %c0_12 = arith.constant 0 : index
    %8 = vector.load %arg4[%c0_11, %c0_12] : memref<96x96xf32, #tpu.memory_space<vmem>>, vector<96x96xf32>
    %cst_13 = arith.constant dense<0.000000e+00> : vector<752x96xf32>
    %9 = tpu.matmul %5, %8, %cst_13 {dimension_numbers = #tpu.dot_dimension_numbers<[1], [0], [0], [1], [0, 0, 1, 1], [], []>} : vector<752x96xf32>, vector<96x96xf32>, vector<752x96xf32> -> vector<752x96xf32>
    %10 = arith.addf %7, %9 : vector<752x96xf32>
    %cst_14 = arith.constant 0.000000e+00 : f32
    %11 = vector.broadcast %cst_14 : f32 to vector<752x96xf32>
    %12 = arith.cmpf oge, %10, %11 : vector<752x96xf32>
    %cst_15 = arith.constant 2.000000e-01 : f32
    %13 = vector.broadcast %cst_15 : f32 to vector<752x96xf32>
    %14 = arith.mulf %13, %10 : vector<752x96xf32>
    %15 = arith.select %12, %10, %14 : vector<752x96xi1>, vector<752x96xf32>
    %16 = vector.extract_strided_slice %15 {offsets = [0, 0], sizes = [752, 32], strides = [1, 1]} : vector<752x96xf32> to vector<752x32xf32>
    %17 = vector.extract_strided_slice %15 {offsets = [0, 32], sizes = [752, 32], strides = [1, 1]} : vector<752x96xf32> to vector<752x32xf32>
    %18 = arith.maximumf %16, %17 : vector<752x32xf32>
    %19 = vector.extract_strided_slice %15 {offsets = [0, 64], sizes = [752, 32], strides = [1, 1]} : vector<752x96xf32> to vector<752x32xf32>
    %20 = arith.maximumf %18, %19 : vector<752x32xf32>
    %cst_16 = arith.constant 0.000000e+00 : f32
    %21 = vector.broadcast %cst_16 : f32 to vector<752x32xf32>
    %cst_17 = arith.constant 0.000000e+00 : f32
    %22 = vector.broadcast %cst_17 : f32 to vector<752x32xf32>
    %23 = vector.extract_strided_slice %15 {offsets = [0, 0], sizes = [752, 32], strides = [1, 1]} : vector<752x96xf32> to vector<752x32xf32>
    %24 = arith.subf %23, %20 : vector<752x32xf32>
    %25 = math.exp %24 : vector<752x32xf32>
    %26 = arith.addf %21, %25 : vector<752x32xf32>
    %27 = vector.extract_strided_slice %5 {offsets = [0, 0], sizes = [752, 32], strides = [1, 1]} : vector<752x96xf32> to vector<752x32xf32>
    %28 = arith.mulf %25, %27 : vector<752x32xf32>
    %29 = arith.addf %22, %28 : vector<752x32xf32>
    %30 = vector.extract_strided_slice %15 {offsets = [0, 32], sizes = [752, 32], strides = [1, 1]} : vector<752x96xf32> to vector<752x32xf32>
    %31 = arith.subf %30, %20 : vector<752x32xf32>
    %32 = math.exp %31 : vector<752x32xf32>
    %33 = arith.addf %26, %32 : vector<752x32xf32>
    %34 = vector.extract_strided_slice %5 {offsets = [0, 32], sizes = [752, 32], strides = [1, 1]} : vector<752x96xf32> to vector<752x32xf32>
    %35 = arith.mulf %32, %34 : vector<752x32xf32>
    %36 = arith.addf %29, %35 : vector<752x32xf32>
    %37 = vector.extract_strided_slice %15 {offsets = [0, 64], sizes = [752, 32], strides = [1, 1]} : vector<752x96xf32> to vector<752x32xf32>
    %38 = arith.subf %37, %20 : vector<752x32xf32>
    %39 = math.exp %38 : vector<752x32xf32>
    %40 = arith.addf %33, %39 : vector<752x32xf32>
    %41 = vector.extract_strided_slice %5 {offsets = [0, 64], sizes = [752, 32], strides = [1, 1]} : vector<752x96xf32> to vector<752x32xf32>
    %42 = arith.mulf %39, %41 : vector<752x32xf32>
    %43 = arith.addf %36, %42 : vector<752x32xf32>
    %44 = tpu.reciprocal %40 {approx = true} : vector<752x32xf32> -> vector<752x32xf32>
    %45 = arith.mulf %43, %44 : vector<752x32xf32>
    %c0_18 = arith.constant 0 : index
    %c0_19 = arith.constant 0 : index
    %46 = vector.load %arg7[%c0_18, %c0_19] : memref<752x32xf32, #tpu.memory_space<vmem>>, vector<752x32xf32>
    tpu.vector_store %arg7[%c0_18, %c0_19], %45 {strides = array<i32>} : memref<752x32xf32, #tpu.memory_space<vmem>>, vector<752x32xf32>,
    return
  }
  func.func @transform_0(%arg0: i32) -> (i32, i32) {
    %c0_i32 = arith.constant 0 : i32
    %c0_i32_0 = arith.constant 0 : i32
    return %arg0, %c0_i32 : i32, i32
  }
  func.func @transform_1(%arg0: i32) -> (i32, i32) {
    %c0_i32 = arith.constant 0 : i32
    %c0_i32_0 = arith.constant 0 : i32
    %c0_i32_1 = arith.constant 0 : i32
    return %c0_i32, %c0_i32_0 : i32, i32
  }
  func.func @transform_2(%arg0: i32) -> (i32, i32) {
    %c0_i32 = arith.constant 0 : i32
    %c0_i32_0 = arith.constant 0 : i32
    %c0_i32_1 = arith.constant 0 : i32
    return %c0_i32, %c0_i32_0 : i32, i32
  }
  func.func @transform_3(%arg0: i32) -> (i32, i32) {
    %c0_i32 = arith.constant 0 : i32
    %c0_i32_0 = arith.constant 0 : i32
    %c0_i32_1 = arith.constant 0 : i32
    return %c0_i32, %c0_i32_0 : i32, i32
  }
  func.func @transform_4(%arg0: i32) -> (i32, i32) {
    %c0_i32 = arith.constant 0 : i32
    %c0_i32_0 = arith.constant 0 : i32
    return %arg0, %c0_i32 : i32, i32
  }
  func.func @transform_5(%arg0: i32) -> (i32, i32) {
    %c0_i32 = arith.constant 0 : i32
    %c0_i32_0 = arith.constant 0 : i32
    %c0_i32_1 = arith.constant 0 : i32
    return %c0_i32, %c0_i32_0 : i32, i32
  }
  func.func @transform_6(%arg0: i32) -> (i32, i32) {
    %c0_i32 = arith.constant 0 : i32
    %c0_i32_0 = arith.constant 0 : i32
    return %arg0, %c0_i32 : i32, i32
  }
}

</mosaic_0001>

<bundles_post_ra>
// kernel: macro_conv_forward.1
= control target key start
LH: loop header
LB: loop body
LE: loop exit
PB: predicated region body
PF: predicated region fallthrough
CT: control target
= control target key end

     0   :  { %s11500_s21 = smov 0   ;;  %s18085_s0 = inlined_call_operand.vmem [shape: f32[1504,32], index: 0, kind: input, shape index: {}]   ;;  %s18086_s1 = inlined_call_operand.vmem [shape: f32[32,32], index: 1, kind: input, shape index: {}]   ;;  %s18087_s2 = inlined_call_operand.vmem [shape: f32[32,96], index: 2, kind: input, shape index: {}]   ;;  %s18088_s3 = inlined_call_operand.vmem [shape: f32[96,96], index: 3, kind: input, shape index: {}]   ;;  %s18089_s4 = inlined_call_operand.vmem [shape: f32[1504,96], index: 4, kind: input, shape index: {}]   ;;  %s18090_s5 = inlined_call_operand.vmem [shape: f32[96,96], index: 5, kind: input, shape index: {}]   ;;  %s18091_s6 = inlined_call_operand.vmem [shape: f32[1504,32], index: 6, kind: output, shape index: {}]  }
   0x1 LB: > { %s9099_s22 = sadd.s32 4294967295, %s11460_s21   ;;  %p9103_p0 = scmp.ge.s32.totalorder %s11460_s21, 1  ;;  %s11460_s21 = sphi %s11500_s21, %s16_s21  }
   0x2   : > { %p224_p1 = scmp.lt.s32.totalorder %s11460_s21, 3 }
   0x4   : > { %p225_p2 = pnand %p9103_p0, %p224_p1 }
   0x6   : > { %228 = sbr.rel (%p225_p2) target bundleno = 2103 (0x837), region = 44 }
   0xd   : > { %v1287_v0 = vld [vmem:[%s18090_s5] sm:$0xff]  ;;  %v1288_v1 = vld [vmem:[%s18090_s5 + $0x8] sm:$0xff]  ;;  %v1289_v2 = vld [vmem:[%s18090_s5 + $0x10] sm:$0xff]  ;;  %s259_s29 = smul.u32 94, %s9099_s22  ;;  %vm1299_vm0 = vcmask 785408   ;;  %vm375_vm1 = vcmask 261120  }
   0xe   : > { %v10529_v3 = vpack.c.bf16 %v1288_v1, %v1287_v0  ;;  %v1290_v4 = vld [vmem:[%s18090_s5 + $0x18] sm:$0xff]  ;;  %v1291_v6 = vld [vmem:[%s18090_s5 + $0x20] sm:$0xff]  ;;  %v1292_v7 = vld [vmem:[%s18090_s5 + $0x28] sm:$0xff]  ;;  %s11463_s30 = smov 96   ;;  %s11464_s7 = smov 32  }
   0xf   : > { %v10533_v5 = vpack.c.bf16 %v1290_v4, %v1289_v2  ;;  %p260_p3 = scmp.lt.s32.totalorder %s259_s29, 187  ;;  %v371_v8 = vld [vmem:[%s18086_s1] sm:$0xff]  ;;  %v372_v9 = vld [vmem:[%s18086_s1 + $0x8] sm:$0xff]  ;;  %v373_v10 = vld [vmem:[%s18086_s1 + $0x10] sm:$0xff]  ;;  %v10537_v11 = vpack.c.bf16 %v1292_v7, %v1291_v6 }
  0x10   : > { %10530 = vmatprep.subr.bf16.mxu1 %v10529_v3  ;;  %v1293_v12 = vld [vmem:[%s18090_s5 + $0x30] sm:$0xff]  ;;  %v10521_v13 = vpack.c.bf16 %v372_v9, %v371_v8  ;;  %v374_v14 = vld [vmem:[%s18086_s1 + $0x18] sm:$0xff]  ;;  %v2121_v17 = vld [vmem:[%s18088_s3] sm:$0xff] }
  0x11   : > { %10532 = vmatpush3.bf16.msra.mxu1 %v10529_v3  ;;  %s20789_s29 = smov (!%p260_p3, %s259_s29), 187  ;;  %v1294_v15 = vld [vmem:[%s18090_s5 + $0x38] sm:$0xff]  ;;  %v10525_v16 = vpack.c.bf16 %v374_v14, %v373_v10  ;;  %v2122_v18 = vld [vmem:[%s18088_s3 + $0x8] sm:$0xff]  ;;  %v1295_v23 = vld [vmem:[%s18090_s5 + $0x40] sm:$0xff] }
  0x12   : > { %10534 = vmatprep.subr.bf16.mxu1 %v10533_v5  ;;  %s11544_s25 = sshll.u32 %s20789_s29, 3  ;;  %10522 = vmatprep.subr.bf16.mxu0 %v10521_v13  ;;  %v10541_v20 = vpack.c.bf16 %v1294_v15, %v1293_v12  ;;  %v10553_v22 = vpack.c.bf16 %v2122_v18, %v2121_v17  ;;  %v1296_v24 = vld [vmem:[%s18090_s5 + $0x48] sm:$0xff]  ;;  %v2123_v25 = vld [vmem:[%s18088_s3 + $0x10] sm:$0xff]  ;;  %v2124_v26 = vld [vmem:[%s18088_s3 + $0x18] sm:$0xff] }
  0x13   : > { %s11556_s9 = scalar_lea.vmem %s18089_s4, %s11544_s25  ;;  %10524 = vmatpush3.bf16.msra.mxu0 %v10521_v13  ;;  %s11563_s11 = scalar_lea.vmem %s18085_s0, %s11544_s25  ;;  %v10545_v28 = vpack.c.bf16 %v1296_v24, %v1295_v23  ;;  %v1297_v30 = vld [vmem:[%s18090_s5 + $0x50] sm:$0xff]  ;;  %v1298_v31 = vld [vmem:[%s18090_s5 + $0x58] sm:$0xff]  ;;  %v10557_v32 = vpack.c.bf16 %v2124_v26, %v2123_v25  ;;  %v2125_v33 = vld [vmem:[%s18088_s3 + $0x20] sm:$0xff] }
  0x14   : > { %v1193_v19 = vld [vmem:[%s11556_s9] sm:$0xff]  ;;  %10526 = vmatprep.subr.bf16.mxu0 %v10525_v16  ;;  %v278_v27 = vld [vmem:[%s11563_s11 + $0x8] sm:$0xff]  ;;  %v279_v29 = vld [vmem:[%s11563_s11 + $0x10] sm:$0xff]  ;;  %v10549_v36 = vpack.c.bf16 %v1298_v31, %v1297_v30  ;;  %s17186_s10 = scalar_lea.vmem %s18091_s6, %s11544_s25 }
  0x15   : > { %10536 = vmatpush3.bf16.msra.mxu1 %v10533_v5  ;;  %10066 = vmatprep.mubr.msk.f32.mxu1 %vm1299_vm0, %v1193_v19  ;;  %v277_v21 = vld [vmem:[%s11563_s11] sm:$0xff]  ;;  %v2126_v34 = vld [vmem:[%s18088_s3 + $0x28] sm:$0xff]  ;;  %v280_v35 = vld [vmem:[%s11563_s11 + $0x18] sm:$0xff] }
  0x16   : > { %10538 = vmatprep.subr.bf16.mxu1 %v10537_v11  ;;  %9901 = vmatprep.mubr.msk.f32.mxu0 %vm375_vm1, %v277_v21  ;;  %v281_v37 = vld [vmem:[%s11563_s11 + $0x20] sm:$0xff]  ;;  %v10561_v38 = vpack.c.bf16 %v2126_v34, %v2125_v33  ;;  %v2127_v39 = vld [vmem:[%s18088_s3 + $0x30] sm:$0xff]  ;;  %v2128_v40 = vld [vmem:[%s18088_s3 + $0x38] sm:$0xff] }
  0x17   : > { %10528 = vmatpush3.bf16.msra.mxu0 %v10525_v16  ;;  %v282_v41 = vld [vmem:[%s11563_s11 + $0x28] sm:$0xff]  ;;  %v283_v42 = vld [vmem:[%s11563_s11 + $0x30] sm:$0xff]  ;;  %v10565_v43 = vpack.c.bf16 %v2128_v40, %v2127_v39  ;;  %v284_v45 = vld [vmem:[%s11563_s11 + $0x38] sm:$0xff] }
  0x18   : > { %10554 = vmatprep.subr.bf16.mxu0 %v10553_v22  ;;  %v1194_v44 = vld [vmem:[%s11556_s9 + $0x8] sm:$0xff]  ;;  %v1195_v46 = vld [vmem:[%s11556_s9 + $0x10] sm:$0xff]  ;;  %v285_v47 = vld [vmem:[%s11563_s11 + $0x40] sm:$0xff] }
  0x19   : > { %10540 = vmatpush3.bf16.msra.mxu1 %v10537_v11  ;;  %v1196_v48 = vld [vmem:[%s11556_s9 + $0x18] sm:$0xff]  ;;  %v286_v49 = vld [vmem:[%s11563_s11 + $0x48] sm:$0xff]  ;;  %v1197_v50 = vld [vmem:[%s11556_s9 + $0x20] sm:$0xff] }
  0x1a   : > { %10542 = vmatprep.subr.bf16.mxu1 %v10541_v20  ;;  %9902 = vmatmul.mubr.msk.f32.vlgmr.msra.gmra.mrb[0].mxu0 %vm375_vm1, %v278_v27  ;;  %v287_v51 = vld [vmem:[%s11563_s11 + $0x50] sm:$0xff]  ;;  %v1198_v52 = vld [vmem:[%s11556_s9 + $0x28] sm:$0xff]  ;;  %v288_v53 = vld [vmem:[%s11563_s11 + $0x58] sm:$0xff] }
  0x1b   : > { %9904 = vmatprep.mubr.msk.f32.mxu0 %vm375_vm1, %v279_v29  ;;  %10556 = vmatpush3.bf16.msra.mxu0 %v10553_v22  ;;  %v1199_v54 = vld [vmem:[%s11556_s9 + $0x30] sm:$0xff]  ;;  %v289_v55 = vld [vmem:[%s11563_s11 + $0x60] sm:$0xff]  ;;  %v1200_v56 = vld [vmem:[%s11556_s9 + $0x38] sm:$0xff] }
  0x1c   : > { %10558 = vmatprep.subr.bf16.mxu0 %v10557_v32  ;;  %v290_v57 = vld [vmem:[%s11563_s11 + $0x68] sm:$0xff]  ;;  %v1201_v58 = vld [vmem:[%s11556_s9 + $0x40] sm:$0xff]  ;;  %v291_v59 = vld [vmem:[%s11563_s11 + $0x70] sm:$0xff] }
  0x1d   : > { %10544 = vmatpush3.bf16.msra.mxu1 %v10541_v20  ;;  %v1202_v60 = vld [vmem:[%s11556_s9 + $0x48] sm:$0xff]  ;;  %v292_v61 = vld [vmem:[%s11563_s11 + $0x78] sm:$0xff]  ;;  %v1203_v62 = vld [vmem:[%s11556_s9 + $0x50] sm:$0xff] }
  0x1e   : > { %10546 = vmatprep.subr.bf16.mxu1 %v10545_v28  ;;  %9905 = vmatmul.mubr.msk.f32.gmra.mrb[2].mxu0 %vm375_vm1, %v280_v35  ;;  %v293_v63 = vld [vmem:[%s11563_s11 + $0x80] sm:$0xff]  ;;  %v1204_v0 = vld [vmem:[%s11556_s9 + $0x58] sm:$0xff]  ;;  %v294_v1 = vld [vmem:[%s11563_s11 + $0x88] sm:$0xff] }
  0x1f   : > { %9907 = vmatprep.mubr.msk.f32.mxu0 %vm375_vm1, %v281_v37  ;;  %10560 = vmatpush3.bf16.msra.mxu0 %v10557_v32  ;;  %v1205_v2 = vld [vmem:[%s11556_s9 + $0x60] sm:$0xff]  ;;  %v295_v3 = vld [vmem:[%s11563_s11 + $0x90] sm:$0xff]  ;;  %v1206_v4 = vld [vmem:[%s11556_s9 + $0x68] sm:$0xff] }
  0x20   : > { %10562 = vmatprep.subr.bf16.mxu0 %v10561_v38  ;;  %v296_v5 = vld [vmem:[%s11563_s11 + $0x98] sm:$0xff]  ;;  %v1207_v6 = vld [vmem:[%s11556_s9 + $0x70] sm:$0xff]  ;;  %v297_v7 = vld [vmem:[%s11563_s11 + $0xa0] sm:$0xff] }
  0x21   : > { %10548 = vmatpush3.bf16.msra.mxu1 %v10545_v28  ;;  %v1208_v8 = vld [vmem:[%s11556_s9 + $0x78] sm:$0xff]  ;;  %v298_v9 = vld [vmem:[%s11563_s11 + $0xa8] sm:$0xff]  ;;  %v2129_v10 = vld [vmem:[%s18088_s3 + $0x40] sm:$0xff] }
  0x22   : > { %10550 = vmatprep.subr.bf16.mxu1 %v10549_v36  ;;  %9908 = vmatmul.mubr.msk.f32.gmra.mrb[4].mxu0 %vm375_vm1, %v282_v41  ;;  %v2130_v11 = vld [vmem:[%s18088_s3 + $0x48] sm:$0xff]  ;;  %v1209_v12 = vld [vmem:[%s11556_s9 + $0x80] sm:$0xff]  ;;  %v299_v13 = vld [vmem:[%s11563_s11 + $0xb0] sm:$0xff] }
  0x23   : > { %9910 = vmatprep.mubr.msk.f32.mxu0 %vm375_vm1, %v283_v42  ;;  %10564 = vmatpush3.bf16.msra.mxu0 %v10561_v38  ;;  %v10569_v14 = vpack.c.bf16 %v2130_v11, %v2129_v10  ;;  %v1210_v15 = vld [vmem:[%s11556_s9 + $0x88] sm:$0xff]  ;;  %v300_v16 = vld [vmem:[%s11563_s11 + $0xb8] sm:$0xff]  ;;  %v1211_v17 = vld [vmem:[%s11556_s9 + $0x90] sm:$0xff] }
  0x24   : > { %10566 = vmatprep.subr.bf16.mxu0 %v10565_v43  ;;  %v301_v18 = vld [vmem:[%s11563_s11 + $0xc0] sm:$0xff]  ;;  %v1212_v19 = vld [vmem:[%s11556_s9 + $0x98] sm:$0xff]  ;;  %v302_v20 = vld [vmem:[%s11563_s11 + $0xc8] sm:$0xff] }
  0x25   : > { %10552 = vmatpush3.bf16.msra.mxu1 %v10549_v36  ;;  %v1213_v21 = vld [vmem:[%s11556_s9 + $0xa0] sm:$0xff]  ;;  %v2131_v23 = vld [vmem:[%s18088_s3 + $0x50] sm:$0xff]  ;;  %v2132_v24 = vld [vmem:[%s18088_s3 + $0x58] sm:$0xff] }
  0x26   : > { %10585 = vmatprep.subr.bf16.mxu1 %v10553_v22  ;;  %9911 = vmatmul.mubr.msk.f32.gmra.mrb[6].mxu0 %vm375_vm1, %v284_v45  ;;  %v1214_v25 = vld [vmem:[%s11556_s9 + $0xa8] sm:$0xff]  ;;  %v304_v26 = vld [vmem:[%s11563_s11 + $0xd8] sm:$0xff]  ;;  %v10573_v27 = vpack.c.bf16 %v2132_v24, %v2131_v23  ;;  %v1215_v28 = vld [vmem:[%s11556_s9 + $0xb0] sm:$0xff] }
  0x27   : > { %9913 = vmatprep.mubr.msk.f32.mxu0 %vm375_vm1, %v285_v47  ;;  %10568 = vmatpush3.bf16.msra.mxu0 %v10565_v43  ;;  %v305_v29 = vld [vmem:[%s11563_s11 + $0xe0] sm:$0xff]  ;;  %v1216_v30 = vld [vmem:[%s11556_s9 + $0xb8] sm:$0xff]  ;;  %v306_v31 = vld [vmem:[%s11563_s11 + $0xe8] sm:$0xff] }
  0x28   : > { %10067 = vmatmul.mubr.msk.f32.vlgmr.msra.gmra.mrb[0].mxu1 %vm1299_vm0, %v1194_v44  ;;  %10570 = vmatprep.subr.bf16.mxu0 %v10569_v14  ;;  %v307_v33 = vld [vmem:[%s11563_s11 + $0xf0] sm:$0xff]  ;;  %v1218_v34 = vld [vmem:[%s11556_s9 + $0xc8] sm:$0xff]  ;;  %v308_v35 = vld [vmem:[%s11563_s11 + $0xf8] sm:$0xff] }
  0x29   : > { %10069 = vmatprep.mubr.msk.f32.mxu1 %vm1299_vm0, %v1195_v46  ;;  %10591 = vmatpush3.bf16.msra.mxu1 %v10553_v22  ;;  %v303_v22 = vld [vmem:[%s11563_s11 + $0xd0] sm:$0xff]  ;;  %v309_v37 = vld [vmem:[%s11563_s11 + $0x100] sm:$0xff]  ;;  %v310_v39 = vld [vmem:[%s11563_s11 + $0x108] sm:$0xff] }
  0x2a   : > { %10586 = vmatprep.subr.bf16.mxu1 %v10557_v32  ;;  %9914 = vmatmul.mubr.msk.f32.gmra.mrb[8].mxu0 %vm375_vm1, %v286_v49  ;;  %v1219_v36 = vld [vmem:[%s11556_s9 + $0xd0] sm:$0xff]  ;;  %v1221_v40 = vld [vmem:[%s11556_s9 + $0xe0] sm:$0xff]  ;;  %v1222_v42 = vld [vmem:[%s11556_s9 + $0xe8] sm:$0xff] }
  0x2b   : > { %9916 = vmatprep.mubr.msk.f32.mxu0 %vm375_vm1, %v287_v51  ;;  %10572 = vmatpush3.bf16.msra.mxu0 %v10569_v14  ;;  %v311_v41 = vld [vmem:[%s11563_s11 + $0x110] sm:$0xff]  ;;  %v313_v45 = vld [vmem:[%s11563_s11 + $0x120] sm:$0xff]  ;;  %v1224_v46 = vld [vmem:[%s11556_s9 + $0xf8] sm:$0xff] }
  0x2c   : > { %10070 = vmatmul.mubr.msk.f32.gmra.mrb[2].mxu1 %vm1299_vm0, %v1196_v48  ;;  %10574 = vmatprep.subr.bf16.mxu0 %v10573_v27  ;;  %v1223_v44 = vld [vmem:[%s11556_s9 + $0xf0] sm:$0xff]  ;;  %v314_v47 = vld [vmem:[%s11563_s11 + $0x128] sm:$0xff]  ;;  %v1225_v48 = vld [vmem:[%s11556_s9 + $0x100] sm:$0xff] }
  0x2d   : > { %10072 = vmatprep.mubr.msk.f32.mxu1 %vm1299_vm0, %v1197_v50  ;;  %10592 = vmatpush3.bf16.msra.mxu1 %v10557_v32  ;;  %v1217_v32 = vld [vmem:[%s11556_s9 + $0xc0] sm:$0xff]  ;;  %v315_v49 = vld [vmem:[%s11563_s11 + $0x130] sm:$0xff]  ;;  %v1226_v50 = vld [vmem:[%s11556_s9 + $0x108] sm:$0xff] }
  0x2e   : > { %10587 = vmatprep.subr.bf16.mxu1 %v10561_v38  ;;  %9917 = vmatmul.mubr.msk.f32.gmra.mrb[10].mxu0 %vm375_vm1, %v288_v53  ;;  %v316_v51 = vld [vmem:[%s11563_s11 + $0x138] sm:$0xff]  ;;  %v317_v53 = vld [vmem:[%s11563_s11 + $0x140] sm:$0xff]  ;;  %v2118_v11 = vld [vmem:[%s18087_s2 + $0x8] sm:$0xff] }
  0x2f   : > { %9919 = vmatprep.mubr.msk.f32.mxu0 %vm375_vm1, %v289_v55  ;;  %10576 = vmatpush3.bf16.msra.mxu0 %v10573_v27  ;;  %v318_v55 = vld [vmem:[%s11563_s11 + $0x148] sm:$0xff]  ;;  %v2117_v10 = vld [vmem:[%s18087_s2] sm:$0xff]  ;;  %v1243_v23 = vld [vmem:[%s11556_s9 + $0x190] sm:$0xff] }
  0x30   : > { %10073 = vmatmul.mubr.msk.f32.gmra.mrb[4].mxu1 %vm1299_vm0, %v1198_v52  ;;  %v1227_v52 = vld [vmem:[%s11556_s9 + $0x110] sm:$0xff]  ;;  %v333_v24 = vld [vmem:[%s11563_s11 + $0x1c0] sm:$0xff] }
  0x31   : > { %10075 = vmatprep.mubr.msk.f32.mxu1 %vm1299_vm0, %v1199_v54  ;;  %10593 = vmatpush3.bf16.msra.mxu1 %v10561_v38  ;;  %v1220_v38 = vld [vmem:[%s11556_s9 + $0xd8] sm:$0xff] }
  0x32   : > { %10588 = vmatprep.subr.bf16.mxu1 %v10565_v43  ;;  %9920 = vmatmul.mubr.msk.f32.gmra.mrb[12].mxu0 %vm375_vm1, %v290_v57  ;;  %v1228_v54 = vld [vmem:[%s11556_s9 + $0x118] sm:$0xff]  ;;  %v319_v57 = vld [vmem:[%s11563_s11 + $0x150] sm:$0xff] }
  0x33   : > { %9922 = vmatprep.mubr.msk.f32.mxu0 %vm375_vm1, %v291_v59  ;;  %v320_v59 = vld [vmem:[%s11563_s11 + $0x158] sm:$0xff] }
  0x34   : > { %10076 = vmatmul.mubr.msk.f32.gmra.mrb[6].mxu1 %vm1299_vm0, %v1200_v56  ;;  %v1229_v56 = vld [vmem:[%s11556_s9 + $0x120] sm:$0xff] }
  0x35   : > { %10078 = vmatprep.mubr.msk.f32.mxu1 %vm1299_vm0, %v1201_v58  ;;  %10594 = vmatpush3.bf16.msra.mxu1 %v10565_v43  ;;  %v312_v43 = vld [vmem:[%s11563_s11 + $0x118] sm:$0xff]  ;;  %v1230_v58 = vld [vmem:[%s11556_s9 + $0x128] sm:$0xff] }
  0x36   : > { %9923 = vmatmul.mubr.msk.f32.gmra.mrb[14].mxu0 %vm375_vm1, %v292_v61  ;;  %10589 = vmatprep.subr.bf16.mxu1 %v10569_v14  ;;  %v321_v61 = vld [vmem:[%s11563_s11 + $0x160] sm:$0xff] }
  0x37   : > { %9925 = vmatprep.mubr.msk.f32.mxu0 %vm375_vm1, %v293_v63  ;;  %v322_v63 = vld [vmem:[%s11563_s11 + $0x168] sm:$0xff] }
  0x38   : > { %10079 = vmatmul.mubr.msk.f32.gmra.mrb[8].mxu1 %vm1299_vm0, %v1202_v60  ;;  %v1231_v60 = vld [vmem:[%s11556_s9 + $0x130] sm:$0xff] }
  0x39   : > { %10081 = vmatprep.mubr.msk.f32.mxu1 %vm1299_vm0, %v1203_v62  ;;  %10595 = vmatpush3.bf16.msra.mxu1 %v10569_v14  ;;  %v1232_v62 = vld [vmem:[%s11556_s9 + $0x138] sm:$0xff] }
  0x3a   : > { %9926 = vmatmul.mubr.msk.f32.gmra.mrb[16].mxu0 %vm375_vm1, %v294_v1  ;;  %10590 = vmatprep.subr.bf16.mxu1 %v10573_v27  ;;  %v323_v1 = vld [vmem:[%s11563_s11 + $0x170] sm:$0xff]  ;;  %v328_v14 = vld [vmem:[%s11563_s11 + $0x198] sm:$0xff] }
  0x3b   : > { %9928 = vmatprep.mubr.msk.f32.mxu0 %vm375_vm1, %v295_v3  ;;  %v324_v3 = vld [vmem:[%s11563_s11 + $0x178] sm:$0xff] }
  0x3c   : > { %10082 = vmatmul.mubr.msk.f32.gmra.mrb[10].mxu1 %vm1299_vm0, %v1204_v0  ;;  %v1233_v0 = vld [vmem:[%s11556_s9 + $0x140] sm:$0xff] }
  0x3d   : > { %10084 = vmatprep.mubr.msk.f32.mxu1 %vm1299_vm0, %v1205_v2  ;;  %10596 = vmatpush3.bf16.msra.mxu1 %v10573_v27  ;;  %v1234_v2 = vld [vmem:[%s11556_s9 + $0x148] sm:$0xff]  ;;  %v1245_v27 = vld [vmem:[%s11556_s9 + $0x1a0] sm:$0xff] }
  0x3e   : > { %9929 = vmatmul.mubr.msk.f32.gmra.mrb[18].mxu0 %vm375_vm1, %v296_v5  ;;  %v325_v5 = vld [vmem:[%s11563_s11 + $0x180] sm:$0xff] }
  0x3f   : > { %9931 = vmatprep.mubr.msk.f32.mxu0 %vm375_vm1, %v297_v7  ;;  %v326_v7 = vld [vmem:[%s11563_s11 + $0x188] sm:$0xff] }
  0x40   : > { %10085 = vmatmul.mubr.msk.f32.gmra.mrb[12].mxu1 %vm1299_vm0, %v1206_v4  ;;  %v1235_v4 = vld [vmem:[%s11556_s9 + $0x150] sm:$0xff] }
  0x41   : > { %10087 = vmatprep.mubr.msk.f32.mxu1 %vm1299_vm0, %v1207_v6  ;;  %v1236_v6 = vld [vmem:[%s11556_s9 + $0x158] sm:$0xff] }
  0x42   : > { %9932 = vmatmul.mubr.msk.f32.gmra.mrb[20].mxu0 %vm375_vm1, %v298_v9  ;;  %v327_v9 = vld [vmem:[%s11563_s11 + $0x190] sm:$0xff] }
  0x43   : > { %9934 = vmatprep.mubr.msk.f32.mxu0 %vm375_vm1, %v299_v13  ;;  %v1238_v13 = vld [vmem:[%s11556_s9 + $0x168] sm:$0xff] }
  0x44   : > { %10088 = vmatmul.mubr.msk.f32.gmra.mrb[14].mxu1 %vm1299_vm0, %v1208_v8  ;;  %v1237_v8 = vld [vmem:[%s11556_s9 + $0x160] sm:$0xff] }
  0x45   : > { %10090 = vmatprep.mubr.msk.f32.mxu1 %vm1299_vm0, %v1209_v12  ;;  %v11802_v12 = vpack.c.bf16 %v2118_v11, %v2117_v10  ;;  %v358_v10 = vld [vmem:[%s11563_s11 + $0x288] sm:$0xff]  ;;  %v1269_v11 = vld [vmem:[%s11556_s9 + $0x260] sm:$0xff] }
  0x46   : > { %9935 = vmatmul.mubr.msk.f32.gmra.mrb[22].mxu0 %vm375_vm1, %v300_v16  ;;  %v329_v16 = vld [vmem:[%s11563_s11 + $0x1a0] sm:$0xff] }
  0x47   : > { %9937 = vmatprep.mubr.msk.f32.mxu0 %vm375_vm1, %v301_v18  ;;  %10578 = vmatprep.subr.bf16.mxu0 %v11802_v12  ;;  %v330_v18 = vld [vmem:[%s11563_s11 + $0x1a8] sm:$0xff] }
  0x48   : > { %10091 = vmatmul.mubr.msk.f32.gmra.mrb[16].mxu1 %vm1299_vm0, %v1210_v15  ;;  %v1239_v15 = vld [vmem:[%s11556_s9 + $0x170] sm:$0xff] }
  0x49   : > { %10093 = vmatprep.mubr.msk.f32.mxu1 %vm1299_vm0, %v1211_v17  ;;  %v1240_v17 = vld [vmem:[%s11556_s9 + $0x178] sm:$0xff] }
  0x4a   : > { %9938 = vmatmul.mubr.msk.f32.gmra.mrb[24].mxu0 %vm375_vm1, %v302_v20  ;;  %v331_v20 = vld [vmem:[%s11563_s11 + $0x1b0] sm:$0xff] }
  0x4b   : > { %9940 = vmatprep.mubr.msk.f32.mxu0 %vm375_vm1, %v303_v22  ;;  %v332_v22 = vld [vmem:[%s11563_s11 + $0x1b8] sm:$0xff] }
  0x4c   : > { %10094 = vmatmul.mubr.msk.f32.gmra.mrb[18].mxu1 %vm1299_vm0, %v1212_v19  ;;  %v1241_v19 = vld [vmem:[%s11556_s9 + $0x180] sm:$0xff] }
  0x4d   : > { %10096 = vmatprep.mubr.msk.f32.mxu1 %vm1299_vm0, %v1213_v21  ;;  %v1242_v21 = vld [vmem:[%s11556_s9 + $0x188] sm:$0xff] }
  0x4e   : > { %9941 = vmatmul.mubr.msk.f32.gmra.mrb[26].mxu0 %vm375_vm1, %v304_v26  ;;  %v334_v26 = vld [vmem:[%s11563_s11 + $0x1c8] sm:$0xff] }
  0x4f   : > { %9943 = vmatprep.mubr.msk.f32.mxu0 %vm375_vm1, %v305_v29  ;;  %v1246_v29 = vld [vmem:[%s11556_s9 + $0x1a8] sm:$0xff] }
  0x50   : > { %10097 = vmatmul.mubr.msk.f32.gmra.mrb[20].mxu1 %vm1299_vm0, %v1214_v25  ;;  %v1244_v25 = vld [vmem:[%s11556_s9 + $0x198] sm:$0xff] }
  0x51   : > { %10099 = vmatprep.mubr.msk.f32.mxu1 %vm1299_vm0, %v1215_v28  ;;  %v335_v28 = vld [vmem:[%s11563_s11 + $0x1d0] sm:$0xff] }
  0x52   : > { %9944 = vmatmul.mubr.msk.f32.gmra.mrb[28].mxu0 %vm375_vm1, %v306_v31  ;;  %v1247_v31 = vld [vmem:[%s11556_s9 + $0x1b0] sm:$0xff] }
  0x53   : > { %9946 = vmatprep.mubr.msk.f32.mxu0 %vm375_vm1, %v307_v33  ;;  %v1248_v33 = vld [vmem:[%s11556_s9 + $0x1b8] sm:$0xff] }
  0x54   : > { %10100 = vmatmul.mubr.msk.f32.gmra.mrb[22].mxu1 %vm1299_vm0, %v1216_v30  ;;  %v336_v30 = vld [vmem:[%s11563_s11 + $0x1d8] sm:$0xff] }
  0x55   : > { %10102 = vmatprep.mubr.msk.f32.mxu1 %vm1299_vm0, %v1217_v32  ;;  %v337_v32 = vld [vmem:[%s11563_s11 + $0x1e0] sm:$0xff] }
  0x56   : > { %9947 = vmatmul.mubr.msk.f32.gmra.mrb[30].mxu0 %vm375_vm1, %v308_v35  ;;  %v1249_v35 = vld [vmem:[%s11556_s9 + $0x1c0] sm:$0xff] }
  0x57   : > { %9949 = vmatprep.mubr.msk.f32.mxu0 %vm375_vm1, %v309_v37  ;;  %v1250_v37 = vld [vmem:[%s11556_s9 + $0x1c8] sm:$0xff] }
  0x58   : > { %10103 = vmatmul.mubr.msk.f32.gmra.mrb[24].mxu1 %vm1299_vm0, %v1218_v34  ;;  %v338_v34 = vld [vmem:[%s11563_s11 + $0x1e8] sm:$0xff] }
  0x59   : > { %10105 = vmatprep.mubr.msk.f32.mxu1 %vm1299_vm0, %v1219_v36  ;;  %v339_v36 = vld [vmem:[%s11563_s11 + $0x1f0] sm:$0xff] }
  0x5a   : > { %9950 = vmatmul.mubr.msk.f32.gmra.mrb[32].mxu0 %vm375_vm1, %v310_v39  ;;  %v1251_v39 = vld [vmem:[%s11556_s9 + $0x1d0] sm:$0xff] }
  0x5b   : > { %9952 = vmatprep.mubr.msk.f32.mxu0 %vm375_vm1, %v311_v41  ;;  %v1252_v41 = vld [vmem:[%s11556_s9 + $0x1d8] sm:$0xff] }
  0x5c   : > { %10106 = vmatmul.mubr.msk.f32.gmra.mrb[26].mxu1 %vm1299_vm0, %v1220_v38  ;;  %v340_v38 = vld [vmem:[%s11563_s11 + $0x1f8] sm:$0xff] }
  0x5d   : > { %10108 = vmatprep.mubr.msk.f32.mxu1 %vm1299_vm0, %v1221_v40  ;;  %v341_v40 = vld [vmem:[%s11563_s11 + $0x200] sm:$0xff] }
  0x5e   : > { %9953 = vmatmul.mubr.msk.f32.gmra.mrb[34].mxu0 %vm375_vm1, %v312_v43  ;;  %v1253_v43 = vld [vmem:[%s11556_s9 + $0x1e0] sm:$0xff] }
  0x5f   : > { %9955 = vmatprep.mubr.msk.f32.mxu0 %vm375_vm1, %v313_v45  ;;  %v1254_v45 = vld [vmem:[%s11556_s9 + $0x1e8] sm:$0xff] }
  0x60   : > { %10109 = vmatmul.mubr.msk.f32.gmra.mrb[28].mxu1 %vm1299_vm0, %v1222_v42  ;;  %v342_v42 = vld [vmem:[%s11563_s11 + $0x208] sm:$0xff] }
  0x61   : > { %10111 = vmatprep.mubr.msk.f32.mxu1 %vm1299_vm0, %v1223_v44  ;;  %v343_v44 = vld [vmem:[%s11563_s11 + $0x210] sm:$0xff] }
  0x62   : > { %9956 = vmatmul.mubr.msk.f32.gmra.mrb[36].mxu0 %vm375_vm1, %v314_v47  ;;  %v1255_v47 = vld [vmem:[%s11556_s9 + $0x1f0] sm:$0xff] }
  0x63   : > { %9958 = vmatprep.mubr.msk.f32.mxu0 %vm375_vm1, %v315_v49  ;;  %v1256_v49 = vld [vmem:[%s11556_s9 + $0x1f8] sm:$0xff] }
  0x64   : > { %10112 = vmatmul.mubr.msk.f32.gmra.mrb[30].mxu1 %vm1299_vm0, %v1224_v46  ;;  %v344_v46 = vld [vmem:[%s11563_s11 + $0x218] sm:$0xff] }
  0x65   : > { %10114 = vmatprep.mubr.msk.f32.mxu1 %vm1299_vm0, %v1225_v48  ;;  %v345_v48 = vld [vmem:[%s11563_s11 + $0x220] sm:$0xff] }
  0x66   : > { %9959 = vmatmul.mubr.msk.f32.gmra.mrb[38].mxu0 %vm375_vm1, %v316_v51  ;;  %v1257_v51 = vld [vmem:[%s11556_s9 + $0x200] sm:$0xff] }
  0x67   : > { %9961 = vmatprep.mubr.msk.f32.mxu0 %vm375_vm1, %v317_v53  ;;  %v1258_v53 = vld [vmem:[%s11556_s9 + $0x208] sm:$0xff] }
  0x68   : > { %10115 = vmatmul.mubr.msk.f32.gmra.mrb[32].mxu1 %vm1299_vm0, %v1226_v50  ;;  %v346_v50 = vld [vmem:[%s11563_s11 + $0x228] sm:$0xff] }
  0x69   : > { %10117 = vmatprep.mubr.msk.f32.mxu1 %vm1299_vm0, %v1227_v52  ;;  %v347_v52 = vld [vmem:[%s11563_s11 + $0x230] sm:$0xff] }
  0x6a   : > { %9962 = vmatmul.mubr.msk.f32.gmra.mrb[40].mxu0 %vm375_vm1, %v318_v55  ;;  %v1259_v55 = vld [vmem:[%s11556_s9 + $0x210] sm:$0xff] }
  0x6b   : > { %9964 = vmatprep.mubr.msk.f32.mxu0 %vm375_vm1, %v319_v57  ;;  %v1260_v57 = vld [vmem:[%s11556_s9 + $0x218] sm:$0xff] }
  0x6c   : > { %10118 = vmatmul.mubr.msk.f32.gmra.mrb[34].mxu1 %vm1299_vm0, %v1228_v54  ;;  %v348_v54 = vld [vmem:[%s11563_s11 + $0x238] sm:$0xff] }
  0x6d   : > { %10120 = vmatprep.mubr.msk.f32.mxu1 %vm1299_vm0, %v1229_v56  ;;  %v349_v56 = vld [vmem:[%s11563_s11 + $0x240] sm:$0xff] }
  0x6e   : > { %9965 = vmatmul.mubr.msk.f32.gmra.mrb[42].mxu0 %vm375_vm1, %v320_v59  ;;  %v1261_v59 = vld [vmem:[%s11556_s9 + $0x220] sm:$0xff] }
  0x6f   : > { %9967 = vmatprep.mubr.msk.f32.mxu0 %vm375_vm1, %v321_v61  ;;  %v1262_v61 = vld [vmem:[%s11556_s9 + $0x228] sm:$0xff] }
  0x70   : > { %10121 = vmatmul.mubr.msk.f32.gmra.mrb[36].mxu1 %vm1299_vm0, %v1230_v58  ;;  %v350_v58 = vld [vmem:[%s11563_s11 + $0x248] sm:$0xff] }
  0x71   : > { %10123 = vmatprep.mubr.msk.f32.mxu1 %vm1299_vm0, %v1231_v60  ;;  %v351_v60 = vld [vmem:[%s11563_s11 + $0x250] sm:$0xff] }
  0x72   : > { %9968 = vmatmul.mubr.msk.f32.gmra.mrb[44].mxu0 %vm375_vm1, %v322_v63  ;;  %v1263_v63 = vld [vmem:[%s11556_s9 + $0x230] sm:$0xff] }
  0x73   : > { %9970 = vmatprep.mubr.msk.f32.mxu0 %vm375_vm1, %v323_v1  ;;  %v1264_v1 = vld [vmem:[%s11556_s9 + $0x238] sm:$0xff] }
  0x74   : > { %10124 = vmatmul.mubr.msk.f32.gmra.mrb[38].mxu1 %vm1299_vm0, %v1232_v62  ;;  %v352_v62 = vld [vmem:[%s11563_s11 + $0x258] sm:$0xff] }
  0x75   : > { %10126 = vmatprep.mubr.msk.f32.mxu1 %vm1299_vm0, %v1233_v0  ;;  %v353_v0 = vld [vmem:[%s11563_s11 + $0x260] sm:$0xff] }
  0x76   : > { %9971 = vmatmul.mubr.msk.f32.gmra.mrb[46].mxu0 %vm375_vm1, %v324_v3  ;;  %v1265_v3 = vld [vmem:[%s11556_s9 + $0x240] sm:$0xff] }
  0x77   : > { %9973 = vmatprep.mubr.msk.f32.mxu0 %vm375_vm1, %v325_v5  ;;  %v1266_v5 = vld [vmem:[%s11556_s9 + $0x248] sm:$0xff] }
  0x78   : > { %10127 = vmatmul.mubr.msk.f32.gmra.mrb[40].mxu1 %vm1299_vm0, %v1234_v2  ;;  %v354_v2 = vld [vmem:[%s11563_s11 + $0x268] sm:$0xff] }
  0x79   : > { %10129 = vmatprep.mubr.msk.f32.mxu1 %vm1299_vm0, %v1235_v4  ;;  %v355_v4 = vld [vmem:[%s11563_s11 + $0x270] sm:$0xff] }
  0x7a   : > { %9974 = vmatmul.mubr.msk.f32.gmra.mrb[48].mxu0 %vm375_vm1, %v326_v7  ;;  %v1267_v7 = vld [vmem:[%s11556_s9 + $0x250] sm:$0xff] }
  0x7b   : > { %9976 = vmatprep.mubr.msk.f32.mxu0 %vm375_vm1, %v327_v9  ;;  %v1268_v9 = vld [vmem:[%s11556_s9 + $0x258] sm:$0xff] }
  0x7c   : > { %10130 = vmatmul.mubr.msk.f32.gmra.mrb[42].mxu1 %vm1299_vm0, %v1236_v6  ;;  %v356_v6 = vld [vmem:[%s11563_s11 + $0x278] sm:$0xff] }
  0x7d   : > { %10132 = vmatprep.mubr.msk.f32.mxu1 %vm1299_vm0, %v1237_v8  ;;  %v357_v8 = vld [vmem:[%s11563_s11 + $0x280] sm:$0xff] }
  0x7e   : > { %9977 = vmatmul.mubr.msk.f32.gmra.mrb[50].mxu0 %vm375_vm1, %v328_v14  ;;  %v1270_v14 = vld [vmem:[%s11556_s9 + $0x268] sm:$0xff] }
  0x7f   : > { %9979 = vmatprep.mubr.msk.f32.mxu0 %vm375_vm1, %v329_v16  ;;  %v1271_v16 = vld [vmem:[%s11556_s9 + $0x270] sm:$0xff] }
  0x80   : > { %10133 = vmatmul.mubr.msk.f32.gmra.mrb[44].mxu1 %vm1299_vm0, %v1238_v13  ;;  %v359_v13 = vld [vmem:[%s11563_s11 + $0x290] sm:$0xff] }
  0x81   : > { %10135 = vmatprep.mubr.msk.f32.mxu1 %vm1299_vm0, %v1239_v15  ;;  %v360_v15 = vld [vmem:[%s11563_s11 + $0x298] sm:$0xff] }
  0x82   : > { %9980 = vmatmul.mubr.msk.f32.gmra.mrb[52].mxu0 %vm375_vm1, %v330_v18  ;;  %v1272_v18 = vld [vmem:[%s11556_s9 + $0x278] sm:$0xff] }
  0x83   : > { %9982 = vmatprep.mubr.msk.f32.mxu0 %vm375_vm1, %v331_v20  ;;  %v1273_v20 = vld [vmem:[%s11556_s9 + $0x280] sm:$0xff] }
  0x84   : > { %10136 = vmatmul.mubr.msk.f32.gmra.mrb[46].mxu1 %vm1299_vm0, %v1240_v17  ;;  %v361_v17 = vld [vmem:[%s11563_s11 + $0x2a0] sm:$0xff] }
  0x85   : > { %10138 = vmatprep.mubr.msk.f32.mxu1 %vm1299_vm0, %v1241_v19  ;;  %v362_v19 = vld [vmem:[%s11563_s11 + $0x2a8] sm:$0xff] }
  0x86   : > { %9983 = vmatmul.mubr.msk.f32.gmra.mrb[54].mxu0 %vm375_vm1, %v332_v22  ;;  %v1274_v22 = vld [vmem:[%s11556_s9 + $0x288] sm:$0xff] }
  0x87   : > { %9985 = vmatprep.mubr.msk.f32.mxu0 %vm375_vm1, %v333_v24  ;;  %v1275_v24 = vld [vmem:[%s11556_s9 + $0x290] sm:$0xff] }
  0x88   : > { %10139 = vmatmul.mubr.msk.f32.gmra.mrb[48].mxu1 %vm1299_vm0, %v1242_v21  ;;  %v363_v21 = vld [vmem:[%s11563_s11 + $0x2b0] sm:$0xff] }
  0x89   : > { %10141 = vmatprep.mubr.msk.f32.mxu1 %vm1299_vm0, %v1243_v23  ;;  %v364_v23 = vld [vmem:[%s11563_s11 + $0x2b8] sm:$0xff] }
  0x8a   : > { %9986 = vmatmul.mubr.msk.f32.gmra.mrb[56].mxu0 %vm375_vm1, %v334_v26  ;;  %v1276_v26 = vld [vmem:[%s11556_s9 + $0x298] sm:$0xff] }
  0x8b   : > { %9988 = vmatprep.mubr.msk.f32.mxu0 %vm375_vm1, %v335_v28  ;;  %v1277_v28 = vld [vmem:[%s11556_s9 + $0x2a0] sm:$0xff] }
  0x8c   : > { %10142 = vmatmul.mubr.msk.f32.gmra.mrb[50].mxu1 %vm1299_vm0, %v1244_v25  ;;  %v365_v25 = vld [vmem:[%s11563_s11 + $0x2c0] sm:$0xff] }
  0x8d   : > { %10144 = vmatprep.mubr.msk.f32.mxu1 %vm1299_vm0, %v1245_v27  ;;  %v366_v27 = vld [vmem:[%s11563_s11 + $0x2c8] sm:$0xff] }
  0x8e   : > { %9989 = vmatmul.mubr.msk.f32.gmra.mrb[58].mxu0 %vm375_vm1, %v336_v30  ;;  %v1278_v30 = vld [vmem:[%s11556_s9 + $0x2a8] sm:$0xff] }
  0x8f   : > { %9991 = vmatprep.mubr.msk.f32.mxu0 %vm375_vm1, %v337_v32  ;;  %v1279_v32 = vld [vmem:[%s11556_s9 + $0x2b0] sm:$0xff] }
  0x90   : > { %10145 = vmatmul.mubr.msk.f32.gmra.mrb[52].mxu1 %vm1299_vm0, %v1246_v29  ;;  %v367_v29 = vld [vmem:[%s11563_s11 + $0x2d0] sm:$0xff] }
  0x91   : > { %10147 = vmatprep.mubr.msk.f32.mxu1 %vm1299_vm0, %v1247_v31  ;;  %v368_v31 = vld [vmem:[%s11563_s11 + $0x2d8] sm:$0xff] }
  0x92   : > { %9992 = vmatmul.mubr.msk.f32.gmra.mrb[60].mxu0 %vm375_vm1, %v338_v34  ;;  %v1280_v34 = vld [vmem:[%s11556_s9 + $0x2b8] sm:$0xff] }
  0x93   : > { %9994 = vmatprep.mubr.msk.f32.mxu0 %vm375_vm1, %v339_v36  ;;  %v1281_v36 = vld [vmem:[%s11556_s9 + $0x2c0] sm:$0xff] }
  0x94   : > { %10148 = vmatmul.mubr.msk.f32.gmra.mrb[54].mxu1 %vm1299_vm0, %v1248_v33  ;;  %v369_v33 = vld [vmem:[%s11563_s11 + $0x2e0] sm:$0xff] }
  0x95   : > { %10150 = vmatprep.mubr.msk.f32.mxu1 %vm1299_vm0, %v1249_v35  ;;  %v370_v35 = vld [vmem:[%s11563_s11 + $0x2e8] sm:$0xff] }
  0x96   : > { %9995 = vmatmul.mubr.msk.f32.gmra.mrb[62].mxu0 %vm375_vm1, %v340_v38  ;;  %v1283_v38 = vld [vmem:[%s11556_s9 + $0x2d0] sm:$0xff] }
  0x97   : > { %9997 = vmatprep.mubr.msk.f32.mxu0 %vm375_vm1, %v341_v40  ;;  %v1285_v40 = vld [vmem:[%s11556_s9 + $0x2e0] sm:$0xff] }
  0x98   : > { %10151 = vmatmul.mubr.msk.f32.gmra.mrb[56].mxu1 %vm1299_vm0, %v1250_v37  ;;  %v1282_v37 = vld [vmem:[%s11556_s9 + $0x2c8] sm:$0xff] }
  0x99   : > { %10153 = vmatprep.mubr.msk.f32.mxu1 %vm1299_vm0, %v1251_v39  ;;  %v1284_v39 = vld [vmem:[%s11556_s9 + $0x2d8] sm:$0xff] }
  0x9a   : > { %9998 = vmatmul.mubr.msk.f32.gmra.mrb[64].mxu0 %vm375_vm1, %v342_v42 }
  0x9b   : > { %10000 = vmatprep.mubr.msk.f32.mxu0 %vm375_vm1, %v343_v44 }
  0x9c   : > { %10154 = vmatmul.mubr.msk.f32.gmra.mrb[58].mxu1 %vm1299_vm0, %v1252_v41  ;;  %v1286_v41 = vld [vmem:[%s11556_s9 + $0x2e8] sm:$0xff]  ;;  %s11462_s9 = smov 64  }
  0x9d   : > { %10156 = vmatprep.mubr.msk.f32.mxu1 %vm1299_vm0, %v1253_v43 }
  0x9e   : > { %10001 = vmatmul.mubr.msk.f32.gmra.mrb[66].mxu0 %vm375_vm1, %v344_v46 }
  0x9f   : > { %10003 = vmatprep.mubr.msk.f32.mxu0 %vm375_vm1, %v345_v48  ;;  %v2119_v48 = vld [vmem:[%s18087_s2 + $0x10] sm:$0xff] }
  0xa0   : > { %10157 = vmatmul.mubr.msk.f32.gmra.mrb[60].mxu1 %vm1299_vm0, %v1254_v45 }
  0xa1   : > { %10159 = vmatprep.mubr.msk.f32.mxu1 %vm1299_vm0, %v1255_v47 }
  0xa2   : > { %10004 = vmatmul.mubr.msk.f32.gmra.mrb[68].mxu0 %vm375_vm1, %v346_v50 }
  0xa3   : > { %10006 = vmatprep.mubr.msk.f32.mxu0 %vm375_vm1, %v347_v52 }
  0xa4   : > { %10160 = vmatmul.mubr.msk.f32.gmra.mrb[62].mxu1 %vm1299_vm0, %v1256_v49  ;;  %v2120_v49 = vld [vmem:[%s18087_s2 + $0x18] sm:$0xff] }
  0xa5   : > { %10162 = vmatprep.mubr.msk.f32.mxu1 %vm1299_vm0, %v1257_v51 }
  0xa6   : > { %10007 = vmatmul.mubr.msk.f32.gmra.mrb[70].mxu0 %vm375_vm1, %v348_v54 }
  0xa7   : > { %10009 = vmatprep.mubr.msk.f32.mxu0 %vm375_vm1, %v349_v56 }
  0xa8   : > { %10163 = vmatmul.mubr.msk.f32.gmra.mrb[64].mxu1 %vm1299_vm0, %v1258_v53  ;;  %v10581_v53 = vpack.c.bf16 %v2120_v49, %v2119_v48 }
  0xa9   : > { %10165 = vmatprep.mubr.msk.f32.mxu1 %vm1299_vm0, %v1259_v55 }
  0xaa   : > { %10010 = vmatmul.mubr.msk.f32.gmra.mrb[72].mxu0 %vm375_vm1, %v350_v58 }
  0xab   : > { %10012 = vmatprep.mubr.msk.f32.mxu0 %vm375_vm1, %v351_v60 }
  0xac   : > { %10166 = vmatmul.mubr.msk.f32.gmra.mrb[66].mxu1 %vm1299_vm0, %v1260_v57 }
  0xad   : > { %10168 = vmatprep.mubr.msk.f32.mxu1 %vm1299_vm0, %v1261_v59 }
  0xae   : > { %10013 = vmatmul.mubr.msk.f32.gmra.mrb[74].mxu0 %vm375_vm1, %v352_v62 }
  0xaf   : > { %10015 = vmatprep.mubr.msk.f32.mxu0 %vm375_vm1, %v353_v0 }
  0xb0   : > { %10169 = vmatmul.mubr.msk.f32.gmra.mrb[68].mxu1 %vm1299_vm0, %v1262_v61 }
  0xb1   : > { %10171 = vmatprep.mubr.msk.f32.mxu1 %vm1299_vm0, %v1263_v63 }
  0xb2   : > { %10016 = vmatmul.mubr.msk.f32.gmra.mrb[76].mxu0 %vm375_vm1, %v354_v2 }
  0xb3   : > { %10018 = vmatprep.mubr.msk.f32.mxu0 %vm375_vm1, %v355_v4 }
  0xb4   : > { %10172 = vmatmul.mubr.msk.f32.gmra.mrb[70].mxu1 %vm1299_vm0, %v1264_v1 }
  0xb5   : > { %10174 = vmatprep.mubr.msk.f32.mxu1 %vm1299_vm0, %v1265_v3 }
  0xb6   : > { %10019 = vmatmul.mubr.msk.f32.gmra.mrb[78].mxu0 %vm375_vm1, %v356_v6 }
  0xb7   : > { %10021 = vmatprep.mubr.msk.f32.mxu0 %vm375_vm1, %v357_v8 }
  0xb8   : > { %10175 = vmatmul.mubr.msk.f32.gmra.mrb[72].mxu1 %vm1299_vm0, %v1266_v5 }
  0xb9   : > { %10177 = vmatprep.mubr.msk.f32.mxu1 %vm1299_vm0, %v1267_v7 }
  0xba   : > { %10022 = vmatmul.mubr.msk.f32.gmra.mrb[80].mxu0 %vm375_vm1, %v358_v10 }
  0xbb   : > { %10024 = vmatprep.mubr.msk.f32.mxu0 %vm375_vm1, %v359_v13 }
  0xbc   : > { %10178 = vmatmul.mubr.msk.f32.gmra.mrb[74].mxu1 %vm1299_vm0, %v1268_v9 }
  0xbd   : > { %10180 = vmatprep.mubr.msk.f32.mxu1 %vm1299_vm0, %v1269_v11 }
  0xbe   : > { %10025 = vmatmul.mubr.msk.f32.gmra.mrb[82].mxu0 %vm375_vm1, %v360_v15 }
  0xbf   : > { %10027 = vmatprep.mubr.msk.f32.mxu0 %vm375_vm1, %v361_v17 }
  0xc0   : > { %10181 = vmatmul.mubr.msk.f32.gmra.mrb[76].mxu1 %vm1299_vm0, %v1270_v14 }
  0xc1   : > { %10183 = vmatprep.mubr.msk.f32.mxu1 %vm1299_vm0, %v1271_v16 }
  0xc2   : > { %10028 = vmatmul.mubr.msk.f32.gmra.mrb[84].mxu0 %vm375_vm1, %v362_v19 }
  0xc3   : > { %10030 = vmatprep.mubr.msk.f32.mxu0 %vm375_vm1, %v363_v21 }
  0xc4   : > { %10184 = vmatmul.mubr.msk.f32.gmra.mrb[78].mxu1 %vm1299_vm0, %v1272_v18 }
  0xc5   : > { %10186 = vmatprep.mubr.msk.f32.mxu1 %vm1299_vm0, %v1273_v20 }
  0xc6   : > { %10031 = vmatmul.mubr.msk.f32.gmra.mrb[86].mxu0 %vm375_vm1, %v364_v23 }
  0xc7   : > { %10033 = vmatprep.mubr.msk.f32.mxu0 %vm375_vm1, %v365_v25 }
  0xc8   : > { %10187 = vmatmul.mubr.msk.f32.gmra.mrb[80].mxu1 %vm1299_vm0, %v1274_v22 }
  0xc9   : > { %10189 = vmatprep.mubr.msk.f32.mxu1 %vm1299_vm0, %v1275_v24 }
  0xca   : > { %10034 = vmatmul.mubr.msk.f32.gmra.mrb[88].mxu0 %vm375_vm1, %v366_v27 }
  0xcb   : > { %10036 = vmatprep.mubr.msk.f32.mxu0 %vm375_vm1, %v367_v29 }
  0xcc   : > { %10190 = vmatmul.mubr.msk.f32.gmra.mrb[82].mxu1 %vm1299_vm0, %v1276_v26 }
  0xcd   : > { %10192 = vmatprep.mubr.msk.f32.mxu1 %vm1299_vm0, %v1277_v28 }
  0xce   : > { %10037 = vmatmul.mubr.msk.f32.gmra.mrb[90].mxu0 %vm375_vm1, %v368_v31 }
  0xcf   : > { %10039 = vmatprep.mubr.msk.f32.mxu0 %vm375_vm1, %v369_v33 }
  0xd0   : > { %10193 = vmatmul.mubr.msk.f32.gmra.mrb[84].mxu1 %vm1299_vm0, %v1278_v30 }
  0xd1   : > { %10195 = vmatprep.mubr.msk.f32.mxu1 %vm1299_vm0, %v1279_v32 }
  0xd2   : > { %10040 = vmatmul.mubr.msk.f32.gmra.mrb[92].mxu0 %vm375_vm1, %v370_v35 }
  0xd4   : > { %10196 = vmatmul.mubr.msk.f32.gmra.mrb[86].mxu1 %vm1299_vm0, %v1280_v34 }
  0xd5   : > { %10198 = vmatprep.mubr.msk.f32.mxu1 %vm1299_vm0, %v1281_v36 }
  0xd8   : > { %10199 = vmatmul.mubr.msk.f32.gmra.mrb[88].mxu1 %vm1299_vm0, %v1282_v37 }
  0xd9   : > { %10201 = vmatprep.mubr.msk.f32.mxu1 %vm1299_vm0, %v1283_v38 }
  0xdc   : > { %10202 = vmatmul.mubr.msk.f32.gmra.mrb[90].mxu1 %vm1299_vm0, %v1284_v39 }
  0xdd   : > { %10204 = vmatprep.mubr.msk.f32.mxu1 %vm1299_vm0, %v1285_v40 }
  0xe0   : > { %10205 = vmatmul.mubr.msk.f32.gmra.mrb[92].mxu1 %vm1299_vm0, %v1286_v41 }
  0xed   : > { %v9903_v42 = vpop.f32.mrb[0].mxu0 }
  0xee   : > { %v724_v43 = vpop.f32.mrb[1].mxu0 }
  0xf1   : > { %v9906_v44 = vpop.f32.mrb[2].mxu0 }
  0xf2   : > { %v734_v45 = vpop.f32.mrb[3].mxu0 }
  0xf5   : > { %v9909_v46 = vpop.f32.mrb[4].mxu0 }
  0xf6   : > { %v744_v47 = vpop.f32.mrb[5].mxu0 }
  0xf9   : > { %v9912_v51 = vpop.f32.mrb[6].mxu0 }
  0xfa   : > { %v754_v54 = vpop.f32.mrb[7].mxu0 }
  0xfb   : > { %v11997_v50 = vpop.f32.mrb[0].mxu1 }
  0xfc   : > { %18734 = vst [vmem:[#allocation2_spill] sm:$0xff] %v11997_v50  ;;  %v11999_v52 = vpop.f32.mrb[1].mxu1 }
  0xfd   : > { %18735 = vst [vmem:[#allocation3_spill] sm:$0xff] %v11999_v52  ;;  %10231 = vmatprep.mubr.msk.f32.mxu0 %vm1299_vm0, %v11999_v52  ;;  %v9915_v56 = vpop.f32.mrb[8].mxu0 }
  0xfe   : > { %10232 = vmatmul.mubr.msk.f32.vlgmr.msra.gmra.mrb[94].mxu0 %vm1299_vm0, %v11997_v50  ;;  %v764_v58 = vpop.f32.mrb[9].mxu0 }
  0xff   : > { %10580 = vmatpush3.bf16.msra.mxu0 %v11802_v12  ;;  %v12006_v55 = vpop.f32.mrb[2].mxu1 }
 0x100   : > { %18736 = vst [vmem:[#allocation4_spill] sm:$0xff] %v12006_v55  ;;  %v12008_v57 = vpop.f32.mrb[3].mxu1  ;;  %10582 = vmatprep.subr.bf16.mxu0 %v10581_v53 }
 0x101   : > { %18737 = vst [vmem:[#allocation5_spill] sm:$0xff] %v12008_v57  ;;  %10234 = vmatprep.mubr.msk.f32.mxu0 %vm1299_vm0, %v12008_v57  ;;  %v9918_v60 = vpop.f32.mrb[10].mxu0 }
 0x102   : > { %10235 = vmatmul.mubr.msk.f32.gmra.mrb[96].mxu0 %vm1299_vm0, %v12006_v55  ;;  %v774_v61 = vpop.f32.mrb[11].mxu0 }
 0x103   : > { %10584 = vmatpush3.bf16.msra.mxu0 %v10581_v53  ;;  %10380 = vmatprep.mubr.msk.f32.mxu0 %vm375_vm1, %v724_v43  ;;  %v12015_v59 = vpop.f32.mrb[4].mxu1 }
 0x104   : > { %18738 = vst [vmem:[#allocation6_spill] sm:$0xff] %v12015_v59  ;;  %v12017_v12 = vpop.f32.mrb[5].mxu1 }
 0x105   : > { %18739 = vst [vmem:[#allocation7_spill] sm:$0xff] %v12017_v12  ;;  %10237 = vmatprep.mubr.msk.f32.mxu1 %vm1299_vm0, %v12017_v12  ;;  %v9921_v63 = vpop.f32.mrb[12].mxu0 }
 0x106   : > { %10381 = vmatmul.mubr.msk.f32.vlgmr.msra.gmra.mrb[94].mxu0 %vm375_vm1, %v9903_v42  ;;  %10238 = vmatmul.mubr.msk.f32.vlgmr.msra.gmra.mrb[94].mxu1 %vm1299_vm0, %v12015_v59  ;;  %v784_v1 = vpop.f32.mrb[13].mxu0 }
 0x107   : > { %10383 = vmatprep.mubr.msk.f32.mxu0 %vm375_vm1, %v734_v45  ;;  %v12025_v62 = vpop.f32.mrb[6].mxu1 }
 0x108   : > { %18740 = vst [vmem:[#allocation8_spill] sm:$0xff] %v12025_v62  ;;  %v12027_v0 = vpop.f32.mrb[7].mxu1 }
 0x109   : > { %18741 = vst [vmem:[#allocation9_spill] sm:$0xff] %v12027_v0  ;;  %10240 = vmatprep.mubr.msk.f32.mxu1 %vm1299_vm0, %v12027_v0  ;;  %v9924_v3 = vpop.f32.mrb[14].mxu0 }
 0x10a   : > { %10384 = vmatmul.mubr.msk.f32.gmra.mrb[96].mxu0 %vm375_vm1, %v9906_v44  ;;  %10241 = vmatmul.mubr.msk.f32.gmra.mrb[96].mxu1 %vm1299_vm0, %v12025_v62  ;;  %v794_v5 = vpop.f32.mrb[15].mxu0 }
 0x10b   : > { %10386 = vmatprep.mubr.msk.f32.mxu0 %vm375_vm1, %v744_v47  ;;  %v12035_v2 = vpop.f32.mrb[8].mxu1 }
 0x10c   : > { %18742 = vst [vmem:[#allocation10_spill] sm:$0xff] %v12035_v2  ;;  %v12037_v4 = vpop.f32.mrb[9].mxu1 }
 0x10d   : > { %18743 = vst [vmem:[#allocation11_spill] sm:$0xff] %v12037_v4  ;;  %10243 = vmatprep.mubr.msk.f32.mxu1 %vm1299_vm0, %v12037_v4  ;;  %v9927_v7 = vpop.f32.mrb[16].mxu0 }
 0x10e   : > { %10387 = vmatmul.mubr.msk.f32.gmra.mrb[98].mxu0 %vm375_vm1, %v9909_v46  ;;  %10244 = vmatmul.mubr.msk.f32.gmra.mrb[98].mxu1 %vm1299_vm0, %v12035_v2  ;;  %v804_v9 = vpop.f32.mrb[17].mxu0 }
 0x10f   : > { %10389 = vmatprep.mubr.msk.f32.mxu0 %vm375_vm1, %v754_v54  ;;  %v12045_v6 = vpop.f32.mrb[10].mxu1 }
 0x110   : > { %18744 = vst [vmem:[#allocation12_spill] sm:$0xff] %v12045_v6  ;;  %v12047_v8 = vpop.f32.mrb[11].mxu1 }
 0x111   : > { %18745 = vst [vmem:[#allocation13_spill] sm:$0xff] %v12047_v8  ;;  %10246 = vmatprep.mubr.msk.f32.mxu1 %vm1299_vm0, %v12047_v8  ;;  %v9930_v11 = vpop.f32.mrb[18].mxu0 }
 0x112   : > { %10390 = vmatmul.mubr.msk.f32.gmra.mrb[100].mxu0 %vm375_vm1, %v9912_v51  ;;  %10247 = vmatmul.mubr.msk.f32.gmra.mrb[100].mxu1 %vm1299_vm0, %v12045_v6  ;;  %v814_v14 = vpop.f32.mrb[19].mxu0 }
 0x113   : > { %10392 = vmatprep.mubr.msk.f32.mxu0 %vm375_vm1, %v764_v58  ;;  %v12055_v10 = vpop.f32.mrb[12].mxu1 }
 0x114   : > { %18746 = vst [vmem:[#allocation14_spill] sm:$0xff] %v12055_v10  ;;  %v12057_v13 = vpop.f32.mrb[13].mxu1 }
 0x115   : > { %18747 = vst [vmem:[#allocation15_spill] sm:$0xff] %v12057_v13  ;;  %10249 = vmatprep.mubr.msk.f32.mxu1 %vm1299_vm0, %v12057_v13  ;;  %v9933_v16 = vpop.f32.mrb[20].mxu0 }
 0x116   : > { %10393 = vmatmul.mubr.msk.f32.gmra.mrb[102].mxu0 %vm375_vm1, %v9915_v56  ;;  %10250 = vmatmul.mubr.msk.f32.gmra.mrb[102].mxu1 %vm1299_vm0, %v12055_v10  ;;  %v824_v18 = vpop.f32.mrb[21].mxu0 }
 0x117   : > { %10395 = vmatprep.mubr.msk.f32.mxu0 %vm375_vm1, %v774_v61  ;;  %v12065_v15 = vpop.f32.mrb[14].mxu1 }
 0x118   : > { %18748 = vst [vmem:[#allocation16_spill] sm:$0xff] %v12065_v15  ;;  %v12067_v17 = vpop.f32.mrb[15].mxu1 }
 0x119   : > { %18749 = vst [vmem:[#allocation17_spill] sm:$0xff] %v12067_v17  ;;  %10252 = vmatprep.mubr.msk.f32.mxu1 %vm1299_vm0, %v12067_v17  ;;  %v9936_v20 = vpop.f32.mrb[22].mxu0 }
 0x11a   : > { %10396 = vmatmul.mubr.msk.f32.gmra.mrb[104].mxu0 %vm375_vm1, %v9918_v60  ;;  %10253 = vmatmul.mubr.msk.f32.gmra.mrb[104].mxu1 %vm1299_vm0, %v12065_v15  ;;  %v834_v22 = vpop.f32.mrb[23].mxu0 }
 0x11b   : > { %10398 = vmatprep.mubr.msk.f32.mxu0 %vm375_vm1, %v784_v1  ;;  %v12075_v19 = vpop.f32.mrb[16].mxu1 }
 0x11c   : > { %18750 = vst [vmem:[#allocation18_spill] sm:$0xff] %v12075_v19  ;;  %v12077_v21 = vpop.f32.mrb[17].mxu1 }
 0x11d   : > { %18751 = vst [vmem:[#allocation19_spill] sm:$0xff] %v12077_v21  ;;  %10255 = vmatprep.mubr.msk.f32.mxu1 %vm1299_vm0, %v12077_v21  ;;  %v9939_v24 = vpop.f32.mrb[24].mxu0 }
 0x11e   : > { %10399 = vmatmul.mubr.msk.f32.gmra.mrb[106].mxu0 %vm375_vm1, %v9921_v63  ;;  %10256 = vmatmul.mubr.msk.f32.gmra.mrb[106].mxu1 %vm1299_vm0, %v12075_v19  ;;  %v844_v26 = vpop.f32.mrb[25].mxu0 }
 0x11f   : > { %10401 = vmatprep.mubr.msk.f32.mxu0 %vm375_vm1, %v794_v5  ;;  %v12085_v23 = vpop.f32.mrb[18].mxu1 }
 0x120   : > { %18752 = vst [vmem:[#allocation20_spill] sm:$0xff] %v12085_v23  ;;  %v12087_v25 = vpop.f32.mrb[19].mxu1 }
 0x121   : > { %18753 = vst [vmem:[#allocation21_spill] sm:$0xff] %v12087_v25  ;;  %10258 = vmatprep.mubr.msk.f32.mxu1 %vm1299_vm0, %v12087_v25  ;;  %v9942_v28 = vpop.f32.mrb[26].mxu0 }
 0x122   : > { %10402 = vmatmul.mubr.msk.f32.gmra.mrb[108].mxu0 %vm375_vm1, %v9924_v3  ;;  %10259 = vmatmul.mubr.msk.f32.gmra.mrb[108].mxu1 %vm1299_vm0, %v12085_v23  ;;  %v854_v30 = vpop.f32.mrb[27].mxu0 }
 0x123   : > { %10404 = vmatprep.mubr.msk.f32.mxu0 %vm375_vm1, %v804_v9  ;;  %v12095_v27 = vpop.f32.mrb[20].mxu1 }
 0x124   : > { %18754 = vst [vmem:[#allocation22_spill] sm:$0xff] %v12095_v27  ;;  %v12097_v29 = vpop.f32.mrb[21].mxu1 }
 0x125   : > { %18755 = vst [vmem:[#allocation23_spill] sm:$0xff] %v12097_v29  ;;  %10261 = vmatprep.mubr.msk.f32.mxu1 %vm1299_vm0, %v12097_v29  ;;  %v9945_v32 = vpop.f32.mrb[28].mxu0 }
 0x126   : > { %10405 = vmatmul.mubr.msk.f32.gmra.mrb[110].mxu0 %vm375_vm1, %v9927_v7  ;;  %10262 = vmatmul.mubr.msk.f32.gmra.mrb[110].mxu1 %vm1299_vm0, %v12095_v27  ;;  %v864_v34 = vpop.f32.mrb[29].mxu0 }
 0x127   : > { %10407 = vmatprep.mubr.msk.f32.mxu0 %vm375_vm1, %v814_v14  ;;  %v12105_v31 = vpop.f32.mrb[22].mxu1 }
 0x128   : > { %18756 = vst [vmem:[#allocation24_spill] sm:$0xff] %v12105_v31  ;;  %v12107_v33 = vpop.f32.mrb[23].mxu1 }
 0x129   : > { %18757 = vst [vmem:[#allocation25_spill] sm:$0xff] %v12107_v33  ;;  %10264 = vmatprep.mubr.msk.f32.mxu1 %vm1299_vm0, %v12107_v33  ;;  %v9948_v36 = vpop.f32.mrb[30].mxu0 }
 0x12a   : > { %10408 = vmatmul.mubr.msk.f32.gmra.mrb[112].mxu0 %vm375_vm1, %v9930_v11  ;;  %10265 = vmatmul.mubr.msk.f32.gmra.mrb[112].mxu1 %vm1299_vm0, %v12105_v31  ;;  %v874_v38 = vpop.f32.mrb[31].mxu0 }
 0x12b   : > { %10410 = vmatprep.mubr.msk.f32.mxu0 %vm375_vm1, %v824_v18  ;;  %v12115_v35 = vpop.f32.mrb[24].mxu1 }
 0x12c   : > { %18758 = vst [vmem:[#allocation26_spill] sm:$0xff] %v12115_v35  ;;  %v12117_v37 = vpop.f32.mrb[25].mxu1 }
 0x12d   : > { %18759 = vst [vmem:[#allocation27_spill] sm:$0xff] %v12117_v37  ;;  %10267 = vmatprep.mubr.msk.f32.mxu1 %vm1299_vm0, %v12117_v37  ;;  %v9951_v40 = vpop.f32.mrb[32].mxu0 }
 0x12e   : > { %10411 = vmatmul.mubr.msk.f32.gmra.mrb[114].mxu0 %vm375_vm1, %v9933_v16  ;;  %10268 = vmatmul.mubr.msk.f32.gmra.mrb[114].mxu1 %vm1299_vm0, %v12115_v35  ;;  %v884_v42 = vpop.f32.mrb[33].mxu0 }
 0x12f   : > { %10413 = vmatprep.mubr.msk.f32.mxu0 %vm375_vm1, %v834_v22  ;;  %v12125_v39 = vpop.f32.mrb[26].mxu1 }
 0x130   : > { %18760 = vst [vmem:[#allocation28_spill] sm:$0xff] %v12125_v39  ;;  %v12127_v41 = vpop.f32.mrb[27].mxu1 }
 0x131   : > { %18761 = vst [vmem:[#allocation29_spill] sm:$0xff] %v12127_v41  ;;  %10270 = vmatprep.mubr.msk.f32.mxu1 %vm1299_vm0, %v12127_v41  ;;  %v9954_v44 = vpop.f32.mrb[34].mxu0 }
 0x132   : > { %10414 = vmatmul.mubr.msk.f32.gmra.mrb[116].mxu0 %vm375_vm1, %v9936_v20  ;;  %10271 = vmatmul.mubr.msk.f32.gmra.mrb[116].mxu1 %vm1299_vm0, %v12125_v39  ;;  %v894_v46 = vpop.f32.mrb[35].mxu0 }
 0x133   : > { %10416 = vmatprep.mubr.msk.f32.mxu0 %vm375_vm1, %v844_v26  ;;  %v12135_v43 = vpop.f32.mrb[28].mxu1 }
 0x134   : > { %18762 = vst [vmem:[#allocation30_spill] sm:$0xff] %v12135_v43  ;;  %v12137_v45 = vpop.f32.mrb[29].mxu1 }
 0x135   : > { %18763 = vst [vmem:[#allocation31_spill] sm:$0xff] %v12137_v45  ;;  %10273 = vmatprep.mubr.msk.f32.mxu1 %vm1299_vm0, %v12137_v45  ;;  %v9957_v48 = vpop.f32.mrb[36].mxu0 }
 0x136   : > { %10417 = vmatmul.mubr.msk.f32.gmra.mrb[118].mxu0 %vm375_vm1, %v9939_v24  ;;  %10274 = vmatmul.mubr.msk.f32.gmra.mrb[118].mxu1 %vm1299_vm0, %v12135_v43  ;;  %v904_v51 = vpop.f32.mrb[37].mxu0 }
 0x137   : > { %10419 = vmatprep.mubr.msk.f32.mxu0 %vm375_vm1, %v854_v30  ;;  %v12145_v47 = vpop.f32.mrb[30].mxu1 }
 0x138   : > { %18764 = vst [vmem:[#allocation32_spill] sm:$0xff] %v12145_v47  ;;  %v12147_v49 = vpop.f32.mrb[31].mxu1 }
 0x139   : > { %18765 = vst [vmem:[#allocation33_spill] sm:$0xff] %v12147_v49  ;;  %10276 = vmatprep.mubr.msk.f32.mxu1 %vm1299_vm0, %v12147_v49  ;;  %v9960_v54 = vpop.f32.mrb[38].mxu0 }
 0x13a   : > { %10420 = vmatmul.mubr.msk.f32.gmra.mrb[120].mxu0 %vm375_vm1, %v9942_v28  ;;  %10277 = vmatmul.mubr.msk.f32.gmra.mrb[120].mxu1 %vm1299_vm0, %v12145_v47  ;;  %v914_v58 = vpop.f32.mrb[39].mxu0 }
 0x13b   : > { %10422 = vmatprep.mubr.msk.f32.mxu0 %vm375_vm1, %v864_v34  ;;  %v12155_v53 = vpop.f32.mrb[32].mxu1 }
 0x13c   : > { %18766 = vst [vmem:[#allocation34_spill] sm:$0xff] %v12155_v53  ;;  %v12157_v56 = vpop.f32.mrb[33].mxu1 }
 0x13d   : > { %18767 = vst [vmem:[#allocation35_spill] sm:$0xff] %v12157_v56  ;;  %10279 = vmatprep.mubr.msk.f32.mxu1 %vm1299_vm0, %v12157_v56  ;;  %v9963_v61 = vpop.f32.mrb[40].mxu0 }
 0x13e   : > { %10423 = vmatmul.mubr.msk.f32.gmra.mrb[122].mxu0 %vm375_vm1, %v9945_v32  ;;  %10280 = vmatmul.mubr.msk.f32.gmra.mrb[122].mxu1 %vm1299_vm0, %v12155_v53  ;;  %v924_v1 = vpop.f32.mrb[41].mxu0 }
 0x13f   : > { %10425 = vmatprep.mubr.msk.f32.mxu0 %vm375_vm1, %v874_v38  ;;  %v12165_v60 = vpop.f32.mrb[34].mxu1 }
 0x140   : > { %18768 = vst [vmem:[#allocation36_spill] sm:$0xff] %v12165_v60  ;;  %v12167_v63 = vpop.f32.mrb[35].mxu1 }
 0x141   : > { %18769 = vst [vmem:[#allocation37_spill] sm:$0xff] %v12167_v63  ;;  %10282 = vmatprep.mubr.msk.f32.mxu1 %vm1299_vm0, %v12167_v63  ;;  %v9966_v5 = vpop.f32.mrb[42].mxu0 }
 0x142   : > { %10426 = vmatmul.mubr.msk.f32.gmra.mrb[124].mxu0 %vm375_vm1, %v9948_v36  ;;  %10283 = vmatmul.mubr.msk.f32.gmra.mrb[124].mxu1 %vm1299_vm0, %v12165_v60  ;;  %v934_v9 = vpop.f32.mrb[43].mxu0 }
 0x143   : > { %10428 = vmatprep.mubr.msk.f32.mxu0 %vm375_vm1, %v884_v42  ;;  %v12175_v3 = vpop.f32.mrb[36].mxu1 }
 0x144   : > { %18770 = vst [vmem:[#allocation38_spill] sm:$0xff] %v12175_v3  ;;  %v12177_v7 = vpop.f32.mrb[37].mxu1 }
 0x145   : > { %18771 = vst [vmem:[#allocation39_spill] sm:$0xff] %v12177_v7  ;;  %10285 = vmatprep.mubr.msk.f32.mxu1 %vm1299_vm0, %v12177_v7  ;;  %v9969_v14 = vpop.f32.mrb[44].mxu0 }
 0x146   : > { %10429 = vmatmul.mubr.msk.f32.gmra.mrb[126].mxu0 %vm375_vm1, %v9951_v40  ;;  %10286 = vmatmul.mubr.msk.f32.gmra.mrb[126].mxu1 %vm1299_vm0, %v12175_v3  ;;  %v944_v18 = vpop.f32.mrb[45].mxu0 }
 0x147   : > { %10431 = vmatprep.mubr.msk.f32.mxu0 %vm375_vm1, %v894_v46  ;;  %v12185_v11 = vpop.f32.mrb[38].mxu1 }
 0x148   : > { %18772 = vst [vmem:[#allocation40_spill] sm:$0xff] %v12185_v11  ;;  %v12187_v16 = vpop.f32.mrb[39].mxu1 }
 0x149   : > { %18773 = vst [vmem:[#allocation41_spill] sm:$0xff] %v12187_v16  ;;  %10288 = vmatprep.mubr.msk.f32.mxu1 %vm1299_vm0, %v12187_v16  ;;  %v9972_v22 = vpop.f32.mrb[46].mxu0 }
 0x14a   : > { %10432 = vmatmul.mubr.msk.f32.gmra.mrb[128].mxu0 %vm375_vm1, %v9954_v44  ;;  %10289 = vmatmul.mubr.msk.f32.gmra.mrb[128].mxu1 %vm1299_vm0, %v12185_v11  ;;  %v954_v26 = vpop.f32.mrb[47].mxu0 }
 0x14b   : > { %10434 = vmatprep.mubr.msk.f32.mxu0 %vm375_vm1, %v904_v51  ;;  %v12195_v20 = vpop.f32.mrb[40].mxu1 }
 0x14c   : > { %18774 = vst [vmem:[#allocation42_spill] sm:$0xff] %v12195_v20  ;;  %v12197_v24 = vpop.f32.mrb[41].mxu1 }
 0x14d   : > { %18775 = vst [vmem:[#allocation43_spill] sm:$0xff] %v12197_v24  ;;  %10291 = vmatprep.mubr.msk.f32.mxu1 %vm1299_vm0, %v12197_v24  ;;  %v9975_v30 = vpop.f32.mrb[48].mxu0 }
 0x14e   : > { %10435 = vmatmul.mubr.msk.f32.gmra.mrb[130].mxu0 %vm375_vm1, %v9957_v48  ;;  %10292 = vmatmul.mubr.msk.f32.gmra.mrb[130].mxu1 %vm1299_vm0, %v12195_v20  ;;  %v964_v34 = vpop.f32.mrb[49].mxu0 }
 0x14f   : > { %10437 = vmatprep.mubr.msk.f32.mxu0 %vm375_vm1, %v914_v58  ;;  %v12205_v28 = vpop.f32.mrb[42].mxu1 }
 0x150   : > { %18776 = vst [vmem:[#allocation44_spill] sm:$0xff] %v12205_v28  ;;  %v12207_v32 = vpop.f32.mrb[43].mxu1 }
 0x151   : > { %18777 = vst [vmem:[#allocation45_spill] sm:$0xff] %v12207_v32  ;;  %10294 = vmatprep.mubr.msk.f32.mxu1 %vm1299_vm0, %v12207_v32  ;;  %v9978_v38 = vpop.f32.mrb[50].mxu0 }
 0x152   : > { %10438 = vmatmul.mubr.msk.f32.gmra.mrb[132].mxu0 %vm375_vm1, %v9960_v54  ;;  %10295 = vmatmul.mubr.msk.f32.gmra.mrb[132].mxu1 %vm1299_vm0, %v12205_v28  ;;  %v974_v42 = vpop.f32.mrb[51].mxu0 }
 0x153   : > { %10440 = vmatprep.mubr.msk.f32.mxu0 %vm375_vm1, %v924_v1  ;;  %v12215_v36 = vpop.f32.mrb[44].mxu1 }
 0x154   : > { %18778 = vst [vmem:[#allocation46_spill] sm:$0xff] %v12215_v36  ;;  %v12217_v40 = vpop.f32.mrb[45].mxu1 }
 0x155   : > { %18779 = vst [vmem:[#allocation47_spill] sm:$0xff] %v12217_v40  ;;  %10297 = vmatprep.mubr.msk.f32.mxu1 %vm1299_vm0, %v12217_v40  ;;  %v9981_v46 = vpop.f32.mrb[52].mxu0 }
 0x156   : > { %10441 = vmatmul.mubr.msk.f32.gmra.mrb[134].mxu0 %vm375_vm1, %v9963_v61  ;;  %10298 = vmatmul.mubr.msk.f32.gmra.mrb[134].mxu1 %vm1299_vm0, %v12215_v36  ;;  %v984_v51 = vpop.f32.mrb[53].mxu0 }
 0x157   : > { %10443 = vmatprep.mubr.msk.f32.mxu0 %vm375_vm1, %v934_v9  ;;  %v12225_v44 = vpop.f32.mrb[46].mxu1 }
 0x158   : > { %18780 = vst [vmem:[#allocation48_spill] sm:$0xff] %v12225_v44  ;;  %v12227_v48 = vpop.f32.mrb[47].mxu1 }
 0x159   : > { %18781 = vst [vmem:[#allocation49_spill] sm:$0xff] %v12227_v48  ;;  %10300 = vmatprep.mubr.msk.f32.mxu1 %vm1299_vm0, %v12227_v48  ;;  %v9984_v58 = vpop.f32.mrb[54].mxu0 }
 0x15a   : > { %10444 = vmatmul.mubr.msk.f32.gmra.mrb[136].mxu0 %vm375_vm1, %v9966_v5  ;;  %10301 = vmatmul.mubr.msk.f32.gmra.mrb[136].mxu1 %vm1299_vm0, %v12225_v44  ;;  %v994_v1 = vpop.f32.mrb[55].mxu0 }
 0x15b   : > { %10446 = vmatprep.mubr.msk.f32.mxu0 %vm375_vm1, %v944_v18  ;;  %v12235_v54 = vpop.f32.mrb[48].mxu1 }
 0x15c   : > { %18782 = vst [vmem:[#allocation50_spill] sm:$0xff] %v12235_v54  ;;  %v12237_v61 = vpop.f32.mrb[49].mxu1 }
 0x15d   : > { %18783 = vst [vmem:[#allocation51_spill] sm:$0xff] %v12237_v61  ;;  %10303 = vmatprep.mubr.msk.f32.mxu1 %vm1299_vm0, %v12237_v61  ;;  %v9987_v9 = vpop.f32.mrb[56].mxu0 }
 0x15e   : > { %10447 = vmatmul.mubr.msk.f32.gmra.mrb[138].mxu0 %vm375_vm1, %v9969_v14  ;;  %10304 = vmatmul.mubr.msk.f32.gmra.mrb[138].mxu1 %vm1299_vm0, %v12235_v54  ;;  %v1004_v48 = vpop.f32.mrb[57].mxu0 }
 0x15f   : > { %10449 = vmatprep.mubr.msk.f32.mxu0 %vm375_vm1, %v954_v26  ;;  %v12245_v5 = vpop.f32.mrb[50].mxu1 }
 0x160   : > { %18784 = vst [vmem:[#allocation52_spill] sm:$0xff] %v12245_v5  ;;  %v12247_v18 = vpop.f32.mrb[51].mxu1 }
 0x161   : > { %18785 = vst [vmem:[#allocation53_spill] sm:$0xff] %v12247_v18  ;;  %10306 = vmatprep.mubr.msk.f32.mxu1 %vm1299_vm0, %v12247_v18  ;;  %v9990_v61 = vpop.f32.mrb[58].mxu0 }
 0x162   : > { %10450 = vmatmul.mubr.msk.f32.gmra.mrb[140].mxu0 %vm375_vm1, %v9972_v22  ;;  %10307 = vmatmul.mubr.msk.f32.gmra.mrb[140].mxu1 %vm1299_vm0, %v12245_v5  ;;  %v1014_v54 = vpop.f32.mrb[59].mxu0 }
 0x163   : > { %10452 = vmatprep.mubr.msk.f32.mxu0 %vm375_vm1, %v964_v34  ;;  %v12255_v14 = vpop.f32.mrb[52].mxu1 }
 0x164   : > { %18786 = vst [vmem:[#allocation54_spill] sm:$0xff] %v12255_v14  ;;  %v12257_v26 = vpop.f32.mrb[53].mxu1 }
 0x165   : > { %18787 = vst [vmem:[#allocation55_spill] sm:$0xff] %v12257_v26  ;;  %10309 = vmatprep.mubr.msk.f32.mxu1 %vm1299_vm0, %v12257_v26  ;;  %v9993_v18 = vpop.f32.mrb[60].mxu0 }
 0x166   : > { %10453 = vmatmul.mubr.msk.f32.gmra.mrb[142].mxu0 %vm375_vm1, %v9975_v30  ;;  %10310 = vmatmul.mubr.msk.f32.gmra.mrb[142].mxu1 %vm1299_vm0, %v12255_v14  ;;  %v1024_v5 = vpop.f32.mrb[61].mxu0 }
 0x167   : > { %10455 = vmatprep.mubr.msk.f32.mxu0 %vm375_vm1, %v974_v42  ;;  %v12265_v22 = vpop.f32.mrb[54].mxu1 }
 0x168   : > { %18788 = vst [vmem:[#allocation56_spill] sm:$0xff] %v12265_v22  ;;  %v12267_v34 = vpop.f32.mrb[55].mxu1 }
 0x169   : > { %18789 = vst [vmem:[#allocation57_spill] sm:$0xff] %v12267_v34  ;;  %10312 = vmatprep.mubr.msk.f32.mxu1 %vm1299_vm0, %v12267_v34  ;;  %v9996_v26 = vpop.f32.mrb[62].mxu0 }
 0x16a   : > { %10456 = vmatmul.mubr.msk.f32.gmra.mrb[144].mxu0 %vm375_vm1, %v9978_v38  ;;  %10313 = vmatmul.mubr.msk.f32.gmra.mrb[144].mxu1 %vm1299_vm0, %v12265_v22  ;;  %v1034_v14 = vpop.f32.mrb[63].mxu0 }
 0x16b   : > { %10458 = vmatprep.mubr.msk.f32.mxu0 %vm375_vm1, %v984_v51  ;;  %v12275_v30 = vpop.f32.mrb[56].mxu1 }
 0x16c   : > { %18790 = vst [vmem:[#allocation58_spill] sm:$0xff] %v12275_v30  ;;  %v12277_v42 = vpop.f32.mrb[57].mxu1 }
 0x16d   : > { %18791 = vst [vmem:[#allocation59_spill] sm:$0xff] %v12277_v42  ;;  %10315 = vmatprep.mubr.msk.f32.mxu1 %vm1299_vm0, %v12277_v42  ;;  %v9999_v34 = vpop.f32.mrb[64].mxu0 }
 0x16e   : > { %10459 = vmatmul.mubr.msk.f32.gmra.mrb[146].mxu0 %vm375_vm1, %v9981_v46  ;;  %10316 = vmatmul.mubr.msk.f32.gmra.mrb[146].mxu1 %vm1299_vm0, %v12275_v30  ;;  %v1044_v22 = vpop.f32.mrb[65].mxu0 }
 0x16f   : > { %10461 = vmatprep.mubr.msk.f32.mxu0 %vm375_vm1, %v994_v1  ;;  %v12285_v38 = vpop.f32.mrb[58].mxu1 }
 0x170   : > { %18792 = vst [vmem:[#allocation60_spill] sm:$0xff] %v12285_v38  ;;  %v12287_v51 = vpop.f32.mrb[59].mxu1 }
 0x171   : > { %18793 = vst [vmem:[#allocation61_spill] sm:$0xff] %v12287_v51  ;;  %10318 = vmatprep.mubr.msk.f32.mxu1 %vm1299_vm0, %v12287_v51  ;;  %v10002_v42 = vpop.f32.mrb[66].mxu0 }
 0x172   : > { %10462 = vmatmul.mubr.msk.f32.gmra.mrb[148].mxu0 %vm375_vm1, %v9984_v58  ;;  %10319 = vmatmul.mubr.msk.f32.gmra.mrb[148].mxu1 %vm1299_vm0, %v12285_v38  ;;  %v1054_v30 = vpop.f32.mrb[67].mxu0 }
 0x173   : > { %10464 = vmatprep.mubr.msk.f32.mxu0 %vm375_vm1, %v1004_v48  ;;  %v12295_v46 = vpop.f32.mrb[60].mxu1 }
 0x174   : > { %18794 = vst [vmem:[#allocation62_spill] sm:$0xff] %v12295_v46  ;;  %v12297_v1 = vpop.f32.mrb[61].mxu1 }
 0x175   : > { %18795 = vst [vmem:[#allocation63_spill] sm:$0xff] %v12297_v1  ;;  %10321 = vmatprep.mubr.msk.f32.mxu1 %vm1299_vm0, %v12297_v1  ;;  %v10005_v51 = vpop.f32.mrb[68].mxu0 }
 0x176   : > { %10465 = vmatmul.mubr.msk.f32.gmra.mrb[150].mxu0 %vm375_vm1, %v9987_v9  ;;  %10322 = vmatmul.mubr.msk.f32.gmra.mrb[150].mxu1 %vm1299_vm0, %v12295_v46  ;;  %v1064_v38 = vpop.f32.mrb[69].mxu0 }
 0x177   : > { %10467 = vmatprep.mubr.msk.f32.mxu0 %vm375_vm1, %v1014_v54  ;;  %v12305_v58 = vpop.f32.mrb[62].mxu1 }
 0x178   : > { %18796 = vst [vmem:[#allocation64_spill] sm:$0xff] %v12305_v58  ;;  %v12307_v48 = vpop.f32.mrb[63].mxu1 }
 0x179   : > { %18797 = vst [vmem:[#allocation65_spill] sm:$0xff] %v12307_v48  ;;  %10324 = vmatprep.mubr.msk.f32.mxu1 %vm1299_vm0, %v12307_v48  ;;  %v10008_v1 = vpop.f32.mrb[70].mxu0 }
 0x17a   : > { %10468 = vmatmul.mubr.msk.f32.gmra.mrb[152].mxu0 %vm375_vm1, %v9990_v61  ;;  %10325 = vmatmul.mubr.msk.f32.gmra.mrb[152].mxu1 %vm1299_vm0, %v12305_v58  ;;  %v1074_v46 = vpop.f32.mrb[71].mxu0 }
 0x17b   : > { %10470 = vmatprep.mubr.msk.f32.mxu0 %vm375_vm1, %v1024_v5  ;;  %v12315_v9 = vpop.f32.mrb[64].mxu1 }
 0x17c   : > { %18798 = vst [vmem:[#allocation66_spill] sm:$0xff] %v12315_v9  ;;  %v12317_v54 = vpop.f32.mrb[65].mxu1 }
 0x17d   : > { %18799 = vst [vmem:[#allocation67_spill] sm:$0xff] %v12317_v54  ;;  %10327 = vmatprep.mubr.msk.f32.mxu1 %vm1299_vm0, %v12317_v54  ;;  %v10011_v48 = vpop.f32.mrb[72].mxu0 }
 0x17e   : > { %10471 = vmatmul.mubr.msk.f32.gmra.mrb[154].mxu0 %vm375_vm1, %v9993_v18  ;;  %10328 = vmatmul.mubr.msk.f32.gmra.mrb[154].mxu1 %vm1299_vm0, %v12315_v9  ;;  %v1084_v58 = vpop.f32.mrb[73].mxu0 }
 0x17f   : > { %10473 = vmatprep.mubr.msk.f32.mxu0 %vm375_vm1, %v1034_v14  ;;  %v12325_v61 = vpop.f32.mrb[66].mxu1 }
 0x180   : > { %18800 = vst [vmem:[#allocation68_spill] sm:$0xff] %v12325_v61  ;;  %v12327_v5 = vpop.f32.mrb[67].mxu1 }
 0x181   : > { %18801 = vst [vmem:[#allocation69_spill] sm:$0xff] %v12327_v5  ;;  %10330 = vmatprep.mubr.msk.f32.mxu1 %vm1299_vm0, %v12327_v5  ;;  %v10014_v54 = vpop.f32.mrb[74].mxu0 }
 0x182   : > { %10474 = vmatmul.mubr.msk.f32.gmra.mrb[156].mxu0 %vm375_vm1, %v9996_v26  ;;  %10331 = vmatmul.mubr.msk.f32.gmra.mrb[156].mxu1 %vm1299_vm0, %v12325_v61  ;;  %v1094_v9 = vpop.f32.mrb[75].mxu0 }
 0x183   : > { %10476 = vmatprep.mubr.msk.f32.mxu0 %vm375_vm1, %v1044_v22  ;;  %v12335_v18 = vpop.f32.mrb[68].mxu1 }
 0x184   : > { %18802 = vst [vmem:[#allocation70_spill] sm:$0xff] %v12335_v18  ;;  %v12337_v14 = vpop.f32.mrb[69].mxu1 }
 0x185   : > { %18803 = vst [vmem:[#allocation71_spill] sm:$0xff] %v12337_v14  ;;  %10333 = vmatprep.mubr.msk.f32.mxu1 %vm1299_vm0, %v12337_v14  ;;  %v10017_v5 = vpop.f32.mrb[76].mxu0 }
 0x186   : > { %10477 = vmatmul.mubr.msk.f32.gmra.mrb[158].mxu0 %vm375_vm1, %v9999_v34  ;;  %10334 = vmatmul.mubr.msk.f32.gmra.mrb[158].mxu1 %vm1299_vm0, %v12335_v18  ;;  %v1104_v61 = vpop.f32.mrb[77].mxu0 }
 0x187   : > { %10479 = vmatprep.mubr.msk.f32.mxu0 %vm375_vm1, %v1054_v30  ;;  %v12345_v26 = vpop.f32.mrb[70].mxu1 }
 0x188   : > { %18804 = vst [vmem:[#allocation72_spill] sm:$0xff] %v12345_v26  ;;  %v12347_v22 = vpop.f32.mrb[71].mxu1 }
 0x189   : > { %18805 = vst [vmem:[#allocation73_spill] sm:$0xff] %v12347_v22  ;;  %10336 = vmatprep.mubr.msk.f32.mxu1 %vm1299_vm0, %v12347_v22  ;;  %v10020_v14 = vpop.f32.mrb[78].mxu0 }
 0x18a   : > { %10480 = vmatmul.mubr.msk.f32.gmra.mrb[160].mxu0 %vm375_vm1, %v10002_v42  ;;  %10337 = vmatmul.mubr.msk.f32.gmra.mrb[160].mxu1 %vm1299_vm0, %v12345_v26  ;;  %v1114_v18 = vpop.f32.mrb[79].mxu0 }
 0x18b   : > { %10482 = vmatprep.mubr.msk.f32.mxu0 %vm375_vm1, %v1064_v38  ;;  %v12355_v34 = vpop.f32.mrb[72].mxu1 }
 0x18c   : > { %18806 = vst [vmem:[#allocation74_spill] sm:$0xff] %v12355_v34  ;;  %v12357_v30 = vpop.f32.mrb[73].mxu1 }
 0x18d   : > { %18807 = vst [vmem:[#allocation75_spill] sm:$0xff] %v12357_v30  ;;  %10339 = vmatprep.mubr.msk.f32.mxu1 %vm1299_vm0, %v12357_v30  ;;  %v10023_v22 = vpop.f32.mrb[80].mxu0 }
 0x18e   : > { %10483 = vmatmul.mubr.msk.f32.gmra.mrb[162].mxu0 %vm375_vm1, %v10005_v51  ;;  %10340 = vmatmul.mubr.msk.f32.gmra.mrb[162].mxu1 %vm1299_vm0, %v12355_v34  ;;  %v1124_v26 = vpop.f32.mrb[81].mxu0 }
 0x18f   : > { %10485 = vmatprep.mubr.msk.f32.mxu0 %vm375_vm1, %v1074_v46  ;;  %v12365_v42 = vpop.f32.mrb[74].mxu1 }
 0x190   : > { %18808 = vst [vmem:[#allocation76_spill] sm:$0xff] %v12365_v42  ;;  %v12367_v38 = vpop.f32.mrb[75].mxu1 }
 0x191   : > { %18809 = vst [vmem:[#allocation77_spill] sm:$0xff] %v12367_v38  ;;  %10342 = vmatprep.mubr.msk.f32.mxu1 %vm1299_vm0, %v12367_v38  ;;  %v10026_v30 = vpop.f32.mrb[82].mxu0 }
 0x192   : > { %10486 = vmatmul.mubr.msk.f32.gmra.mrb[164].mxu0 %vm375_vm1, %v10008_v1  ;;  %10343 = vmatmul.mubr.msk.f32.gmra.mrb[164].mxu1 %vm1299_vm0, %v12365_v42  ;;  %v1134_v34 = vpop.f32.mrb[83].mxu0 }
 0x193   : > { %10488 = vmatprep.mubr.msk.f32.mxu0 %vm375_vm1, %v1084_v58  ;;  %v12375_v51 = vpop.f32.mrb[76].mxu1 }
 0x194   : > { %18810 = vst [vmem:[#allocation78_spill] sm:$0xff] %v12375_v51  ;;  %v12377_v46 = vpop.f32.mrb[77].mxu1 }
 0x195   : > { %18811 = vst [vmem:[#allocation79_spill] sm:$0xff] %v12377_v46  ;;  %10345 = vmatprep.mubr.msk.f32.mxu1 %vm1299_vm0, %v12377_v46  ;;  %v10029_v42 = vpop.f32.mrb[84].mxu0 }
 0x196   : > { %10489 = vmatmul.mubr.msk.f32.gmra.mrb[166].mxu0 %vm375_vm1, %v10011_v48  ;;  %10346 = vmatmul.mubr.msk.f32.gmra.mrb[166].mxu1 %vm1299_vm0, %v12375_v51  ;;  %v1144_v38 = vpop.f32.mrb[85].mxu0 }
 0x197   : > { %10491 = vmatprep.mubr.msk.f32.mxu0 %vm375_vm1, %v1094_v9  ;;  %v12385_v1 = vpop.f32.mrb[78].mxu1 }
 0x198   : > { %18812 = vst [vmem:[#allocation80_spill] sm:$0xff] %v12385_v1  ;;  %v12387_v58 = vpop.f32.mrb[79].mxu1 }
 0x199   : > { %18813 = vst [vmem:[#allocation81_spill] sm:$0xff] %v12387_v58  ;;  %10348 = vmatprep.mubr.msk.f32.mxu1 %vm1299_vm0, %v12387_v58  ;;  %v10032_v46 = vpop.f32.mrb[86].mxu0 }
 0x19a   : > { %10492 = vmatmul.mubr.msk.f32.gmra.mrb[168].mxu0 %vm375_vm1, %v10014_v54  ;;  %10349 = vmatmul.mubr.msk.f32.gmra.mrb[168].mxu1 %vm1299_vm0, %v12385_v1  ;;  %v1154_v51 = vpop.f32.mrb[87].mxu0 }
 0x19b   : > { %10494 = vmatprep.mubr.msk.f32.mxu0 %vm375_vm1, %v1104_v61  ;;  %v12395_v48 = vpop.f32.mrb[80].mxu1 }
 0x19c   : > { %18814 = vst [vmem:[#allocation82_spill] sm:$0xff] %v12395_v48  ;;  %v12397_v9 = vpop.f32.mrb[81].mxu1 }
 0x19d   : > { %18815 = vst [vmem:[#allocation83_spill] sm:$0xff] %v12397_v9  ;;  %10351 = vmatprep.mubr.msk.f32.mxu1 %vm1299_vm0, %v12397_v9  ;;  %v10035_v58 = vpop.f32.mrb[88].mxu0 }
 0x19e   : > { %10495 = vmatmul.mubr.msk.f32.gmra.mrb[170].mxu0 %vm375_vm1, %v10017_v5  ;;  %10352 = vmatmul.mubr.msk.f32.gmra.mrb[170].mxu1 %vm1299_vm0, %v12395_v48  ;;  %v1164_v1 = vpop.f32.mrb[89].mxu0 }
 0x19f   : > { %10497 = vmatprep.mubr.msk.f32.mxu0 %vm375_vm1, %v1114_v18  ;;  %v12405_v54 = vpop.f32.mrb[82].mxu1 }
 0x1a0   : > { %18816 = vst [vmem:[#allocation84_spill] sm:$0xff] %v12405_v54  ;;  %v12407_v61 = vpop.f32.mrb[83].mxu1 }
 0x1a1   : > { %18817 = vst [vmem:[#allocation85_spill] sm:$0xff] %v12407_v61  ;;  %10354 = vmatprep.mubr.msk.f32.mxu1 %vm1299_vm0, %v12407_v61  ;;  %v10038_v9 = vpop.f32.mrb[90].mxu0 }
 0x1a2   : > { %10498 = vmatmul.mubr.msk.f32.gmra.mrb[172].mxu0 %vm375_vm1, %v10020_v14  ;;  %10355 = vmatmul.mubr.msk.f32.gmra.mrb[172].mxu1 %vm1299_vm0, %v12405_v54  ;;  %v1174_v48 = vpop.f32.mrb[91].mxu0 }
 0x1a3   : > { %10500 = vmatprep.mubr.msk.f32.mxu0 %vm375_vm1, %v1124_v26  ;;  %v12415_v5 = vpop.f32.mrb[84].mxu1 }
 0x1a4   : > { %18818 = vst [vmem:[#allocation86_spill] sm:$0xff] %v12415_v5  ;;  %v12417_v18 = vpop.f32.mrb[85].mxu1 }
 0x1a5   : > { %18819 = vst [vmem:[#allocation87_spill] sm:$0xff] %v12417_v18  ;;  %10357 = vmatprep.mubr.msk.f32.mxu1 %vm1299_vm0, %v12417_v18  ;;  %v10041_v61 = vpop.f32.mrb[92].mxu0 }
 0x1a6   : > { %10501 = vmatmul.mubr.msk.f32.gmra.mrb[174].mxu0 %vm375_vm1, %v10023_v22  ;;  %10358 = vmatmul.mubr.msk.f32.gmra.mrb[174].mxu1 %vm1299_vm0, %v12415_v5  ;;  %v1184_v54 = vpop.f32.mrb[93].mxu0 }
 0x1a7   : > { %10503 = vmatprep.mubr.msk.f32.mxu0 %vm375_vm1, %v1134_v34  ;;  %v12425_v14 = vpop.f32.mrb[86].mxu1 }
 0x1a8   : > { %18820 = vst [vmem:[#allocation88_spill] sm:$0xff] %v12425_v14  ;;  %v12427_v26 = vpop.f32.mrb[87].mxu1 }
 0x1a9   : > { %18821 = vst [vmem:[#allocation89_spill] sm:$0xff] %v12427_v26  ;;  %10360 = vmatprep.mubr.msk.f32.mxu1 %vm1299_vm0, %v12427_v26 }
 0x1aa   : > { %10504 = vmatmul.mubr.msk.f32.gmra.mrb[176].mxu0 %vm375_vm1, %v10026_v30  ;;  %10361 = vmatmul.mubr.msk.f32.gmra.mrb[176].mxu1 %vm1299_vm0, %v12425_v14 }
 0x1ab   : > { %10506 = vmatprep.mubr.msk.f32.mxu0 %vm375_vm1, %v1144_v38  ;;  %v12435_v22 = vpop.f32.mrb[88].mxu1 }
 0x1ac   : > { %18822 = vst [vmem:[#allocation90_spill] sm:$0xff] %v12435_v22  ;;  %v12437_v18 = vpop.f32.mrb[89].mxu1 }
 0x1ad   : > { %18823 = vst [vmem:[#allocation91_spill] sm:$0xff] %v12437_v18  ;;  %10363 = vmatprep.mubr.msk.f32.mxu1 %vm1299_vm0, %v12437_v18 }
 0x1ae   : > { %10507 = vmatmul.mubr.msk.f32.gmra.mrb[178].mxu0 %vm375_vm1, %v10029_v42  ;;  %10364 = vmatmul.mubr.msk.f32.gmra.mrb[178].mxu1 %vm1299_vm0, %v12435_v22 }
 0x1af   : > { %10509 = vmatprep.mubr.msk.f32.mxu0 %vm375_vm1, %v1154_v51  ;;  %v12445_v34 = vpop.f32.mrb[90].mxu1 }
 0x1b0   : > { %18824 = vst [vmem:[#allocation92_spill] sm:$0xff] %v12445_v34  ;;  %v12447_v30 = vpop.f32.mrb[91].mxu1 }
 0x1b1   : > { %18825 = vst [vmem:[#allocation93_spill] sm:$0xff] %v12447_v30  ;;  %10366 = vmatprep.mubr.msk.f32.mxu1 %vm1299_vm0, %v12447_v30 }
 0x1b2   : > { %10510 = vmatmul.mubr.msk.f32.gmra.mrb[180].mxu0 %vm375_vm1, %v10032_v46  ;;  %10367 = vmatmul.mubr.msk.f32.gmra.mrb[180].mxu1 %vm1299_vm0, %v12445_v34 }
 0x1b3   : > { %10512 = vmatprep.mubr.msk.f32.mxu0 %vm375_vm1, %v1164_v1  ;;  %v12455_v42 = vpop.f32.mrb[92].mxu1 }
 0x1b4   : > { %18826 = vst [vmem:[#allocation94_spill] sm:$0xff] %v12455_v42  ;;  %v12457_v38 = vpop.f32.mrb[93].mxu1 }
 0x1b5   : > { %18827 = vst [vmem:[#allocation95_spill] sm:$0xff] %v12457_v38  ;;  %10369 = vmatprep.mubr.msk.f32.mxu1 %vm1299_vm0, %v12457_v38 }
 0x1b6   : > { %10513 = vmatmul.mubr.msk.f32.gmra.mrb[182].mxu0 %vm375_vm1, %v10035_v58  ;;  %10370 = vmatmul.mubr.msk.f32.gmra.mrb[182].mxu1 %vm1299_vm0, %v12455_v42 }
 0x1b7   : > { %10515 = vmatprep.mubr.msk.f32.mxu0 %vm375_vm1, %v1174_v48 }
 0x1ba   : > { %10516 = vmatmul.mubr.msk.f32.gmra.mrb[184].mxu0 %vm375_vm1, %v10038_v9 }
 0x1bb   : > { %10518 = vmatprep.mubr.msk.f32.mxu0 %vm375_vm1, %v1184_v54 }
 0x1be   : > { %10519 = vmatmul.mubr.msk.f32.gmra.mrb[186].mxu0 %vm375_vm1, %v10041_v61 }
 0x1d9   : > { %v10382_v51 = vpop.f32.mrb[94].mxu0  ;;  %v10239_v46 = vpop.f32.mrb[94].mxu1 }
 0x1da   : > { %vm3768_vm2 = vcmp.ge.f32.partialorder %v10382_v51, 0.0  ;;  %v3862_v1 = vmul.f32 0.2, %v10382_v51  ;;  %v3298_v30 = vpop.f32.mrb[95].mxu0  ;;  %v2501_v34 = vpop.f32.mrb[95].mxu1 }
 0x1db   : > { %v3861_v58 = vmul.f32 0.2, %v3298_v30  ;;  %vm3767_vm3 = vcmp.ge.f32.partialorder %v3298_v30, 0.0 }
 0x1dc   : > { %v12468_v38 = vsel %vm3768_vm2, %v10382_v51, %v3862_v1 }
 0x1dd   : > { %18828 = vst [vmem:[#allocation96_spill] sm:$0xff] %v12468_v38  ;;  %4521 = vrot.lane.b32.xlu1 %v12468_v38, %s11462_s9  ;;  %4145 = vrot.lane.b32.xlu0 %v12468_v38, %s11463_s30  ;;  %v10385_v48 = vpop.f32.mrb[96].mxu0  ;;  %v10242_v9 = vpop.f32.mrb[96].mxu1  ;;  %v12474_v18 = vsel %vm3767_vm3, %v3298_v30, %v3861_v58 }
 0x1de   : > { %vm3770_vm4 = vcmp.ge.f32.partialorder %v10385_v48, 0.0  ;;  %v3864_v54 = vmul.f32 0.2, %v10385_v48  ;;  %v3308_v61 = vpop.f32.mrb[97].mxu0  ;;  %v2511_v42 = vpop.f32.mrb[97].mxu1  ;;  %18829 = vst [vmem:[#allocation97_spill] sm:$0xff] %v12474_v18 }
 0x1df   : > { %v3863_v40 = vmul.f32 0.2, %v3308_v61  ;;  %vm3769_vm5 = vcmp.ge.f32.partialorder %v3308_v61, 0.0 }
 0x1e0   : > { %v12476_v51 = vsel %vm3770_vm4, %v10385_v48, %v3864_v54 }
 0x1e1   : > { %18830 = vst [vmem:[#allocation98_spill] sm:$0xff] %v12476_v51  ;;  %4143 = vrot.lane.b32.xlu0 %v12474_v18, %s11463_s30  ;;  %4149 = vrot.lane.b32.xlu1 %v12476_v51, %s11463_s30  ;;  %v10388_v1 = vpop.f32.mrb[98].mxu0  ;;  %v10245_v22 = vpop.f32.mrb[98].mxu1  ;;  %v12486_v28 = vsel %vm3769_vm5, %v3308_v61, %v3863_v40 }
 0x1e2   : > { %v3324_v26 = vadd.f32 %v10388_v1, %v10239_v46  ;;  %v3318_v14 = vpop.f32.mrb[99].mxu0  ;;  %v2521_v5 = vpop.f32.mrb[99].mxu1  ;;  %18831 = vst [vmem:[#allocation99_spill] sm:$0xff] %v12486_v28 }
 0x1e3   : > { %v3319_v44 = vadd.f32 %v3318_v14, %v2501_v34 }
 0x1e4   : > { %v3866_v46 = vmul.f32 0.2, %v3324_v26  ;;  %vm3772_vm6 = vcmp.ge.f32.partialorder %v3324_v26, 0.0 }
 0x1e5   : > { %4519 = vrot.lane.b32.xlu0 %v12474_v18, %s11462_s9  ;;  %4525 = vrot.lane.b32.xlu1 %v12476_v51, %s11462_s9  ;;  %v10391_v30 = vpop.f32.mrb[100].mxu0  ;;  %v10248_v58 = vpop.f32.mrb[100].mxu1  ;;  %v3865_v1 = vmul.f32 0.2, %v3319_v44  ;;  %vm3771_vm7 = vcmp.ge.f32.partialorder %v3319_v44, 0.0 }
 0x1e6   : > { %v3334_v48 = vadd.f32 %v10391_v30, %v10242_v9  ;;  %v3328_v54 = vpop.f32.mrb[101].mxu0  ;;  %v2531_v36 = vpop.f32.mrb[101].mxu1  ;;  %v12492_v16 = vsel %vm3772_vm6, %v3324_v26, %v3866_v46 }
 0x1e7   : > { %v3329_v32 = vadd.f32 %v3328_v54, %v2511_v42  ;;  %18832 = vst [vmem:[#allocation100_spill] sm:$0xff] %v12492_v16  ;;  %v12494_v40 = vsel %vm3771_vm7, %v3319_v44, %v3865_v1 }
 0x1e8   : > { %18833 = vst [vmem:[#allocation101_spill] sm:$0xff] %v12494_v40  ;;  %vm3774_vm8 = vcmp.ge.f32.partialorder %v3334_v48, 0.0 }
 0x1e9   : > { %4523 = vrot.lane.b32.xlu0 %v12486_v28, %s11462_s9  ;;  %4147 = vrot.lane.b32.xlu1 %v12486_v28, %s11463_s30  ;;  %v10394_v14 = vpop.f32.mrb[102].mxu0  ;;  %v10251_v34 = vpop.f32.mrb[102].mxu1  ;;  %vm3773_vm9 = vcmp.ge.f32.partialorder %v3329_v32, 0.0 }
 0x1ea   : > { %v3344_v24 = vadd.f32 %v10394_v14, %v10245_v22  ;;  %v3338_v20 = vpop.f32.mrb[103].mxu0  ;;  %v2541_v9 = vpop.f32.mrb[103].mxu1  ;;  %v3868_v22 = vmul.f32 0.2, %v3334_v48  ;;  %v3867_v14 = vmul.f32 0.2, %v3329_v32 }
 0x1eb   : > { %v3339_v30 = vadd.f32 %v3338_v20, %v2521_v5 }
 0x1ec   : > { %v12508_v1 = vsel %vm3774_vm8, %v3334_v48, %v3868_v22  ;;  %vm3776_vm10 = vcmp.ge.f32.partialorder %v3344_v24, 0.0 }
 0x1ed   : > { %4153 = vrot.lane.b32.xlu1 %v12492_v16, %s11463_s30  ;;  %4151 = vrot.lane.b32.xlu0 %v12494_v40, %s11463_s30  ;;  %v10397_v42 = vpop.f32.mrb[104].mxu0  ;;  %v10254_v61 = vpop.f32.mrb[104].mxu1  ;;  %18834 = vst [vmem:[#allocation102_spill] sm:$0xff] %v12508_v1  ;;  %vm3775_vm11 = vcmp.ge.f32.partialorder %v3339_v30, 0.0 }
 0x1ee   : > { %v3354_v54 = vadd.f32 %v10397_v42, %v10248_v58  ;;  %v3348_v11 = vpop.f32.mrb[105].mxu0  ;;  %v2551_v7 = vpop.f32.mrb[105].mxu1 }
 0x1ef   : > { %v3349_v3 = vadd.f32 %v3348_v11, %v2531_v36  ;;  %v12510_v11 = vsel %vm3773_vm9, %v3329_v32, %v3867_v14 }
 0x1f0   : > { %18835 = vst [vmem:[#allocation103_spill] sm:$0xff] %v12510_v11  ;;  %vm3778_vm12 = vcmp.ge.f32.partialorder %v3354_v54, 0.0 }
 0x1f1   : > { %4529 = vrot.lane.b32.xlu1 %v12492_v16, %s11462_s9  ;;  %4527 = vrot.lane.b32.xlu0 %v12494_v40, %s11462_s9  ;;  %v10400_v20 = vpop.f32.mrb[106].mxu0  ;;  %v10257_v44 = vpop.f32.mrb[106].mxu1  ;;  %vm3777_vm13 = vcmp.ge.f32.partialorder %v3349_v3, 0.0 }
 0x1f2   : > { %v12504_v5 = vadd.f32 %v10400_v20, %v10251_v34  ;;  %v3358_v26 = vpop.f32.mrb[107].mxu0  ;;  %v2561_v46 = vpop.f32.mrb[107].mxu1 }
 0x1f3   : > { %v12506_v58 = vadd.f32 %v3358_v26, %v2541_v9  ;;  %v3870_v9 = vmul.f32 0.2, %v3344_v24  ;;  %v3869_v26 = vmul.f32 0.2, %v3339_v30 }
 0x1f4   : > { %vm3780_vm14 = vcmp.ge.f32.partialorder %v12504_v5, 0.0 }
 0x1f5   : > { %4157 = vrot.lane.b32.xlu1 %v12508_v1, %s11463_s30  ;;  %4155 = vrot.lane.b32.xlu0 %v12510_v11, %s11463_s30  ;;  %v10403_v36 = vpop.f32.mrb[108].mxu0  ;;  %v10260_v42 = vpop.f32.mrb[108].mxu1  ;;  %vm3779_vm15 = vcmp.ge.f32.partialorder %v12506_v58, 0.0 }
 0x1f6   : > { %v12516_v63 = vadd.f32 %v10403_v36, %v10254_v61  ;;  %v3368_v34 = vpop.f32.mrb[109].mxu0  ;;  %v2571_v20 = vpop.f32.mrb[109].mxu1 }
 0x1f7   : > { %v12518_v60 = vadd.f32 %v3368_v34, %v2551_v7  ;;  %v12528_v7 = vsel %vm3776_vm10, %v3344_v24, %v3870_v9  ;;  %v12530_v34 = vsel %vm3775_vm11, %v3339_v30, %v3869_v26 }
 0x1f8   : > { %18836 = vst [vmem:[#allocation104_spill] sm:$0xff] %v12528_v7  ;;  %18837 = vst [vmem:[#allocation105_spill] sm:$0xff] %v12530_v34  ;;  %vm3782_vm0 = vcmp.ge.f32.partialorder %v12516_v63, 0.0 }
 0x1f9   : > { %4533 = vrot.lane.b32.xlu1 %v12508_v1, %s11462_s9  ;;  %4531 = vrot.lane.b32.xlu0 %v12510_v11, %s11462_s9  ;;  %v10406_v32 = vpop.f32.mrb[110].mxu0  ;;  %v10263_v48 = vpop.f32.mrb[110].mxu1  ;;  %vm3781_vm2 = vcmp.ge.f32.partialorder %v12518_v60, 0.0 }
 0x1fa   : > { %v12524_v22 = vadd.f32 %v10406_v32, %v10257_v44  ;;  %v3378_v61 = vpop.f32.mrb[111].mxu0  ;;  %v2581_v14 = vpop.f32.mrb[111].mxu1 }
 0x1fb   : > { %v12526_v36 = vadd.f32 %v3378_v61, %v2561_v46  ;;  %v3872_v46 = vmul.f32 0.2, %v3354_v54  ;;  %v3871_v61 = vmul.f32 0.2, %v3349_v3 }
 0x1fc   : > { %vm3784_vm3 = vcmp.ge.f32.partialorder %v12524_v22, 0.0 }
 0x1fd   : > { %4161 = vrot.lane.b32.xlu1 %v12528_v7, %s11463_s30  ;;  %4159 = vrot.lane.b32.xlu0 %v12530_v34, %s11463_s30  ;;  %v10409_v56 = vpop.f32.mrb[112].mxu0  ;;  %v10266_v53 = vpop.f32.mrb[112].mxu1  ;;  %vm3783_vm4 = vcmp.ge.f32.partialorder %v12526_v36, 0.0 }
 0x1fe   : > { %v12536_v49 = vadd.f32 %v10409_v56, %v10260_v42  ;;  %v3388_v44 = vpop.f32.mrb[113].mxu0  ;;  %v2591_v32 = vpop.f32.mrb[113].mxu1 }
 0x1ff   : > { %v12538_v47 = vadd.f32 %v3388_v44, %v2571_v20  ;;  %v12548_v20 = vsel %vm3778_vm12, %v3354_v54, %v3872_v46  ;;  %v12550_v44 = vsel %vm3777_vm13, %v3349_v3, %v3871_v61  ;;  %v3873_v54 = vmul.f32 0.2, %v12506_v58 }
 0x200   : > { %18838 = vst [vmem:[#allocation106_spill] sm:$0xff] %v12548_v20  ;;  %18839 = vst [vmem:[#allocation107_spill] sm:$0xff] %v12550_v44  ;;  %vm3786_vm5 = vcmp.ge.f32.partialorder %v12536_v49, 0.0 }
 0x201   : > { %4537 = vrot.lane.b32.xlu1 %v12528_v7, %s11462_s9  ;;  %4535 = vrot.lane.b32.xlu0 %v12530_v34, %s11462_s9  ;;  %v10412_v24 = vpop.f32.mrb[114].mxu0  ;;  %v10269_v30 = vpop.f32.mrb[114].mxu1  ;;  %vm3785_vm6 = vcmp.ge.f32.partialorder %v12538_v47, 0.0 }
 0x202   : > { %v12544_v9 = vadd.f32 %v10412_v24, %v10263_v48  ;;  %v3398_v56 = vpop.f32.mrb[115].mxu0  ;;  %v2601_v42 = vpop.f32.mrb[115].mxu1 }
 0x203   : > { %v12546_v26 = vadd.f32 %v3398_v56, %v2581_v14  ;;  %v3874_v14 = vmul.f32 0.2, %v12504_v5 }
 0x204   : > { %vm3788_vm7 = vcmp.ge.f32.partialorder %v12544_v9, 0.0 }
 0x205   : > { %4165 = vrot.lane.b32.xlu1 %v12548_v20, %s11463_s30  ;;  %4163 = vrot.lane.b32.xlu0 %v12550_v44, %s11463_s30  ;;  %v10415_v45 = vpop.f32.mrb[116].mxu0  ;;  %v10272_v43 = vpop.f32.mrb[116].mxu1  ;;  %v12573_v56 = vsel %vm3780_vm14, %v12504_v5, %v3874_v14  ;;  %v3876_v5 = vmul.f32 0.2, %v12516_v63  ;;  %v3875_v14 = vmul.f32 0.2, %v12518_v60 }
 0x206   : > { %v12556_v41 = vadd.f32 %v10415_v45, %v10266_v53  ;;  %v3408_v48 = vpop.f32.mrb[117].mxu0  ;;  %v2611_v24 = vpop.f32.mrb[117].mxu1  ;;  %18840 = vst [vmem:[#allocation108_spill] sm:$0xff] %v12573_v56  ;;  %vm3787_vm8 = vcmp.ge.f32.partialorder %v12546_v26, 0.0 }
 0x207   : > { %v12558_v39 = vadd.f32 %v3408_v48, %v2591_v32  ;;  %v12576_v48 = vsel %vm3779_vm15, %v12506_v58, %v3873_v54  ;;  %v12602_v31 = vsel %vm3781_vm2, %v12518_v60, %v3875_v14 }
 0x208   : > { %18841 = vst [vmem:[#allocation109_spill] sm:$0xff] %v12576_v48  ;;  %18843 = vst [vmem:[#allocation111_spill] sm:$0xff] %v12602_v31  ;;  %vm3790_vm9 = vcmp.ge.f32.partialorder %v12556_v41, 0.0 }
 0x209   : > { %4541 = vrot.lane.b32.xlu1 %v12548_v20, %s11462_s9  ;;  %4539 = vrot.lane.b32.xlu0 %v12550_v44, %s11462_s9  ;;  %v10418_v45 = vpop.f32.mrb[118].mxu0  ;;  %v10275_v53 = vpop.f32.mrb[118].mxu1  ;;  %vm3789_vm10 = vcmp.ge.f32.partialorder %v12558_v39, 0.0 }
 0x20a   : > { %v12568_v3 = vadd.f32 %v10418_v45, %v10269_v30  ;;  %v3418_v32 = vpop.f32.mrb[119].mxu0  ;;  %v2621_v46 = vpop.f32.mrb[119].mxu1 }
 0x20b   : > { %v12570_v61 = vadd.f32 %v3418_v32, %v2601_v42 }
 0x20c   : > { %vm3792_vm11 = vcmp.ge.f32.partialorder %v12568_v3, 0.0 }
 0x20d   : > { %4169 = vrot.lane.b32.xlu1 %v12573_v56, %s11463_s30  ;;  %4167 = vrot.lane.b32.xlu0 %v12576_v48, %s11463_s30  ;;  %v10421_v37 = vpop.f32.mrb[120].mxu0  ;;  %v10278_v35 = vpop.f32.mrb[120].mxu1  ;;  %vm3791_vm12 = vcmp.ge.f32.partialorder %v12570_v61, 0.0 }
 0x20e   : > { %v12582_v30 = vadd.f32 %v10421_v37, %v10272_v43  ;;  %v3428_v45 = vpop.f32.mrb[121].mxu0  ;;  %v2631_v33 = vpop.f32.mrb[121].mxu1 }
 0x20f   : > { %v12584_v42 = vadd.f32 %v3428_v45, %v2611_v24  ;;  %v12599_v45 = vsel %vm3782_vm0, %v12516_v63, %v3876_v5  ;;  %v3878_v63 = vmul.f32 0.2, %v12524_v22  ;;  %v3877_v5 = vmul.f32 0.2, %v12526_v36 }
 0x210   : > { %18842 = vst [vmem:[#allocation110_spill] sm:$0xff] %v12599_v45  ;;  %vm3794_vm13 = vcmp.ge.f32.partialorder %v12582_v30, 0.0 }
 0x211   : > { %4545 = vrot.lane.b32.xlu1 %v12573_v56, %s11462_s9  ;;  %4543 = vrot.lane.b32.xlu0 %v12576_v48, %s11462_s9  ;;  %v10424_v37 = vpop.f32.mrb[122].mxu0  ;;  %v10281_v43 = vpop.f32.mrb[122].mxu1  ;;  %v12628_v23 = vsel %vm3783_vm4, %v12526_v36, %v3877_v5  ;;  %vm3793_vm14 = vcmp.ge.f32.partialorder %v12584_v42, 0.0 }
 0x212   : > { %v12594_v58 = vadd.f32 %v10424_v37, %v10275_v53  ;;  %v3438_v24 = vpop.f32.mrb[123].mxu0  ;;  %v2641_v54 = vpop.f32.mrb[123].mxu1  ;;  %18845 = vst [vmem:[#allocation113_spill] sm:$0xff] %v12628_v23 }
 0x213   : > { %v12596_v32 = vadd.f32 %v3438_v24, %v2621_v46 }
 0x214   : > { %vm3796_vm15 = vcmp.ge.f32.partialorder %v12594_v58, 0.0 }
 0x215   : > { %4173 = vrot.lane.b32.xlu1 %v12599_v45, %s11463_s30  ;;  %4171 = vrot.lane.b32.xlu0 %v12602_v31, %s11463_s30  ;;  %v10427_v29 = vpop.f32.mrb[124].mxu0  ;;  %v10284_v27 = vpop.f32.mrb[124].mxu1  ;;  %vm3795_vm0 = vcmp.ge.f32.partialorder %v12596_v32, 0.0 }
 0x216   : > { %v12608_v53 = vadd.f32 %v10427_v29, %v10278_v35  ;;  %v3448_v37 = vpop.f32.mrb[125].mxu0  ;;  %v2651_v25 = vpop.f32.mrb[125].mxu1 }
 0x217   : > { %v12610_v46 = vadd.f32 %v3448_v37, %v2631_v33  ;;  %v12625_v37 = vsel %vm3784_vm3, %v12524_v22, %v3878_v63  ;;  %v3880_v22 = vmul.f32 0.2, %v12536_v49  ;;  %v3879_v63 = vmul.f32 0.2, %v12538_v47 }
 0x218   : > { %18844 = vst [vmem:[#allocation112_spill] sm:$0xff] %v12625_v37  ;;  %vm3798_vm2 = vcmp.ge.f32.partialorder %v12608_v53, 0.0 }
 0x219   : > { %4549 = vrot.lane.b32.xlu1 %v12599_v45, %s11462_s9  ;;  %4547 = vrot.lane.b32.xlu0 %v12602_v31, %s11462_s9  ;;  %v10430_v29 = vpop.f32.mrb[126].mxu0  ;;  %v10287_v35 = vpop.f32.mrb[126].mxu1  ;;  %v12654_v15 = vsel %vm3785_vm6, %v12538_v47, %v3879_v63  ;;  %vm3797_vm3 = vcmp.ge.f32.partialorder %v12610_v46, 0.0 }
 0x21a   : > { %v12620_v60 = vadd.f32 %v10430_v29, %v10281_v43  ;;  %v3458_v33 = vpop.f32.mrb[127].mxu0  ;;  %v2661_v14 = vpop.f32.mrb[127].mxu1  ;;  %18847 = vst [vmem:[#allocation115_spill] sm:$0xff] %v12654_v15 }
 0x21b   : > { %v12622_v24 = vadd.f32 %v3458_v33, %v2641_v54 }
 0x21c   : > { %vm3800_vm4 = vcmp.ge.f32.partialorder %v12620_v60, 0.0 }
 0x21d   : > { %4177 = vrot.lane.b32.xlu1 %v12625_v37, %s11463_s30  ;;  %4175 = vrot.lane.b32.xlu0 %v12628_v23, %s11463_s30  ;;  %v10433_v21 = vpop.f32.mrb[128].mxu0  ;;  %v10290_v19 = vpop.f32.mrb[128].mxu1 }
 0x21e   : > { %v12634_v43 = vadd.f32 %v10433_v21, %v10284_v27  ;;  %v3468_v29 = vpop.f32.mrb[129].mxu0  ;;  %v2671_v17 = vpop.f32.mrb[129].mxu1 }
 0x21f   : > { %v12636_v54 = vadd.f32 %v3468_v29, %v2651_v25  ;;  %v12651_v29 = vsel %vm3786_vm5, %v12536_v49, %v3880_v22  ;;  %v3882_v49 = vmul.f32 0.2, %v12544_v9  ;;  %v3881_v22 = vmul.f32 0.2, %v12546_v26 }
 0x220   : > { %18846 = vst [vmem:[#allocation114_spill] sm:$0xff] %v12651_v29  ;;  %vm3799_vm5 = vcmp.ge.f32.partialorder %v12622_v24, 0.0  ;;  %vm3802_vm6 = vcmp.ge.f32.partialorder %v12634_v43, 0.0 }
 0x221   : > { %4553 = vrot.lane.b32.xlu1 %v12625_v37, %s11462_s9  ;;  %4551 = vrot.lane.b32.xlu0 %v12628_v23, %s11462_s9  ;;  %v10436_v21 = vpop.f32.mrb[130].mxu0  ;;  %v10293_v27 = vpop.f32.mrb[130].mxu1  ;;  %v12680_v6 = vsel %vm3787_vm8, %v12546_v26, %v3881_v22 }
 0x222   : > { %v12646_v36 = vadd.f32 %v10436_v21, %v10287_v35  ;;  %v3478_v25 = vpop.f32.mrb[131].mxu0  ;;  %v2681_v5 = vpop.f32.mrb[131].mxu1  ;;  %18849 = vst [vmem:[#allocation117_spill] sm:$0xff] %v12680_v6 }
 0x223   : > { %v12648_v33 = vadd.f32 %v3478_v25, %v2661_v14 }
 0x224   : > { %vm3804_vm8 = vcmp.ge.f32.partialorder %v12646_v36, 0.0 }
 0x225   : > { %4181 = vrot.lane.b32.xlu1 %v12651_v29, %s11463_s30  ;;  %4179 = vrot.lane.b32.xlu0 %v12654_v15, %s11463_s30  ;;  %v10439_v13 = vpop.f32.mrb[132].mxu0  ;;  %v10296_v10 = vpop.f32.mrb[132].mxu1 }
 0x226   : > { %v12660_v35 = vadd.f32 %v10439_v13, %v10290_v19  ;;  %v3488_v21 = vpop.f32.mrb[133].mxu0  ;;  %v2691_v8 = vpop.f32.mrb[133].mxu1 }
 0x227   : > { %v12662_v14 = vadd.f32 %v3488_v21, %v2671_v17  ;;  %v12677_v21 = vsel %vm3788_vm7, %v12544_v9, %v3882_v49  ;;  %v3884_v9 = vmul.f32 0.2, %v12556_v41  ;;  %v3883_v49 = vmul.f32 0.2, %v12558_v39 }
 0x228   : > { %18848 = vst [vmem:[#allocation116_spill] sm:$0xff] %v12677_v21  ;;  %vm3801_vm7 = vcmp.ge.f32.partialorder %v12636_v54, 0.0 }
 0x229   : > { %4557 = vrot.lane.b32.xlu1 %v12651_v29, %s11462_s9  ;;  %4555 = vrot.lane.b32.xlu0 %v12654_v15, %s11462_s9  ;;  %v10442_v13 = vpop.f32.mrb[134].mxu0  ;;  %v10299_v19 = vpop.f32.mrb[134].mxu1  ;;  %v12706_v62 = vsel %vm3789_vm10, %v12558_v39, %v3883_v49  ;;  %vm3806_vm10 = vcmp.ge.f32.partialorder %v12660_v35, 0.0 }
 0x22a   : > { %v12672_v47 = vadd.f32 %v10442_v13, %v10293_v27  ;;  %v3498_v17 = vpop.f32.mrb[135].mxu0  ;;  %v2701_v63 = vpop.f32.mrb[135].mxu1  ;;  %18851 = vst [vmem:[#allocation119_spill] sm:$0xff] %v12706_v62 }
 0x22b   : > { %v12674_v25 = vadd.f32 %v3498_v17, %v2681_v5 }
 0x22d   : > { %4185 = vrot.lane.b32.xlu1 %v12677_v21, %s11463_s30  ;;  %4183 = vrot.lane.b32.xlu0 %v12680_v6, %s11463_s30  ;;  %v10445_v4 = vpop.f32.mrb[136].mxu0  ;;  %v10302_v2 = vpop.f32.mrb[136].mxu1 }
 0x22e   : > { %v12686_v27 = vadd.f32 %v10445_v4, %v10296_v10  ;;  %v3508_v13 = vpop.f32.mrb[137].mxu0  ;;  %v2711_v0 = vpop.f32.mrb[137].mxu1 }
 0x22f   : > { %v12688_v5 = vadd.f32 %v3508_v13, %v2691_v8  ;;  %v12703_v13 = vsel %vm3790_vm9, %v12556_v41, %v3884_v9  ;;  %v3886_v41 = vmul.f32 0.2, %v12568_v3  ;;  %v3885_v9 = vmul.f32 0.2, %v12570_v61 }
 0x230   : > { %18850 = vst [vmem:[#allocation118_spill] sm:$0xff] %v12703_v13  ;;  %vm3803_vm9 = vcmp.ge.f32.partialorder %v12648_v33, 0.0 }
 0x231   : > { %4561 = vrot.lane.b32.xlu1 %v12677_v21, %s11462_s9  ;;  %4559 = vrot.lane.b32.xlu0 %v12680_v6, %s11462_s9  ;;  %v10448_v4 = vpop.f32.mrb[138].mxu0  ;;  %v10305_v10 = vpop.f32.mrb[138].mxu1  ;;  %v12732_v55 = vsel %vm3791_vm12, %v12570_v61, %v3885_v9  ;;  %vm3808_vm12 = vcmp.ge.f32.partialorder %v12672_v47, 0.0 }
 0x232   : > { %v12698_v26 = vadd.f32 %v10448_v4, %v10299_v19  ;;  %v3518_v8 = vpop.f32.mrb[139].mxu0  ;;  %v2721_v22 = vpop.f32.mrb[139].mxu1  ;;  %18853 = vst [vmem:[#allocation121_spill] sm:$0xff] %v12732_v55 }
 0x233   : > { %v12700_v17 = vadd.f32 %v3518_v8, %v2701_v63 }
 0x235   : > { %4189 = vrot.lane.b32.xlu1 %v12703_v13, %s11463_s30  ;;  %4187 = vrot.lane.b32.xlu0 %v12706_v62, %s11463_s30  ;;  %v10451_v12 = vpop.f32.mrb[140].mxu0  ;;  %v10308_v59 = vpop.f32.mrb[140].mxu1 }
 0x236   : > { %v12712_v19 = vadd.f32 %v10451_v12, %v10302_v2  ;;  %v3528_v4 = vpop.f32.mrb[141].mxu0  ;;  %v2731_v57 = vpop.f32.mrb[141].mxu1 }
 0x237   : > { %v12714_v63 = vadd.f32 %v3528_v4, %v2711_v0  ;;  %v12729_v4 = vsel %vm3792_vm11, %v12568_v3, %v3886_v41  ;;  %v3888_v3 = vmul.f32 0.2, %v12582_v30  ;;  %v3887_v41 = vmul.f32 0.2, %v12584_v42 }
 0x238   : > { %18852 = vst [vmem:[#allocation120_spill] sm:$0xff] %v12729_v4  ;;  %vm3805_vm11 = vcmp.ge.f32.partialorder %v12662_v14, 0.0 }
 0x239   : > { %4565 = vrot.lane.b32.xlu1 %v12703_v13, %s11462_s9  ;;  %4563 = vrot.lane.b32.xlu0 %v12706_v62, %s11462_s9  ;;  %v10454_v12 = vpop.f32.mrb[142].mxu0  ;;  %v10311_v2 = vpop.f32.mrb[142].mxu1  ;;  %v12758_v13 = vsel %vm3793_vm14, %v12584_v42, %v3887_v41  ;;  %vm3810_vm14 = vcmp.ge.f32.partialorder %v12686_v27, 0.0 }
 0x23a   : > { %v12724_v39 = vadd.f32 %v10454_v12, %v10305_v10  ;;  %v3538_v0 = vpop.f32.mrb[143].mxu0  ;;  %v2741_v49 = vpop.f32.mrb[143].mxu1  ;;  %18855 = vst [vmem:[#allocation123_spill] sm:$0xff] %v12758_v13 }
 0x23b   : > { %v12726_v8 = vadd.f32 %v3538_v0, %v2721_v22 }
 0x23d   : > { %4193 = vrot.lane.b32.xlu1 %v12729_v4, %s11463_s30  ;;  %4191 = vrot.lane.b32.xlu0 %v12732_v55, %s11463_s30  ;;  %v10457_v52 = vpop.f32.mrb[144].mxu0  ;;  %v10314_v50 = vpop.f32.mrb[144].mxu1 }
 0x23e   : > { %v12738_v10 = vadd.f32 %v10457_v52, %v10308_v59  ;;  %v3548_v12 = vpop.f32.mrb[145].mxu0  ;;  %v2751_v62 = vpop.f32.mrb[145].mxu1 }
 0x23f   : > { %v12740_v22 = vadd.f32 %v3548_v12, %v2731_v57  ;;  %v12755_v12 = vsel %vm3794_vm13, %v12582_v30, %v3888_v3  ;;  %v3890_v30 = vmul.f32 0.2, %v12594_v58  ;;  %v3889_v3 = vmul.f32 0.2, %v12596_v32 }
 0x240   : > { %18854 = vst [vmem:[#allocation122_spill] sm:$0xff] %v12755_v12  ;;  %vm3807_vm13 = vcmp.ge.f32.partialorder %v12674_v25, 0.0 }
 0x241   : > { %4569 = vrot.lane.b32.xlu1 %v12729_v4, %s11462_s9  ;;  %4567 = vrot.lane.b32.xlu0 %v12732_v55, %s11462_s9  ;;  %v10460_v52 = vpop.f32.mrb[146].mxu0  ;;  %v10317_v59 = vpop.f32.mrb[146].mxu1  ;;  %v12784_v21 = vsel %vm3795_vm0, %v12596_v32, %v3889_v3  ;;  %v3892_v32 = vmul.f32 0.2, %v12608_v53  ;;  %vm3812_vm0 = vcmp.ge.f32.partialorder %v12698_v26, 0.0 }
 0x242   : > { %v12750_v61 = vadd.f32 %v10460_v52, %v10311_v2  ;;  %v3558_v57 = vpop.f32.mrb[147].mxu0  ;;  %v2761_v9 = vpop.f32.mrb[147].mxu1  ;;  %18857 = vst [vmem:[#allocation125_spill] sm:$0xff] %v12784_v21 }
 0x243   : > { %v12752_v0 = vadd.f32 %v3558_v57, %v2741_v49  ;;  %v12815_v31 = vsel %vm3798_vm2, %v12608_v53, %v3892_v32  ;;  %v3893_v32 = vmul.f32 0.2, %v12622_v24  ;;  %vm3811_vm2 = vcmp.ge.f32.partialorder %v12700_v17, 0.0 }
 0x244   : > { %18858 = vst [vmem:[#allocation126_spill] sm:$0xff] %v12815_v31 }
 0x245   : > { %4197 = vrot.lane.b32.xlu1 %v12755_v12, %s11463_s30  ;;  %4195 = vrot.lane.b32.xlu0 %v12758_v13, %s11463_s30  ;;  %v10463_v55 = vpop.f32.mrb[148].mxu0  ;;  %v10320_v4 = vpop.f32.mrb[148].mxu1  ;;  %v12852_v34 = vsel %vm3799_vm5, %v12622_v24, %v3893_v32  ;;  %v3896_v24 = vmul.f32 0.2, %v12634_v43  ;;  %vm3816_vm5 = vcmp.ge.f32.partialorder %v12724_v39, 0.0 }
 0x246   : > { %v12764_v2 = vadd.f32 %v10463_v55, %v10314_v50  ;;  %v3568_v52 = vpop.f32.mrb[149].mxu0  ;;  %v2771_v6 = vpop.f32.mrb[149].mxu1  ;;  %18862 = vst [vmem:[#allocation130_spill] sm:$0xff] %v12852_v34 }
 0x247   : > { %v12766_v49 = vadd.f32 %v3568_v52, %v2751_v62  ;;  %v12781_v52 = vsel %vm3796_vm15, %v12594_v58, %v3890_v30  ;;  %v3891_v30 = vmul.f32 0.2, %v12610_v46  ;;  %v12883_v1 = vsel %vm3802_vm6, %v12634_v43, %v3896_v24 }
 0x248   : > { %18856 = vst [vmem:[#allocation124_spill] sm:$0xff] %v12781_v52  ;;  %18867 = vst [vmem:[#allocation135_spill] sm:$0xff] %v12883_v1  ;;  %v3897_v24 = vmul.f32 0.2, %v12648_v33  ;;  %vm3809_vm15 = vcmp.ge.f32.partialorder %v12688_v5, 0.0  ;;  %vm3815_vm6 = vcmp.ge.f32.partialorder %v12726_v8, 0.0 }
 0x249   : > { %4573 = vrot.lane.b32.xlu1 %v12755_v12, %s11462_s9  ;;  %4571 = vrot.lane.b32.xlu0 %v12758_v13, %s11462_s9  ;;  %v10466_v50 = vpop.f32.mrb[150].mxu0  ;;  %v10323_v55 = vpop.f32.mrb[150].mxu1 }
 0x24a   : > { %v12776_v42 = vadd.f32 %v10466_v50, %v10317_v59  ;;  %v3578_v62 = vpop.f32.mrb[151].mxu0  ;;  %v2781_v41 = vpop.f32.mrb[151].mxu1 }
 0x24b   : > { %v12778_v57 = vadd.f32 %v3578_v62, %v2761_v9 }
 0x24d   : > { %4201 = vrot.lane.b32.xlu1 %v12781_v52, %s11463_s30  ;;  %4199 = vrot.lane.b32.xlu0 %v12784_v21, %s11463_s30  ;;  %v10469_v13 = vpop.f32.mrb[152].mxu0  ;;  %v10326_v12 = vpop.f32.mrb[152].mxu1 }
 0x24e   : > { %v12790_v59 = vadd.f32 %v10469_v13, %v10320_v4  ;;  %v3588_v50 = vpop.f32.mrb[153].mxu0  ;;  %v2791_v15 = vpop.f32.mrb[153].mxu1 }
 0x24f   : > { %v12792_v9 = vpop.permute.xlu1 %4521  ;;  %v12794_v62 = vpop.permute.xlu0 %4145  ;;  %v12796_v58 = vadd.f32 %v3588_v50, %v2771_v6 }
 0x251   : > { %4577 = vrot.lane.b32.xlu1 %v12781_v52, %s11462_s9  ;;  %4575 = vrot.lane.b32.xlu0 %v12784_v21, %s11462_s9  ;;  %v10472_v13 = vpop.f32.mrb[154].mxu0  ;;  %v10329_v4 = vpop.f32.mrb[154].mxu1  ;;  %v12818_v52 = vsel %vm3797_vm3, %v12610_v46, %v3891_v30  ;;  %v3894_v46 = vmul.f32 0.2, %v12620_v60  ;;  %vm3814_vm3 = vcmp.ge.f32.partialorder %v12712_v19, 0.0 }
 0x252   : > { %v12806_v3 = vadd.f32 %v10472_v13, %v10323_v55  ;;  %v3598_v6 = vpop.f32.mrb[155].mxu0  ;;  %v2801_v50 = vpop.f32.mrb[155].mxu1  ;;  %18859 = vst [vmem:[#allocation127_spill] sm:$0xff] %v12818_v52 }
 0x253   : > { %v12808_v29 = vpop.permute.xlu0 %4143  ;;  %v12810_v23 = vpop.permute.xlu1 %4149  ;;  %v12812_v37 = vadd.f32 %v3598_v6, %v2781_v41  ;;  %v12849_v20 = vsel %vm3800_vm4, %v12620_v60, %v3894_v46  ;;  %v3895_v46 = vmul.f32 0.2, %v12636_v54  ;;  %vm3813_vm4 = vcmp.ge.f32.partialorder %v12714_v63, 0.0 }
 0x254   : > { %18861 = vst [vmem:[#allocation129_spill] sm:$0xff] %v12849_v20 }
 0x255   : > { %4205 = vrot.lane.b32.xlu1 %v12815_v31, %s11463_s30  ;;  %4203 = vrot.lane.b32.xlu0 %v12818_v52, %s11463_s30  ;;  %v10475_v55 = vpop.f32.mrb[156].mxu0  ;;  %v10332_v45 = vpop.f32.mrb[156].mxu1 }
 0x256   : > { %v12824_v13 = vadd.f32 %v10475_v55, %v10326_v12  ;;  %v3608_v21 = vpop.f32.mrb[157].mxu0  ;;  %v2811_v30 = vpop.f32.mrb[157].mxu1 }
 0x257   : > { %v12826_v48 = vpop.permute.xlu0 %4519  ;;  %v12828_v41 = vpop.permute.xlu1 %4525  ;;  %v12830_v53 = vadd.f32 %v3608_v21, %v2791_v15 }
 0x259   : > { %4581 = vrot.lane.b32.xlu1 %v12815_v31, %s11462_s9  ;;  %4579 = vrot.lane.b32.xlu0 %v12818_v52, %s11462_s9  ;;  %v10478_v12 = vpop.f32.mrb[158].mxu0  ;;  %v10335_v21 = vpop.f32.mrb[158].mxu1 }
 0x25a   : > { %v12840_v6 = vadd.f32 %v10478_v12, %v10329_v4  ;;  %v3618_v15 = vpop.f32.mrb[159].mxu0  ;;  %v2821_v31 = vpop.f32.mrb[159].mxu1 }
 0x25b   : > { %v12842_v55 = vpop.permute.xlu0 %4523  ;;  %v12844_v56 = vpop.permute.xlu1 %4147  ;;  %v12846_v44 = vadd.f32 %v3618_v15, %v2801_v50 }
 0x25d   : > { %18860 = vst [vmem:[#allocation128_spill] sm:$0xff] %v12846_v44  ;;  %4209 = vrot.lane.b32.xlu1 %v12849_v20, %s11463_s30  ;;  %4207 = vrot.lane.b32.xlu0 %v12852_v34, %s11463_s30  ;;  %v10481_v4 = vpop.f32.mrb[160].mxu0  ;;  %v10338_v7 = vpop.f32.mrb[160].mxu1  ;;  %v12886_v44 = vsel %vm3801_vm7, %v12636_v54, %v3895_v46  ;;  %v3898_v54 = vmul.f32 0.2, %v12646_v36  ;;  %vm3818_vm7 = vcmp.ge.f32.partialorder %v12738_v10, 0.0 }
 0x25e   : > { %v12858_v12 = vadd.f32 %v10481_v4, %v10332_v45  ;;  %v3628_v52 = vpop.f32.mrb[161].mxu0  ;;  %v2831_v32 = vpop.f32.mrb[161].mxu1  ;;  %18868 = vst [vmem:[#allocation136_spill] sm:$0xff] %v12886_v44 }
 0x25f   : > { %v12860_v50 = vpop.permute.xlu1 %4153  ;;  %v12862_v15 = vpop.permute.xlu0 %4151  ;;  %v12864_v60 = vadd.f32 %v3628_v52, %v2811_v30 }
 0x260   : > { %18863 = vst [vmem:[#allocation131_spill] sm:$0xff] %v12858_v12 }
 0x261   : > { %18864 = vst [vmem:[#allocation132_spill] sm:$0xff] %v12864_v60  ;;  %4585 = vrot.lane.b32.xlu1 %v12849_v20, %s11462_s9  ;;  %4583 = vrot.lane.b32.xlu0 %v12852_v34, %s11462_s9  ;;  %v10484_v45 = vpop.f32.mrb[162].mxu0  ;;  %v10341_v30 = vpop.f32.mrb[162].mxu1 }
 0x262   : > { %v12874_v4 = vadd.f32 %v10484_v45, %v10335_v21  ;;  %v3638_v52 = vpop.f32.mrb[163].mxu0  ;;  %v2841_v20 = vpop.f32.mrb[163].mxu1 }
 0x263   : > { %v12876_v60 = vpop.permute.xlu1 %4529  ;;  %v12878_v12 = vpop.permute.xlu0 %4527  ;;  %v12880_v11 = vadd.f32 %v3638_v52, %v2821_v31 }
 0x264   : > { %18865 = vst [vmem:[#allocation133_spill] sm:$0xff] %v12874_v4 }
 0x265   : > { %18866 = vst [vmem:[#allocation134_spill] sm:$0xff] %v12880_v11  ;;  %4213 = vrot.lane.b32.xlu1 %v12883_v1, %s11463_s30  ;;  %4211 = vrot.lane.b32.xlu0 %v12886_v44, %s11463_s30  ;;  %v10487_v21 = vpop.f32.mrb[164].mxu0  ;;  %v10344_v4 = vpop.f32.mrb[164].mxu1  ;;  %v12918_v11 = vsel %vm3803_vm9, %v12648_v33, %v3897_v24  ;;  %vm3820_vm9 = vcmp.ge.f32.partialorder %v12750_v61, 0.0 }
 0x266   : > { %v12892_v45 = vadd.f32 %v10487_v21, %v10338_v7  ;;  %v3648_v34 = vpop.f32.mrb[165].mxu0  ;;  %v2851_v46 = vpop.f32.mrb[165].mxu1  ;;  %18877 = vst [vmem:[#allocation145_spill] sm:$0xff] %v12918_v11 }
 0x267   : > { %v12894_v31 = vpop.permute.xlu1 %4157  ;;  %v12896_v52 = vpop.permute.xlu0 %4155  ;;  %v12898_v43 = vadd.f32 %v3648_v34, %v2831_v32 }
 0x268   : > { %18869 = vst [vmem:[#allocation137_spill] sm:$0xff] %v12892_v45  ;;  %18870 = vst [vmem:[#allocation138_spill] sm:$0xff] %v12894_v31 }
 0x269   : > { %18871 = vst [vmem:[#allocation139_spill] sm:$0xff] %v12896_v52  ;;  %18872 = vst [vmem:[#allocation140_spill] sm:$0xff] %v12898_v43  ;;  %4589 = vrot.lane.b32.xlu1 %v12883_v1, %s11462_s9  ;;  %4587 = vrot.lane.b32.xlu0 %v12886_v44, %s11462_s9  ;;  %v10490_v7 = vpop.f32.mrb[166].mxu0  ;;  %v10347_v21 = vpop.f32.mrb[166].mxu1  ;;  %v12915_v43 = vsel %vm3804_vm8, %v12646_v36, %v3898_v54  ;;  %vm3817_vm8 = vcmp.ge.f32.partialorder %v12740_v22, 0.0 }
 0x26a   : > { %v12912_v32 = vadd.f32 %v10490_v7, %v10341_v30  ;;  %18876 = vst [vmem:[#allocation144_spill] sm:$0xff] %v12915_v43  ;;  %v3658_v52 = vpop.f32.mrb[167].mxu0  ;;  %v2861_v31 = vpop.f32.mrb[167].mxu1 }
 0x26b   : > { %v12908_v45 = vpop.permute.xlu1 %4533  ;;  %v12910_v34 = vpop.permute.xlu0 %4531  ;;  %v12924_v44 = vadd.f32 %v3658_v52, %v2841_v20 }
 0x26c   : > { %18873 = vst [vmem:[#allocation141_spill] sm:$0xff] %v12908_v45  ;;  %18874 = vst [vmem:[#allocation142_spill] sm:$0xff] %v12910_v34  ;;  %v3899_v45 = vmul.f32 0.2, %v12662_v14 }
 0x26d   : > { %18875 = vst [vmem:[#allocation143_spill] sm:$0xff] %v12912_v32  ;;  %4217 = vrot.lane.b32.xlu1 %v12915_v43, %s11463_s30  ;;  %4215 = vrot.lane.b32.xlu0 %v12918_v11, %s11463_s30  ;;  %18878 = vst [vmem:[#allocation146_spill] sm:$0xff] %v12924_v44  ;;  %v10493_v1 = vpop.f32.mrb[168].mxu0  ;;  %v10350_v34 = vpop.f32.mrb[168].mxu1  ;;  %v3900_v32 = vmul.f32 0.2, %v12660_v35 }
 0x26e   : > { %v12926_v30 = vadd.f32 %v10493_v1, %v10344_v4  ;;  %v3668_v7 = vpop.f32.mrb[169].mxu0  ;;  %v2871_v36 = vpop.f32.mrb[169].mxu1 }
 0x26f   : > { %v12928_v54 = vpop.permute.xlu1 %4161  ;;  %v12930_v33 = vpop.permute.xlu0 %4159  ;;  %v12932_v24 = vadd.f32 %v3668_v7, %v2851_v46  ;;  %v12951_v44 = vsel %vm3806_vm10, %v12660_v35, %v3900_v32  ;;  %vm3819_vm10 = vcmp.ge.f32.partialorder %v12752_v0, 0.0 }
 0x270   : > { %18879 = vst [vmem:[#allocation147_spill] sm:$0xff] %v12926_v30  ;;  %18884 = vst [vmem:[#allocation152_spill] sm:$0xff] %v12951_v44 }
 0x271   : > { %18880 = vst [vmem:[#allocation148_spill] sm:$0xff] %v12932_v24  ;;  %4593 = vrot.lane.b32.xlu1 %v12915_v43, %s11462_s9  ;;  %4591 = vrot.lane.b32.xlu0 %v12918_v11, %s11462_s9  ;;  %v10496_v1 = vpop.f32.mrb[170].mxu0  ;;  %v10353_v20 = vpop.f32.mrb[170].mxu1  ;;  %v12954_v43 = vsel %vm3805_vm11, %v12662_v14, %v3899_v45  ;;  %v3902_v14 = vmul.f32 0.2, %v12672_v47  ;;  %vm3822_vm11 = vcmp.ge.f32.partialorder %v12764_v2, 0.0 }
 0x272   : > { %v12942_v4 = vadd.f32 %v10496_v1, %v10347_v21  ;;  %v3678_v52 = vpop.f32.mrb[171].mxu0  ;;  %v2881_v46 = vpop.f32.mrb[171].mxu1  ;;  %18885 = vst [vmem:[#allocation153_spill] sm:$0xff] %v12954_v43  ;;  %v3901_v45 = vmul.f32 0.2, %v12674_v25 }
 0x273   : > { %v12944_v7 = vpop.permute.xlu1 %4537  ;;  %v12946_v24 = vpop.permute.xlu0 %4535  ;;  %v12948_v30 = vadd.f32 %v3678_v52, %v2861_v31 }
 0x274   : > { %18881 = vst [vmem:[#allocation149_spill] sm:$0xff] %v12942_v4  ;;  %18882 = vst [vmem:[#allocation150_spill] sm:$0xff] %v12946_v24 }
 0x275   : > { %18883 = vst [vmem:[#allocation151_spill] sm:$0xff] %v12948_v30  ;;  %4221 = vrot.lane.b32.xlu1 %v12951_v44, %s11463_s30  ;;  %4219 = vrot.lane.b32.xlu0 %v12954_v43, %s11463_s30  ;;  %v10499_v21 = vpop.f32.mrb[172].mxu0  ;;  %v10356_v4 = vpop.f32.mrb[172].mxu1 }
 0x276   : > { %v12960_v1 = vadd.f32 %v10499_v21, %v10350_v34  ;;  %v3688_v11 = vpop.f32.mrb[173].mxu0  ;;  %v2891_v32 = vpop.f32.mrb[173].mxu1 }
 0x277   : > { %v12962_v24 = vpop.permute.xlu1 %4165  ;;  %v12964_v31 = vpop.permute.xlu0 %4163  ;;  %v12966_v35 = vadd.f32 %v3688_v11, %v2871_v36 }
 0x278   : > { %18886 = vst [vmem:[#allocation154_spill] sm:$0xff] %v12960_v1  ;;  %18887 = vst [vmem:[#allocation155_spill] sm:$0xff] %v12964_v31  ;;  %v12986_v1 = vsel %vm3807_vm13, %v12674_v25, %v3901_v45  ;;  %vm3824_vm13 = vcmp.ge.f32.partialorder %v12776_v42, 0.0 }
 0x279   : > { %18888 = vst [vmem:[#allocation156_spill] sm:$0xff] %v12966_v35  ;;  %4597 = vrot.lane.b32.xlu1 %v12951_v44, %s11462_s9  ;;  %4595 = vrot.lane.b32.xlu0 %v12954_v43, %s11462_s9  ;;  %v10502_v34 = vpop.f32.mrb[174].mxu0  ;;  %v10359_v52 = vpop.f32.mrb[174].mxu1  ;;  %v12983_v35 = vsel %vm3808_vm12, %v12672_v47, %v3902_v14  ;;  %18893 = vst [vmem:[#allocation161_spill] sm:$0xff] %v12986_v1  ;;  %vm3821_vm12 = vcmp.ge.f32.partialorder %v12766_v49, 0.0 }
 0x27a   : > { %v12980_v36 = vadd.f32 %v10502_v34, %v10353_v20  ;;  %18892 = vst [vmem:[#allocation160_spill] sm:$0xff] %v12983_v35  ;;  %v3698_v30 = vpop.f32.mrb[175].mxu0  ;;  %v2901_v31 = vpop.f32.mrb[175].mxu1 }
 0x27b   : > { %v12976_v21 = vpop.permute.xlu1 %4541  ;;  %v12978_v11 = vpop.permute.xlu0 %4539  ;;  %v12992_v43 = vadd.f32 %v3698_v30, %v2881_v46 }
 0x27c   : > { %18889 = vst [vmem:[#allocation157_spill] sm:$0xff] %v12976_v21  ;;  %18890 = vst [vmem:[#allocation158_spill] sm:$0xff] %v12978_v11  ;;  %v3903_v21 = vmul.f32 0.2, %v12688_v5 }
 0x27d   : > { %18891 = vst [vmem:[#allocation159_spill] sm:$0xff] %v12980_v36  ;;  %4225 = vrot.lane.b32.xlu1 %v12983_v35, %s11463_s30  ;;  %4223 = vrot.lane.b32.xlu0 %v12986_v1, %s11463_s30  ;;  %18894 = vst [vmem:[#allocation162_spill] sm:$0xff] %v12992_v43  ;;  %v10505_v44 = vpop.f32.mrb[176].mxu0  ;;  %v10362_v11 = vpop.f32.mrb[176].mxu1  ;;  %v3904_v36 = vmul.f32 0.2, %v12686_v27 }
 0x27e   : > { %v12994_v20 = vadd.f32 %v10505_v44, %v10356_v4  ;;  %v3708_v34 = vpop.f32.mrb[177].mxu0  ;;  %v2911_v47 = vpop.f32.mrb[177].mxu1 }
 0x27f   : > { %v12996_v14 = vpop.permute.xlu1 %4169  ;;  %v12998_v25 = vpop.permute.xlu0 %4167  ;;  %v13000_v45 = vadd.f32 %v3708_v34, %v2891_v32  ;;  %v13019_v43 = vsel %vm3810_vm14, %v12686_v27, %v3904_v36  ;;  %vm3823_vm14 = vcmp.ge.f32.partialorder %v12778_v57, 0.0 }
 0x280   : > { %18895 = vst [vmem:[#allocation163_spill] sm:$0xff] %v12994_v20  ;;  %18900 = vst [vmem:[#allocation168_spill] sm:$0xff] %v13019_v43 }
 0x281   : > { %18896 = vst [vmem:[#allocation164_spill] sm:$0xff] %v13000_v45  ;;  %4601 = vrot.lane.b32.xlu1 %v12983_v35, %s11462_s9  ;;  %4599 = vrot.lane.b32.xlu0 %v12986_v1, %s11462_s9  ;;  %v10508_v44 = vpop.f32.mrb[178].mxu0  ;;  %v10365_v30 = vpop.f32.mrb[178].mxu1  ;;  %v13022_v35 = vsel %vm3809_vm15, %v12688_v5, %v3903_v21  ;;  %v3906_v5 = vmul.f32 0.2, %v12698_v26  ;;  %vm3826_vm15 = vcmp.ge.f32.partialorder %v12790_v59, 0.0 }
 0x282   : > { %v13010_v4 = vadd.f32 %v10508_v44, %v10359_v52  ;;  %v3718_v46 = vpop.f32.mrb[179].mxu0  ;;  %v2921_v32 = vpop.f32.mrb[179].mxu1  ;;  %18901 = vst [vmem:[#allocation169_spill] sm:$0xff] %v13022_v35  ;;  %v3905_v21 = vmul.f32 0.2, %v12700_v17 }
 0x283   : > { %v13012_v34 = vpop.permute.xlu1 %4545  ;;  %v13014_v45 = vpop.permute.xlu0 %4543  ;;  %v13016_v20 = vadd.f32 %v3718_v46, %v2901_v31 }
 0x284   : > { %18897 = vst [vmem:[#allocation165_spill] sm:$0xff] %v13010_v4  ;;  %18898 = vst [vmem:[#allocation166_spill] sm:$0xff] %v13014_v45 }
 0x285   : > { %18899 = vst [vmem:[#allocation167_spill] sm:$0xff] %v13016_v20  ;;  %4229 = vrot.lane.b32.xlu1 %v13019_v43, %s11463_s30  ;;  %4227 = vrot.lane.b32.xlu0 %v13022_v35, %s11463_s30  ;;  %v10511_v52 = vpop.f32.mrb[180].mxu0  ;;  %v10368_v4 = vpop.f32.mrb[180].mxu1 }
 0x286   : > { %v13028_v44 = vadd.f32 %v10511_v52, %v10362_v11  ;;  %v3728_v1 = vpop.f32.mrb[181].mxu0  ;;  %v2931_v36 = vpop.f32.mrb[181].mxu1 }
 0x287   : > { %v13030_v45 = vpop.permute.xlu1 %4173  ;;  %v13032_v31 = vpop.permute.xlu0 %4171  ;;  %v13034_v27 = vadd.f32 %v3728_v1, %v2911_v47 }
 0x288   : > { %18902 = vst [vmem:[#allocation170_spill] sm:$0xff] %v13028_v44  ;;  %18903 = vst [vmem:[#allocation171_spill] sm:$0xff] %v13032_v31  ;;  %v13054_v44 = vsel %vm3811_vm2, %v12700_v17, %v3905_v21  ;;  %v3907_v21 = vmul.f32 0.2, %v12714_v63  ;;  %vm3828_vm2 = vcmp.ge.f32.partialorder %v12806_v3, 0.0 }
 0x289   : > { %18904 = vst [vmem:[#allocation172_spill] sm:$0xff] %v13034_v27  ;;  %4605 = vrot.lane.b32.xlu1 %v13019_v43, %s11462_s9  ;;  %4603 = vrot.lane.b32.xlu0 %v13022_v35, %s11462_s9  ;;  %v10514_v11 = vpop.f32.mrb[182].mxu0  ;;  %v10371_v46 = vpop.f32.mrb[182].mxu1  ;;  %v13051_v27 = vsel %vm3812_vm0, %v12698_v26, %v3906_v5  ;;  %18908 = vst [vmem:[#allocation176_spill] sm:$0xff] %v13054_v44  ;;  %v3908_v5 = vmul.f32 0.2, %v12712_v19 }
 0x28a   : > { %v13048_v47 = vadd.f32 %v10514_v11, %v10365_v30  ;;  %18907 = vst [vmem:[#allocation175_spill] sm:$0xff] %v13051_v27  ;;  %v3738_v20 = vpop.f32.mrb[183].mxu0  ;;  %v2941_v31 = vpop.f32.mrb[183].mxu1  ;;  %vm3825_vm0 = vcmp.ge.f32.partialorder %v12796_v58, 0.0 }
 0x28b   : > { %v13044_v52 = vpop.permute.xlu1 %4549  ;;  %v13046_v1 = vpop.permute.xlu0 %4547  ;;  %v13060_v35 = vadd.f32 %v3738_v20, %v2921_v32 }
 0x28c   : > { %18905 = vst [vmem:[#allocation173_spill] sm:$0xff] %v13046_v1  ;;  %18906 = vst [vmem:[#allocation174_spill] sm:$0xff] %v13048_v47  ;;  %v3915_v47 = vmul.f32 0.2, %v12766_v49 }
 0x28d   : > { %4233 = vrot.lane.b32.xlu1 %v13051_v27, %s11463_s30  ;;  %4231 = vrot.lane.b32.xlu0 %v13054_v44, %s11463_s30  ;;  %18909 = vst [vmem:[#allocation177_spill] sm:$0xff] %v13060_v35  ;;  %v10517_v43 = vpop.f32.mrb[184].mxu0 }
 0x28e   : > { %v13062_v1 = vadd.f32 %v10517_v43, %v10368_v4  ;;  %v3748_v30 = vpop.f32.mrb[185].mxu0 }
 0x28f   : > { %v13064_v11 = vpop.permute.xlu1 %4177  ;;  %v13066_v26 = vpop.permute.xlu0 %4175  ;;  %v13068_v17 = vadd.f32 %v3748_v30, %v2931_v36 }
 0x290   : > { %18910 = vst [vmem:[#allocation178_spill] sm:$0xff] %v13062_v1  ;;  %v13090_v1 = vsel %vm3813_vm4, %v12714_v63, %v3907_v21  ;;  %vm3830_vm4 = vcmp.ge.f32.partialorder %v12824_v13, 0.0 }
 0x291   : > { %18911 = vst [vmem:[#allocation179_spill] sm:$0xff] %v13068_v17  ;;  %4609 = vrot.lane.b32.xlu1 %v13051_v27, %s11462_s9  ;;  %4607 = vrot.lane.b32.xlu0 %v13054_v44, %s11462_s9  ;;  %v10520_v43 = vpop.f32.mrb[186].mxu0  ;;  %v13087_v17 = vsel %vm3814_vm3, %v12712_v19, %v3908_v5  ;;  %18915 = vst [vmem:[#allocation183_spill] sm:$0xff] %v13090_v1  ;;  %v3910_v44 = vmul.f32 0.2, %v12724_v39  ;;  %vm3827_vm3 = vcmp.ge.f32.partialorder %v12812_v37, 0.0 }
 0x292   : > { %v13078_v20 = vadd.f32 %v10520_v43, %v10371_v46  ;;  %v3758_v4 = vpop.f32.mrb[187].mxu0  ;;  %18914 = vst [vmem:[#allocation182_spill] sm:$0xff] %v13087_v17  ;;  %v3911_v27 = vmul.f32 0.2, %v12740_v22 }
 0x293   : > { %v13080_v32 = vpop.permute.xlu1 %4553  ;;  %v13082_v36 = vpop.permute.xlu0 %4551  ;;  %v13084_v30 = vadd.f32 %v3758_v4, %v2941_v31  ;;  %v3909_v31 = vmul.f32 0.2, %v12726_v8  ;;  %v13113_v5 = vsel %vm3816_vm5, %v12724_v39, %v3910_v44  ;;  %vm3829_vm5 = vcmp.ge.f32.partialorder %v12830_v53, 0.0 }
 0x294   : > { %18912 = vst [vmem:[#allocation180_spill] sm:$0xff] %v13078_v20  ;;  %18916 = vst [vmem:[#allocation184_spill] sm:$0xff] %v13113_v5  ;;  %v3913_v20 = vmul.f32 0.2, %v12752_v0 }
 0x295   : > { %18913 = vst [vmem:[#allocation181_spill] sm:$0xff] %v13084_v30  ;;  %4237 = vrot.lane.b32.xlu1 %v13087_v17, %s11463_s30  ;;  %4235 = vrot.lane.b32.xlu0 %v13090_v1, %s11463_s30  ;;  %v13116_v21 = vsel %vm3815_vm6, %v12726_v8, %v3909_v31  ;;  %v13142_v31 = vsel %vm3817_vm8, %v12740_v22, %v3911_v27  ;;  %vm3832_vm6 = vcmp.ge.f32.partialorder %v12840_v6, 0.0 }
 0x296   : > { %18917 = vst [vmem:[#allocation185_spill] sm:$0xff] %v13116_v21  ;;  %18919 = vst [vmem:[#allocation187_spill] sm:$0xff] %v13142_v31 }
 0x297   : > { %v13096_v46 = vpop.permute.xlu1 %4181  ;;  %v13098_v43 = vpop.permute.xlu0 %4179 }
 0x299   : > { %4613 = vrot.lane.b32.xlu1 %v13087_v17, %s11462_s9  ;;  %4611 = vrot.lane.b32.xlu0 %v13090_v1, %s11462_s9  ;;  %v3912_v1 = vmul.f32 0.2, %v12738_v10 }
 0x29b   : > { %v13108_v19 = vpop.permute.xlu1 %4557  ;;  %v13110_v63 = vpop.permute.xlu0 %4555  ;;  %v13139_v44 = vsel %vm3818_vm7, %v12738_v10, %v3912_v1  ;;  %v13168_v1 = vsel %vm3819_vm10, %v12752_v0, %v3913_v20 }
 0x29c   : > { %18918 = vst [vmem:[#allocation186_spill] sm:$0xff] %v13139_v44  ;;  %18921 = vst [vmem:[#allocation189_spill] sm:$0xff] %v13168_v1 }
 0x29d   : > { %4241 = vrot.lane.b32.xlu1 %v13113_v5, %s11463_s30  ;;  %4239 = vrot.lane.b32.xlu0 %v13116_v21, %s11463_s30 }
 0x29f   : > { %v13122_v4 = vpop.permute.xlu1 %4185  ;;  %v13124_v17 = vpop.permute.xlu0 %4183 }
 0x2a1   : > { %4617 = vrot.lane.b32.xlu1 %v13113_v5, %s11462_s9  ;;  %4615 = vrot.lane.b32.xlu0 %v13116_v21, %s11462_s9  ;;  %v3914_v21 = vmul.f32 0.2, %v12750_v61 }
 0x2a3   : > { %v13134_v39 = vpop.permute.xlu1 %4561  ;;  %v13136_v8 = vpop.permute.xlu0 %4559  ;;  %v13165_v27 = vsel %vm3820_vm9, %v12750_v61, %v3914_v21  ;;  %v13194_v21 = vsel %vm3821_vm12, %v12766_v49, %v3915_v47 }
 0x2a4   : > { %18920 = vst [vmem:[#allocation188_spill] sm:$0xff] %v13165_v27  ;;  %18925 = vst [vmem:[#allocation193_spill] sm:$0xff] %v13194_v21 }
 0x2a5   : > { %4245 = vrot.lane.b32.xlu1 %v13139_v44, %s11463_s30  ;;  %4243 = vrot.lane.b32.xlu0 %v13142_v31, %s11463_s30 }
 0x2a7   : > { %v13148_v5 = vpop.permute.xlu1 %4189  ;;  %v13150_v30 = vpop.permute.xlu0 %4187 }
 0x2a9   : > { %4621 = vrot.lane.b32.xlu1 %v13139_v44, %s11462_s9  ;;  %4619 = vrot.lane.b32.xlu0 %v13142_v31, %s11462_s9  ;;  %v3916_v31 = vmul.f32 0.2, %v12764_v2 }
 0x2ab   : > { %v13160_v10 = vpop.permute.xlu1 %4565  ;;  %v13162_v22 = vpop.permute.xlu0 %4563  ;;  %v13191_v20 = vsel %vm3822_vm11, %v12764_v2, %v3916_v31 }
 0x2ac   : > { %18924 = vst [vmem:[#allocation192_spill] sm:$0xff] %v13191_v20 }
 0x2ad   : > { %4249 = vrot.lane.b32.xlu1 %v13165_v27, %s11463_s30  ;;  %4247 = vrot.lane.b32.xlu0 %v13168_v1, %s11463_s30 }
 0x2af   : > { %v13174_v44 = vpop.permute.xlu1 %4193  ;;  %v13176_v35 = vpop.permute.xlu0 %4191 }
 0x2b0   : > { %18922 = vst [vmem:[#allocation190_spill] sm:$0xff] %v13176_v35 }
 0x2b1   : > { %4625 = vrot.lane.b32.xlu1 %v13165_v27, %s11462_s9  ;;  %4623 = vrot.lane.b32.xlu0 %v13168_v1, %s11462_s9  ;;  %v3918_v1 = vmul.f32 0.2, %v12776_v42 }
 0x2b3   : > { %v13186_v61 = vpop.permute.xlu1 %4569  ;;  %v13188_v0 = vpop.permute.xlu0 %4567  ;;  %v13217_v47 = vsel %vm3824_vm13, %v12776_v42, %v3918_v1 }
 0x2b4   : > { %18923 = vst [vmem:[#allocation191_spill] sm:$0xff] %v13188_v0  ;;  %v3917_v0 = vmul.f32 0.2, %v12778_v57  ;;  %18928 = vst [vmem:[#allocation196_spill] sm:$0xff] %v13217_v47 }
 0x2b5   : > { %4253 = vrot.lane.b32.xlu1 %v13191_v20, %s11463_s30  ;;  %4251 = vrot.lane.b32.xlu0 %v13194_v21, %s11463_s30 }
 0x2b6   : > { %v13220_v31 = vsel %vm3823_vm14, %v12778_v57, %v3917_v0 }
 0x2b7   : > { %v13200_v27 = vpop.permute.xlu1 %4197  ;;  %v13202_v35 = vpop.permute.xlu0 %4195  ;;  %18929 = vst [vmem:[#allocation197_spill] sm:$0xff] %v13220_v31 }
 0x2b8   : > { %18926 = vst [vmem:[#allocation194_spill] sm:$0xff] %v13202_v35 }
 0x2b9   : > { %4629 = vrot.lane.b32.xlu1 %v13191_v20, %s11462_s9  ;;  %4627 = vrot.lane.b32.xlu0 %v13194_v21, %s11462_s9  ;;  %v3920_v21 = vmul.f32 0.2, %v12790_v59 }
 0x2bb   : > { %v13212_v2 = vpop.permute.xlu1 %4573  ;;  %v13214_v49 = vpop.permute.xlu0 %4571  ;;  %v13243_v1 = vsel %vm3826_vm15, %v12790_v59, %v3920_v21  ;;  %v4425_v59 = vmax.f32 %v12474_v18, %v12808_v29  ;;  %v3921_v29 = vmul.f32 0.2, %v12812_v37 }
 0x2bc   : > { %18927 = vst [vmem:[#allocation195_spill] sm:$0xff] %v13214_v49  ;;  %v3919_v49 = vmul.f32 0.2, %v12796_v58  ;;  %18931 = vst [vmem:[#allocation199_spill] sm:$0xff] %v13243_v1 }
 0x2bd   : > { %4257 = vrot.lane.b32.xlu1 %v13217_v47, %s11463_s30  ;;  %4255 = vrot.lane.b32.xlu0 %v13220_v31, %s11463_s30  ;;  %v13268_v21 = vmax.f32 %v4425_v59, %v12826_v48  ;;  %v13290_v59 = vsel %vm3827_vm3, %v12812_v37, %v3921_v29 }
 0x2be   : > { %v13246_v0 = vsel %vm3825_vm0, %v12796_v58, %v3919_v49  ;;  %18936 = vst [vmem:[#allocation204_spill] sm:$0xff] %v13290_v59 }
 0x2bf   : > { %v13226_v20 = vpop.permute.xlu1 %4201  ;;  %v13228_v35 = vpop.permute.xlu0 %4199  ;;  %18932 = vst [vmem:[#allocation200_spill] sm:$0xff] %v13246_v0  ;;  %18934 = vst [vmem:[#allocation202_spill] sm:$0xff] %v13268_v21 }
 0x2c1   : > { %4633 = vrot.lane.b32.xlu1 %v13217_v47, %s11462_s9  ;;  %4631 = vrot.lane.b32.xlu0 %v13220_v31, %s11462_s9  ;;  %v4426_v47 = vmax.f32 %v12468_v38, %v12794_v62  ;;  %v3922_v38 = vmul.f32 0.2, %v12806_v3 }
 0x2c3   : > { %v13238_v42 = vpop.permute.xlu1 %4577  ;;  %v13240_v57 = vpop.permute.xlu0 %4575  ;;  %v13265_v58 = vmax.f32 %v4426_v47, %v12792_v9  ;;  %v13287_v47 = vsel %vm3828_vm2, %v12806_v3, %v3922_v38  ;;  %v4428_v38 = vmax.f32 %v12476_v51, %v12810_v23  ;;  %v3923_v23 = vmul.f32 0.2, %v12830_v53 }
 0x2c4   : > { %18930 = vst [vmem:[#allocation198_spill] sm:$0xff] %v13238_v42  ;;  %18935 = vst [vmem:[#allocation203_spill] sm:$0xff] %v13287_v47 }
 0x2c5   : > { %4261 = vrot.lane.b32.xlu1 %v13243_v1, %s11463_s30  ;;  %4259 = vrot.lane.b32.xlu0 %v13246_v0, %s11463_s30  ;;  %18933 = vst [vmem:[#allocation201_spill] sm:$0xff] %v13265_v58  ;;  %v13309_v37 = vmax.f32 %v4428_v38, %v12828_v41  ;;  %v13334_v38 = vsel %vm3829_vm5, %v12830_v53, %v3923_v23 }
 0x2c6   : > { %18940 = vst [vmem:[#allocation208_spill] sm:$0xff] %v13334_v38 }
 0x2c7   : > { %v13254_v31 = vpop.permute.xlu1 %4205  ;;  %v13256_v42 = vpop.permute.xlu0 %4203  ;;  %18937 = vst [vmem:[#allocation205_spill] sm:$0xff] %v13309_v37 }
 0x2c9   : > { %4637 = vrot.lane.b32.xlu1 %v13243_v1, %s11462_s9  ;;  %4635 = vrot.lane.b32.xlu0 %v13246_v0, %s11462_s9  ;;  %v18952_v0 = vld [vmem:[#allocation103_spill] sm:$0xff] }
 0x2cb   : > { %v13270_v62 = vpop.permute.xlu1 %4581  ;;  %v13272_v49 = vpop.permute.xlu0 %4579 }
 0x2cd   : > { %5555 = vrot.lane.b32.xlu1 %v13265_v58, %s11464_s7  ;;  %5553 = vrot.lane.b32.xlu0 %v13268_v21, %s11464_s7  ;;  %v4427_v58 = vmax.f32 %v12486_v28, %v12844_v56  ;;  %v3924_v28 = vmul.f32 0.2, %v12824_v13 }
 0x2cf   : > { %v13282_v48 = vpop.permute.xlu1 %4209  ;;  %v13284_v9 = vpop.permute.xlu0 %4207  ;;  %v13312_v3 = vmax.f32 %v4427_v58, %v12842_v55  ;;  %v13331_v58 = vsel %vm3830_vm4, %v12824_v13, %v3924_v28  ;;  %v4429_v28 = vmax.f32 %v12494_v40, %v12862_v15 }
 0x2d0   : > { %18939 = vst [vmem:[#allocation207_spill] sm:$0xff] %v13331_v58 }
 0x2d1   : > { %4265 = vrot.lane.b32.xlu1 %v13287_v47, %s11463_s30  ;;  %4263 = vrot.lane.b32.xlu0 %v13290_v59, %s11463_s30  ;;  %18938 = vst [vmem:[#allocation206_spill] sm:$0xff] %v13312_v3  ;;  %v13356_v53 = vmax.f32 %v4429_v28, %v12878_v12 }
 0x2d3   : > { %v13298_v21 = vpop.permute.xlu1 %4585  ;;  %v13300_v18 = vpop.permute.xlu0 %4583  ;;  %18942 = vst [vmem:[#allocation210_spill] sm:$0xff] %v13356_v53 }
 0x2d5   : > { %4641 = vrot.lane.b32.xlu1 %v13287_v47, %s11462_s9  ;;  %4639 = vrot.lane.b32.xlu0 %v13290_v59, %s11462_s9  ;;  %v18951_v47 = vld [vmem:[#allocation139_spill] sm:$0xff] }
 0x2d7   : > { %v13314_v56 = vpop.permute.xlu1 %4213  ;;  %v13316_v29 = vpop.permute.xlu0 %4211 }
 0x2d9   : > { %5559 = vrot.lane.b32.xlu1 %v13309_v37, %s11464_s7  ;;  %5557 = vrot.lane.b32.xlu0 %v13312_v3, %s11464_s7  ;;  %v4430_v3 = vmax.f32 %v12492_v16, %v12860_v50  ;;  %v3926_v50 = vmul.f32 0.2, %v12840_v6  ;;  %v18943_v16 = vld [vmem:[#allocation128_spill] sm:$0xff] }
 0x2da   : > { %v3925_v15 = vmul.f32 0.2, %v18943_v16  ;;  %vm3831_vm7 = vcmp.ge.f32.partialorder %v18943_v16, 0.0 }
 0x2db   : > { %v13326_v41 = vpop.permute.xlu1 %4589  ;;  %v13328_v55 = vpop.permute.xlu0 %4587  ;;  %v13353_v13 = vmax.f32 %v4430_v3, %v12876_v60  ;;  %v13375_v3 = vsel %vm3832_vm6, %v12840_v6, %v3926_v50  ;;  %v4431_v6 = vmax.f32 %v18952_v0, %v18951_v47 }
 0x2dc   : > { %18945 = vst [vmem:[#allocation211_spill] sm:$0xff] %v13375_v3  ;;  %v13378_v28 = vsel %vm3831_vm7, %v18943_v16, %v3925_v15  ;;  %v18953_v16 = vld [vmem:[#allocation141_spill] sm:$0xff]  ;;  %v18955_v15 = vld [vmem:[#allocation142_spill] sm:$0xff] }
 0x2dd   : > { %4269 = vrot.lane.b32.xlu1 %v13331_v58, %s11463_s30  ;;  %4267 = vrot.lane.b32.xlu0 %v13334_v38, %s11463_s30  ;;  %18941 = vst [vmem:[#allocation209_spill] sm:$0xff] %v13353_v13  ;;  %18946 = vst [vmem:[#allocation212_spill] sm:$0xff] %v13378_v28  ;;  %v13400_v1 = vmax.f32 %v4431_v6, %v18955_v15 }
 0x2df   : > { %v13340_v37 = vpop.permute.xlu1 %4217  ;;  %v13342_v51 = vpop.permute.xlu0 %4215  ;;  %18956 = vst [vmem:[#allocation139_spill] sm:$0xff] %v13400_v1 }
 0x2e1   : > { %4645 = vrot.lane.b32.xlu1 %v13331_v58, %s11462_s9  ;;  %4643 = vrot.lane.b32.xlu0 %v13334_v38, %s11462_s9  ;;  %v18950_v38 = vld [vmem:[#allocation102_spill] sm:$0xff] }
 0x2e3   : > { %v13358_v23 = vpop.permute.xlu1 %4593  ;;  %v13360_v59 = vpop.permute.xlu0 %4591 }
 0x2e5   : > { %5563 = vrot.lane.b32.xlu1 %v13353_v13, %s11464_s7  ;;  %5561 = vrot.lane.b32.xlu0 %v13356_v53, %s11464_s7  ;;  %v18949_v53 = vld [vmem:[#allocation138_spill] sm:$0xff] }
 0x2e6   : > { %v4432_v58 = vmax.f32 %v18950_v38, %v18949_v53  ;;  %v18957_v53 = vld [vmem:[#allocation131_spill] sm:$0xff] }
 0x2e7   : > { %v13370_v12 = vpop.permute.xlu1 %4221  ;;  %v13372_v60 = vpop.permute.xlu0 %4219  ;;  %v3928_v38 = vmul.f32 0.2, %v18957_v53  ;;  %vm3834_vm8 = vcmp.ge.f32.partialorder %v18957_v53, 0.0 }
 0x2e8   : > { %18944 = vst [vmem:[#allocation128_spill] sm:$0xff] %v13372_v60  ;;  %v13397_v50 = vmax.f32 %v4432_v58, %v18953_v16  ;;  %v18958_v60 = vld [vmem:[#allocation132_spill] sm:$0xff] }
 0x2e9   : > { %4273 = vrot.lane.b32.xlu1 %v13375_v3, %s11463_s30  ;;  %4271 = vrot.lane.b32.xlu0 %v13378_v28, %s11463_s30  ;;  %v3927_v47 = vmul.f32 0.2, %v18958_v60  ;;  %vm3833_vm9 = vcmp.ge.f32.partialorder %v18958_v60, 0.0  ;;  %v13419_v16 = vsel %vm3834_vm8, %v18957_v53, %v3928_v38  ;;  %v18967_v53 = vld [vmem:[#allocation150_spill] sm:$0xff] }
 0x2ea   : > { %18954 = vst [vmem:[#allocation138_spill] sm:$0xff] %v13397_v50  ;;  %18960 = vst [vmem:[#allocation142_spill] sm:$0xff] %v13419_v16 }
 0x2eb   : > { %v13384_v13 = vpop.permute.xlu1 %4597  ;;  %v13386_v40 = vpop.permute.xlu0 %4595  ;;  %v13422_v15 = vsel %vm3833_vm9, %v18958_v60, %v3927_v47 }
 0x2ec   : > { %18947 = vst [vmem:[#allocation213_spill] sm:$0xff] %v13384_v13  ;;  %18948 = vst [vmem:[#allocation214_spill] sm:$0xff] %v13386_v40 }
 0x2ed   : > { %4649 = vrot.lane.b32.xlu1 %v13375_v3, %s11462_s9  ;;  %4647 = vrot.lane.b32.xlu0 %v13378_v28, %s11462_s9  ;;  %18961 = vst [vmem:[#allocation131_spill] sm:$0xff] %v13422_v15  ;;  %v18965_v3 = vld [vmem:[#allocation105_spill] sm:$0xff] }
 0x2ee   : > { %v4433_v38 = vmax.f32 %v18965_v3, %v12930_v33 }
 0x2ef   : > { %v13402_v13 = vpop.permute.xlu1 %4225  ;;  %v13404_v40 = vpop.permute.xlu0 %4223 }
 0x2f0   : > { %v13444_v47 = vmax.f32 %v4433_v38, %v18967_v53 }
 0x2f1   : > { %5567 = vrot.lane.b32.xlu1 %v13397_v50, %s11464_s7  ;;  %5565 = vrot.lane.b32.xlu0 %v13400_v1, %s11464_s7  ;;  %v18964_v1 = vld [vmem:[#allocation104_spill] sm:$0xff] }
 0x2f2   : > { %v4434_v28 = vmax.f32 %v18964_v1, %v12928_v54  ;;  %18968 = vst [vmem:[#allocation150_spill] sm:$0xff] %v13444_v47  ;;  %v18970_v54 = vld [vmem:[#allocation133_spill] sm:$0xff] }
 0x2f3   : > { %v13414_v58 = vpop.permute.xlu1 %4601  ;;  %v13416_v6 = vpop.permute.xlu0 %4599  ;;  %v3930_v1 = vmul.f32 0.2, %v18970_v54  ;;  %vm3836_vm10 = vcmp.ge.f32.partialorder %v18970_v54, 0.0 }
 0x2f4   : > { %18959 = vst [vmem:[#allocation141_spill] sm:$0xff] %v13416_v6  ;;  %v13441_v60 = vmax.f32 %v4434_v28, %v12944_v7  ;;  %v18971_v6 = vld [vmem:[#allocation134_spill] sm:$0xff] }
 0x2f5   : > { %4277 = vrot.lane.b32.xlu1 %v13419_v16, %s11463_s30  ;;  %4275 = vrot.lane.b32.xlu0 %v13422_v15, %s11463_s30  ;;  %v3929_v33 = vmul.f32 0.2, %v18971_v6  ;;  %vm3835_vm11 = vcmp.ge.f32.partialorder %v18971_v6, 0.0  ;;  %v13463_v38 = vsel %vm3836_vm10, %v18970_v54, %v3930_v1 }
 0x2f6   : > { %18966 = vst [vmem:[#allocation216_spill] sm:$0xff] %v13441_v60  ;;  %18974 = vst [vmem:[#allocation218_spill] sm:$0xff] %v13463_v38 }
 0x2f7   : > { %v13428_v50 = vpop.permute.xlu1 %4229  ;;  %v13430_v0 = vpop.permute.xlu0 %4227  ;;  %v13466_v53 = vsel %vm3835_vm11, %v18971_v6, %v3929_v33  ;;  %v18981_v6 = vld [vmem:[#allocation157_spill] sm:$0xff]  ;;  %v18983_v33 = vld [vmem:[#allocation158_spill] sm:$0xff] }
 0x2f8   : > { %18962 = vst [vmem:[#allocation132_spill] sm:$0xff] %v13428_v50  ;;  %18963 = vst [vmem:[#allocation215_spill] sm:$0xff] %v13430_v0 }
 0x2f9   : > { %4653 = vrot.lane.b32.xlu1 %v13419_v16, %s11462_s9  ;;  %4651 = vrot.lane.b32.xlu0 %v13422_v15, %s11462_s9  ;;  %18975 = vst [vmem:[#allocation219_spill] sm:$0xff] %v13466_v53  ;;  %v18979_v16 = vld [vmem:[#allocation155_spill] sm:$0xff] }
 0x2fb   : > { %v13446_v50 = vpop.permute.xlu1 %4605  ;;  %v13448_v0 = vpop.permute.xlu0 %4603 }
 0x2fc   : > { %18969 = vst [vmem:[#allocation217_spill] sm:$0xff] %v13448_v0  ;;  %v18986_v0 = vld [vmem:[#allocation140_spill] sm:$0xff] }
 0x2fd   : > { %5571 = vrot.lane.b32.xlu1 %v13441_v60, %s11464_s7  ;;  %5569 = vrot.lane.b32.xlu0 %v13444_v47, %s11464_s7  ;;  %v18978_v47 = vld [vmem:[#allocation106_spill] sm:$0xff]  ;;  %vm3837_vm13 = vcmp.ge.f32.partialorder %v18986_v0, 0.0 }
 0x2fe   : > { %v4436_v15 = vmax.f32 %v18978_v47, %v12962_v24  ;;  %v18985_v24 = vld [vmem:[#allocation137_spill] sm:$0xff] }
 0x2ff   : > { %v13458_v7 = vpop.permute.xlu1 %4233  ;;  %v13460_v28 = vpop.permute.xlu0 %4231  ;;  %v3932_v47 = vmul.f32 0.2, %v18985_v24  ;;  %vm3838_vm12 = vcmp.ge.f32.partialorder %v18985_v24, 0.0 }
 0x300   : > { %18972 = vst [vmem:[#allocation133_spill] sm:$0xff] %v13458_v7  ;;  %18973 = vst [vmem:[#allocation134_spill] sm:$0xff] %v13460_v28  ;;  %v18980_v28 = vld [vmem:[#allocation107_spill] sm:$0xff]  ;;  %v13485_v54 = vmax.f32 %v4436_v15, %v18981_v6 }
 0x301   : > { %4281 = vrot.lane.b32.xlu1 %v13463_v38, %s11463_s30  ;;  %4279 = vrot.lane.b32.xlu0 %v13466_v53, %s11463_s30  ;;  %v4435_v1 = vmax.f32 %v18980_v28, %v18979_v16  ;;  %v3931_v16 = vmul.f32 0.2, %v18986_v0  ;;  %v13507_v6 = vsel %vm3838_vm12, %v18985_v24, %v3932_v47  ;;  %v18995_v24 = vld [vmem:[#allocation166_spill] sm:$0xff] }
 0x302   : > { %18982 = vst [vmem:[#allocation155_spill] sm:$0xff] %v13485_v54  ;;  %18988 = vst [vmem:[#allocation137_spill] sm:$0xff] %v13507_v6 }
 0x303   : > { %v13472_v60 = vpop.permute.xlu1 %4609  ;;  %v13474_v3 = vpop.permute.xlu0 %4607  ;;  %v13488_v7 = vmax.f32 %v4435_v1, %v18983_v33  ;;  %v13510_v33 = vsel %vm3837_vm13, %v18986_v0, %v3931_v16 }
 0x304   : > { %18976 = vst [vmem:[#allocation220_spill] sm:$0xff] %v13472_v60  ;;  %18977 = vst [vmem:[#allocation221_spill] sm:$0xff] %v13474_v3 }
 0x305   : > { %4657 = vrot.lane.b32.xlu1 %v13463_v38, %s11462_s9  ;;  %4655 = vrot.lane.b32.xlu0 %v13466_v53, %s11462_s9  ;;  %18984 = vst [vmem:[#allocation157_spill] sm:$0xff] %v13488_v7  ;;  %18989 = vst [vmem:[#allocation140_spill] sm:$0xff] %v13510_v33  ;;  %v18993_v38 = vld [vmem:[#allocation109_spill] sm:$0xff] }
 0x306   : > { %v4437_v47 = vmax.f32 %v18993_v38, %v12998_v25 }
 0x307   : > { %v13490_v60 = vpop.permute.xlu1 %4237  ;;  %v13492_v3 = vpop.permute.xlu0 %4235 }
 0x308   : > { %v13532_v16 = vmax.f32 %v4437_v47, %v18995_v24 }
 0x309   : > { %5575 = vrot.lane.b32.xlu1 %v13485_v54, %s11464_s7  ;;  %5573 = vrot.lane.b32.xlu0 %v13488_v7, %s11464_s7  ;;  %v18992_v7 = vld [vmem:[#allocation108_spill] sm:$0xff] }
 0x30a   : > { %v4438_v53 = vmax.f32 %v18992_v7, %v12996_v14  ;;  %18996 = vst [vmem:[#allocation166_spill] sm:$0xff] %v13532_v16  ;;  %v18997_v14 = vld [vmem:[#allocation143_spill] sm:$0xff] }
 0x30b   : > { %v13502_v15 = vpop.permute.xlu1 %4613  ;;  %v13504_v1 = vpop.permute.xlu0 %4611  ;;  %v3934_v7 = vmul.f32 0.2, %v18997_v14  ;;  %vm3840_vm14 = vcmp.ge.f32.partialorder %v18997_v14, 0.0 }
 0x30c   : > { %18987 = vst [vmem:[#allocation158_spill] sm:$0xff] %v13504_v1  ;;  %v13529_v0 = vmax.f32 %v4438_v53, %v13012_v34  ;;  %v18998_v1 = vld [vmem:[#allocation146_spill] sm:$0xff] }
 0x30d   : > { %4285 = vrot.lane.b32.xlu1 %v13507_v6, %s11463_s30  ;;  %4283 = vrot.lane.b32.xlu0 %v13510_v33, %s11463_s30  ;;  %v3933_v25 = vmul.f32 0.2, %v18998_v1  ;;  %vm3839_vm15 = vcmp.ge.f32.partialorder %v18998_v1, 0.0  ;;  %v13551_v47 = vsel %vm3840_vm14, %v18997_v14, %v3934_v7  ;;  %v19009_v14 = vld [vmem:[#allocation173_spill] sm:$0xff] }
 0x30e   : > { %18994 = vst [vmem:[#allocation224_spill] sm:$0xff] %v13529_v0  ;;  %19001 = vst [vmem:[#allocation225_spill] sm:$0xff] %v13551_v47 }
 0x30f   : > { %v13516_v54 = vpop.permute.xlu1 %4241  ;;  %v13518_v28 = vpop.permute.xlu0 %4239  ;;  %v13554_v24 = vsel %vm3839_vm15, %v18998_v1, %v3933_v25 }
 0x310   : > { %18990 = vst [vmem:[#allocation222_spill] sm:$0xff] %v13516_v54  ;;  %18991 = vst [vmem:[#allocation223_spill] sm:$0xff] %v13518_v28 }
 0x311   : > { %4661 = vrot.lane.b32.xlu1 %v13507_v6, %s11462_s9  ;;  %4659 = vrot.lane.b32.xlu0 %v13510_v33, %s11462_s9  ;;  %19002 = vst [vmem:[#allocation226_spill] sm:$0xff] %v13554_v24  ;;  %v19006_v6 = vld [vmem:[#allocation171_spill] sm:$0xff] }
 0x313   : > { %v13534_v54 = vpop.permute.xlu1 %4617  ;;  %v13536_v28 = vpop.permute.xlu0 %4615 }
 0x315   : > { %5579 = vrot.lane.b32.xlu1 %v13529_v0, %s11464_s7  ;;  %5577 = vrot.lane.b32.xlu0 %v13532_v16, %s11464_s7  ;;  %v19005_v16 = vld [vmem:[#allocation110_spill] sm:$0xff] }
 0x316   : > { %v4440_v33 = vmax.f32 %v19005_v16, %v13030_v45  ;;  %v19011_v45 = vld [vmem:[#allocation147_spill] sm:$0xff] }
 0x317   : > { %v13546_v34 = vpop.permute.xlu1 %4245  ;;  %v13548_v53 = vpop.permute.xlu0 %4243  ;;  %v3936_v16 = vmul.f32 0.2, %v19011_v45  ;;  %vm3842_vm0 = vcmp.ge.f32.partialorder %v19011_v45, 0.0 }
 0x318   : > { %18999 = vst [vmem:[#allocation143_spill] sm:$0xff] %v13546_v34  ;;  %19000 = vst [vmem:[#allocation146_spill] sm:$0xff] %v13548_v53  ;;  %v19007_v53 = vld [vmem:[#allocation111_spill] sm:$0xff]  ;;  %v13573_v1 = vmax.f32 %v4440_v33, %v13044_v52  ;;  %v19012_v34 = vld [vmem:[#allocation148_spill] sm:$0xff] }
 0x319   : > { %4289 = vrot.lane.b32.xlu1 %v13551_v47, %s11463_s30  ;;  %4287 = vrot.lane.b32.xlu0 %v13554_v24, %s11463_s30  ;;  %v4439_v7 = vmax.f32 %v19007_v53, %v19006_v6  ;;  %v3935_v6 = vmul.f32 0.2, %v19012_v34  ;;  %vm3841_vm2 = vcmp.ge.f32.partialorder %v19012_v34, 0.0 }
 0x31a   : > { %19008 = vst [vmem:[#allocation171_spill] sm:$0xff] %v13573_v1 }
 0x31b   : > { %v13560_v0 = vpop.permute.xlu1 %4621  ;;  %v13562_v38 = vpop.permute.xlu0 %4619  ;;  %v13576_v25 = vmax.f32 %v4439_v7, %v19009_v14  ;;  %v13595_v7 = vsel %vm3842_vm0, %v19011_v45, %v3936_v16  ;;  %v13598_v14 = vsel %vm3841_vm2, %v19012_v34, %v3935_v6 }
 0x31c   : > { %19003 = vst [vmem:[#allocation227_spill] sm:$0xff] %v13560_v0  ;;  %19004 = vst [vmem:[#allocation228_spill] sm:$0xff] %v13562_v38 }
 0x31d   : > { %4665 = vrot.lane.b32.xlu1 %v13551_v47, %s11462_s9  ;;  %4663 = vrot.lane.b32.xlu0 %v13554_v24, %s11462_s9  ;;  %19010 = vst [vmem:[#allocation173_spill] sm:$0xff] %v13576_v25  ;;  %19013 = vst [vmem:[#allocation147_spill] sm:$0xff] %v13595_v7  ;;  %v19018_v47 = vld [vmem:[#allocation113_spill] sm:$0xff] }
 0x31e   : > { %19014 = vst [vmem:[#allocation148_spill] sm:$0xff] %v13598_v14  ;;  %v4441_v16 = vmax.f32 %v19018_v47, %v13066_v26 }
 0x31f   : > { %v13578_v0 = vpop.permute.xlu1 %4249  ;;  %v13580_v38 = vpop.permute.xlu0 %4247 }
 0x320   : > { %v13620_v45 = vmax.f32 %v4441_v16, %v13082_v36 }
 0x321   : > { %5583 = vrot.lane.b32.xlu1 %v13573_v1, %s11464_s7  ;;  %5581 = vrot.lane.b32.xlu0 %v13576_v25, %s11464_s7  ;;  %v19017_v25 = vld [vmem:[#allocation112_spill] sm:$0xff] }
 0x322   : > { %v4442_v24 = vmax.f32 %v19017_v25, %v13064_v11  ;;  %19020 = vst [vmem:[#allocation232_spill] sm:$0xff] %v13620_v45  ;;  %v19021_v11 = vld [vmem:[#allocation149_spill] sm:$0xff] }
 0x323   : > { %v13590_v52 = vpop.permute.xlu1 %4625  ;;  %v13592_v33 = vpop.permute.xlu0 %4623  ;;  %v3938_v25 = vmul.f32 0.2, %v19021_v11  ;;  %vm3844_vm3 = vcmp.ge.f32.partialorder %v19021_v11, 0.0 }
 0x324   : > { %v13617_v34 = vmax.f32 %v4442_v24, %v13080_v32 }
 0x325   : > { %4293 = vrot.lane.b32.xlu1 %v13595_v7, %s11463_s30  ;;  %4291 = vrot.lane.b32.xlu0 %v13598_v14, %s11463_s30  ;;  %v13639_v24 = vsel %vm3844_vm3, %v19021_v11, %v3938_v25 }
 0x326   : > { %19019 = vst [vmem:[#allocation231_spill] sm:$0xff] %v13617_v34  ;;  %19023 = vst [vmem:[#allocation149_spill] sm:$0xff] %v13639_v24 }
 0x327   : > { %v13604_v1 = vpop.permute.xlu1 %4253  ;;  %v13606_v53 = vpop.permute.xlu0 %4251 }
 0x328   : > { %19015 = vst [vmem:[#allocation229_spill] sm:$0xff] %v13604_v1  ;;  %19016 = vst [vmem:[#allocation230_spill] sm:$0xff] %v13606_v53  ;;  %v19022_v1 = vld [vmem:[#allocation151_spill] sm:$0xff] }
 0x329   : > { %4669 = vrot.lane.b32.xlu1 %v13595_v7, %s11462_s9  ;;  %4667 = vrot.lane.b32.xlu0 %v13598_v14, %s11462_s9  ;;  %v3937_v26 = vmul.f32 0.2, %v19022_v1  ;;  %vm3843_vm4 = vcmp.ge.f32.partialorder %v19022_v1, 0.0  ;;  %v19028_v7 = vld [vmem:[#allocation115_spill] sm:$0xff] }
 0x32a   : > { %v4443_v25 = vmax.f32 %v19028_v7, %v13098_v43 }
 0x32b   : > { %v13622_v6 = vpop.permute.xlu1 %4629  ;;  %v13624_v53 = vpop.permute.xlu0 %4627  ;;  %v13642_v16 = vsel %vm3843_vm4, %v19022_v1, %v3937_v26 }
 0x32c   : > { %19024 = vst [vmem:[#allocation151_spill] sm:$0xff] %v13642_v16  ;;  %v13664_v11 = vmax.f32 %v4443_v25, %v13110_v63 }
 0x32d   : > { %5587 = vrot.lane.b32.xlu1 %v13617_v34, %s11464_s7  ;;  %5585 = vrot.lane.b32.xlu0 %v13620_v45, %s11464_s7  ;;  %v19027_v45 = vld [vmem:[#allocation114_spill] sm:$0xff] }
 0x32e   : > { %v4444_v14 = vmax.f32 %v19027_v45, %v13096_v46  ;;  %19030 = vst [vmem:[#allocation236_spill] sm:$0xff] %v13664_v11  ;;  %v19031_v46 = vld [vmem:[#allocation154_spill] sm:$0xff] }
 0x32f   : > { %v13634_v32 = vpop.permute.xlu1 %4257  ;;  %v13636_v36 = vpop.permute.xlu0 %4255  ;;  %v3940_v45 = vmul.f32 0.2, %v19031_v46  ;;  %vm3846_vm5 = vcmp.ge.f32.partialorder %v19031_v46, 0.0 }
 0x330   : > { %v13661_v1 = vmax.f32 %v4444_v14, %v13108_v19 }
 0x331   : > { %4297 = vrot.lane.b32.xlu1 %v13639_v24, %s11463_s30  ;;  %4295 = vrot.lane.b32.xlu0 %v13642_v16, %s11463_s30  ;;  %v13683_v14 = vsel %vm3846_vm5, %v19031_v46, %v3940_v45 }
 0x332   : > { %19029 = vst [vmem:[#allocation235_spill] sm:$0xff] %v13661_v1  ;;  %19035 = vst [vmem:[#allocation237_spill] sm:$0xff] %v13683_v14 }
 0x333   : > { %v13648_v34 = vpop.permute.xlu1 %4633  ;;  %v13650_v47 = vpop.permute.xlu0 %4631 }
 0x334   : > { %19025 = vst [vmem:[#allocation233_spill] sm:$0xff] %v13648_v34  ;;  %19026 = vst [vmem:[#allocation234_spill] sm:$0xff] %v13650_v47  ;;  %v19032_v34 = vld [vmem:[#allocation156_spill] sm:$0xff] }
 0x335   : > { %4673 = vrot.lane.b32.xlu1 %v13639_v24, %s11462_s9  ;;  %4671 = vrot.lane.b32.xlu0 %v13642_v16, %s11462_s9  ;;  %v3939_v43 = vmul.f32 0.2, %v19032_v34  ;;  %vm3845_vm6 = vcmp.ge.f32.partialorder %v19032_v34, 0.0  ;;  %v19038_v24 = vld [vmem:[#allocation117_spill] sm:$0xff] }
 0x336   : > { %v4445_v45 = vmax.f32 %v19038_v24, %v13124_v17 }
 0x337   : > { %v13666_v26 = vpop.permute.xlu1 %4261  ;;  %v13668_v47 = vpop.permute.xlu0 %4259  ;;  %v13686_v25 = vsel %vm3845_vm6, %v19032_v34, %v3939_v43 }
 0x338   : > { %19036 = vst [vmem:[#allocation238_spill] sm:$0xff] %v13686_v25  ;;  %v13708_v46 = vmax.f32 %v4445_v45, %v13136_v8 }
 0x339   : > { %5591 = vrot.lane.b32.xlu1 %v13661_v1, %s11464_s7  ;;  %5589 = vrot.lane.b32.xlu0 %v13664_v11, %s11464_s7  ;;  %v19037_v11 = vld [vmem:[#allocation116_spill] sm:$0xff] }
 0x33a   : > { %v4446_v16 = vmax.f32 %v19037_v11, %v13122_v4  ;;  %19040 = vst [vmem:[#allocation240_spill] sm:$0xff] %v13708_v46  ;;  %v19041_v4 = vld [vmem:[#allocation159_spill] sm:$0xff] }
 0x33b   : > { %v13678_v19 = vpop.permute.xlu1 %4637  ;;  %v13680_v63 = vpop.permute.xlu0 %4635  ;;  %v3942_v11 = vmul.f32 0.2, %v19041_v4  ;;  %vm3848_vm7 = vcmp.ge.f32.partialorder %v19041_v4, 0.0 }
 0x33c   : > { %19033 = vst [vmem:[#allocation154_spill] sm:$0xff] %v13678_v19  ;;  %19034 = vst [vmem:[#allocation156_spill] sm:$0xff] %v13680_v63  ;;  %v13705_v34 = vmax.f32 %v4446_v16, %v13134_v39  ;;  %v19042_v19 = vld [vmem:[#allocation162_spill] sm:$0xff] }
 0x33d   : > { %4301 = vrot.lane.b32.xlu1 %v13683_v14, %s11463_s30  ;;  %4299 = vrot.lane.b32.xlu0 %v13686_v25, %s11463_s30  ;;  %v3941_v17 = vmul.f32 0.2, %v19042_v19  ;;  %vm3847_vm8 = vcmp.ge.f32.partialorder %v19042_v19, 0.0  ;;  %v13727_v16 = vsel %vm3848_vm7, %v19041_v4, %v3942_v11 }
 0x33e   : > { %19039 = vst [vmem:[#allocation239_spill] sm:$0xff] %v13705_v34  ;;  %19043 = vst [vmem:[#allocation159_spill] sm:$0xff] %v13727_v16 }
 0x33f   : > { %v13692_v1 = vpop.permute.xlu1 %5555  ;;  %v13694_v7 = vpop.permute.xlu0 %5553  ;;  %v13730_v45 = vsel %vm3847_vm8, %v19042_v19, %v3941_v17 }
 0x340   : > { %19044 = vst [vmem:[#allocation162_spill] sm:$0xff] %v13730_v45 }
 0x341   : > { %4677 = vrot.lane.b32.xlu1 %v13683_v14, %s11462_s9  ;;  %4675 = vrot.lane.b32.xlu0 %v13686_v25, %s11462_s9  ;;  %v19048_v14 = vld [vmem:[#allocation119_spill] sm:$0xff] }
 0x342   : > { %v4447_v11 = vmax.f32 %v19048_v14, %v13150_v30 }
 0x343   : > { %v13710_v43 = vpop.permute.xlu1 %4265  ;;  %v13712_v63 = vpop.permute.xlu0 %4263 }
 0x344   : > { %v13752_v4 = vmax.f32 %v4447_v11, %v13162_v22 }
 0x345   : > { %5595 = vrot.lane.b32.xlu1 %v13705_v34, %s11464_s7  ;;  %5593 = vrot.lane.b32.xlu0 %v13708_v46, %s11464_s7  ;;  %v19047_v46 = vld [vmem:[#allocation118_spill] sm:$0xff] }
 0x346   : > { %v4448_v25 = vmax.f32 %v19047_v46, %v13148_v5  ;;  %19050 = vst [vmem:[#allocation244_spill] sm:$0xff] %v13752_v4  ;;  %v19051_v5 = vld [vmem:[#allocation163_spill] sm:$0xff] }
 0x347   : > { %v13722_v39 = vpop.permute.xlu1 %4641  ;;  %v13724_v8 = vpop.permute.xlu0 %4639  ;;  %v3944_v46 = vmul.f32 0.2, %v19051_v5  ;;  %vm3850_vm9 = vcmp.ge.f32.partialorder %v19051_v5, 0.0 }
 0x348   : > { %v13749_v19 = vmax.f32 %v4448_v25, %v13160_v10 }
 0x349   : > { %4305 = vrot.lane.b32.xlu1 %v13727_v16, %s11463_s30  ;;  %4303 = vrot.lane.b32.xlu0 %v13730_v45, %s11463_s30  ;;  %v13771_v25 = vsel %vm3850_vm9, %v19051_v5, %v3944_v46  ;;  %v19063_v5 = vld [vmem:[#allocation191_spill] sm:$0xff] }
 0x34a   : > { %19049 = vst [vmem:[#allocation243_spill] sm:$0xff] %v13749_v19  ;;  %19055 = vst [vmem:[#allocation245_spill] sm:$0xff] %v13771_v25 }
 0x34b   : > { %v13736_v34 = vpop.permute.xlu1 %5559  ;;  %v13738_v24 = vpop.permute.xlu0 %5557 }
 0x34c   : > { %19045 = vst [vmem:[#allocation241_spill] sm:$0xff] %v13736_v34  ;;  %19046 = vst [vmem:[#allocation242_spill] sm:$0xff] %v13738_v24  ;;  %v19052_v34 = vld [vmem:[#allocation164_spill] sm:$0xff] }
 0x34d   : > { %4681 = vrot.lane.b32.xlu1 %v13727_v16, %s11462_s9  ;;  %4679 = vrot.lane.b32.xlu0 %v13730_v45, %s11462_s9  ;;  %v3943_v30 = vmul.f32 0.2, %v19052_v34  ;;  %vm3849_vm10 = vcmp.ge.f32.partialorder %v19052_v34, 0.0  ;;  %v19060_v16 = vld [vmem:[#allocation190_spill] sm:$0xff] }
 0x34f   : > { %v13754_v17 = vpop.permute.xlu1 %4269  ;;  %v13756_v24 = vpop.permute.xlu0 %4267  ;;  %v13774_v11 = vsel %vm3849_vm10, %v19052_v34, %v3943_v30 }
 0x350   : > { %19056 = vst [vmem:[#allocation246_spill] sm:$0xff] %v13774_v11 }
 0x351   : > { %5599 = vrot.lane.b32.xlu1 %v13749_v19, %s11464_s7  ;;  %5597 = vrot.lane.b32.xlu0 %v13752_v4, %s11464_s7  ;;  %v19059_v4 = vld [vmem:[#allocation120_spill] sm:$0xff] }
 0x352   : > { %v4450_v45 = vmax.f32 %v19059_v4, %v13174_v44  ;;  %v19065_v44 = vld [vmem:[#allocation165_spill] sm:$0xff] }
 0x353   : > { %v13766_v10 = vpop.permute.xlu1 %4645  ;;  %v13768_v22 = vpop.permute.xlu0 %4643  ;;  %v3946_v4 = vmul.f32 0.2, %v19065_v44  ;;  %vm3852_vm11 = vcmp.ge.f32.partialorder %v19065_v44, 0.0 }
 0x354   : > { %19053 = vst [vmem:[#allocation163_spill] sm:$0xff] %v13766_v10  ;;  %19054 = vst [vmem:[#allocation164_spill] sm:$0xff] %v13768_v22  ;;  %v19061_v22 = vld [vmem:[#allocation121_spill] sm:$0xff]  ;;  %v13793_v34 = vmax.f32 %v4450_v45, %v13186_v61  ;;  %v19066_v10 = vld [vmem:[#allocation167_spill] sm:$0xff] }
 0x355   : > { %4309 = vrot.lane.b32.xlu1 %v13771_v25, %s11463_s30  ;;  %4307 = vrot.lane.b32.xlu0 %v13774_v11, %s11463_s30  ;;  %v4449_v46 = vmax.f32 %v19061_v22, %v19060_v16  ;;  %v3945_v16 = vmul.f32 0.2, %v19066_v10  ;;  %vm3851_vm12 = vcmp.ge.f32.partialorder %v19066_v10, 0.0 }
 0x356   : > { %19062 = vst [vmem:[#allocation190_spill] sm:$0xff] %v13793_v34 }
 0x357   : > { %v13780_v19 = vpop.permute.xlu1 %5563  ;;  %v13782_v14 = vpop.permute.xlu0 %5561  ;;  %v13796_v30 = vmax.f32 %v4449_v46, %v19063_v5  ;;  %v13815_v46 = vsel %vm3852_vm11, %v19065_v44, %v3946_v4  ;;  %v13818_v5 = vsel %vm3851_vm12, %v19066_v10, %v3945_v16  ;;  %v19077_v44 = vld [vmem:[#allocation195_spill] sm:$0xff] }
 0x358   : > { %19057 = vst [vmem:[#allocation247_spill] sm:$0xff] %v13780_v19  ;;  %19058 = vst [vmem:[#allocation248_spill] sm:$0xff] %v13782_v14 }
 0x359   : > { %4685 = vrot.lane.b32.xlu1 %v13771_v25, %s11462_s9  ;;  %4683 = vrot.lane.b32.xlu0 %v13774_v11, %s11462_s9  ;;  %19064 = vst [vmem:[#allocation191_spill] sm:$0xff] %v13796_v30  ;;  %19069 = vst [vmem:[#allocation249_spill] sm:$0xff] %v13815_v46  ;;  %v19074_v25 = vld [vmem:[#allocation194_spill] sm:$0xff] }
 0x35a   : > { %19070 = vst [vmem:[#allocation250_spill] sm:$0xff] %v13818_v5 }
 0x35b   : > { %v13798_v19 = vpop.permute.xlu1 %4273  ;;  %v13800_v14 = vpop.permute.xlu0 %4271 }
 0x35d   : > { %5603 = vrot.lane.b32.xlu1 %v13793_v34, %s11464_s7  ;;  %5601 = vrot.lane.b32.xlu0 %v13796_v30, %s11464_s7  ;;  %v19073_v30 = vld [vmem:[#allocation122_spill] sm:$0xff] }
 0x35e   : > { %v4452_v11 = vmax.f32 %v19073_v30, %v13200_v27  ;;  %v19079_v27 = vld [vmem:[#allocation170_spill] sm:$0xff] }
 0x35f   : > { %v13810_v61 = vpop.permute.xlu1 %4649  ;;  %v13812_v45 = vpop.permute.xlu0 %4647  ;;  %v3948_v30 = vmul.f32 0.2, %v19079_v27  ;;  %vm3854_vm13 = vcmp.ge.f32.partialorder %v19079_v27, 0.0 }
 0x360   : > { %19067 = vst [vmem:[#allocation165_spill] sm:$0xff] %v13810_v61  ;;  %19068 = vst [vmem:[#allocation167_spill] sm:$0xff] %v13812_v45  ;;  %v19075_v45 = vld [vmem:[#allocation123_spill] sm:$0xff]  ;;  %v13837_v10 = vmax.f32 %v4452_v11, %v13212_v2  ;;  %v19080_v61 = vld [vmem:[#allocation172_spill] sm:$0xff] }
 0x361   : > { %4313 = vrot.lane.b32.xlu1 %v13815_v46, %s11463_s30  ;;  %4311 = vrot.lane.b32.xlu0 %v13818_v5, %s11463_s30  ;;  %v4451_v4 = vmax.f32 %v19075_v45, %v19074_v25  ;;  %v3947_v25 = vmul.f32 0.2, %v19080_v61  ;;  %vm3853_vm14 = vcmp.ge.f32.partialorder %v19080_v61, 0.0 }
 0x362   : > { %19076 = vst [vmem:[#allocation194_spill] sm:$0xff] %v13837_v10 }
 0x363   : > { %v13824_v34 = vpop.permute.xlu1 %5567  ;;  %v13826_v22 = vpop.permute.xlu0 %5565  ;;  %v13840_v16 = vmax.f32 %v4451_v4, %v19077_v44  ;;  %v13859_v4 = vsel %vm3854_vm13, %v19079_v27, %v3948_v30  ;;  %v13862_v44 = vsel %vm3853_vm14, %v19080_v61, %v3947_v25  ;;  %v19088_v61 = vld [vmem:[#allocation198_spill] sm:$0xff] }
 0x364   : > { %19071 = vst [vmem:[#allocation251_spill] sm:$0xff] %v13824_v34  ;;  %19072 = vst [vmem:[#allocation252_spill] sm:$0xff] %v13826_v22 }
 0x365   : > { %4689 = vrot.lane.b32.xlu1 %v13815_v46, %s11462_s9  ;;  %4687 = vrot.lane.b32.xlu0 %v13818_v5, %s11462_s9  ;;  %19078 = vst [vmem:[#allocation195_spill] sm:$0xff] %v13840_v16  ;;  %19082 = vst [vmem:[#allocation172_spill] sm:$0xff] %v13859_v4  ;;  %v19087_v46 = vld [vmem:[#allocation125_spill] sm:$0xff] }
 0x366   : > { %19083 = vst [vmem:[#allocation253_spill] sm:$0xff] %v13862_v44  ;;  %v4453_v30 = vmax.f32 %v19087_v46, %v13228_v35 }
 0x367   : > { %v13842_v34 = vpop.permute.xlu1 %4277  ;;  %v13844_v22 = vpop.permute.xlu0 %4275 }
 0x368   : > { %v13884_v25 = vmax.f32 %v4453_v30, %v13240_v57 }
 0x369   : > { %5607 = vrot.lane.b32.xlu1 %v13837_v10, %s11464_s7  ;;  %5605 = vrot.lane.b32.xlu0 %v13840_v16, %s11464_s7  ;;  %v19086_v16 = vld [vmem:[#allocation124_spill] sm:$0xff] }
 0x36a   : > { %v4454_v5 = vmax.f32 %v19086_v16, %v13226_v20  ;;  %19090 = vst [vmem:[#allocation256_spill] sm:$0xff] %v13884_v25  ;;  %v19091_v20 = vld [vmem:[#allocation174_spill] sm:$0xff] }
 0x36b   : > { %v13854_v2 = vpop.permute.xlu1 %4653  ;;  %v13856_v11 = vpop.permute.xlu0 %4651  ;;  %v3950_v16 = vmul.f32 0.2, %v19091_v20  ;;  %vm3856_vm15 = vcmp.ge.f32.partialorder %v19091_v20, 0.0 }
 0x36c   : > { %19081 = vst [vmem:[#allocation170_spill] sm:$0xff] %v13856_v11  ;;  %v13881_v27 = vmax.f32 %v4454_v5, %v19088_v61  ;;  %v19092_v11 = vld [vmem:[#allocation177_spill] sm:$0xff] }
 0x36d   : > { %4317 = vrot.lane.b32.xlu1 %v13859_v4, %s11463_s30  ;;  %4315 = vrot.lane.b32.xlu0 %v13862_v44, %s11463_s30  ;;  %v3949_v35 = vmul.f32 0.2, %v19092_v11  ;;  %vm3855_vm0 = vcmp.ge.f32.partialorder %v19092_v11, 0.0  ;;  %v13903_v30 = vsel %vm3856_vm15, %v19091_v20, %v3950_v16 }
 0x36e   : > { %19089 = vst [vmem:[#allocation198_spill] sm:$0xff] %v13881_v27  ;;  %19093 = vst [vmem:[#allocation174_spill] sm:$0xff] %v13903_v30 }
 0x36f   : > { %v13868_v10 = vpop.permute.xlu1 %5571  ;;  %v13870_v45 = vpop.permute.xlu0 %5569  ;;  %v13906_v61 = vsel %vm3855_vm0, %v19092_v11, %v3949_v35 }
 0x370   : > { %19084 = vst [vmem:[#allocation254_spill] sm:$0xff] %v13868_v10  ;;  %19085 = vst [vmem:[#allocation255_spill] sm:$0xff] %v13870_v45 }
 0x371   : > { %4693 = vrot.lane.b32.xlu1 %v13859_v4, %s11462_s9  ;;  %4691 = vrot.lane.b32.xlu0 %v13862_v44, %s11462_s9  ;;  %19094 = vst [vmem:[#allocation177_spill] sm:$0xff] %v13906_v61  ;;  %v19098_v4 = vld [vmem:[#allocation127_spill] sm:$0xff] }
 0x372   : > { %v4455_v16 = vmax.f32 %v19098_v4, %v13256_v42 }
 0x373   : > { %v13886_v10 = vpop.permute.xlu1 %4281  ;;  %v13888_v45 = vpop.permute.xlu0 %4279 }
 0x374   : > { %v13928_v20 = vmax.f32 %v4455_v16, %v13272_v49 }
 0x375   : > { %5611 = vrot.lane.b32.xlu1 %v13881_v27, %s11464_s7  ;;  %5609 = vrot.lane.b32.xlu0 %v13884_v25, %s11464_s7  ;;  %v19097_v25 = vld [vmem:[#allocation126_spill] sm:$0xff] }
 0x376   : > { %v4456_v44 = vmax.f32 %v19097_v25, %v13254_v31  ;;  %19100 = vst [vmem:[#allocation260_spill] sm:$0xff] %v13928_v20  ;;  %v19101_v31 = vld [vmem:[#allocation178_spill] sm:$0xff] }
 0x377   : > { %v13898_v57 = vpop.permute.xlu1 %4657  ;;  %v13900_v5 = vpop.permute.xlu0 %4655  ;;  %v3952_v25 = vmul.f32 0.2, %v19101_v31  ;;  %vm3858_vm2 = vcmp.ge.f32.partialorder %v19101_v31, 0.0 }
 0x378   : > { %v13925_v11 = vmax.f32 %v4456_v44, %v13270_v62 }
 0x379   : > { %4321 = vrot.lane.b32.xlu1 %v13903_v30, %s11463_s30  ;;  %4319 = vrot.lane.b32.xlu0 %v13906_v61, %s11463_s30  ;;  %v13947_v44 = vsel %vm3858_vm2, %v19101_v31, %v3952_v25 }
 0x37a   : > { %19099 = vst [vmem:[#allocation259_spill] sm:$0xff] %v13925_v11  ;;  %19103 = vst [vmem:[#allocation178_spill] sm:$0xff] %v13947_v44 }
 0x37b   : > { %v13912_v27 = vpop.permute.xlu1 %5575  ;;  %v13914_v46 = vpop.permute.xlu0 %5573 }
 0x37c   : > { %19095 = vst [vmem:[#allocation257_spill] sm:$0xff] %v13912_v27  ;;  %19096 = vst [vmem:[#allocation258_spill] sm:$0xff] %v13914_v46  ;;  %v19102_v27 = vld [vmem:[#allocation179_spill] sm:$0xff] }
 0x37d   : > { %4697 = vrot.lane.b32.xlu1 %v13903_v30, %s11462_s9  ;;  %4695 = vrot.lane.b32.xlu0 %v13906_v61, %s11462_s9  ;;  %v3951_v42 = vmul.f32 0.2, %v19102_v27  ;;  %vm3857_vm3 = vcmp.ge.f32.partialorder %v19102_v27, 0.0  ;;  %v19108_v30 = vld [vmem:[#allocation130_spill] sm:$0xff] }
 0x37e   : > { %v4457_v25 = vmax.f32 %v19108_v30, %v13284_v9 }
 0x37f   : > { %v13930_v35 = vpop.permute.xlu1 %4285  ;;  %v13932_v46 = vpop.permute.xlu0 %4283  ;;  %v13950_v16 = vsel %vm3857_vm3, %v19102_v27, %v3951_v42 }
 0x380   : > { %19104 = vst [vmem:[#allocation179_spill] sm:$0xff] %v13950_v16  ;;  %v13972_v31 = vmax.f32 %v4457_v25, %v13300_v18 }
 0x381   : > { %5615 = vrot.lane.b32.xlu1 %v13925_v11, %s11464_s7  ;;  %5613 = vrot.lane.b32.xlu0 %v13928_v20, %s11464_s7  ;;  %v19107_v20 = vld [vmem:[#allocation129_spill] sm:$0xff] }
 0x382   : > { %v4458_v61 = vmax.f32 %v19107_v20, %v13282_v48  ;;  %19110 = vst [vmem:[#allocation264_spill] sm:$0xff] %v13972_v31  ;;  %v19111_v48 = vld [vmem:[#allocation180_spill] sm:$0xff] }
 0x383   : > { %v13942_v62 = vpop.permute.xlu1 %4661  ;;  %v13944_v49 = vpop.permute.xlu0 %4659  ;;  %v3954_v20 = vmul.f32 0.2, %v19111_v48  ;;  %vm3860_vm4 = vcmp.ge.f32.partialorder %v19111_v48, 0.0 }
 0x384   : > { %v13969_v27 = vmax.f32 %v4458_v61, %v13298_v21 }
 0x385   : > { %4325 = vrot.lane.b32.xlu1 %v13947_v44, %s11463_s30  ;;  %4323 = vrot.lane.b32.xlu0 %v13950_v16, %s11463_s30  ;;  %v13991_v61 = vsel %vm3860_vm4, %v19111_v48, %v3954_v20 }
 0x386   : > { %19109 = vst [vmem:[#allocation263_spill] sm:$0xff] %v13969_v27  ;;  %19113 = vst [vmem:[#allocation180_spill] sm:$0xff] %v13991_v61 }
 0x387   : > { %v13956_v11 = vpop.permute.xlu1 %5579  ;;  %v13958_v4 = vpop.permute.xlu0 %5577 }
 0x388   : > { %19105 = vst [vmem:[#allocation261_spill] sm:$0xff] %v13956_v11  ;;  %19106 = vst [vmem:[#allocation262_spill] sm:$0xff] %v13958_v4  ;;  %v19112_v11 = vld [vmem:[#allocation181_spill] sm:$0xff] }
 0x389   : > { %4701 = vrot.lane.b32.xlu1 %v13947_v44, %s11462_s9  ;;  %4699 = vrot.lane.b32.xlu0 %v13950_v16, %s11462_s9  ;;  %v3953_v9 = vmul.f32 0.2, %v19112_v11  ;;  %vm3859_vm5 = vcmp.ge.f32.partialorder %v19112_v11, 0.0  ;;  %v19117_v44 = vld [vmem:[#allocation136_spill] sm:$0xff] }
 0x38a   : > { %v4459_v20 = vmax.f32 %v19117_v44, %v13316_v29  ;;  %v19121_v29 = vld [vmem:[#allocation145_spill] sm:$0xff] }
 0x38b   : > { %v13974_v42 = vpop.permute.xlu1 %4289  ;;  %v13976_v4 = vpop.permute.xlu0 %4287  ;;  %v13994_v25 = vsel %vm3859_vm5, %v19112_v11, %v3953_v9  ;;  %v4461_v44 = vmax.f32 %v19121_v29, %v13342_v51  ;;  %v19125_v51 = vld [vmem:[#allocation128_spill] sm:$0xff]  ;;  %v19126_v29 = vld [vmem:[#allocation153_spill] sm:$0xff] }
 0x38c   : > { %19114 = vst [vmem:[#allocation181_spill] sm:$0xff] %v13994_v25  ;;  %v14016_v48 = vmax.f32 %v4459_v20, %v13328_v55 }
 0x38d   : > { %5619 = vrot.lane.b32.xlu1 %v13969_v27, %s11464_s7  ;;  %5617 = vrot.lane.b32.xlu0 %v13972_v31, %s11464_s7  ;;  %v19116_v31 = vld [vmem:[#allocation135_spill] sm:$0xff]  ;;  %v14034_v55 = vmax.f32 %v4461_v44, %v13360_v59  ;;  %v19129_v59 = vld [vmem:[#allocation214_spill] sm:$0xff] }
 0x38e   : > { %v4460_v16 = vmax.f32 %v19116_v31, %v13314_v56  ;;  %19119 = vst [vmem:[#allocation267_spill] sm:$0xff] %v14016_v48  ;;  %v19120_v56 = vld [vmem:[#allocation144_spill] sm:$0xff] }
 0x38f   : > { %v13986_v18 = vpop.permute.xlu1 %4665  ;;  %v13988_v21 = vpop.permute.xlu0 %4663  ;;  %v4462_v31 = vmax.f32 %v19120_v56, %v13340_v37  ;;  %19123 = vst [vmem:[#allocation269_spill] sm:$0xff] %v14034_v55  ;;  %v19124_v37 = vld [vmem:[#allocation152_spill] sm:$0xff] }
 0x390   : > { %v14013_v11 = vmax.f32 %v4460_v16, %v13326_v41  ;;  %v4464_v56 = vmax.f32 %v19124_v37, %v13370_v12  ;;  %v19132_v12 = vld [vmem:[#allocation160_spill] sm:$0xff] }
 0x391   : > { %4329 = vrot.lane.b32.xlu1 %v13991_v61, %s11463_s30  ;;  %4327 = vrot.lane.b32.xlu0 %v13994_v25, %s11463_s30  ;;  %v14031_v41 = vmax.f32 %v4462_v31, %v13358_v23  ;;  %v19127_v23 = vld [vmem:[#allocation213_spill] sm:$0xff]  ;;  %v4466_v37 = vmax.f32 %v19132_v12, %v13402_v13  ;;  %v19137_v13 = vld [vmem:[#allocation132_spill] sm:$0xff] }
 0x392   : > { %19118 = vst [vmem:[#allocation266_spill] sm:$0xff] %v14013_v11  ;;  %v14049_v31 = vmax.f32 %v4464_v56, %v19127_v23 }
 0x393   : > { %v14000_v27 = vpop.permute.xlu1 %5583  ;;  %v14002_v30 = vpop.permute.xlu0 %5581  ;;  %19122 = vst [vmem:[#allocation268_spill] sm:$0xff] %v14031_v41  ;;  %v14067_v56 = vmax.f32 %v4466_v37, %v13414_v58 }
 0x394   : > { %19115 = vst [vmem:[#allocation265_spill] sm:$0xff] %v14002_v30  ;;  %19128 = vst [vmem:[#allocation128_spill] sm:$0xff] %v14049_v31 }
 0x395   : > { %4705 = vrot.lane.b32.xlu1 %v13991_v61, %s11462_s9  ;;  %4703 = vrot.lane.b32.xlu0 %v13994_v25, %s11462_s9  ;;  %v4463_v25 = vmax.f32 %v19126_v29, %v19125_v51  ;;  %v19133_v51 = vld [vmem:[#allocation161_spill] sm:$0xff]  ;;  %19134 = vst [vmem:[#allocation270_spill] sm:$0xff] %v14067_v56 }
 0x396   : > { %v4465_v29 = vmax.f32 %v19133_v51, %v13404_v40  ;;  %v19139_v40 = vld [vmem:[#allocation215_spill] sm:$0xff]  ;;  %v19140_v51 = vld [vmem:[#allocation169_spill] sm:$0xff] }
 0x397   : > { %v14018_v9 = vpop.permute.xlu1 %4293  ;;  %v14020_v30 = vpop.permute.xlu0 %4291  ;;  %v14052_v44 = vmax.f32 %v4463_v25, %v19129_v59  ;;  %v19135_v25 = vld [vmem:[#allocation141_spill] sm:$0xff]  ;;  %v4467_v61 = vmax.f32 %v19140_v51, %v19139_v40  ;;  %v19146_v40 = vld [vmem:[#allocation134_spill] sm:$0xff]  ;;  %v19147_v51 = vld [vmem:[#allocation176_spill] sm:$0xff] }
 0x398   : > { %v14070_v23 = vmax.f32 %v4465_v29, %v19135_v25  ;;  %v19142_v29 = vld [vmem:[#allocation217_spill] sm:$0xff] }
 0x399   : > { %5623 = vrot.lane.b32.xlu1 %v14013_v11, %s11464_s7  ;;  %5621 = vrot.lane.b32.xlu0 %v14016_v48, %s11464_s7  ;;  %19130 = vst [vmem:[#allocation213_spill] sm:$0xff] %v14052_v44  ;;  %v14088_v37 = vmax.f32 %v4467_v61, %v19142_v29  ;;  %v19150_v61 = vld [vmem:[#allocation221_spill] sm:$0xff] }
 0x39a   : > { %19136 = vst [vmem:[#allocation141_spill] sm:$0xff] %v14070_v23 }
 0x39b   : > { %v14036_v16 = vpop.permute.xlu1 %4669  ;;  %v14038_v20 = vpop.permute.xlu0 %4667  ;;  %19143 = vst [vmem:[#allocation215_spill] sm:$0xff] %v14088_v37 }
 0x39d   : > { %5627 = vrot.lane.b32.xlu1 %v14031_v41, %s11464_s7  ;;  %5625 = vrot.lane.b32.xlu0 %v14034_v55, %s11464_s7  ;;  %v19138_v41 = vld [vmem:[#allocation168_spill] sm:$0xff] }
 0x39e   : > { %v4468_v12 = vmax.f32 %v19138_v41, %v19137_v13  ;;  %v19144_v13 = vld [vmem:[#allocation133_spill] sm:$0xff] }
 0x39f   : > { %v14054_v48 = vpop.permute.xlu1 %5587  ;;  %v14056_v11 = vpop.permute.xlu0 %5585 }
 0x3a0   : > { %19131 = vst [vmem:[#allocation214_spill] sm:$0xff] %v14056_v11  ;;  %v14085_v58 = vmax.f32 %v4468_v12, %v13446_v50  ;;  %v4469_v11 = vmax.f32 %v19147_v51, %v19146_v40  ;;  %v19148_v50 = vld [vmem:[#allocation220_spill] sm:$0xff]  ;;  %v19154_v40 = vld [vmem:[#allocation183_spill] sm:$0xff] }
 0x3a1   : > { %5631 = vrot.lane.b32.xlu1 %v14049_v31, %s11464_s7  ;;  %5629 = vrot.lane.b32.xlu0 %v14052_v44, %s11464_s7  ;;  %v19145_v31 = vld [vmem:[#allocation175_spill] sm:$0xff]  ;;  %v4471_v51 = vmax.f32 %v19154_v40, %v13492_v3  ;;  %v19161_v40 = vld [vmem:[#allocation185_spill] sm:$0xff] }
 0x3a2   : > { %19141 = vst [vmem:[#allocation132_spill] sm:$0xff] %v14085_v58  ;;  %v4470_v41 = vmax.f32 %v19145_v31, %v19144_v13  ;;  %v14106_v29 = vmax.f32 %v4469_v11, %v19150_v61  ;;  %v19153_v13 = vld [vmem:[#allocation182_spill] sm:$0xff]  ;;  %v19160_v3 = vld [vmem:[#allocation223_spill] sm:$0xff] }
 0x3a3   : > { %v14072_v59 = vpop.permute.xlu1 %4297  ;;  %v14074_v55 = vpop.permute.xlu0 %4295  ;;  %v4472_v31 = vmax.f32 %v19153_v13, %v13490_v60  ;;  %v19156_v11 = vld [vmem:[#allocation158_spill] sm:$0xff] }
 0x3a4   : > { %v14103_v12 = vmax.f32 %v4470_v41, %v19148_v50  ;;  %19151 = vst [vmem:[#allocation133_spill] sm:$0xff] %v14106_v29  ;;  %v14124_v50 = vmax.f32 %v4471_v51, %v19156_v11  ;;  %v19158_v60 = vld [vmem:[#allocation222_spill] sm:$0xff] }
 0x3a5   : > { %5635 = vrot.lane.b32.xlu1 %v14067_v56, %s11464_s7  ;;  %5633 = vrot.lane.b32.xlu0 %v14070_v23, %s11464_s7  ;;  %v14121_v41 = vmax.f32 %v4472_v31, %v13502_v15 }
 0x3a6   : > { %19149 = vst [vmem:[#allocation217_spill] sm:$0xff] %v14103_v12  ;;  %19157 = vst [vmem:[#allocation221_spill] sm:$0xff] %v14124_v50 }
 0x3a7   : > { %v14090_v25 = vpop.permute.xlu1 %4673  ;;  %v14092_v44 = vpop.permute.xlu0 %4671  ;;  %19155 = vst [vmem:[#allocation220_spill] sm:$0xff] %v14121_v41 }
 0x3a9   : > { %5639 = vrot.lane.b32.xlu1 %v14085_v58, %s11464_s7  ;;  %5637 = vrot.lane.b32.xlu0 %v14088_v37, %s11464_s7  ;;  %v19159_v58 = vld [vmem:[#allocation184_spill] sm:$0xff] }
 0x3aa   : > { %v4474_v13 = vmax.f32 %v19159_v58, %v19158_v60  ;;  %v19164_v60 = vld [vmem:[#allocation143_spill] sm:$0xff] }
 0x3ab   : > { %v14108_v23 = vpop.permute.xlu1 %5591  ;;  %v14110_v56 = vpop.permute.xlu0 %5589 }
 0x3ac   : > { %19152 = vst [vmem:[#allocation134_spill] sm:$0xff] %v14110_v56  ;;  %v4473_v56 = vmax.f32 %v19161_v40, %v19160_v3  ;;  %v14139_v15 = vmax.f32 %v4474_v13, %v13534_v54  ;;  %v19166_v3 = vld [vmem:[#allocation146_spill] sm:$0xff]  ;;  %v19167_v40 = vld [vmem:[#allocation187_spill] sm:$0xff] }
 0x3ad   : > { %5643 = vrot.lane.b32.xlu1 %v14103_v12, %s11464_s7  ;;  %5641 = vrot.lane.b32.xlu0 %v14106_v29, %s11464_s7  ;;  %v19165_v29 = vld [vmem:[#allocation186_spill] sm:$0xff]  ;;  %v4475_v58 = vmax.f32 %v19167_v40, %v19166_v3  ;;  %v19168_v54 = vld [vmem:[#allocation227_spill] sm:$0xff]  ;;  %v19173_v3 = vld [vmem:[#allocation189_spill] sm:$0xff] }
 0x3ae   : > { %19162 = vst [vmem:[#allocation158_spill] sm:$0xff] %v14139_v15  ;;  %v14142_v31 = vmax.f32 %v4473_v56, %v13536_v28  ;;  %v4476_v12 = vmax.f32 %v19165_v29, %v19164_v60  ;;  %v19170_v28 = vld [vmem:[#allocation228_spill] sm:$0xff]  ;;  %v4477_v40 = vmax.f32 %v19173_v3, %v13580_v38  ;;  %v19178_v38 = vld [vmem:[#allocation230_spill] sm:$0xff]  ;;  %v19179_v3 = vld [vmem:[#allocation193_spill] sm:$0xff] }
 0x3af   : > { %v14126_v61 = vpop.permute.xlu1 %4301  ;;  %v14128_v37 = vpop.permute.xlu0 %4299  ;;  %v14160_v56 = vmax.f32 %v4475_v58, %v19170_v28  ;;  %v19172_v60 = vld [vmem:[#allocation188_spill] sm:$0xff] }
 0x3b0   : > { %19163 = vst [vmem:[#allocation222_spill] sm:$0xff] %v14142_v31  ;;  %v14157_v13 = vmax.f32 %v4476_v12, %v19168_v54  ;;  %v4478_v29 = vmax.f32 %v19172_v60, %v13578_v0  ;;  %v14178_v58 = vmax.f32 %v4477_v40, %v13592_v33  ;;  %v19176_v0 = vld [vmem:[#allocation229_spill] sm:$0xff]  ;;  %v4479_v60 = vmax.f32 %v19179_v3, %v19178_v38 }
 0x3b1   : > { %5647 = vrot.lane.b32.xlu1 %v14121_v41, %s11464_s7  ;;  %5645 = vrot.lane.b32.xlu0 %v14124_v50, %s11464_s7  ;;  %19171 = vst [vmem:[#allocation143_spill] sm:$0xff] %v14160_v56  ;;  %v19183_v38 = vld [vmem:[#allocation197_spill] sm:$0xff] }
 0x3b2   : > { %19169 = vst [vmem:[#allocation223_spill] sm:$0xff] %v14157_v13  ;;  %v14175_v12 = vmax.f32 %v4478_v29, %v13590_v52  ;;  %19175 = vst [vmem:[#allocation227_spill] sm:$0xff] %v14178_v58  ;;  %v14196_v33 = vmax.f32 %v4479_v60, %v13624_v53  ;;  %v19186_v53 = vld [vmem:[#allocation234_spill] sm:$0xff] }
 0x3b3   : > { %v14144_v51 = vpop.permute.xlu1 %4677  ;;  %v14146_v11 = vpop.permute.xlu0 %4675 }
 0x3b4   : > { %19174 = vst [vmem:[#allocation146_spill] sm:$0xff] %v14175_v12  ;;  %19181 = vst [vmem:[#allocation229_spill] sm:$0xff] %v14196_v33 }
 0x3b5   : > { %5651 = vrot.lane.b32.xlu1 %v14139_v15, %s11464_s7  ;;  %5649 = vrot.lane.b32.xlu0 %v14142_v31, %s11464_s7  ;;  %v19177_v31 = vld [vmem:[#allocation192_spill] sm:$0xff] }
 0x3b6   : > { %v4480_v15 = vmax.f32 %v19177_v31, %v19176_v0  ;;  %v19182_v0 = vld [vmem:[#allocation196_spill] sm:$0xff] }
 0x3b7   : > { %v14162_v50 = vpop.permute.xlu1 %5595  ;;  %v14164_v41 = vpop.permute.xlu0 %5593 }
 0x3b8   : > { %v14193_v52 = vmax.f32 %v4480_v15, %v13622_v6  ;;  %v19184_v6 = vld [vmem:[#allocation233_spill] sm:$0xff] }
 0x3b9   : > { %5655 = vrot.lane.b32.xlu1 %v14157_v13, %s11464_s7  ;;  %5653 = vrot.lane.b32.xlu0 %v14160_v56, %s11464_s7  ;;  %v4482_v56 = vmax.f32 %v19182_v0, %v13634_v32  ;;  %v4481_v13 = vmax.f32 %v19183_v38, %v13636_v36  ;;  %v19188_v32 = vld [vmem:[#allocation199_spill] sm:$0xff]  ;;  %v19189_v36 = vld [vmem:[#allocation200_spill] sm:$0xff] }
 0x3ba   : > { %19180 = vst [vmem:[#allocation228_spill] sm:$0xff] %v14193_v52  ;;  %v4484_v0 = vmax.f32 %v19188_v32, %v13666_v26  ;;  %v4483_v38 = vmax.f32 %v19189_v36, %v13668_v47  ;;  %v19197_v36 = vld [vmem:[#allocation204_spill] sm:$0xff] }
 0x3bb   : > { %v14180_v54 = vpop.permute.xlu1 %4305  ;;  %v14182_v28 = vpop.permute.xlu0 %4303  ;;  %v14211_v15 = vmax.f32 %v4482_v56, %v19184_v6  ;;  %v14214_v60 = vmax.f32 %v4481_v13, %v19186_v53  ;;  %v19191_v13 = vld [vmem:[#allocation97_spill] sm:$0xff]  ;;  %v19192_v6 = vld [vmem:[#allocation154_spill] sm:$0xff] }
 0x3bc   : > { %v5835_v56 = vsub.f32 %v19191_v13, %v13694_v7  ;;  %v14233_v53 = vmax.f32 %v4484_v0, %v19192_v6  ;;  %v19201_v6 = vld [vmem:[#allocation208_spill] sm:$0xff]  ;;  %v19209_v13 = vld [vmem:[#allocation211_spill] sm:$0xff] }
 0x3bd   : > { %5659 = vrot.lane.b32.xlu1 %v14175_v12, %s11464_s7  ;;  %5657 = vrot.lane.b32.xlu0 %v14178_v58, %s11464_s7  ;;  %19185 = vst [vmem:[#allocation230_spill] sm:$0xff] %v14211_v15  ;;  %19187 = vst [vmem:[#allocation233_spill] sm:$0xff] %v14214_v60 }
 0x3be   : > { %19193 = vst [vmem:[#allocation234_spill] sm:$0xff] %v14233_v53  ;;  %v5929_v7 = vmul.f32 1.442695, %v5835_v56 }
 0x3bf   : > { %v14198_v29 = vpop.permute.xlu1 %4681  ;;  %v14200_v40 = vpop.permute.xlu0 %4679 }
 0x3c1   : > { %5663 = vrot.lane.b32.xlu1 %v14193_v52, %s11464_s7  ;;  %5661 = vrot.lane.b32.xlu0 %v14196_v33, %s11464_s7  ;;  %v19190_v52 = vld [vmem:[#allocation96_spill] sm:$0xff] }
 0x3c2   : > { %v5836_v3 = vsub.f32 %v19190_v52, %v13692_v1  ;;  %v19194_v33 = vld [vmem:[#allocation156_spill] sm:$0xff]  ;;  %v19196_v52 = vld [vmem:[#allocation203_spill] sm:$0xff] }
 0x3c3   : > { %v14216_v58 = vpop.permute.xlu1 %5599  ;;  %v14218_v12 = vpop.permute.xlu0 %5597  ;;  %v14236_v26 = vmax.f32 %v4483_v38, %v19194_v33 }
 0x3c4   : > { %v5931_v1 = vmul.f32 1.442695, %v5836_v3 }
 0x3c5   : > { %5667 = vrot.lane.b32.xlu1 %v14211_v15, %s11464_s7  ;;  %5665 = vrot.lane.b32.xlu0 %v14214_v60, %s11464_s7  ;;  %19195 = vst [vmem:[#allocation154_spill] sm:$0xff] %v14236_v26  ;;  %v4486_v15 = vmax.f32 %v19196_v52, %v13710_v43  ;;  %v4485_v60 = vmax.f32 %v19197_v36, %v13712_v63  ;;  %v19200_v63 = vld [vmem:[#allocation207_spill] sm:$0xff]  ;;  %v19223_v36 = vld [vmem:[#allocation142_spill] sm:$0xff] }
 0x3c6   : > { %10702 = vpow2.f32 %v5931_v1  ;;  %v4488_v43 = vmax.f32 %v19200_v63, %v13754_v17  ;;  %v19207_v17 = vld [vmem:[#allocation241_spill] sm:$0xff]  ;;  %v19215_v63 = vld [vmem:[#allocation167_spill] sm:$0xff]  ;;  %v4492_v52 = vmax.f32 %v19223_v36, %v13842_v34 }
 0x3c7   : > { %v14238_v32 = vpop.permute.xlu1 %4309  ;;  %v14240_v47 = vpop.permute.xlu0 %4307  ;;  %v14251_v33 = vmax.f32 %v4486_v15, %v13722_v39  ;;  %v14254_v0 = vmax.f32 %v4485_v60, %v13724_v8  ;;  %10704 = vpow2.f32 %v5929_v7  ;;  %v19202_v39 = vld [vmem:[#allocation163_spill] sm:$0xff]  ;;  %v19204_v15 = vld [vmem:[#allocation164_spill] sm:$0xff] }
 0x3c8   : > { %v14269_v8 = vmax.f32 %v4488_v43, %v19202_v39  ;;  %v19212_v7 = vld [vmem:[#allocation99_spill] sm:$0xff]  ;;  %v19213_v39 = vld [vmem:[#allocation165_spill] sm:$0xff] }
 0x3c9   : > { %5671 = vrot.lane.b32.xlu1 %v14233_v53, %s11464_s7  ;;  %5669 = vrot.lane.b32.xlu0 %v14236_v26, %s11464_s7  ;;  %19198 = vst [vmem:[#allocation156_spill] sm:$0xff] %v14251_v33  ;;  %19199 = vst [vmem:[#allocation271_spill] sm:$0xff] %v14254_v0  ;;  %v4487_v53 = vmax.f32 %v19201_v6, %v13756_v24  ;;  %v19208_v26 = vld [vmem:[#allocation98_spill] sm:$0xff]  ;;  %v19210_v6 = vld [vmem:[#allocation212_spill] sm:$0xff] }
 0x3ca   : > { %19203 = vst [vmem:[#allocation163_spill] sm:$0xff] %v14269_v8  ;;  %v5838_v24 = vsub.f32 %v19208_v26, %v19207_v17 }
 0x3cb   : > { %v14256_v3 = vpop.permute.xlu1 %4685  ;;  %v14258_v38 = vpop.permute.xlu0 %4683  ;;  %v14272_v60 = vmax.f32 %v4487_v53, %v19204_v15  ;;  %v19211_v53 = vld [vmem:[#allocation242_spill] sm:$0xff] }
 0x3cc   : > { %v5837_v43 = vsub.f32 %v19212_v7, %v19211_v53  ;;  %v19221_v7 = vld [vmem:[#allocation247_spill] sm:$0xff] }
 0x3cd   : > { %5675 = vrot.lane.b32.xlu1 %v14251_v33, %s11464_s7  ;;  %5673 = vrot.lane.b32.xlu0 %v14254_v0, %s11464_s7  ;;  %19205 = vst [vmem:[#allocation164_spill] sm:$0xff] %v14272_v60  ;;  %v4490_v33 = vmax.f32 %v19209_v13, %v13798_v19  ;;  %v4489_v0 = vmax.f32 %v19210_v6, %v13800_v14  ;;  %v5935_v14 = vmul.f32 1.442695, %v5838_v24  ;;  %v19219_v24 = vld [vmem:[#allocation2_spill] sm:$0xff]  ;;  %v19222_v6 = vld [vmem:[#allocation100_spill] sm:$0xff] }
 0x3ce   : > { %v5840_v13 = vsub.f32 %v19222_v6, %v19221_v7 }
 0x3cf   : > { %v14274_v56 = vpop.permute.xlu1 %5603  ;;  %v14276_v1 = vpop.permute.xlu0 %5601  ;;  %v14291_v15 = vmax.f32 %v4490_v33, %v19213_v39  ;;  %v14294_v17 = vmax.f32 %v4489_v0, %v19215_v63  ;;  %10706 = vpow2.f32 %v5935_v14  ;;  %v19224_v14 = vld [vmem:[#allocation131_spill] sm:$0xff] }
 0x3d0   : > { %19206 = vst [vmem:[#allocation272_spill] sm:$0xff] %v14276_v1  ;;  %v4491_v31 = vmax.f32 %v19224_v14, %v13844_v22  ;;  %v5939_v34 = vmul.f32 1.442695, %v5840_v13  ;;  %v19236_v14 = vld [vmem:[#allocation218_spill] sm:$0xff] }
 0x3d1   : > { %5679 = vrot.lane.b32.xlu1 %v14269_v8, %s11464_s7  ;;  %5677 = vrot.lane.b32.xlu0 %v14272_v60, %s11464_s7  ;;  %19214 = vst [vmem:[#allocation241_spill] sm:$0xff] %v14291_v15  ;;  %19216 = vst [vmem:[#allocation242_spill] sm:$0xff] %v14294_v17  ;;  %v5933_v60 = vmul.f32 1.442695, %v5837_v43  ;;  %v10703_v8 = vpop.eup %10702  ;;  %v4494_v36 = vmax.f32 %v19236_v14, %v13886_v10 }
 0x3d2   : > { %v10705_v39 = vpop.eup %10704 }
 0x3d3   : > { %v14296_v26 = vpop.permute.xlu1 %4313  ;;  %v14298_v19 = vpop.permute.xlu0 %4311  ;;  %10708 = vpow2.f32 %v5933_v60  ;;  %v19225_v60 = vld [vmem:[#allocation248_spill] sm:$0xff] }
 0x3d4   : > { %10710 = vpow2.f32 %v5939_v34  ;;  %v19237_v34 = vld [vmem:[#allocation219_spill] sm:$0xff] }
 0x3d5   : > { %5683 = vrot.lane.b32.xlu1 %v14291_v15, %s11464_s7  ;;  %5681 = vrot.lane.b32.xlu0 %v14294_v17, %s11464_s7  ;;  %v6588_v15 = vmul.f32 %v10703_v8, %v19219_v24  ;;  %v19220_v17 = vld [vmem:[#allocation3_spill] sm:$0xff]  ;;  %v4493_v1 = vmax.f32 %v19237_v34, %v13888_v45 }
 0x3d6   : > { %v6587_v43 = vmul.f32 %v10705_v39, %v19220_v17 }
 0x3d7   : > { %v14304_v53 = vpop.permute.xlu1 %4689  ;;  %v14306_v33 = vpop.permute.xlu0 %4687 }
 0x3d9   : > { %6213 = vrot.lane.b32.xlu1 %v10703_v8, %s11463_s30  ;;  %6211 = vrot.lane.b32.xlu0 %v10705_v39, %s11463_s30  ;;  %v14327_v8 = vmax.f32 %v4492_v52, %v13854_v2  ;;  %v19228_v39 = vld [vmem:[#allocation170_spill] sm:$0xff] }
 0x3da   : > { %v14330_v17 = vmax.f32 %v4491_v31, %v19228_v39 }
 0x3db   : > { %v14310_v0 = vpop.permute.xlu1 %5607  ;;  %v14312_v63 = vpop.permute.xlu0 %5605  ;;  %19227 = vst [vmem:[#allocation247_spill] sm:$0xff] %v14327_v8 }
 0x3dc   : > { %19217 = vst [vmem:[#allocation165_spill] sm:$0xff] %v14310_v0  ;;  %19218 = vst [vmem:[#allocation167_spill] sm:$0xff] %v14312_v63  ;;  %v19226_v0 = vld [vmem:[#allocation101_spill] sm:$0xff] }
 0x3dd   : > { %6777 = vrot.lane.b32.xlu1 %v6588_v15, %s11463_s30  ;;  %6775 = vrot.lane.b32.xlu0 %v6587_v43, %s11463_s30  ;;  %v5839_v63 = vsub.f32 %v19226_v0, %v19225_v60  ;;  %19229 = vst [vmem:[#allocation248_spill] sm:$0xff] %v14330_v17  ;;  %v10707_v15 = vpop.eup %10706  ;;  %v19232_v60 = vld [vmem:[#allocation4_spill] sm:$0xff]  ;;  %v19235_v0 = vld [vmem:[#allocation102_spill] sm:$0xff] }
 0x3de   : > { %v10709_v52 = vpop.eup %10708  ;;  %v6590_v39 = vmul.f32 %v10707_v15, %v19232_v60  ;;  %v19246_v60 = vld [vmem:[#allocation254_spill] sm:$0xff] }
 0x3df   : > { %v14332_v7 = vpop.permute.xlu1 %4317  ;;  %v14334_v24 = vpop.permute.xlu0 %4315  ;;  %v5937_v22 = vmul.f32 1.442695, %v5839_v63 }
 0x3e1   : > { %5687 = vrot.lane.b32.xlu1 %v14327_v8, %s11464_s7  ;;  %5685 = vrot.lane.b32.xlu0 %v14330_v17, %s11464_s7  ;;  %10712 = vpow2.f32 %v5937_v22  ;;  %v19233_v17 = vld [vmem:[#allocation5_spill] sm:$0xff]  ;;  %v19234_v8 = vld [vmem:[#allocation251_spill] sm:$0xff]  ;;  %v19238_v22 = vld [vmem:[#allocation252_spill] sm:$0xff] }
 0x3e2   : > { %v6589_v63 = vmul.f32 %v10709_v52, %v19233_v17  ;;  %v5842_v6 = vsub.f32 %v19235_v0, %v19234_v8 }
 0x3e3   : > { %v14340_v43 = vpop.permute.xlu1 %4693  ;;  %v14342_v2 = vpop.permute.xlu0 %4691 }
 0x3e4   : > { %v5943_v10 = vmul.f32 1.442695, %v5842_v6 }
 0x3e5   : > { %6217 = vrot.lane.b32.xlu1 %v10707_v15, %s11463_s30  ;;  %6215 = vrot.lane.b32.xlu0 %v10709_v52, %s11463_s30  ;;  %v14363_v15 = vmax.f32 %v4494_v36, %v13898_v57  ;;  %v14366_v52 = vmax.f32 %v4493_v1, %v13900_v5  ;;  %v19242_v5 = vld [vmem:[#allocation137_spill] sm:$0xff] }
 0x3e6   : > { %10714 = vpow2.f32 %v5943_v10  ;;  %v4496_v1 = vmax.f32 %v19242_v5, %v13930_v35  ;;  %v19247_v35 = vld [vmem:[#allocation104_spill] sm:$0xff] }
 0x3e7   : > { %v14346_v31 = vpop.permute.xlu1 %5611  ;;  %v14348_v13 = vpop.permute.xlu0 %5609  ;;  %19240 = vst [vmem:[#allocation251_spill] sm:$0xff] %v14363_v15  ;;  %19241 = vst [vmem:[#allocation252_spill] sm:$0xff] %v14366_v52 }
 0x3e8   : > { %19230 = vst [vmem:[#allocation170_spill] sm:$0xff] %v14346_v31  ;;  %19231 = vst [vmem:[#allocation273_spill] sm:$0xff] %v14348_v13  ;;  %v19239_v31 = vld [vmem:[#allocation103_spill] sm:$0xff] }
 0x3e9   : > { %6781 = vrot.lane.b32.xlu1 %v6590_v39, %s11463_s30  ;;  %6779 = vrot.lane.b32.xlu0 %v6589_v63, %s11463_s30  ;;  %v5841_v13 = vsub.f32 %v19239_v31, %v19238_v22  ;;  %v10711_v39 = vpop.eup %10710  ;;  %v19243_v22 = vld [vmem:[#allocation140_spill] sm:$0xff]  ;;  %v5844_v31 = vsub.f32 %v19247_v35, %v19246_v60 }
 0x3ea   : > { %v4495_v6 = vmax.f32 %v19243_v22, %v13932_v46  ;;  %v19248_v46 = vld [vmem:[#allocation255_spill] sm:$0xff] }
 0x3eb   : > { %v14368_v8 = vpop.permute.xlu1 %4321  ;;  %v14370_v17 = vpop.permute.xlu0 %4319  ;;  %v5941_v45 = vmul.f32 1.442695, %v5841_v13  ;;  %v14387_v13 = vmax.f32 %v4496_v1, %v13942_v62  ;;  %v19251_v22 = vld [vmem:[#allocation7_spill] sm:$0xff]  ;;  %v5947_v34 = vmul.f32 1.442695, %v5844_v31 }
 0x3ec   : > { %v10713_v36 = vpop.eup %10712 }
 0x3ed   : > { %5691 = vrot.lane.b32.xlu1 %v14363_v15, %s11464_s7  ;;  %5689 = vrot.lane.b32.xlu0 %v14366_v52, %s11464_s7  ;;  %10716 = vpow2.f32 %v5941_v45  ;;  %19244 = vst [vmem:[#allocation274_spill] sm:$0xff] %v14387_v13  ;;  %v14390_v52 = vmax.f32 %v4495_v6, %v13944_v49  ;;  %v19249_v45 = vld [vmem:[#allocation105_spill] sm:$0xff]  ;;  %v19250_v6 = vld [vmem:[#allocation6_spill] sm:$0xff]  ;;  %v6591_v5 = vmul.f32 %v10713_v36, %v19251_v22 }
 0x3ee   : > { %v5843_v62 = vsub.f32 %v19249_v45, %v19248_v46  ;;  %v6592_v0 = vmul.f32 %v10711_v39, %v19250_v6  ;;  %10718 = vpow2.f32 %v5947_v34  ;;  %v19252_v45 = vld [vmem:[#allocation225_spill] sm:$0xff] }
 0x3ef   : > { %v14376_v63 = vpop.permute.xlu1 %4697  ;;  %v14378_v57 = vpop.permute.xlu0 %4695  ;;  %19245 = vst [vmem:[#allocation275_spill] sm:$0xff] %v14390_v52  ;;  %v4498_v14 = vmax.f32 %v19252_v45, %v13974_v42  ;;  %v19259_v42 = vld [vmem:[#allocation106_spill] sm:$0xff] }
 0x3f0   : > { %v5945_v60 = vmul.f32 1.442695, %v5843_v62 }
 0x3f1   : > { %6221 = vrot.lane.b32.xlu1 %v10711_v39, %s11463_s30  ;;  %6219 = vrot.lane.b32.xlu0 %v10713_v36, %s11463_s30  ;;  %v19253_v39 = vld [vmem:[#allocation226_spill] sm:$0xff] }
 0x3f2   : > { %v4497_v6 = vmax.f32 %v19253_v39, %v13976_v4  ;;  %10720 = vpow2.f32 %v5945_v60  ;;  %v19260_v4 = vld [vmem:[#allocation258_spill] sm:$0xff]  ;;  %v19261_v60 = vld [vmem:[#allocation107_spill] sm:$0xff]  ;;  %v19263_v39 = vld [vmem:[#allocation9_spill] sm:$0xff] }
 0x3f3   : > { %v14392_v15 = vpop.permute.xlu1 %5615  ;;  %v14394_v10 = vpop.permute.xlu0 %5613 }
 0x3f4   : > { %v14426_v31 = vmax.f32 %v4497_v6, %v13988_v21  ;;  %v19262_v6 = vld [vmem:[#allocation8_spill] sm:$0xff] }
 0x3f5   : > { %5695 = vrot.lane.b32.xlu1 %v14387_v13, %s11464_s7  ;;  %5693 = vrot.lane.b32.xlu0 %v14390_v52, %s11464_s7  ;;  %v10715_v13 = vpop.eup %10714 }
 0x3f6   : > { %19255 = vst [vmem:[#allocation255_spill] sm:$0xff] %v14426_v31  ;;  %v6594_v22 = vmul.f32 %v10715_v13, %v19262_v6 }
 0x3f7   : > { %v14404_v1 = vpop.permute.xlu1 %4325  ;;  %v14406_v49 = vpop.permute.xlu0 %4323 }
 0x3f8   : > { %v10717_v46 = vpop.eup %10716 }
 0x3f9   : > { %6785 = vrot.lane.b32.xlu1 %v6592_v0, %s11463_s30  ;;  %6783 = vrot.lane.b32.xlu0 %v6591_v5, %s11463_s30  ;;  %v14423_v0 = vmax.f32 %v4498_v14, %v13986_v18  ;;  %v19258_v5 = vld [vmem:[#allocation257_spill] sm:$0xff]  ;;  %v5845_v18 = vsub.f32 %v19261_v60, %v19260_v4  ;;  %v6593_v45 = vmul.f32 %v10717_v46, %v19263_v39  ;;  %v19264_v60 = vld [vmem:[#allocation147_spill] sm:$0xff] }
 0x3fa   : > { %v5846_v62 = vsub.f32 %v19259_v42, %v19258_v5 }
 0x3fb   : > { %v14412_v35 = vpop.permute.xlu1 %4701  ;;  %v14414_v52 = vpop.permute.xlu0 %4699  ;;  %19254 = vst [vmem:[#allocation254_spill] sm:$0xff] %v14423_v0  ;;  %v5949_v5 = vmul.f32 1.442695, %v5845_v18 }
 0x3fd   : > { %6225 = vrot.lane.b32.xlu1 %v10715_v13, %s11463_s30  ;;  %6223 = vrot.lane.b32.xlu0 %v10717_v46, %s11463_s30  ;;  %v19265_v13 = vld [vmem:[#allocation148_spill] sm:$0xff] }
 0x3fe   : > { %v4499_v6 = vmax.f32 %v19265_v13, %v14020_v30  ;;  %v19271_v30 = vld [vmem:[#allocation262_spill] sm:$0xff]  ;;  %v19275_v13 = vld [vmem:[#allocation11_spill] sm:$0xff] }
 0x3ff   : > { %v14428_v36 = vpop.permute.xlu1 %5619  ;;  %v14430_v34 = vpop.permute.xlu0 %5617 }
 0x400   : > { %19256 = vst [vmem:[#allocation276_spill] sm:$0xff] %v14428_v36  ;;  %19257 = vst [vmem:[#allocation277_spill] sm:$0xff] %v14430_v34  ;;  %v5951_v34 = vmul.f32 1.442695, %v5846_v62  ;;  %v4500_v36 = vmax.f32 %v19264_v60, %v14018_v9  ;;  %v19269_v62 = vld [vmem:[#allocation261_spill] sm:$0xff]  ;;  %v19270_v9 = vld [vmem:[#allocation108_spill] sm:$0xff] }
 0x401   : > { %5699 = vrot.lane.b32.xlu1 %v14423_v0, %s11464_s7  ;;  %5697 = vrot.lane.b32.xlu0 %v14426_v31, %s11464_s7  ;;  %v10719_v0 = vpop.eup %10718  ;;  %v5848_v18 = vsub.f32 %v19270_v9, %v19269_v62 }
 0x402   : > { %v10721_v4 = vpop.eup %10720  ;;  %10722 = vpow2.f32 %v5951_v34 }
 0x403   : > { %v14440_v14 = vpop.permute.xlu1 %4329  ;;  %v14442_v21 = vpop.permute.xlu0 %4327  ;;  %10724 = vpow2.f32 %v5949_v5  ;;  %v19272_v5 = vld [vmem:[#allocation109_spill] sm:$0xff]  ;;  %v6595_v60 = vmul.f32 %v10721_v4, %v19275_v13 }
 0x404   : > { %v19285_v13 = vld [vmem:[#allocation13_spill] sm:$0xff] }
 0x405   : > { %6789 = vrot.lane.b32.xlu1 %v6594_v22, %s11463_s30  ;;  %6787 = vrot.lane.b32.xlu0 %v6593_v45, %s11463_s30  ;;  %v14459_v22 = vmax.f32 %v4500_v36, %v14036_v16  ;;  %v14462_v45 = vmax.f32 %v4499_v6, %v14038_v20  ;;  %v5847_v16 = vsub.f32 %v19272_v5, %v19271_v30  ;;  %v19274_v6 = vld [vmem:[#allocation10_spill] sm:$0xff]  ;;  %v19276_v5 = vld [vmem:[#allocation149_spill] sm:$0xff] }
 0x406   : > { %v6596_v39 = vmul.f32 %v10719_v0, %v19274_v6 }
 0x407   : > { %v14448_v42 = vpop.permute.xlu1 %4705  ;;  %v14450_v31 = vpop.permute.xlu0 %4703  ;;  %19266 = vst [vmem:[#allocation257_spill] sm:$0xff] %v14459_v22  ;;  %19267 = vst [vmem:[#allocation258_spill] sm:$0xff] %v14462_v45  ;;  %v5953_v62 = vmul.f32 1.442695, %v5847_v16  ;;  %v19282_v16 = vld [vmem:[#allocation111_spill] sm:$0xff] }
 0x409   : > { %6229 = vrot.lane.b32.xlu1 %v10719_v0, %s11463_s30  ;;  %6227 = vrot.lane.b32.xlu0 %v10721_v4, %s11463_s30  ;;  %v19277_v0 = vld [vmem:[#allocation151_spill] sm:$0xff] }
 0x40a   : > { %v4501_v6 = vmax.f32 %v19277_v0, %v14074_v55  ;;  %v19281_v55 = vld [vmem:[#allocation265_spill] sm:$0xff] }
 0x40b   : > { %v14464_v46 = vpop.permute.xlu1 %5623  ;;  %v14466_v34 = vpop.permute.xlu0 %5621 }
 0x40c   : > { %19268 = vst [vmem:[#allocation278_spill] sm:$0xff] %v14466_v34  ;;  %v5955_v34 = vmul.f32 1.442695, %v5848_v18 }
 0x40d   : > { %5703 = vrot.lane.b32.xlu1 %v14459_v22, %s11464_s7  ;;  %5701 = vrot.lane.b32.xlu0 %v14462_v45, %s11464_s7  ;;  %v10723_v22 = vpop.eup %10722 }
 0x40e   : > { %v10725_v30 = vpop.eup %10724  ;;  %10726 = vpow2.f32 %v5955_v34 }
 0x40f   : > { %v14476_v36 = vpop.permute.xlu1 %5627  ;;  %v14478_v20 = vpop.permute.xlu0 %5625  ;;  %10728 = vpow2.f32 %v5953_v62  ;;  %v6597_v0 = vmul.f32 %v10725_v30, %v19285_v13  ;;  %v19295_v13 = vld [vmem:[#allocation15_spill] sm:$0xff] }
 0x410   : > { %19273 = vst [vmem:[#allocation261_spill] sm:$0xff] %v14478_v20  ;;  %v4502_v20 = vmax.f32 %v19276_v5, %v14072_v59  ;;  %v19280_v59 = vld [vmem:[#allocation110_spill] sm:$0xff] }
 0x411   : > { %6793 = vrot.lane.b32.xlu1 %v6596_v39, %s11463_s30  ;;  %6791 = vrot.lane.b32.xlu0 %v6595_v60, %s11463_s30  ;;  %v14498_v60 = vmax.f32 %v4501_v6, %v14092_v44  ;;  %v5850_v18 = vsub.f32 %v19280_v59, %v14000_v27  ;;  %v19284_v6 = vld [vmem:[#allocation12_spill] sm:$0xff] }
 0x412   : > { %v14495_v39 = vmax.f32 %v4502_v20, %v14090_v25  ;;  %v5849_v25 = vsub.f32 %v19282_v16, %v19281_v55  ;;  %v6598_v62 = vmul.f32 %v10723_v22, %v19284_v6  ;;  %v19286_v16 = vld [vmem:[#allocation237_spill] sm:$0xff] }
 0x413   : > { %v14484_v9 = vpop.permute.xlu1 %5631  ;;  %v14486_v45 = vpop.permute.xlu0 %5629  ;;  %19279 = vst [vmem:[#allocation279_spill] sm:$0xff] %v14498_v60  ;;  %v5959_v5 = vmul.f32 1.442695, %v5850_v18 }
 0x414   : > { %19278 = vst [vmem:[#allocation262_spill] sm:$0xff] %v14495_v39  ;;  %v5957_v27 = vmul.f32 1.442695, %v5849_v25 }
 0x415   : > { %6233 = vrot.lane.b32.xlu1 %v10723_v22, %s11463_s30  ;;  %6231 = vrot.lane.b32.xlu0 %v10725_v30, %s11463_s30  ;;  %10730 = vpow2.f32 %v5959_v5  ;;  %v19287_v22 = vld [vmem:[#allocation238_spill] sm:$0xff] }
 0x416   : > { %v4503_v6 = vmax.f32 %v19287_v22, %v14128_v37  ;;  %10732 = vpow2.f32 %v5957_v27  ;;  %v19291_v37 = vld [vmem:[#allocation214_spill] sm:$0xff] }
 0x417   : > { %v14500_v4 = vpop.permute.xlu1 %5635  ;;  %v14502_v34 = vpop.permute.xlu0 %5633 }
 0x419   : > { %5707 = vrot.lane.b32.xlu1 %v14495_v39, %s11464_s7  ;;  %5705 = vrot.lane.b32.xlu0 %v14498_v60, %s11464_s7  ;;  %v10727_v39 = vpop.eup %10726 }
 0x41a   : > { %v10729_v55 = vpop.eup %10728 }
 0x41b   : > { %v14512_v20 = vpop.permute.xlu1 %5639  ;;  %v14514_v44 = vpop.permute.xlu0 %5637  ;;  %v6599_v22 = vmul.f32 %v10729_v55, %v19295_v13  ;;  %v19305_v13 = vld [vmem:[#allocation17_spill] sm:$0xff] }
 0x41c   : > { %19283 = vst [vmem:[#allocation265_spill] sm:$0xff] %v14514_v44  ;;  %v4504_v44 = vmax.f32 %v19286_v16, %v14126_v61  ;;  %v19290_v61 = vld [vmem:[#allocation112_spill] sm:$0xff] }
 0x41d   : > { %6797 = vrot.lane.b32.xlu1 %v6598_v62, %s11463_s30  ;;  %6795 = vrot.lane.b32.xlu0 %v6597_v0, %s11463_s30  ;;  %v14534_v0 = vmax.f32 %v4503_v6, %v14146_v11  ;;  %v5852_v25 = vsub.f32 %v19290_v61, %v14054_v48  ;;  %v19292_v62 = vld [vmem:[#allocation113_spill] sm:$0xff]  ;;  %v19294_v6 = vld [vmem:[#allocation14_spill] sm:$0xff] }
 0x41e   : > { %v14531_v30 = vmax.f32 %v4504_v44, %v14144_v51  ;;  %v5851_v51 = vsub.f32 %v19292_v62, %v19291_v37  ;;  %v6600_v27 = vmul.f32 %v10727_v39, %v19294_v6  ;;  %v19296_v62 = vld [vmem:[#allocation159_spill] sm:$0xff] }
 0x41f   : > { %v14520_v59 = vpop.permute.xlu1 %5643  ;;  %v14522_v60 = vpop.permute.xlu0 %5641  ;;  %19289 = vst [vmem:[#allocation281_spill] sm:$0xff] %v14534_v0  ;;  %v5963_v16 = vmul.f32 1.442695, %v5852_v25 }
 0x420   : > { %19288 = vst [vmem:[#allocation280_spill] sm:$0xff] %v14531_v30  ;;  %v5961_v48 = vmul.f32 1.442695, %v5851_v51 }
 0x421   : > { %6237 = vrot.lane.b32.xlu1 %v10727_v39, %s11463_s30  ;;  %6235 = vrot.lane.b32.xlu0 %v10729_v55, %s11463_s30  ;;  %10734 = vpow2.f32 %v5963_v16  ;;  %v19297_v39 = vld [vmem:[#allocation162_spill] sm:$0xff] }
 0x422   : > { %v4505_v6 = vmax.f32 %v19297_v39, %v14182_v28  ;;  %10736 = vpow2.f32 %v5961_v48  ;;  %v19301_v28 = vld [vmem:[#allocation134_spill] sm:$0xff] }
 0x423   : > { %v14536_v18 = vpop.permute.xlu1 %5647  ;;  %v14538_v5 = vpop.permute.xlu0 %5645 }
 0x425   : > { %5711 = vrot.lane.b32.xlu1 %v14531_v30, %s11464_s7  ;;  %5709 = vrot.lane.b32.xlu0 %v14534_v0, %s11464_s7  ;;  %v10731_v30 = vpop.eup %10730 }
 0x426   : > { %v10733_v37 = vpop.eup %10732 }
 0x427   : > { %v14548_v44 = vpop.permute.xlu1 %5651  ;;  %v14550_v11 = vpop.permute.xlu0 %5649  ;;  %v6601_v39 = vmul.f32 %v10733_v37, %v19305_v13 }
 0x428   : > { %19293 = vst [vmem:[#allocation214_spill] sm:$0xff] %v14550_v11  ;;  %v4506_v11 = vmax.f32 %v19296_v62, %v14180_v54  ;;  %v19300_v54 = vld [vmem:[#allocation114_spill] sm:$0xff] }
 0x429   : > { %6801 = vrot.lane.b32.xlu1 %v6600_v27, %s11463_s30  ;;  %6799 = vrot.lane.b32.xlu0 %v6599_v22, %s11463_s30  ;;  %v14570_v22 = vmax.f32 %v4505_v6, %v14200_v40  ;;  %v5854_v51 = vsub.f32 %v19300_v54, %v14108_v23  ;;  %v19302_v27 = vld [vmem:[#allocation115_spill] sm:$0xff]  ;;  %v19304_v6 = vld [vmem:[#allocation16_spill] sm:$0xff] }
 0x42a   : > { %v14567_v55 = vmax.f32 %v4506_v11, %v14198_v29  ;;  %v5853_v29 = vsub.f32 %v19302_v27, %v19301_v28  ;;  %v6602_v48 = vmul.f32 %v10731_v30, %v19304_v6  ;;  %v19306_v27 = vld [vmem:[#allocation245_spill] sm:$0xff] }
 0x42b   : > { %v14556_v61 = vpop.permute.xlu1 %5655  ;;  %v14558_v0 = vpop.permute.xlu0 %5653  ;;  %19299 = vst [vmem:[#allocation283_spill] sm:$0xff] %v14570_v22  ;;  %v5967_v62 = vmul.f32 1.442695, %v5854_v51 }
 0x42c   : > { %19298 = vst [vmem:[#allocation282_spill] sm:$0xff] %v14567_v55  ;;  %v5965_v23 = vmul.f32 1.442695, %v5853_v29 }
 0x42d   : > { %6241 = vrot.lane.b32.xlu1 %v10731_v30, %s11463_s30  ;;  %6239 = vrot.lane.b32.xlu0 %v10733_v37, %s11463_s30  ;;  %10738 = vpow2.f32 %v5967_v62  ;;  %v19307_v30 = vld [vmem:[#allocation246_spill] sm:$0xff] }
 0x42e   : > { %v4507_v6 = vmax.f32 %v19307_v30, %v14240_v47  ;;  %10740 = vpow2.f32 %v5965_v23  ;;  %v19311_v47 = vld [vmem:[#allocation117_spill] sm:$0xff]  ;;  %v19313_v23 = vld [vmem:[#allocation19_spill] sm:$0xff] }
 0x42f   : > { %v14572_v25 = vpop.permute.xlu1 %5659  ;;  %v14574_v16 = vpop.permute.xlu0 %5657 }
 0x431   : > { %5715 = vrot.lane.b32.xlu1 %v14567_v55, %s11464_s7  ;;  %5713 = vrot.lane.b32.xlu0 %v14570_v22, %s11464_s7  ;;  %v10735_v55 = vpop.eup %10734 }
 0x432   : > { %v10737_v28 = vpop.eup %10736 }
 0x433   : > { %v14584_v11 = vpop.permute.xlu1 %5663  ;;  %v14586_v40 = vpop.permute.xlu0 %5661  ;;  %v6603_v13 = vmul.f32 %v10737_v28, %v19313_v23 }
 0x434   : > { %19303 = vst [vmem:[#allocation134_spill] sm:$0xff] %v14586_v40  ;;  %v4508_v40 = vmax.f32 %v19306_v27, %v14238_v32  ;;  %v19310_v32 = vld [vmem:[#allocation116_spill] sm:$0xff] }
 0x435   : > { %6805 = vrot.lane.b32.xlu1 %v6602_v48, %s11463_s30  ;;  %6803 = vrot.lane.b32.xlu0 %v6601_v39, %s11463_s30  ;;  %v14606_v39 = vmax.f32 %v4507_v6, %v14258_v38  ;;  %v5856_v29 = vsub.f32 %v19310_v32, %v14162_v50  ;;  %v19312_v6 = vld [vmem:[#allocation18_spill] sm:$0xff] }
 0x436   : > { %v14603_v37 = vmax.f32 %v4508_v40, %v14256_v3  ;;  %v5855_v3 = vsub.f32 %v19311_v47, %v14164_v41  ;;  %v6604_v48 = vmul.f32 %v10735_v55, %v19312_v6  ;;  %v19314_v47 = vld [vmem:[#allocation249_spill] sm:$0xff] }
 0x437   : > { %v14592_v54 = vpop.permute.xlu1 %5667  ;;  %v14594_v22 = vpop.permute.xlu0 %5665  ;;  %19309 = vst [vmem:[#allocation285_spill] sm:$0xff] %v14606_v39  ;;  %v5971_v30 = vmul.f32 1.442695, %v5856_v29  ;;  %v4510_v27 = vmax.f32 %v19314_v47, %v14296_v26  ;;  %v19318_v26 = vld [vmem:[#allocation118_spill] sm:$0xff] }
 0x438   : > { %19308 = vst [vmem:[#allocation284_spill] sm:$0xff] %v14603_v37  ;;  %v5969_v50 = vmul.f32 1.442695, %v5855_v3  ;;  %v5858_v3 = vsub.f32 %v19318_v26, %v14216_v58 }
 0x439   : > { %6245 = vrot.lane.b32.xlu1 %v10735_v55, %s11463_s30  ;;  %6243 = vrot.lane.b32.xlu0 %v10737_v28, %s11463_s30  ;;  %10742 = vpow2.f32 %v5971_v30  ;;  %v19315_v55 = vld [vmem:[#allocation250_spill] sm:$0xff] }
 0x43a   : > { %v4509_v6 = vmax.f32 %v19315_v55, %v14298_v19  ;;  %10744 = vpow2.f32 %v5969_v50  ;;  %v19319_v19 = vld [vmem:[#allocation119_spill] sm:$0xff]  ;;  %v19323_v50 = vld [vmem:[#allocation21_spill] sm:$0xff]  ;;  %v5975_v55 = vmul.f32 1.442695, %v5858_v3 }
 0x43b   : > { %v14608_v51 = vpop.permute.xlu1 %5671  ;;  %v14610_v62 = vpop.permute.xlu0 %5669 }
 0x43c   : > { %v14642_v28 = vmax.f32 %v4509_v6, %v14306_v33  ;;  %v19322_v6 = vld [vmem:[#allocation20_spill] sm:$0xff]  ;;  %10746 = vpow2.f32 %v5975_v55 }
 0x43d   : > { %5719 = vrot.lane.b32.xlu1 %v14603_v37, %s11464_s7  ;;  %5717 = vrot.lane.b32.xlu0 %v14606_v39, %s11464_s7  ;;  %v10739_v37 = vpop.eup %10738 }
 0x43e   : > { %v10741_v41 = vpop.eup %10740  ;;  %19317 = vst [vmem:[#allocation287_spill] sm:$0xff] %v14642_v28 }
 0x43f   : > { %v14620_v40 = vpop.permute.xlu1 %5675  ;;  %v14622_v38 = vpop.permute.xlu0 %5673  ;;  %v6605_v23 = vmul.f32 %v10741_v41, %v19323_v50 }
 0x441   : > { %6809 = vrot.lane.b32.xlu1 %v6604_v48, %s11463_s30  ;;  %6807 = vrot.lane.b32.xlu0 %v6603_v13, %s11463_s30  ;;  %v14639_v13 = vmax.f32 %v4510_v27, %v14304_v53  ;;  %v5857_v53 = vsub.f32 %v19319_v19, %v14218_v12  ;;  %v6606_v48 = vmul.f32 %v10739_v37, %v19322_v6 }
 0x443   : > { %v14628_v32 = vpop.permute.xlu1 %5679  ;;  %v14630_v39 = vpop.permute.xlu0 %5677  ;;  %19316 = vst [vmem:[#allocation286_spill] sm:$0xff] %v14639_v13  ;;  %v5973_v58 = vmul.f32 1.442695, %v5857_v53 }
 0x445   : > { %6249 = vrot.lane.b32.xlu1 %v10739_v37, %s11463_s30  ;;  %6247 = vrot.lane.b32.xlu0 %v10741_v41, %s11463_s30  ;;  %v19327_v37 = vld [vmem:[#allocation253_spill] sm:$0xff]  ;;  %10748 = vpow2.f32 %v5973_v58 }
 0x446   : > { %v4511_v6 = vmax.f32 %v19327_v37, %v14334_v24  ;;  %v19331_v24 = vld [vmem:[#allocation272_spill] sm:$0xff] }
 0x447   : > { %v14644_v29 = vpop.permute.xlu1 %5683  ;;  %v14646_v30 = vpop.permute.xlu0 %5681 }
 0x448   : > { %v14678_v41 = vmax.f32 %v4511_v6, %v14342_v2  ;;  %v19335_v6 = vld [vmem:[#allocation22_spill] sm:$0xff] }
 0x449   : > { %5723 = vrot.lane.b32.xlu1 %v14639_v13, %s11464_s7  ;;  %5721 = vrot.lane.b32.xlu0 %v14642_v28, %s11464_s7  ;;  %v10743_v13 = vpop.eup %10742 }
 0x44a   : > { %v10745_v12 = vpop.eup %10744  ;;  %19329 = vst [vmem:[#allocation293_spill] sm:$0xff] %v14678_v41  ;;  %v6608_v58 = vmul.f32 %v10743_v13, %v19335_v6 }
 0x44b   : > { %v14656_v27 = vpop.permute.xlu1 %6213  ;;  %v14658_v33 = vpop.permute.xlu0 %6211 }
 0x44c   : > { %19320 = vst [vmem:[#allocation288_spill] sm:$0xff] %v14656_v27  ;;  %19321 = vst [vmem:[#allocation289_spill] sm:$0xff] %v14658_v33  ;;  %v19326_v27 = vld [vmem:[#allocation172_spill] sm:$0xff] }
 0x44d   : > { %6813 = vrot.lane.b32.xlu1 %v6606_v48, %s11463_s30  ;;  %6811 = vrot.lane.b32.xlu0 %v6605_v23, %s11463_s30  ;;  %v4512_v33 = vmax.f32 %v19326_v27, %v14332_v7  ;;  %v19330_v7 = vld [vmem:[#allocation120_spill] sm:$0xff]  ;;  %v19332_v48 = vld [vmem:[#allocation121_spill] sm:$0xff] }
 0x44e   : > { %v5860_v53 = vsub.f32 %v19330_v7, %v14274_v56 }
 0x44f   : > { %v14664_v26 = vpop.permute.xlu1 %6777  ;;  %v14666_v28 = vpop.permute.xlu0 %6775  ;;  %v14675_v23 = vmax.f32 %v4512_v33, %v14340_v43  ;;  %v5859_v43 = vsub.f32 %v19332_v48, %v19331_v24 }
 0x450   : > { %19324 = vst [vmem:[#allocation290_spill] sm:$0xff] %v14664_v26  ;;  %19325 = vst [vmem:[#allocation291_spill] sm:$0xff] %v14666_v28  ;;  %v19336_v28 = vld [vmem:[#allocation23_spill] sm:$0xff]  ;;  %v5979_v50 = vmul.f32 1.442695, %v5860_v53 }
 0x451   : > { %6253 = vrot.lane.b32.xlu1 %v10743_v13, %s11463_s30  ;;  %6251 = vrot.lane.b32.xlu0 %v10745_v12, %s11463_s30  ;;  %19328 = vst [vmem:[#allocation292_spill] sm:$0xff] %v14675_v23  ;;  %v6607_v26 = vmul.f32 %v10745_v12, %v19336_v28  ;;  %v5977_v56 = vmul.f32 1.442695, %v5859_v43  ;;  %v19340_v13 = vld [vmem:[#allocation177_spill] sm:$0xff] }
 0x452   : > { %10750 = vpow2.f32 %v5979_v50  ;;  %v4513_v6 = vmax.f32 %v19340_v13, %v14370_v17  ;;  %v19343_v43 = vld [vmem:[#allocation165_spill] sm:$0xff]  ;;  %v19345_v17 = vld [vmem:[#allocation167_spill] sm:$0xff] }
 0x453   : > { %v14680_v3 = vpop.permute.xlu1 %5687  ;;  %v14682_v55 = vpop.permute.xlu0 %5685  ;;  %10752 = vpow2.f32 %v5977_v56  ;;  %v19346_v56 = vld [vmem:[#allocation123_spill] sm:$0xff] }
 0x454   : > { %v14714_v12 = vmax.f32 %v4513_v6, %v14378_v57  ;;  %v19349_v6 = vld [vmem:[#allocation24_spill] sm:$0xff] }
 0x455   : > { %5727 = vrot.lane.b32.xlu1 %v14675_v23, %s11464_s7  ;;  %5725 = vrot.lane.b32.xlu0 %v14678_v41, %s11464_s7  ;;  %v10747_v23 = vpop.eup %10746 }
 0x456   : > { %v10749_v24 = vpop.eup %10748  ;;  %19342 = vst [vmem:[#allocation298_spill] sm:$0xff] %v14714_v12 }
 0x457   : > { %v14692_v33 = vpop.permute.xlu1 %6217  ;;  %v14694_v2 = vpop.permute.xlu0 %6215 }
 0x458   : > { %19333 = vst [vmem:[#allocation272_spill] sm:$0xff] %v14692_v33  ;;  %19334 = vst [vmem:[#allocation294_spill] sm:$0xff] %v14694_v2  ;;  %v19339_v33 = vld [vmem:[#allocation174_spill] sm:$0xff] }
 0x459   : > { %6817 = vrot.lane.b32.xlu1 %v6608_v58, %s11463_s30  ;;  %6815 = vrot.lane.b32.xlu0 %v6607_v26, %s11463_s30  ;;  %v4514_v2 = vmax.f32 %v19339_v33, %v14368_v8  ;;  %v19344_v8 = vld [vmem:[#allocation122_spill] sm:$0xff] }
 0x45a   : > { %v5862_v58 = vsub.f32 %v19344_v8, %v19343_v43 }
 0x45b   : > { %v14700_v7 = vpop.permute.xlu1 %6781  ;;  %v14702_v41 = vpop.permute.xlu0 %6779  ;;  %v14711_v26 = vmax.f32 %v4514_v2, %v14376_v63  ;;  %v5861_v63 = vsub.f32 %v19346_v56, %v19345_v17 }
 0x45c   : > { %19337 = vst [vmem:[#allocation295_spill] sm:$0xff] %v14700_v7  ;;  %19338 = vst [vmem:[#allocation296_spill] sm:$0xff] %v14702_v41  ;;  %v6610_v41 = vmul.f32 %v10747_v23, %v19349_v6  ;;  %v19350_v7 = vld [vmem:[#allocation25_spill] sm:$0xff]  ;;  %v5983_v48 = vmul.f32 1.442695, %v5862_v58  ;;  %v19357_v58 = vld [vmem:[#allocation170_spill] sm:$0xff] }
 0x45d   : > { %6257 = vrot.lane.b32.xlu1 %v10747_v23, %s11463_s30  ;;  %6255 = vrot.lane.b32.xlu0 %v10749_v24, %s11463_s30  ;;  %19341 = vst [vmem:[#allocation297_spill] sm:$0xff] %v14711_v26  ;;  %v6609_v28 = vmul.f32 %v10749_v24, %v19350_v7  ;;  %v5981_v43 = vmul.f32 1.442695, %v5861_v63  ;;  %v19352_v23 = vld [vmem:[#allocation179_spill] sm:$0xff] }
 0x45e   : > { %10754 = vpow2.f32 %v5983_v48  ;;  %v4515_v6 = vmax.f32 %v19352_v23, %v14406_v49  ;;  %v19359_v49 = vld [vmem:[#allocation273_spill] sm:$0xff]  ;;  %v19364_v7 = vld [vmem:[#allocation27_spill] sm:$0xff] }
 0x45f   : > { %v14716_v53 = vpop.permute.xlu1 %5691  ;;  %v14718_v50 = vpop.permute.xlu0 %5689  ;;  %10756 = vpow2.f32 %v5981_v43  ;;  %v19360_v43 = vld [vmem:[#allocation125_spill] sm:$0xff] }
 0x461   : > { %5731 = vrot.lane.b32.xlu1 %v14711_v26, %s11464_s7  ;;  %5729 = vrot.lane.b32.xlu0 %v14714_v12, %s11464_s7  ;;  %v10751_v26 = vpop.eup %10750 }
 0x462   : > { %v10753_v17 = vpop.eup %10752 }
 0x463   : > { %v14728_v2 = vpop.permute.xlu1 %6221  ;;  %v14730_v57 = vpop.permute.xlu0 %6219 }
 0x464   : > { %19347 = vst [vmem:[#allocation165_spill] sm:$0xff] %v14728_v2  ;;  %19348 = vst [vmem:[#allocation167_spill] sm:$0xff] %v14730_v57  ;;  %v19351_v2 = vld [vmem:[#allocation178_spill] sm:$0xff] }
 0x465   : > { %6821 = vrot.lane.b32.xlu1 %v6610_v41, %s11463_s30  ;;  %6819 = vrot.lane.b32.xlu0 %v6609_v28, %s11463_s30  ;;  %v4516_v57 = vmax.f32 %v19351_v2, %v14404_v1  ;;  %v14750_v41 = vmax.f32 %v4515_v6, %v14414_v52  ;;  %v19358_v1 = vld [vmem:[#allocation124_spill] sm:$0xff]  ;;  %v19363_v6 = vld [vmem:[#allocation26_spill] sm:$0xff] }
 0x466   : > { %v5864_v63 = vsub.f32 %v19358_v1, %v19357_v58 }
 0x467   : > { %v14736_v8 = vpop.permute.xlu1 %5695  ;;  %v14738_v12 = vpop.permute.xlu0 %5693  ;;  %v14747_v28 = vmax.f32 %v4516_v57, %v14412_v35  ;;  %19354 = vst [vmem:[#allocation300_spill] sm:$0xff] %v14750_v41  ;;  %v5863_v35 = vsub.f32 %v19360_v43, %v19359_v49 }
 0x468   : > { %v5987_v56 = vmul.f32 1.442695, %v5864_v63 }
 0x469   : > { %6261 = vrot.lane.b32.xlu1 %v10751_v26, %s11463_s30  ;;  %6259 = vrot.lane.b32.xlu0 %v10753_v17, %s11463_s30  ;;  %19353 = vst [vmem:[#allocation299_spill] sm:$0xff] %v14747_v28  ;;  %v5985_v58 = vmul.f32 1.442695, %v5863_v35 }
 0x46a   : > { %10758 = vpow2.f32 %v5987_v56 }
 0x46b   : > { %v14752_v24 = vpop.permute.xlu1 %6785  ;;  %v14754_v48 = vpop.permute.xlu0 %6783  ;;  %10760 = vpow2.f32 %v5985_v58 }
 0x46c   : > { %19355 = vst [vmem:[#allocation301_spill] sm:$0xff] %v14752_v24  ;;  %19356 = vst [vmem:[#allocation302_spill] sm:$0xff] %v14754_v48  ;;  %v6612_v24 = vmul.f32 %v10751_v26, %v19363_v6  ;;  %v6611_v48 = vmul.f32 %v10753_v17, %v19364_v7  ;;  %v19366_v26 = vld [vmem:[#allocation180_spill] sm:$0xff]  ;;  %v19367_v17 = vld [vmem:[#allocation181_spill] sm:$0xff] }
 0x46d   : > { %5735 = vrot.lane.b32.xlu1 %v14747_v28, %s11464_s7  ;;  %5733 = vrot.lane.b32.xlu0 %v14750_v41, %s11464_s7  ;;  %v10755_v28 = vpop.eup %10754  ;;  %v4518_v6 = vmax.f32 %v19366_v26, %v14440_v14  ;;  %v4517_v63 = vmax.f32 %v19367_v17, %v14442_v21 }
 0x46e   : > { %v10757_v49 = vpop.eup %10756 }
 0x46f   : > { %v14764_v57 = vpop.permute.xlu1 %6225  ;;  %v14766_v52 = vpop.permute.xlu0 %6223  ;;  %v14787_v35 = vmax.f32 %v4518_v6, %v14448_v42  ;;  %v14790_v56 = vmax.f32 %v4517_v63, %v14450_v31  ;;  %v19375_v42 = vld [vmem:[#allocation28_spill] sm:$0xff]  ;;  %v19376_v31 = vld [vmem:[#allocation29_spill] sm:$0xff] }
 0x470   : > { %19361 = vst [vmem:[#allocation170_spill] sm:$0xff] %v14764_v57  ;;  %19362 = vst [vmem:[#allocation273_spill] sm:$0xff] %v14766_v52  ;;  %v19365_v57 = vld [vmem:[#allocation126_spill] sm:$0xff]  ;;  %v6614_v6 = vmul.f32 %v10755_v28, %v19375_v42  ;;  %v6613_v63 = vmul.f32 %v10757_v49, %v19376_v31  ;;  %v19385_v31 = vld [vmem:[#allocation135_spill] sm:$0xff] }
 0x471   : > { %6825 = vrot.lane.b32.xlu1 %v6612_v24, %s11463_s30  ;;  %6823 = vrot.lane.b32.xlu0 %v6611_v48, %s11463_s30  ;;  %v5866_v52 = vsub.f32 %v19365_v57, %v14392_v15  ;;  %v19368_v24 = vld [vmem:[#allocation127_spill] sm:$0xff]  ;;  %19369 = vst [vmem:[#allocation303_spill] sm:$0xff] %v14787_v35  ;;  %19370 = vst [vmem:[#allocation304_spill] sm:$0xff] %v14790_v56 }
 0x472   : > { %v5865_v48 = vsub.f32 %v19368_v24, %v14394_v10  ;;  %v19378_v24 = vld [vmem:[#allocation129_spill] sm:$0xff] }
 0x473   : > { %v14772_v1 = vpop.permute.xlu1 %5699  ;;  %v14774_v41 = vpop.permute.xlu0 %5697  ;;  %v5991_v7 = vmul.f32 1.442695, %v5866_v52  ;;  %v19379_v52 = vld [vmem:[#allocation277_spill] sm:$0xff] }
 0x474   : > { %v5989_v21 = vmul.f32 1.442695, %v5865_v48 }
 0x475   : > { %6265 = vrot.lane.b32.xlu1 %v10755_v28, %s11463_s30  ;;  %6263 = vrot.lane.b32.xlu0 %v10757_v49, %s11463_s30  ;;  %10762 = vpow2.f32 %v5991_v7 }
 0x476   : > { %10764 = vpow2.f32 %v5989_v21  ;;  %v19383_v21 = vld [vmem:[#allocation30_spill] sm:$0xff] }
 0x477   : > { %v14792_v15 = vpop.permute.xlu1 %6789  ;;  %v14794_v14 = vpop.permute.xlu0 %6787 }
 0x478   : > { %19371 = vst [vmem:[#allocation305_spill] sm:$0xff] %v14792_v15  ;;  %19372 = vst [vmem:[#allocation306_spill] sm:$0xff] %v14794_v14  ;;  %v19377_v15 = vld [vmem:[#allocation276_spill] sm:$0xff] }
 0x479   : > { %5739 = vrot.lane.b32.xlu1 %v14787_v35, %s11464_s7  ;;  %5737 = vrot.lane.b32.xlu0 %v14790_v56, %s11464_s7  ;;  %v5868_v14 = vsub.f32 %v19378_v24, %v19377_v15  ;;  %v19380_v56 = vld [vmem:[#allocation130_spill] sm:$0xff]  ;;  %v10759_v35 = vpop.eup %10758  ;;  %v19387_v24 = vld [vmem:[#allocation136_spill] sm:$0xff] }
 0x47a   : > { %v5867_v48 = vsub.f32 %v19380_v56, %v19379_v52  ;;  %v10761_v28 = vpop.eup %10760  ;;  %v5870_v56 = vsub.f32 %v19385_v31, %v14464_v46 }
 0x47b   : > { %v14800_v58 = vpop.permute.xlu1 %6229  ;;  %v14802_v10 = vpop.permute.xlu0 %6227  ;;  %v5995_v42 = vmul.f32 1.442695, %v5868_v14  ;;  %v19386_v14 = vld [vmem:[#allocation278_spill] sm:$0xff] }
 0x47c   : > { %19373 = vst [vmem:[#allocation307_spill] sm:$0xff] %v14800_v58  ;;  %19374 = vst [vmem:[#allocation308_spill] sm:$0xff] %v14802_v10  ;;  %v5993_v7 = vmul.f32 1.442695, %v5867_v48  ;;  %v5869_v48 = vsub.f32 %v19387_v24, %v19386_v14 }
 0x47d   : > { %6829 = vrot.lane.b32.xlu1 %v6614_v6, %s11463_s30  ;;  %6827 = vrot.lane.b32.xlu0 %v6613_v63, %s11463_s30  ;;  %v6616_v6 = vmul.f32 %v10759_v35, %v19383_v21  ;;  %v19384_v63 = vld [vmem:[#allocation31_spill] sm:$0xff]  ;;  %10766 = vpow2.f32 %v5995_v42  ;;  %v5999_v21 = vmul.f32 1.442695, %v5870_v56  ;;  %v19393_v56 = vld [vmem:[#allocation261_spill] sm:$0xff] }
 0x47e   : > { %v6615_v52 = vmul.f32 %v10761_v28, %v19384_v63  ;;  %10768 = vpow2.f32 %v5993_v7  ;;  %v5997_v46 = vmul.f32 1.442695, %v5869_v48  ;;  %v19390_v7 = vld [vmem:[#allocation32_spill] sm:$0xff] }
 0x47f   : > { %v14812_v58 = vpop.permute.xlu1 %5703  ;;  %v14814_v10 = vpop.permute.xlu0 %5701  ;;  %10770 = vpow2.f32 %v5999_v21 }
 0x480   : > { %v10763_v57 = vpop.eup %10762  ;;  %10772 = vpow2.f32 %v5997_v46  ;;  %v19399_v46 = vld [vmem:[#allocation34_spill] sm:$0xff] }
 0x481   : > { %6269 = vrot.lane.b32.xlu1 %v10759_v35, %s11463_s30  ;;  %6267 = vrot.lane.b32.xlu0 %v10761_v28, %s11463_s30  ;;  %v10765_v35 = vpop.eup %10764 }
 0x483   : > { %v14818_v49 = vpop.permute.xlu1 %6793  ;;  %v14820_v15 = vpop.permute.xlu0 %6791 }
 0x484   : > { %19381 = vst [vmem:[#allocation276_spill] sm:$0xff] %v14818_v49  ;;  %19382 = vst [vmem:[#allocation277_spill] sm:$0xff] %v14820_v15 }
 0x485   : > { %6833 = vrot.lane.b32.xlu1 %v6616_v6, %s11463_s30  ;;  %6831 = vrot.lane.b32.xlu0 %v6615_v52, %s11463_s30  ;;  %v6618_v6 = vmul.f32 %v10763_v57, %v19390_v7  ;;  %v19391_v52 = vld [vmem:[#allocation33_spill] sm:$0xff] }
 0x486   : > { %v6617_v14 = vmul.f32 %v10765_v35, %v19391_v52 }
 0x487   : > { %v14830_v49 = vpop.permute.xlu1 %6233  ;;  %v14832_v15 = vpop.permute.xlu0 %6231 }
 0x488   : > { %19388 = vst [vmem:[#allocation278_spill] sm:$0xff] %v14830_v49  ;;  %19389 = vst [vmem:[#allocation309_spill] sm:$0xff] %v14832_v15  ;;  %v19392_v49 = vld [vmem:[#allocation144_spill] sm:$0xff]  ;;  %v19394_v15 = vld [vmem:[#allocation145_spill] sm:$0xff]  ;;  %v10767_v24 = vpop.eup %10766 }
 0x489   : > { %6273 = vrot.lane.b32.xlu1 %v10763_v57, %s11463_s30  ;;  %6271 = vrot.lane.b32.xlu0 %v10765_v35, %s11463_s30  ;;  %v5872_v63 = vsub.f32 %v19392_v49, %v14476_v36  ;;  %v5871_v48 = vsub.f32 %v19394_v15, %v19393_v56  ;;  %v10769_v57 = vpop.eup %10768 }
 0x48b   : > { %v14836_v42 = vpop.permute.xlu1 %5707  ;;  %v14838_v28 = vpop.permute.xlu0 %5705  ;;  %v6003_v7 = vmul.f32 1.442695, %v5872_v63  ;;  %v6001_v36 = vmul.f32 1.442695, %v5871_v48  ;;  %v19402_v63 = vld [vmem:[#allocation153_spill] sm:$0xff] }
 0x48c   : > { %v5873_v48 = vsub.f32 %v19402_v63, %v14486_v45 }
 0x48d   : > { %6837 = vrot.lane.b32.xlu1 %v6618_v6, %s11463_s30  ;;  %6835 = vrot.lane.b32.xlu0 %v6617_v14, %s11463_s30  ;;  %v6620_v6 = vmul.f32 %v10767_v24, %v19399_v46  ;;  %v19400_v14 = vld [vmem:[#allocation35_spill] sm:$0xff]  ;;  %10774 = vpow2.f32 %v6003_v7 }
 0x48e   : > { %v6619_v56 = vmul.f32 %v10769_v57, %v19400_v14  ;;  %10776 = vpow2.f32 %v6001_v36  ;;  %v19405_v36 = vld [vmem:[#allocation36_spill] sm:$0xff] }
 0x48f   : > { %v14848_v31 = vpop.permute.xlu1 %6797  ;;  %v14850_v43 = vpop.permute.xlu0 %6795  ;;  %v19407_v14 = vld [vmem:[#allocation160_spill] sm:$0xff] }
 0x490   : > { %19395 = vst [vmem:[#allocation261_spill] sm:$0xff] %v14848_v31  ;;  %19396 = vst [vmem:[#allocation310_spill] sm:$0xff] %v14850_v43  ;;  %v19401_v31 = vld [vmem:[#allocation152_spill] sm:$0xff]  ;;  %v10771_v43 = vpop.eup %10770  ;;  %v5876_v63 = vsub.f32 %v19407_v14, %v14500_v4 }
 0x491   : > { %6277 = vrot.lane.b32.xlu1 %v10767_v24, %s11463_s30  ;;  %6275 = vrot.lane.b32.xlu0 %v10769_v57, %s11463_s30  ;;  %v5874_v52 = vsub.f32 %v19401_v31, %v14484_v9  ;;  %v10773_v24 = vpop.eup %10772  ;;  %v6005_v9 = vmul.f32 1.442695, %v5873_v48 }
 0x493   : > { %v14854_v21 = vpop.permute.xlu1 %6237  ;;  %v14856_v35 = vpop.permute.xlu0 %6235  ;;  %v6007_v46 = vmul.f32 1.442695, %v5874_v52  ;;  %v19408_v52 = vld [vmem:[#allocation161_spill] sm:$0xff] }
 0x494   : > { %19397 = vst [vmem:[#allocation311_spill] sm:$0xff] %v14854_v21  ;;  %19398 = vst [vmem:[#allocation312_spill] sm:$0xff] %v14856_v35  ;;  %v5875_v48 = vsub.f32 %v19408_v52, %v14502_v34 }
 0x495   : > { %6841 = vrot.lane.b32.xlu1 %v6620_v6, %s11463_s30  ;;  %6839 = vrot.lane.b32.xlu0 %v6619_v56, %s11463_s30  ;;  %v6622_v6 = vmul.f32 %v10771_v43, %v19405_v36  ;;  %v19406_v56 = vld [vmem:[#allocation37_spill] sm:$0xff]  ;;  %10778 = vpow2.f32 %v6007_v46  ;;  %v6011_v36 = vmul.f32 1.442695, %v5876_v63 }
 0x496   : > { %v6621_v45 = vmul.f32 %v10773_v24, %v19406_v56  ;;  %10780 = vpow2.f32 %v6005_v9  ;;  %v6009_v4 = vmul.f32 1.442695, %v5875_v48  ;;  %v19411_v9 = vld [vmem:[#allocation38_spill] sm:$0xff]  ;;  %v19414_v63 = vld [vmem:[#allocation265_spill] sm:$0xff] }
 0x497   : > { %v14866_v21 = vpop.permute.xlu1 %5711  ;;  %v14868_v35 = vpop.permute.xlu0 %5709  ;;  %10782 = vpow2.f32 %v6011_v36 }
 0x498   : > { %v10775_v31 = vpop.eup %10774  ;;  %10784 = vpow2.f32 %v6009_v4  ;;  %v19420_v4 = vld [vmem:[#allocation40_spill] sm:$0xff] }
 0x499   : > { %6281 = vrot.lane.b32.xlu1 %v10771_v43, %s11463_s30  ;;  %6279 = vrot.lane.b32.xlu0 %v10773_v24, %s11463_s30  ;;  %v10777_v43 = vpop.eup %10776 }
 0x49b   : > { %v14872_v7 = vpop.permute.xlu1 %6801  ;;  %v14874_v57 = vpop.permute.xlu0 %6799 }
 0x49c   : > { %19403 = vst [vmem:[#allocation313_spill] sm:$0xff] %v14872_v7  ;;  %19404 = vst [vmem:[#allocation314_spill] sm:$0xff] %v14874_v57 }
 0x49d   : > { %6845 = vrot.lane.b32.xlu1 %v6622_v6, %s11463_s30  ;;  %6843 = vrot.lane.b32.xlu0 %v6621_v45, %s11463_s30  ;;  %v6624_v6 = vmul.f32 %v10775_v31, %v19411_v9  ;;  %v19412_v45 = vld [vmem:[#allocation39_spill] sm:$0xff] }
 0x49e   : > { %v6623_v34 = vmul.f32 %v10777_v43, %v19412_v45 }
 0x49f   : > { %v14884_v7 = vpop.permute.xlu1 %6241  ;;  %v14886_v57 = vpop.permute.xlu0 %6239 }
 0x4a0   : > { %19409 = vst [vmem:[#allocation315_spill] sm:$0xff] %v14884_v7  ;;  %19410 = vst [vmem:[#allocation316_spill] sm:$0xff] %v14886_v57  ;;  %v19413_v7 = vld [vmem:[#allocation168_spill] sm:$0xff]  ;;  %v19415_v57 = vld [vmem:[#allocation169_spill] sm:$0xff]  ;;  %v10779_v52 = vpop.eup %10778 }
 0x4a1   : > { %6285 = vrot.lane.b32.xlu1 %v10775_v31, %s11463_s30  ;;  %6283 = vrot.lane.b32.xlu0 %v10777_v43, %s11463_s30  ;;  %v5878_v56 = vsub.f32 %v19413_v7, %v14512_v20  ;;  %v5877_v48 = vsub.f32 %v19415_v57, %v19414_v63  ;;  %v10781_v31 = vpop.eup %10780 }
 0x4a3   : > { %v14890_v46 = vpop.permute.xlu1 %5715  ;;  %v14892_v24 = vpop.permute.xlu0 %5713  ;;  %v6015_v9 = vmul.f32 1.442695, %v5878_v56  ;;  %v6013_v20 = vmul.f32 1.442695, %v5877_v48  ;;  %v19423_v56 = vld [vmem:[#allocation176_spill] sm:$0xff] }
 0x4a4   : > { %v5879_v48 = vsub.f32 %v19423_v56, %v14522_v60 }
 0x4a5   : > { %6849 = vrot.lane.b32.xlu1 %v6624_v6, %s11463_s30  ;;  %6847 = vrot.lane.b32.xlu0 %v6623_v34, %s11463_s30  ;;  %v6626_v6 = vmul.f32 %v10779_v52, %v19420_v4  ;;  %v19421_v34 = vld [vmem:[#allocation41_spill] sm:$0xff]  ;;  %10786 = vpow2.f32 %v6015_v9 }
 0x4a6   : > { %v6625_v63 = vmul.f32 %v10781_v31, %v19421_v34  ;;  %10788 = vpow2.f32 %v6013_v20  ;;  %v19426_v20 = vld [vmem:[#allocation42_spill] sm:$0xff] }
 0x4a7   : > { %v14902_v14 = vpop.permute.xlu1 %6805  ;;  %v14904_v15 = vpop.permute.xlu0 %6803  ;;  %v19428_v34 = vld [vmem:[#allocation182_spill] sm:$0xff] }
 0x4a8   : > { %19416 = vst [vmem:[#allocation265_spill] sm:$0xff] %v14902_v14  ;;  %19417 = vst [vmem:[#allocation317_spill] sm:$0xff] %v14904_v15  ;;  %v19422_v14 = vld [vmem:[#allocation175_spill] sm:$0xff]  ;;  %v10783_v15 = vpop.eup %10782  ;;  %v5882_v56 = vsub.f32 %v19428_v34, %v14536_v18 }
 0x4a9   : > { %6289 = vrot.lane.b32.xlu1 %v10779_v52, %s11463_s30  ;;  %6287 = vrot.lane.b32.xlu0 %v10781_v31, %s11463_s30  ;;  %v5880_v45 = vsub.f32 %v19422_v14, %v14520_v59  ;;  %v10785_v52 = vpop.eup %10784  ;;  %v6017_v59 = vmul.f32 1.442695, %v5879_v48 }
 0x4ab   : > { %v14908_v36 = vpop.permute.xlu1 %6245  ;;  %v14910_v43 = vpop.permute.xlu0 %6243  ;;  %v6019_v4 = vmul.f32 1.442695, %v5880_v45  ;;  %v19429_v45 = vld [vmem:[#allocation183_spill] sm:$0xff] }
 0x4ac   : > { %19418 = vst [vmem:[#allocation318_spill] sm:$0xff] %v14908_v36  ;;  %19419 = vst [vmem:[#allocation319_spill] sm:$0xff] %v14910_v43  ;;  %v5881_v48 = vsub.f32 %v19429_v45, %v14538_v5 }
 0x4ad   : > { %6853 = vrot.lane.b32.xlu1 %v6626_v6, %s11463_s30  ;;  %6851 = vrot.lane.b32.xlu0 %v6625_v63, %s11463_s30  ;;  %v6628_v6 = vmul.f32 %v10783_v15, %v19426_v20  ;;  %v19427_v63 = vld [vmem:[#allocation43_spill] sm:$0xff]  ;;  %10790 = vpow2.f32 %v6019_v4  ;;  %v6023_v20 = vmul.f32 1.442695, %v5882_v56  ;;  %v19435_v56 = vld [vmem:[#allocation214_spill] sm:$0xff] }
 0x4ae   : > { %v6627_v60 = vmul.f32 %v10785_v52, %v19427_v63  ;;  %10792 = vpow2.f32 %v6017_v59  ;;  %v6021_v18 = vmul.f32 1.442695, %v5881_v48  ;;  %v19432_v59 = vld [vmem:[#allocation44_spill] sm:$0xff] }
 0x4af   : > { %v14920_v36 = vpop.permute.xlu1 %5719  ;;  %v14922_v43 = vpop.permute.xlu0 %5717  ;;  %10794 = vpow2.f32 %v6023_v20 }
 0x4b0   : > { %v10787_v14 = vpop.eup %10786  ;;  %10796 = vpow2.f32 %v6021_v18  ;;  %v19441_v18 = vld [vmem:[#allocation46_spill] sm:$0xff] }
 0x4b1   : > { %6293 = vrot.lane.b32.xlu1 %v10783_v15, %s11463_s30  ;;  %6291 = vrot.lane.b32.xlu0 %v10785_v52, %s11463_s30  ;;  %v10789_v15 = vpop.eup %10788 }
 0x4b3   : > { %v14926_v9 = vpop.permute.xlu1 %6809  ;;  %v14928_v31 = vpop.permute.xlu0 %6807 }
 0x4b4   : > { %19424 = vst [vmem:[#allocation320_spill] sm:$0xff] %v14926_v9  ;;  %19425 = vst [vmem:[#allocation321_spill] sm:$0xff] %v14928_v31 }
 0x4b5   : > { %6857 = vrot.lane.b32.xlu1 %v6628_v6, %s11463_s30  ;;  %6855 = vrot.lane.b32.xlu0 %v6627_v60, %s11463_s30  ;;  %v6630_v6 = vmul.f32 %v10787_v14, %v19432_v59  ;;  %v19433_v60 = vld [vmem:[#allocation45_spill] sm:$0xff] }
 0x4b6   : > { %v6629_v5 = vmul.f32 %v10789_v15, %v19433_v60 }
 0x4b7   : > { %v14938_v9 = vpop.permute.xlu1 %6249  ;;  %v14940_v31 = vpop.permute.xlu0 %6247 }
 0x4b8   : > { %19430 = vst [vmem:[#allocation322_spill] sm:$0xff] %v14938_v9  ;;  %19431 = vst [vmem:[#allocation323_spill] sm:$0xff] %v14940_v31  ;;  %v19434_v9 = vld [vmem:[#allocation184_spill] sm:$0xff]  ;;  %v19436_v31 = vld [vmem:[#allocation185_spill] sm:$0xff]  ;;  %v10791_v45 = vpop.eup %10790 }
 0x4b9   : > { %6297 = vrot.lane.b32.xlu1 %v10787_v14, %s11463_s30  ;;  %6295 = vrot.lane.b32.xlu0 %v10789_v15, %s11463_s30  ;;  %v5884_v63 = vsub.f32 %v19434_v9, %v14548_v44  ;;  %v5883_v48 = vsub.f32 %v19436_v31, %v19435_v56  ;;  %v10793_v14 = vpop.eup %10792 }
 0x4bb   : > { %v14944_v4 = vpop.permute.xlu1 %5723  ;;  %v14946_v52 = vpop.permute.xlu0 %5721  ;;  %v6027_v59 = vmul.f32 1.442695, %v5884_v63  ;;  %v6025_v44 = vmul.f32 1.442695, %v5883_v48  ;;  %v19444_v63 = vld [vmem:[#allocation187_spill] sm:$0xff] }
 0x4bc   : > { %v5885_v48 = vsub.f32 %v19444_v63, %v14558_v0 }
 0x4bd   : > { %6861 = vrot.lane.b32.xlu1 %v6630_v6, %s11463_s30  ;;  %6859 = vrot.lane.b32.xlu0 %v6629_v5, %s11463_s30  ;;  %v6632_v6 = vmul.f32 %v10791_v45, %v19441_v18  ;;  %v19442_v5 = vld [vmem:[#allocation47_spill] sm:$0xff]  ;;  %10798 = vpow2.f32 %v6027_v59 }
 0x4be   : > { %v6631_v56 = vmul.f32 %v10793_v14, %v19442_v5  ;;  %10800 = vpow2.f32 %v6025_v44  ;;  %v19447_v44 = vld [vmem:[#allocation48_spill] sm:$0xff] }
 0x4bf   : > { %v14956_v34 = vpop.permute.xlu1 %6813  ;;  %v14958_v57 = vpop.permute.xlu0 %6811  ;;  %v19449_v5 = vld [vmem:[#allocation188_spill] sm:$0xff] }
 0x4c0   : > { %19437 = vst [vmem:[#allocation214_spill] sm:$0xff] %v14956_v34  ;;  %19438 = vst [vmem:[#allocation324_spill] sm:$0xff] %v14958_v57  ;;  %v19443_v34 = vld [vmem:[#allocation186_spill] sm:$0xff]  ;;  %v10795_v57 = vpop.eup %10794  ;;  %v5888_v63 = vsub.f32 %v19449_v5, %v14572_v25 }
 0x4c1   : > { %6301 = vrot.lane.b32.xlu1 %v10791_v45, %s11463_s30  ;;  %6299 = vrot.lane.b32.xlu0 %v10793_v14, %s11463_s30  ;;  %v5886_v60 = vsub.f32 %v19443_v34, %v14556_v61  ;;  %v10797_v45 = vpop.eup %10796  ;;  %v6029_v61 = vmul.f32 1.442695, %v5885_v48 }
 0x4c3   : > { %v14962_v20 = vpop.permute.xlu1 %6253  ;;  %v14964_v15 = vpop.permute.xlu0 %6251  ;;  %v6031_v18 = vmul.f32 1.442695, %v5886_v60  ;;  %v19450_v60 = vld [vmem:[#allocation189_spill] sm:$0xff] }
 0x4c4   : > { %19439 = vst [vmem:[#allocation325_spill] sm:$0xff] %v14962_v20  ;;  %19440 = vst [vmem:[#allocation326_spill] sm:$0xff] %v14964_v15  ;;  %v5887_v48 = vsub.f32 %v19450_v60, %v14574_v16 }
 0x4c5   : > { %6865 = vrot.lane.b32.xlu1 %v6632_v6, %s11463_s30  ;;  %6863 = vrot.lane.b32.xlu0 %v6631_v56, %s11463_s30  ;;  %v6634_v6 = vmul.f32 %v10795_v57, %v19447_v44  ;;  %v19448_v56 = vld [vmem:[#allocation49_spill] sm:$0xff]  ;;  %10802 = vpow2.f32 %v6031_v18  ;;  %v6035_v44 = vmul.f32 1.442695, %v5888_v63  ;;  %v19456_v63 = vld [vmem:[#allocation134_spill] sm:$0xff] }
 0x4c6   : > { %v6633_v0 = vmul.f32 %v10797_v45, %v19448_v56  ;;  %10804 = vpow2.f32 %v6029_v61  ;;  %v6033_v25 = vmul.f32 1.442695, %v5887_v48  ;;  %v19453_v61 = vld [vmem:[#allocation50_spill] sm:$0xff] }
 0x4c7   : > { %v14974_v20 = vpop.permute.xlu1 %5727  ;;  %v14976_v15 = vpop.permute.xlu0 %5725  ;;  %10806 = vpow2.f32 %v6035_v44 }
 0x4c8   : > { %v10799_v34 = vpop.eup %10798  ;;  %10808 = vpow2.f32 %v6033_v25  ;;  %v19462_v25 = vld [vmem:[#allocation52_spill] sm:$0xff] }
 0x4c9   : > { %6305 = vrot.lane.b32.xlu1 %v10795_v57, %s11463_s30  ;;  %6303 = vrot.lane.b32.xlu0 %v10797_v45, %s11463_s30  ;;  %v10801_v57 = vpop.eup %10800 }
 0x4cb   : > { %v14980_v59 = vpop.permute.xlu1 %6817  ;;  %v14982_v14 = vpop.permute.xlu0 %6815 }
 0x4cc   : > { %19445 = vst [vmem:[#allocation327_spill] sm:$0xff] %v14980_v59  ;;  %19446 = vst [vmem:[#allocation328_spill] sm:$0xff] %v14982_v14 }
 0x4cd   : > { %6869 = vrot.lane.b32.xlu1 %v6634_v6, %s11463_s30  ;;  %6867 = vrot.lane.b32.xlu0 %v6633_v0, %s11463_s30  ;;  %v6636_v6 = vmul.f32 %v10799_v34, %v19453_v61  ;;  %v19454_v0 = vld [vmem:[#allocation51_spill] sm:$0xff] }
 0x4ce   : > { %v6635_v16 = vmul.f32 %v10801_v57, %v19454_v0 }
 0x4cf   : > { %v14992_v59 = vpop.permute.xlu1 %6257  ;;  %v14994_v14 = vpop.permute.xlu0 %6255 }
 0x4d0   : > { %19451 = vst [vmem:[#allocation329_spill] sm:$0xff] %v14992_v59  ;;  %19452 = vst [vmem:[#allocation330_spill] sm:$0xff] %v14994_v14  ;;  %v19455_v59 = vld [vmem:[#allocation192_spill] sm:$0xff]  ;;  %v19457_v14 = vld [vmem:[#allocation193_spill] sm:$0xff]  ;;  %v10803_v60 = vpop.eup %10802 }
 0x4d1   : > { %6309 = vrot.lane.b32.xlu1 %v10799_v34, %s11463_s30  ;;  %6307 = vrot.lane.b32.xlu0 %v10801_v57, %s11463_s30  ;;  %v5890_v56 = vsub.f32 %v19455_v59, %v14584_v11  ;;  %v5889_v48 = vsub.f32 %v19457_v14, %v19456_v63  ;;  %v10805_v34 = vpop.eup %10804 }
 0x4d3   : > { %v14998_v18 = vpop.permute.xlu1 %5731  ;;  %v15000_v45 = vpop.permute.xlu0 %5729  ;;  %v6039_v61 = vmul.f32 1.442695, %v5890_v56  ;;  %v6037_v11 = vmul.f32 1.442695, %v5889_v48  ;;  %v19465_v56 = vld [vmem:[#allocation197_spill] sm:$0xff] }
 0x4d4   : > { %v5891_v48 = vsub.f32 %v19465_v56, %v14594_v22 }
 0x4d5   : > { %6873 = vrot.lane.b32.xlu1 %v6636_v6, %s11463_s30  ;;  %6871 = vrot.lane.b32.xlu0 %v6635_v16, %s11463_s30  ;;  %v6638_v6 = vmul.f32 %v10803_v60, %v19462_v25  ;;  %v19463_v16 = vld [vmem:[#allocation53_spill] sm:$0xff]  ;;  %10810 = vpow2.f32 %v6039_v61 }
 0x4d6   : > { %v6637_v63 = vmul.f32 %v10805_v34, %v19463_v16  ;;  %10812 = vpow2.f32 %v6037_v11  ;;  %v19468_v11 = vld [vmem:[#allocation54_spill] sm:$0xff]  ;;  %v19470_v16 = vld [vmem:[#allocation199_spill] sm:$0xff] }
 0x4d7   : > { %v15010_v5 = vpop.permute.xlu1 %6821  ;;  %v15012_v31 = vpop.permute.xlu0 %6819  ;;  %v5894_v56 = vsub.f32 %v19470_v16, %v14608_v51 }
 0x4d8   : > { %19458 = vst [vmem:[#allocation134_spill] sm:$0xff] %v15010_v5  ;;  %19459 = vst [vmem:[#allocation331_spill] sm:$0xff] %v15012_v31  ;;  %v19464_v5 = vld [vmem:[#allocation196_spill] sm:$0xff]  ;;  %v10807_v31 = vpop.eup %10806 }
 0x4d9   : > { %6313 = vrot.lane.b32.xlu1 %v10803_v60, %s11463_s30  ;;  %6311 = vrot.lane.b32.xlu0 %v10805_v34, %s11463_s30  ;;  %v5892_v0 = vsub.f32 %v19464_v5, %v14592_v54  ;;  %v10809_v60 = vpop.eup %10808  ;;  %v6041_v54 = vmul.f32 1.442695, %v5891_v48 }
 0x4db   : > { %v15016_v44 = vpop.permute.xlu1 %6261  ;;  %v15018_v57 = vpop.permute.xlu0 %6259  ;;  %v6043_v25 = vmul.f32 1.442695, %v5892_v0  ;;  %v19471_v0 = vld [vmem:[#allocation200_spill] sm:$0xff] }
 0x4dc   : > { %19460 = vst [vmem:[#allocation332_spill] sm:$0xff] %v15016_v44  ;;  %19461 = vst [vmem:[#allocation333_spill] sm:$0xff] %v15018_v57  ;;  %v5893_v48 = vsub.f32 %v19471_v0, %v14610_v62 }
 0x4dd   : > { %6877 = vrot.lane.b32.xlu1 %v6638_v6, %s11463_s30  ;;  %6875 = vrot.lane.b32.xlu0 %v6637_v63, %s11463_s30  ;;  %v6640_v6 = vmul.f32 %v10807_v31, %v19468_v11  ;;  %v19469_v63 = vld [vmem:[#allocation55_spill] sm:$0xff]  ;;  %10814 = vpow2.f32 %v6043_v25  ;;  %v6047_v11 = vmul.f32 1.442695, %v5894_v56  ;;  %v19477_v56 = vld [vmem:[#allocation204_spill] sm:$0xff] }
 0x4de   : > { %v6639_v22 = vmul.f32 %v10809_v60, %v19469_v63  ;;  %10816 = vpow2.f32 %v6041_v54  ;;  %v6045_v51 = vmul.f32 1.442695, %v5893_v48  ;;  %v19474_v54 = vld [vmem:[#allocation56_spill] sm:$0xff]  ;;  %v5895_v48 = vsub.f32 %v19477_v56, %v14622_v38 }
 0x4df   : > { %v15028_v44 = vpop.permute.xlu1 %5735  ;;  %v15030_v57 = vpop.permute.xlu0 %5733  ;;  %10818 = vpow2.f32 %v6047_v11 }
 0x4e0   : > { %v10811_v5 = vpop.eup %10810  ;;  %10820 = vpow2.f32 %v6045_v51  ;;  %v19482_v51 = vld [vmem:[#allocation58_spill] sm:$0xff] }
 0x4e1   : > { %6317 = vrot.lane.b32.xlu1 %v10807_v31, %s11463_s30  ;;  %6315 = vrot.lane.b32.xlu0 %v10809_v60, %s11463_s30  ;;  %v10813_v31 = vpop.eup %10812 }
 0x4e3   : > { %v15034_v61 = vpop.permute.xlu1 %6825  ;;  %v15036_v34 = vpop.permute.xlu0 %6823 }
 0x4e4   : > { %19466 = vst [vmem:[#allocation334_spill] sm:$0xff] %v15034_v61  ;;  %19467 = vst [vmem:[#allocation335_spill] sm:$0xff] %v15036_v34 }
 0x4e5   : > { %6881 = vrot.lane.b32.xlu1 %v6640_v6, %s11463_s30  ;;  %6879 = vrot.lane.b32.xlu0 %v6639_v22, %s11463_s30  ;;  %v6642_v6 = vmul.f32 %v10811_v5, %v19474_v54  ;;  %v19475_v22 = vld [vmem:[#allocation57_spill] sm:$0xff] }
 0x4e6   : > { %v6641_v62 = vmul.f32 %v10813_v31, %v19475_v22 }
 0x4e7   : > { %v15046_v61 = vpop.permute.xlu1 %6265  ;;  %v15048_v34 = vpop.permute.xlu0 %6263 }
 0x4e8   : > { %19472 = vst [vmem:[#allocation336_spill] sm:$0xff] %v15046_v61  ;;  %19473 = vst [vmem:[#allocation337_spill] sm:$0xff] %v15048_v34  ;;  %v19476_v61 = vld [vmem:[#allocation203_spill] sm:$0xff]  ;;  %v10815_v34 = vpop.eup %10814 }
 0x4e9   : > { %6321 = vrot.lane.b32.xlu1 %v10811_v5, %s11463_s30  ;;  %6319 = vrot.lane.b32.xlu0 %v10813_v31, %s11463_s30  ;;  %v5896_v63 = vsub.f32 %v19476_v61, %v14620_v40  ;;  %v10817_v5 = vpop.eup %10816  ;;  %v6049_v40 = vmul.f32 1.442695, %v5895_v48 }
 0x4eb   : > { %v15052_v25 = vpop.permute.xlu1 %5739  ;;  %v15054_v60 = vpop.permute.xlu0 %5737  ;;  %v6051_v54 = vmul.f32 1.442695, %v5896_v63  ;;  %v19485_v63 = vld [vmem:[#allocation208_spill] sm:$0xff] }
 0x4ec   : > { %v5897_v48 = vsub.f32 %v19485_v63, %v14630_v39 }
 0x4ed   : > { %6885 = vrot.lane.b32.xlu1 %v6642_v6, %s11463_s30  ;;  %6883 = vrot.lane.b32.xlu0 %v6641_v62, %s11463_s30  ;;  %v6644_v6 = vmul.f32 %v10815_v34, %v19482_v51  ;;  %v19483_v62 = vld [vmem:[#allocation59_spill] sm:$0xff]  ;;  %10822 = vpow2.f32 %v6051_v54 }
 0x4ee   : > { %v6643_v38 = vmul.f32 %v10817_v5, %v19483_v62  ;;  %10824 = vpow2.f32 %v6049_v40  ;;  %v19490_v40 = vld [vmem:[#allocation60_spill] sm:$0xff] }
 0x4ef   : > { %v15064_v0 = vpop.permute.xlu1 %6829  ;;  %v15066_v16 = vpop.permute.xlu0 %6827 }
 0x4f0   : > { %19478 = vst [vmem:[#allocation203_spill] sm:$0xff] %v15064_v0  ;;  %19479 = vst [vmem:[#allocation204_spill] sm:$0xff] %v15066_v16  ;;  %v19484_v0 = vld [vmem:[#allocation207_spill] sm:$0xff]  ;;  %v10819_v16 = vpop.eup %10818 }
 0x4f1   : > { %6325 = vrot.lane.b32.xlu1 %v10815_v34, %s11463_s30  ;;  %6323 = vrot.lane.b32.xlu0 %v10817_v5, %s11463_s30  ;;  %v5898_v22 = vsub.f32 %v19484_v0, %v14628_v32  ;;  %v10821_v34 = vpop.eup %10820  ;;  %v6053_v32 = vmul.f32 1.442695, %v5897_v48 }
 0x4f3   : > { %v15070_v11 = vpop.permute.xlu1 %6269  ;;  %v15072_v31 = vpop.permute.xlu0 %6267  ;;  %v6055_v51 = vmul.f32 1.442695, %v5898_v22  ;;  %v19493_v22 = vld [vmem:[#allocation212_spill] sm:$0xff] }
 0x4f4   : > { %19480 = vst [vmem:[#allocation338_spill] sm:$0xff] %v15070_v11  ;;  %19481 = vst [vmem:[#allocation339_spill] sm:$0xff] %v15072_v31  ;;  %v5899_v48 = vsub.f32 %v19493_v22, %v14646_v30 }
 0x4f5   : > { %6889 = vrot.lane.b32.xlu1 %v6644_v6, %s11463_s30  ;;  %6887 = vrot.lane.b32.xlu0 %v6643_v38, %s11463_s30  ;;  %v6646_v6 = vmul.f32 %v10819_v16, %v19490_v40  ;;  %v19491_v38 = vld [vmem:[#allocation61_spill] sm:$0xff]  ;;  %10826 = vpow2.f32 %v6055_v51 }
 0x4f6   : > { %v6645_v39 = vmul.f32 %v10821_v34, %v19491_v38  ;;  %10828 = vpow2.f32 %v6053_v32  ;;  %v19498_v32 = vld [vmem:[#allocation62_spill] sm:$0xff] }
 0x4f7   : > { %v15082_v11 = vpop.permute.xlu1 %6833  ;;  %v15084_v31 = vpop.permute.xlu0 %6831 }
 0x4f8   : > { %19486 = vst [vmem:[#allocation207_spill] sm:$0xff] %v15082_v11  ;;  %19487 = vst [vmem:[#allocation208_spill] sm:$0xff] %v15084_v31  ;;  %v19492_v11 = vld [vmem:[#allocation211_spill] sm:$0xff]  ;;  %v10823_v31 = vpop.eup %10822 }
 0x4f9   : > { %6329 = vrot.lane.b32.xlu1 %v10819_v16, %s11463_s30  ;;  %6327 = vrot.lane.b32.xlu0 %v10821_v34, %s11463_s30  ;;  %v5900_v62 = vsub.f32 %v19492_v11, %v14644_v29  ;;  %v10825_v16 = vpop.eup %10824  ;;  %v6057_v29 = vmul.f32 1.442695, %v5899_v48 }
 0x4fb   : > { %v15088_v54 = vpop.permute.xlu1 %6273  ;;  %v15090_v5 = vpop.permute.xlu0 %6271  ;;  %v6059_v40 = vmul.f32 1.442695, %v5900_v62  ;;  %v19501_v62 = vld [vmem:[#allocation131_spill] sm:$0xff] }
 0x4fc   : > { %19488 = vst [vmem:[#allocation340_spill] sm:$0xff] %v15088_v54  ;;  %19489 = vst [vmem:[#allocation341_spill] sm:$0xff] %v15090_v5  ;;  %v5901_v48 = vsub.f32 %v19501_v62, %v14682_v55 }
 0x4fd   : > { %6893 = vrot.lane.b32.xlu1 %v6646_v6, %s11463_s30  ;;  %6891 = vrot.lane.b32.xlu0 %v6645_v39, %s11463_s30  ;;  %v6648_v6 = vmul.f32 %v10823_v31, %v19498_v32  ;;  %v19499_v39 = vld [vmem:[#allocation63_spill] sm:$0xff]  ;;  %10830 = vpow2.f32 %v6059_v40 }
 0x4fe   : > { %v6647_v30 = vmul.f32 %v10825_v16, %v19499_v39  ;;  %10832 = vpow2.f32 %v6057_v29  ;;  %v19506_v29 = vld [vmem:[#allocation64_spill] sm:$0xff] }
 0x4ff   : > { %v15100_v54 = vpop.permute.xlu1 %6837  ;;  %v15102_v5 = vpop.permute.xlu0 %6835 }
 0x500   : > { %19494 = vst [vmem:[#allocation211_spill] sm:$0xff] %v15100_v54  ;;  %19495 = vst [vmem:[#allocation212_spill] sm:$0xff] %v15102_v5  ;;  %v19500_v54 = vld [vmem:[#allocation142_spill] sm:$0xff]  ;;  %v10827_v5 = vpop.eup %10826 }
 0x501   : > { %6333 = vrot.lane.b32.xlu1 %v10823_v31, %s11463_s30  ;;  %6331 = vrot.lane.b32.xlu0 %v10825_v16, %s11463_s30  ;;  %v5902_v38 = vsub.f32 %v19500_v54, %v14680_v3  ;;  %v10829_v31 = vpop.eup %10828  ;;  %v6061_v3 = vmul.f32 1.442695, %v5901_v48 }
 0x503   : > { %v15106_v51 = vpop.permute.xlu1 %6277  ;;  %v15108_v34 = vpop.permute.xlu0 %6275  ;;  %v6063_v32 = vmul.f32 1.442695, %v5902_v38  ;;  %v19509_v38 = vld [vmem:[#allocation219_spill] sm:$0xff] }
 0x504   : > { %19496 = vst [vmem:[#allocation342_spill] sm:$0xff] %v15106_v51  ;;  %19497 = vst [vmem:[#allocation343_spill] sm:$0xff] %v15108_v34  ;;  %v5903_v48 = vsub.f32 %v19509_v38, %v14718_v50 }
 0x505   : > { %6897 = vrot.lane.b32.xlu1 %v6648_v6, %s11463_s30  ;;  %6895 = vrot.lane.b32.xlu0 %v6647_v30, %s11463_s30  ;;  %v6650_v6 = vmul.f32 %v10827_v5, %v19506_v29  ;;  %v19507_v30 = vld [vmem:[#allocation65_spill] sm:$0xff]  ;;  %10834 = vpow2.f32 %v6063_v32 }
 0x506   : > { %v6649_v55 = vmul.f32 %v10829_v31, %v19507_v30  ;;  %10836 = vpow2.f32 %v6061_v3  ;;  %v19514_v3 = vld [vmem:[#allocation66_spill] sm:$0xff] }
 0x507   : > { %v15118_v51 = vpop.permute.xlu1 %6841  ;;  %v15120_v34 = vpop.permute.xlu0 %6839 }
 0x508   : > { %19502 = vst [vmem:[#allocation142_spill] sm:$0xff] %v15118_v51  ;;  %19503 = vst [vmem:[#allocation131_spill] sm:$0xff] %v15120_v34  ;;  %v19508_v51 = vld [vmem:[#allocation218_spill] sm:$0xff]  ;;  %v10831_v34 = vpop.eup %10830 }
 0x509   : > { %6337 = vrot.lane.b32.xlu1 %v10827_v5, %s11463_s30  ;;  %6335 = vrot.lane.b32.xlu0 %v10829_v31, %s11463_s30  ;;  %v5904_v39 = vsub.f32 %v19508_v51, %v14716_v53  ;;  %v10833_v5 = vpop.eup %10832  ;;  %v6065_v53 = vmul.f32 1.442695, %v5903_v48 }
 0x50b   : > { %v15124_v40 = vpop.permute.xlu1 %6281  ;;  %v15126_v16 = vpop.permute.xlu0 %6279  ;;  %v6067_v29 = vmul.f32 1.442695, %v5904_v39  ;;  %v19517_v39 = vld [vmem:[#allocation140_spill] sm:$0xff] }
 0x50c   : > { %19504 = vst [vmem:[#allocation344_spill] sm:$0xff] %v15124_v40  ;;  %19505 = vst [vmem:[#allocation345_spill] sm:$0xff] %v15126_v16  ;;  %v5905_v48 = vsub.f32 %v19517_v39, %v14738_v12 }
 0x50d   : > { %6901 = vrot.lane.b32.xlu1 %v6650_v6, %s11463_s30  ;;  %6899 = vrot.lane.b32.xlu0 %v6649_v55, %s11463_s30  ;;  %v6652_v6 = vmul.f32 %v10831_v34, %v19514_v3  ;;  %v19515_v55 = vld [vmem:[#allocation67_spill] sm:$0xff]  ;;  %10838 = vpow2.f32 %v6067_v29 }
 0x50e   : > { %v6651_v50 = vmul.f32 %v10833_v5, %v19515_v55  ;;  %10840 = vpow2.f32 %v6065_v53  ;;  %v19522_v53 = vld [vmem:[#allocation68_spill] sm:$0xff] }
 0x50f   : > { %v15136_v40 = vpop.permute.xlu1 %6845  ;;  %v15138_v16 = vpop.permute.xlu0 %6843 }
 0x510   : > { %19510 = vst [vmem:[#allocation218_spill] sm:$0xff] %v15136_v40  ;;  %19511 = vst [vmem:[#allocation346_spill] sm:$0xff] %v15138_v16  ;;  %v19516_v40 = vld [vmem:[#allocation137_spill] sm:$0xff]  ;;  %v10835_v16 = vpop.eup %10834 }
 0x511   : > { %6341 = vrot.lane.b32.xlu1 %v10831_v34, %s11463_s30  ;;  %6339 = vrot.lane.b32.xlu0 %v10833_v5, %s11463_s30  ;;  %v5906_v30 = vsub.f32 %v19516_v40, %v14736_v8  ;;  %v10837_v34 = vpop.eup %10836  ;;  %v6069_v8 = vmul.f32 1.442695, %v5905_v48 }
 0x513   : > { %v15142_v32 = vpop.permute.xlu1 %6285  ;;  %v15144_v31 = vpop.permute.xlu0 %6283  ;;  %v6071_v3 = vmul.f32 1.442695, %v5906_v30  ;;  %v19525_v30 = vld [vmem:[#allocation226_spill] sm:$0xff] }
 0x514   : > { %19512 = vst [vmem:[#allocation347_spill] sm:$0xff] %v15142_v32  ;;  %19513 = vst [vmem:[#allocation348_spill] sm:$0xff] %v15144_v31  ;;  %v5907_v48 = vsub.f32 %v19525_v30, %v14774_v41 }
 0x515   : > { %6905 = vrot.lane.b32.xlu1 %v6652_v6, %s11463_s30  ;;  %6903 = vrot.lane.b32.xlu0 %v6651_v50, %s11463_s30  ;;  %v6654_v6 = vmul.f32 %v10835_v16, %v19522_v53  ;;  %v19523_v50 = vld [vmem:[#allocation69_spill] sm:$0xff]  ;;  %10842 = vpow2.f32 %v6071_v3 }
 0x516   : > { %v6653_v12 = vmul.f32 %v10837_v34, %v19523_v50  ;;  %10844 = vpow2.f32 %v6069_v8  ;;  %v19530_v8 = vld [vmem:[#allocation70_spill] sm:$0xff] }
 0x517   : > { %v15154_v32 = vpop.permute.xlu1 %6849  ;;  %v15156_v31 = vpop.permute.xlu0 %6847 }
 0x518   : > { %19518 = vst [vmem:[#allocation349_spill] sm:$0xff] %v15154_v32  ;;  %19519 = vst [vmem:[#allocation350_spill] sm:$0xff] %v15156_v31  ;;  %v19524_v32 = vld [vmem:[#allocation225_spill] sm:$0xff]  ;;  %v10839_v31 = vpop.eup %10838 }
 0x519   : > { %6345 = vrot.lane.b32.xlu1 %v10835_v16, %s11463_s30  ;;  %6343 = vrot.lane.b32.xlu0 %v10837_v34, %s11463_s30  ;;  %v5908_v55 = vsub.f32 %v19524_v32, %v14772_v1  ;;  %v10841_v16 = vpop.eup %10840  ;;  %v6073_v1 = vmul.f32 1.442695, %v5907_v48 }
 0x51b   : > { %v15160_v29 = vpop.permute.xlu1 %6289  ;;  %v15162_v5 = vpop.permute.xlu0 %6287  ;;  %v6075_v53 = vmul.f32 1.442695, %v5908_v55  ;;  %v19533_v55 = vld [vmem:[#allocation148_spill] sm:$0xff] }
 0x51c   : > { %19520 = vst [vmem:[#allocation351_spill] sm:$0xff] %v15160_v29  ;;  %19521 = vst [vmem:[#allocation352_spill] sm:$0xff] %v15162_v5  ;;  %v5909_v48 = vsub.f32 %v19533_v55, %v14814_v10  ;;  %v19539_v10 = vld [vmem:[#allocation72_spill] sm:$0xff] }
 0x51d   : > { %6909 = vrot.lane.b32.xlu1 %v6654_v6, %s11463_s30  ;;  %6907 = vrot.lane.b32.xlu0 %v6653_v12, %s11463_s30  ;;  %v6656_v6 = vmul.f32 %v10839_v31, %v19530_v8  ;;  %v19531_v12 = vld [vmem:[#allocation71_spill] sm:$0xff]  ;;  %10846 = vpow2.f32 %v6075_v53  ;;  %v19536_v53 = vld [vmem:[#allocation149_spill] sm:$0xff] }
 0x51e   : > { %v6655_v41 = vmul.f32 %v10841_v16, %v19531_v12  ;;  %10848 = vpow2.f32 %v6073_v1  ;;  %v19540_v12 = vld [vmem:[#allocation73_spill] sm:$0xff] }
 0x51f   : > { %v15172_v29 = vpop.permute.xlu1 %6853  ;;  %v15174_v5 = vpop.permute.xlu0 %6851 }
 0x520   : > { %19526 = vst [vmem:[#allocation353_spill] sm:$0xff] %v15172_v29  ;;  %19527 = vst [vmem:[#allocation354_spill] sm:$0xff] %v15174_v5  ;;  %v19532_v29 = vld [vmem:[#allocation147_spill] sm:$0xff]  ;;  %v10843_v5 = vpop.eup %10842 }
 0x521   : > { %6349 = vrot.lane.b32.xlu1 %v10839_v31, %s11463_s30  ;;  %6347 = vrot.lane.b32.xlu0 %v10841_v16, %s11463_s30  ;;  %v5910_v50 = vsub.f32 %v19532_v29, %v14812_v58  ;;  %v10845_v31 = vpop.eup %10844  ;;  %v6077_v58 = vmul.f32 1.442695, %v5909_v48  ;;  %v5912_v16 = vsub.f32 %v19536_v53, %v14836_v42  ;;  %v19542_v42 = vld [vmem:[#allocation237_spill] sm:$0xff] }
 0x522   : > { %v5914_v53 = vsub.f32 %v19542_v42, %v14866_v21 }
 0x523   : > { %v15178_v3 = vpop.permute.xlu1 %6293  ;;  %v15180_v34 = vpop.permute.xlu0 %6291  ;;  %v6079_v8 = vmul.f32 1.442695, %v5910_v50  ;;  %v6083_v48 = vmul.f32 1.442695, %v5912_v16 }
 0x524   : > { %19528 = vst [vmem:[#allocation355_spill] sm:$0xff] %v15178_v3  ;;  %19529 = vst [vmem:[#allocation356_spill] sm:$0xff] %v15180_v34 }
 0x525   : > { %6913 = vrot.lane.b32.xlu1 %v6656_v6, %s11463_s30  ;;  %6911 = vrot.lane.b32.xlu0 %v6655_v41, %s11463_s30  ;;  %v6658_v41 = vmul.f32 %v10843_v5, %v19539_v10  ;;  %10850 = vpow2.f32 %v6079_v8  ;;  %v19545_v8 = vld [vmem:[#allocation238_spill] sm:$0xff] }
 0x526   : > { %10852 = vpow2.f32 %v6077_v58 }
 0x527   : > { %v15190_v3 = vpop.permute.xlu1 %6857  ;;  %v15192_v34 = vpop.permute.xlu0 %6855  ;;  %10854 = vpow2.f32 %v6083_v48 }
 0x528   : > { %19534 = vst [vmem:[#allocation357_spill] sm:$0xff] %v15190_v3  ;;  %19535 = vst [vmem:[#allocation358_spill] sm:$0xff] %v15192_v34  ;;  %v6657_v3 = vmul.f32 %v10845_v31, %v19540_v12  ;;  %v19541_v34 = vld [vmem:[#allocation151_spill] sm:$0xff]  ;;  %v5913_v12 = vsub.f32 %v19545_v8, %v14868_v35  ;;  %v19551_v35 = vld [vmem:[#allocation162_spill] sm:$0xff] }
 0x529   : > { %6353 = vrot.lane.b32.xlu1 %v10843_v5, %s11463_s30  ;;  %6351 = vrot.lane.b32.xlu0 %v10845_v31, %s11463_s30  ;;  %v5911_v50 = vsub.f32 %v19541_v34, %v14838_v28  ;;  %v6087_v28 = vmul.f32 1.442695, %v5914_v53  ;;  %v5915_v8 = vsub.f32 %v19551_v35, %v14892_v24  ;;  %v19555_v24 = vld [vmem:[#allocation246_spill] sm:$0xff]  ;;  %v19846_v35 = vld [vmem:[#allocation27_spill] sm:$0xff] }
 0x52a   : > { %v6085_v42 = vmul.f32 1.442695, %v5913_v12 }
 0x52b   : > { %v15198_v6 = vpop.permute.xlu1 %6297  ;;  %v15200_v1 = vpop.permute.xlu0 %6295  ;;  %v6081_v31 = vmul.f32 1.442695, %v5911_v50  ;;  %v6089_v12 = vmul.f32 1.442695, %v5915_v8 }
 0x52c   : > { %19537 = vst [vmem:[#allocation359_spill] sm:$0xff] %v15198_v6  ;;  %19538 = vst [vmem:[#allocation360_spill] sm:$0xff] %v15200_v1  ;;  %v10847_v6 = vpop.eup %10846 }
 0x52d   : > { %6917 = vrot.lane.b32.xlu1 %v6658_v41, %s11463_s30  ;;  %6915 = vrot.lane.b32.xlu0 %v6657_v3, %s11463_s30  ;;  %v10849_v5 = vpop.eup %10848  ;;  %v19546_v3 = vld [vmem:[#allocation159_spill] sm:$0xff]  ;;  %v19549_v41 = vld [vmem:[#allocation74_spill] sm:$0xff]  ;;  %10856 = vpow2.f32 %v6081_v31  ;;  %v5917_v31 = vsub.f32 %v19555_v24, %v14922_v43 }
 0x52e   : > { %v5916_v58 = vsub.f32 %v19546_v3, %v14890_v46  ;;  %10858 = vpow2.f32 %v6087_v28  ;;  %v19552_v46 = vld [vmem:[#allocation245_spill] sm:$0xff]  ;;  %v19830_v24 = vld [vmem:[#allocation23_spill] sm:$0xff] }
 0x52f   : > { %v15210_v55 = vpop.permute.xlu1 %6861  ;;  %v15212_v1 = vpop.permute.xlu0 %6859  ;;  %v5918_v48 = vsub.f32 %v19552_v46, %v14920_v36  ;;  %10860 = vpow2.f32 %v6085_v42  ;;  %v5920_v36 = vsub.f32 %v19314_v47, %v14944_v4  ;;  %v6093_v43 = vmul.f32 1.442695, %v5917_v31 }
 0x530   : > { %19543 = vst [vmem:[#allocation361_spill] sm:$0xff] %v15210_v55  ;;  %19544 = vst [vmem:[#allocation362_spill] sm:$0xff] %v15212_v1  ;;  %v6660_v1 = vmul.f32 %v10847_v6, %v19549_v41  ;;  %v19550_v55 = vld [vmem:[#allocation75_spill] sm:$0xff]  ;;  %v6091_v53 = vmul.f32 1.442695, %v5916_v58  ;;  %v5921_v31 = vsub.f32 %v19327_v37, %v14976_v15  ;;  %v19854_v41 = vld [vmem:[#allocation29_spill] sm:$0xff] }
 0x531   : > { %6357 = vrot.lane.b32.xlu1 %v10847_v6, %s11463_s30  ;;  %6355 = vrot.lane.b32.xlu0 %v10849_v5, %s11463_s30  ;;  %v6659_v50 = vmul.f32 %v10849_v5, %v19550_v55  ;;  %v6099_v4 = vmul.f32 1.442695, %v5920_v36 }
 0x532   : > { %10862 = vpow2.f32 %v6091_v53  ;;  %v5922_v53 = vsub.f32 %v19326_v27, %v14974_v20  ;;  %v6101_v15 = vmul.f32 1.442695, %v5921_v31  ;;  %v19799_v27 = vld [vmem:[#allocation15_spill] sm:$0xff] }
 0x533   : > { %v15220_v21 = vpop.permute.xlu1 %6301  ;;  %v15222_v16 = vpop.permute.xlu0 %6299  ;;  %10864 = vpow2.f32 %v6089_v12 }
 0x534   : > { %19547 = vst [vmem:[#allocation363_spill] sm:$0xff] %v15220_v21  ;;  %19548 = vst [vmem:[#allocation364_spill] sm:$0xff] %v15222_v16  ;;  %v15232_v21 = vpop.eup %10850  ;;  %v6103_v20 = vmul.f32 1.442695, %v5922_v53 }
 0x535   : > { %6921 = vrot.lane.b32.xlu1 %v6660_v1, %s11463_s30  ;;  %6919 = vrot.lane.b32.xlu0 %v6659_v50, %s11463_s30  ;;  %v10853_v5 = vpop.eup %10852  ;;  %v6095_v1 = vmul.f32 1.442695, %v5918_v48  ;;  %v19558_v50 = vld [vmem:[#allocation77_spill] sm:$0xff] }
 0x536   : > { %v6661_v42 = vmul.f32 %v10853_v5, %v19558_v50  ;;  %v15250_v8 = vpop.eup %10854 }
 0x537   : > { %v15234_v16 = vpop.permute.xlu1 %6865  ;;  %v15236_v6 = vpop.permute.xlu0 %6863  ;;  %10866 = vpow2.f32 %v6095_v1  ;;  %v5924_v1 = vsub.f32 %v19339_v33, %v14998_v18  ;;  %v19783_v33 = vld [vmem:[#allocation11_spill] sm:$0xff] }
 0x538   : > { %19553 = vst [vmem:[#allocation365_spill] sm:$0xff] %v15234_v16  ;;  %19554 = vst [vmem:[#allocation366_spill] sm:$0xff] %v15236_v6  ;;  %v19559_v6 = vld [vmem:[#allocation250_spill] sm:$0xff]  ;;  %v15259_v48 = vpop.eup %10856  ;;  %10868 = vpow2.f32 %v6093_v43 }
 0x539   : > { %6361 = vrot.lane.b32.xlu1 %v15232_v21, %s11463_s30  ;;  %6359 = vrot.lane.b32.xlu0 %v10853_v5, %s11463_s30  ;;  %v5919_v16 = vsub.f32 %v19559_v6, %v14946_v52  ;;  %v15265_v12 = vpop.eup %10858  ;;  %10870 = vpow2.f32 %v6099_v4  ;;  %v6107_v18 = vmul.f32 1.442695, %v5924_v1  ;;  %v5926_v4 = vsub.f32 %v19351_v2, %v15028_v44  ;;  %v19582_v2 = vld [vmem:[#allocation79_spill] sm:$0xff] }
 0x53a   : > { %v15275_v36 = vpop.eup %10860  ;;  %v19814_v6 = vld [vmem:[#allocation19_spill] sm:$0xff] }
 0x53b   : > { %v15245_v28 = vpop.permute.xlu1 %6305  ;;  %v15247_v58 = vpop.permute.xlu0 %6303  ;;  %v6097_v52 = vmul.f32 1.442695, %v5919_v16  ;;  %v6111_v44 = vmul.f32 1.442695, %v5926_v4 }
 0x53c   : > { %19556 = vst [vmem:[#allocation367_spill] sm:$0xff] %v15245_v28  ;;  %19557 = vst [vmem:[#allocation368_spill] sm:$0xff] %v15247_v58  ;;  %v15281_v16 = vpop.eup %10862 }
 0x53d   : > { %6365 = vrot.lane.b32.xlu1 %v15250_v8, %s11463_s30  ;;  %6923 = vrot.lane.b32.xlu0 %v6661_v42, %s11463_s30  ;;  %10872 = vpow2.f32 %v6097_v52  ;;  %v15291_v53 = vpop.eup %10864 }
 0x53e   : > { %10874 = vpow2.f32 %v6103_v20  ;;  %v5928_v20 = vsub.f32 %v19366_v26, %v15052_v25  ;;  %v5927_v25 = vsub.f32 %v19367_v17, %v15054_v60  ;;  %v19581_v26 = vld [vmem:[#allocation78_spill] sm:$0xff] }
 0x53f   : > { %v15261_v5 = vpop.permute.xlu1 %6869  ;;  %v15263_v58 = vpop.permute.xlu0 %6867  ;;  %10876 = vpow2.f32 %v6101_v15 }
 0x540   : > { %19560 = vst [vmem:[#allocation369_spill] sm:$0xff] %v15261_v5  ;;  %19561 = vst [vmem:[#allocation370_spill] sm:$0xff] %v15263_v58  ;;  %v5923_v58 = vsub.f32 %v19340_v13, %v15000_v45  ;;  %10878 = vpow2.f32 %v6107_v18  ;;  %v6115_v18 = vmul.f32 1.442695, %v5928_v20 }
 0x541   : > { %6369 = vrot.lane.b32.xlu1 %v15265_v12, %s11463_s30  ;;  %6363 = vrot.lane.b32.xlu0 %v15259_v48, %s11463_s30  ;;  %v15297_v31 = vpop.eup %10866 }
 0x542   : > { %v6105_v45 = vmul.f32 1.442695, %v5923_v58  ;;  %v15307_v1 = vpop.eup %10868 }
 0x543   : > { %v15277_v42 = vpop.permute.xlu1 %6309  ;;  %v15279_v43 = vpop.permute.xlu0 %6307 }
 0x544   : > { %19562 = vst [vmem:[#allocation371_spill] sm:$0xff] %v15277_v42  ;;  %19563 = vst [vmem:[#allocation372_spill] sm:$0xff] %v15279_v43  ;;  %v5925_v43 = vsub.f32 %v19352_v23, %v15030_v57  ;;  %v15313_v58 = vpop.eup %10870  ;;  %10880 = vpow2.f32 %v6105_v45  ;;  %v6664_v23 = vmul.f32 %v15250_v8, %v19581_v26  ;;  %v19822_v26 = vld [vmem:[#allocation21_spill] sm:$0xff] }
 0x545   : > { %6373 = vrot.lane.b32.xlu1 %v15281_v16, %s11463_s30  ;;  %6367 = vrot.lane.b32.xlu0 %v15275_v36, %s11463_s30  ;;  %10882 = vpow2.f32 %v6111_v44 }
 0x546   : > { %v6109_v57 = vmul.f32 1.442695, %v5925_v43  ;;  %v6113_v43 = vmul.f32 1.442695, %v5927_v25 }
 0x547   : > { %v15293_v5 = vpop.permute.xlu1 %6873  ;;  %v15295_v52 = vpop.permute.xlu0 %6871 }
 0x548   : > { %19564 = vst [vmem:[#allocation373_spill] sm:$0xff] %v15293_v5  ;;  %19565 = vst [vmem:[#allocation374_spill] sm:$0xff] %v15295_v52  ;;  %v10873_v4 = vpop.eup %10872  ;;  %10884 = vpow2.f32 %v6109_v57 }
 0x549   : > { %6377 = vrot.lane.b32.xlu1 %v15297_v31, %s11463_s30  ;;  %6371 = vrot.lane.b32.xlu0 %v15291_v53, %s11463_s30  ;;  %10886 = vpow2.f32 %v6115_v18 }
 0x54a   : > { %10888 = vpow2.f32 %v6113_v43 }
 0x54b   : > { %v15309_v52 = vpop.permute.xlu1 %6313  ;;  %v15311_v15 = vpop.permute.xlu0 %6311 }
 0x54c   : > { %19566 = vst [vmem:[#allocation375_spill] sm:$0xff] %v15309_v52  ;;  %19567 = vst [vmem:[#allocation376_spill] sm:$0xff] %v15311_v15  ;;  %v15325_v15 = vpop.eup %10874 }
 0x54d   : > { %6381 = vrot.lane.b32.xlu1 %v15313_v58, %s11463_s30  ;;  %6375 = vrot.lane.b32.xlu0 %v15307_v1, %s11463_s30  ;;  %v10877_v45 = vpop.eup %10876 }
 0x54e   : > { %v10879_v60 = vpop.eup %10878 }
 0x54f   : > { %v15321_v5 = vpop.permute.xlu1 %6877  ;;  %v15323_v52 = vpop.permute.xlu0 %6875 }
 0x550   : > { %19568 = vst [vmem:[#allocation377_spill] sm:$0xff] %v15321_v5  ;;  %19569 = vst [vmem:[#allocation378_spill] sm:$0xff] %v15323_v52  ;;  %v10881_v52 = vpop.eup %10880 }
 0x551   : > { %6385 = vrot.lane.b32.xlu1 %v15325_v15, %s11463_s30  ;;  %6379 = vrot.lane.b32.xlu0 %v10873_v4, %s11463_s30  ;;  %v10883_v42 = vpop.eup %10882 }
 0x552   : > { %v10885_v18 = vpop.eup %10884 }
 0x553   : > { %v15330_v44 = vpop.permute.xlu1 %6317  ;;  %v15332_v20 = vpop.permute.xlu0 %6315 }
 0x554   : > { %19570 = vst [vmem:[#allocation379_spill] sm:$0xff] %v15330_v44  ;;  %19571 = vst [vmem:[#allocation380_spill] sm:$0xff] %v15332_v20  ;;  %v10887_v44 = vpop.eup %10886 }
 0x555   : > { %6389 = vrot.lane.b32.xlu1 %v10879_v60, %s11463_s30  ;;  %6383 = vrot.lane.b32.xlu0 %v10877_v45, %s11463_s30  ;;  %v10889_v17 = vpop.eup %10888 }
 0x557   : > { %v15336_v57 = vpop.permute.xlu1 %6881  ;;  %v15338_v5 = vpop.permute.xlu0 %6879 }
 0x558   : > { %19572 = vst [vmem:[#allocation381_spill] sm:$0xff] %v15336_v57  ;;  %19573 = vst [vmem:[#allocation382_spill] sm:$0xff] %v15338_v5  ;;  %v19578_v5 = vld [vmem:[#allocation76_spill] sm:$0xff] }
 0x559   : > { %6393 = vrot.lane.b32.xlu1 %v10883_v42, %s11463_s30  ;;  %6387 = vrot.lane.b32.xlu0 %v10881_v52, %s11463_s30  ;;  %v6662_v28 = vmul.f32 %v15232_v21, %v19578_v5  ;;  %v19838_v5 = vld [vmem:[#allocation25_spill] sm:$0xff] }
 0x55b   : > { %v15342_v25 = vpop.permute.xlu1 %6321  ;;  %v15344_v20 = vpop.permute.xlu0 %6319 }
 0x55c   : > { %19574 = vst [vmem:[#allocation383_spill] sm:$0xff] %v15342_v25  ;;  %19575 = vst [vmem:[#allocation384_spill] sm:$0xff] %v15344_v20 }
 0x55d   : > { %6397 = vrot.lane.b32.xlu1 %v10887_v44, %s11463_s30  ;;  %6391 = vrot.lane.b32.xlu0 %v10885_v18, %s11463_s30 }
 0x55f   : > { %v15348_v43 = vpop.permute.xlu1 %6885  ;;  %v15350_v57 = vpop.permute.xlu0 %6883 }
 0x560   : > { %19576 = vst [vmem:[#allocation385_spill] sm:$0xff] %v15348_v43  ;;  %19577 = vst [vmem:[#allocation386_spill] sm:$0xff] %v15350_v57  ;;  %v6663_v43 = vmul.f32 %v15259_v48, %v19582_v2 }
 0x561   : > { %6925 = vrot.lane.b32.xlu1 %v6662_v28, %s11463_s30  ;;  %6395 = vrot.lane.b32.xlu0 %v10889_v17, %s11463_s30  ;;  %v19585_v28 = vld [vmem:[#allocation80_spill] sm:$0xff] }
 0x562   : > { %v6666_v13 = vmul.f32 %v15265_v12, %v19585_v28 }
 0x563   : > { %v15356_v25 = vpop.permute.xlu1 %6325  ;;  %v15358_v20 = vpop.permute.xlu0 %6323 }
 0x564   : > { %19579 = vst [vmem:[#allocation387_spill] sm:$0xff] %v15356_v25  ;;  %19580 = vst [vmem:[#allocation388_spill] sm:$0xff] %v15358_v20  ;;  %v19586_v25 = vld [vmem:[#allocation81_spill] sm:$0xff] }
 0x565   : > { %6929 = vrot.lane.b32.xlu1 %v6664_v23, %s11463_s30  ;;  %6927 = vrot.lane.b32.xlu0 %v6663_v43, %s11463_s30  ;;  %v6665_v20 = vmul.f32 %v15275_v36, %v19586_v25  ;;  %v19589_v23 = vld [vmem:[#allocation82_spill] sm:$0xff]  ;;  %v19791_v25 = vld [vmem:[#allocation13_spill] sm:$0xff] }
 0x566   : > { %v6668_v43 = vmul.f32 %v15281_v16, %v19589_v23 }
 0x567   : > { %v15366_v21 = vpop.permute.xlu1 %6889  ;;  %v15368_v57 = vpop.permute.xlu0 %6887 }
 0x568   : > { %19583 = vst [vmem:[#allocation389_spill] sm:$0xff] %v15366_v21  ;;  %19584 = vst [vmem:[#allocation390_spill] sm:$0xff] %v15368_v57  ;;  %v19590_v21 = vld [vmem:[#allocation83_spill] sm:$0xff] }
 0x569   : > { %6933 = vrot.lane.b32.xlu1 %v6666_v13, %s11463_s30  ;;  %6931 = vrot.lane.b32.xlu0 %v6665_v20, %s11463_s30  ;;  %v6667_v57 = vmul.f32 %v15291_v53, %v19590_v21  ;;  %v19593_v13 = vld [vmem:[#allocation84_spill] sm:$0xff] }
 0x56a   : > { %v6670_v20 = vmul.f32 %v15297_v31, %v19593_v13 }
 0x56b   : > { %v15376_v8 = vpop.permute.xlu1 %6329  ;;  %v15378_v48 = vpop.permute.xlu0 %6327 }
 0x56c   : > { %19587 = vst [vmem:[#allocation391_spill] sm:$0xff] %v15376_v8  ;;  %19588 = vst [vmem:[#allocation392_spill] sm:$0xff] %v15378_v48  ;;  %v19594_v8 = vld [vmem:[#allocation85_spill] sm:$0xff] }
 0x56d   : > { %6937 = vrot.lane.b32.xlu1 %v6668_v43, %s11463_s30  ;;  %6935 = vrot.lane.b32.xlu0 %v6667_v57, %s11463_s30  ;;  %v6669_v48 = vmul.f32 %v15307_v1, %v19594_v8  ;;  %v19597_v43 = vld [vmem:[#allocation86_spill] sm:$0xff]  ;;  %v19775_v8 = vld [vmem:[#allocation9_spill] sm:$0xff] }
 0x56e   : > { %v6672_v57 = vmul.f32 %v15313_v58, %v19597_v43 }
 0x56f   : > { %v15386_v12 = vpop.permute.xlu1 %6893  ;;  %v15388_v36 = vpop.permute.xlu0 %6891 }
 0x570   : > { %19591 = vst [vmem:[#allocation393_spill] sm:$0xff] %v15386_v12  ;;  %19592 = vst [vmem:[#allocation394_spill] sm:$0xff] %v15388_v36  ;;  %v19598_v12 = vld [vmem:[#allocation87_spill] sm:$0xff]  ;;  %v19602_v36 = vld [vmem:[#allocation89_spill] sm:$0xff] }
 0x571   : > { %6941 = vrot.lane.b32.xlu1 %v6670_v20, %s11463_s30  ;;  %6939 = vrot.lane.b32.xlu0 %v6669_v48, %s11463_s30  ;;  %v6671_v21 = vmul.f32 %v10873_v4, %v19598_v12  ;;  %v19601_v20 = vld [vmem:[#allocation88_spill] sm:$0xff] }
 0x572   : > { %v6674_v48 = vmul.f32 %v15325_v15, %v19601_v20  ;;  %v19767_v20 = vld [vmem:[#allocation7_spill] sm:$0xff] }
 0x573   : > { %v15396_v16 = vpop.permute.xlu1 %6333  ;;  %v15398_v53 = vpop.permute.xlu0 %6331 }
 0x574   : > { %19595 = vst [vmem:[#allocation395_spill] sm:$0xff] %v15396_v16  ;;  %19596 = vst [vmem:[#allocation396_spill] sm:$0xff] %v15398_v53  ;;  %v6673_v16 = vmul.f32 %v10877_v45, %v19602_v36  ;;  %v19609_v45 = vld [vmem:[#allocation92_spill] sm:$0xff] }
 0x575   : > { %6945 = vrot.lane.b32.xlu1 %v6672_v57, %s11463_s30  ;;  %6943 = vrot.lane.b32.xlu0 %v6671_v21, %s11463_s30  ;;  %v19605_v57 = vld [vmem:[#allocation90_spill] sm:$0xff]  ;;  %v19606_v21 = vld [vmem:[#allocation91_spill] sm:$0xff] }
 0x576   : > { %v6676_v53 = vmul.f32 %v10879_v60, %v19605_v57  ;;  %v6675_v12 = vmul.f32 %v10881_v52, %v19606_v21  ;;  %v19613_v52 = vld [vmem:[#allocation94_spill] sm:$0xff]  ;;  %v19740_v21 = vld [vmem:[#allocation101_spill] sm:$0xff] }
 0x577   : > { %v15405_v31 = vpop.permute.xlu1 %6897  ;;  %v15407_v1 = vpop.permute.xlu0 %6895  ;;  %v19759_v57 = vld [vmem:[#allocation5_spill] sm:$0xff] }
 0x578   : > { %19599 = vst [vmem:[#allocation397_spill] sm:$0xff] %v15405_v31  ;;  %19600 = vst [vmem:[#allocation398_spill] sm:$0xff] %v15407_v1  ;;  %v19610_v31 = vld [vmem:[#allocation93_spill] sm:$0xff] }
 0x579   : > { %6949 = vrot.lane.b32.xlu1 %v6674_v48, %s11463_s30  ;;  %6947 = vrot.lane.b32.xlu0 %v6673_v16, %s11463_s30  ;;  %v6678_v48 = vmul.f32 %v10883_v42, %v19609_v45  ;;  %v6677_v16 = vmul.f32 %v10885_v18, %v19610_v31  ;;  %v19617_v18 = vld [vmem:[#allocation201_spill] sm:$0xff] }
 0x57b   : > { %v15414_v58 = vpop.permute.xlu1 %6337  ;;  %v15416_v4 = vpop.permute.xlu0 %6335 }
 0x57c   : > { %19603 = vst [vmem:[#allocation399_spill] sm:$0xff] %v15414_v58  ;;  %19604 = vst [vmem:[#allocation400_spill] sm:$0xff] %v15416_v4  ;;  %v19614_v58 = vld [vmem:[#allocation95_spill] sm:$0xff] }
 0x57d   : > { %6953 = vrot.lane.b32.xlu1 %v6676_v53, %s11463_s30  ;;  %6951 = vrot.lane.b32.xlu0 %v6675_v12, %s11463_s30  ;;  %v6680_v53 = vmul.f32 %v10887_v44, %v19613_v52  ;;  %v6679_v12 = vmul.f32 %v10889_v17, %v19614_v58  ;;  %v19621_v17 = vld [vmem:[#allocation205_spill] sm:$0xff]  ;;  %v19622_v44 = vld [vmem:[#allocation206_spill] sm:$0xff] }
 0x57f   : > { %v15422_v1 = vpop.permute.xlu1 %6901  ;;  %v15424_v15 = vpop.permute.xlu0 %6899 }
 0x580   : > { %19607 = vst [vmem:[#allocation401_spill] sm:$0xff] %v15422_v1  ;;  %19608 = vst [vmem:[#allocation402_spill] sm:$0xff] %v15424_v15 }
 0x581   : > { %6957 = vrot.lane.b32.xlu1 %v6678_v48, %s11463_s30  ;;  %6955 = vrot.lane.b32.xlu0 %v6677_v16, %s11463_s30  ;;  %v19618_v48 = vld [vmem:[#allocation202_spill] sm:$0xff] }
 0x583   : > { %v15430_v4 = vpop.permute.xlu1 %6341  ;;  %v15432_v60 = vpop.permute.xlu0 %6339 }
 0x584   : > { %19611 = vst [vmem:[#allocation403_spill] sm:$0xff] %v15430_v4  ;;  %19612 = vst [vmem:[#allocation404_spill] sm:$0xff] %v15432_v60  ;;  %v19630_v4 = vld [vmem:[#allocation139_spill] sm:$0xff] }
 0x585   : > { %6961 = vrot.lane.b32.xlu1 %v6680_v53, %s11463_s30  ;;  %6959 = vrot.lane.b32.xlu0 %v6679_v12, %s11463_s30 }
 0x587   : > { %v15438_v15 = vpop.permute.xlu1 %6905  ;;  %v15440_v42 = vpop.permute.xlu0 %6903 }
 0x588   : > { %19615 = vst [vmem:[#allocation405_spill] sm:$0xff] %v15438_v15  ;;  %19616 = vst [vmem:[#allocation406_spill] sm:$0xff] %v15440_v42  ;;  %v19625_v42 = vld [vmem:[#allocation209_spill] sm:$0xff]  ;;  %v19626_v15 = vld [vmem:[#allocation210_spill] sm:$0xff] }
 0x589   : > { %7153 = vrot.lane.b32.xlu1 %v19617_v18, %s11462_s9  ;;  %7151 = vrot.lane.b32.xlu0 %v19618_v48, %s11462_s9  ;;  %v19732_v48 = vld [vmem:[#allocation97_spill] sm:$0xff] }
 0x58b   : > { %v15446_v16 = vpop.permute.xlu1 %6345  ;;  %v15448_v1 = vpop.permute.xlu0 %6343 }
 0x58c   : > { %19619 = vst [vmem:[#allocation407_spill] sm:$0xff] %v15446_v16  ;;  %19620 = vst [vmem:[#allocation408_spill] sm:$0xff] %v15448_v1  ;;  %v19629_v1 = vld [vmem:[#allocation138_spill] sm:$0xff] }
 0x58d   : > { %7157 = vrot.lane.b32.xlu1 %v19621_v17, %s11462_s9  ;;  %7155 = vrot.lane.b32.xlu0 %v19622_v44, %s11462_s9  ;;  %v19731_v17 = vld [vmem:[#allocation96_spill] sm:$0xff] }
 0x58f   : > { %v15454_v53 = vpop.permute.xlu1 %6909  ;;  %v15456_v12 = vpop.permute.xlu0 %6907 }
 0x590   : > { %19623 = vst [vmem:[#allocation409_spill] sm:$0xff] %v15454_v53  ;;  %19624 = vst [vmem:[#allocation410_spill] sm:$0xff] %v15456_v12  ;;  %v19633_v12 = vld [vmem:[#allocation216_spill] sm:$0xff] }
 0x591   : > { %7161 = vrot.lane.b32.xlu1 %v19625_v42, %s11462_s9  ;;  %7159 = vrot.lane.b32.xlu0 %v19626_v15, %s11462_s9  ;;  %v19634_v42 = vld [vmem:[#allocation150_spill] sm:$0xff] }
 0x593   : > { %v15462_v60 = vpop.permute.xlu1 %6349  ;;  %v15464_v16 = vpop.permute.xlu0 %6347 }
 0x594   : > { %19627 = vst [vmem:[#allocation411_spill] sm:$0xff] %v15462_v60  ;;  %19628 = vst [vmem:[#allocation412_spill] sm:$0xff] %v15464_v16  ;;  %v19637_v16 = vld [vmem:[#allocation155_spill] sm:$0xff] }
 0x595   : > { %7165 = vrot.lane.b32.xlu1 %v19629_v1, %s11462_s9  ;;  %7163 = vrot.lane.b32.xlu0 %v19630_v4, %s11462_s9  ;;  %v19638_v1 = vld [vmem:[#allocation157_spill] sm:$0xff] }
 0x597   : > { %v15470_v44 = vpop.permute.xlu1 %6913  ;;  %v15472_v53 = vpop.permute.xlu0 %6911 }
 0x598   : > { %19631 = vst [vmem:[#allocation413_spill] sm:$0xff] %v15470_v44  ;;  %19632 = vst [vmem:[#allocation414_spill] sm:$0xff] %v15472_v53  ;;  %v19641_v53 = vld [vmem:[#allocation224_spill] sm:$0xff] }
 0x599   : > { %7169 = vrot.lane.b32.xlu1 %v19633_v12, %s11462_s9  ;;  %7167 = vrot.lane.b32.xlu0 %v19634_v42, %s11462_s9  ;;  %v19642_v12 = vld [vmem:[#allocation166_spill] sm:$0xff] }
 0x59b   : > { %v15478_v15 = vpop.permute.xlu1 %6353  ;;  %v15480_v60 = vpop.permute.xlu0 %6351 }
 0x59c   : > { %19635 = vst [vmem:[#allocation415_spill] sm:$0xff] %v15478_v15  ;;  %19636 = vst [vmem:[#allocation416_spill] sm:$0xff] %v15480_v60  ;;  %v19645_v60 = vld [vmem:[#allocation171_spill] sm:$0xff] }
 0x59d   : > { %7173 = vrot.lane.b32.xlu1 %v19637_v16, %s11462_s9  ;;  %7171 = vrot.lane.b32.xlu0 %v19638_v1, %s11462_s9  ;;  %v19646_v16 = vld [vmem:[#allocation173_spill] sm:$0xff] }
 0x59f   : > { %v15486_v4 = vpop.permute.xlu1 %6917  ;;  %v15488_v44 = vpop.permute.xlu0 %6915 }
 0x5a0   : > { %19639 = vst [vmem:[#allocation417_spill] sm:$0xff] %v15486_v4  ;;  %19640 = vst [vmem:[#allocation418_spill] sm:$0xff] %v15488_v44  ;;  %v19649_v44 = vld [vmem:[#allocation231_spill] sm:$0xff] }
 0x5a1   : > { %7177 = vrot.lane.b32.xlu1 %v19641_v53, %s11462_s9  ;;  %7175 = vrot.lane.b32.xlu0 %v19642_v12, %s11462_s9  ;;  %v19650_v53 = vld [vmem:[#allocation232_spill] sm:$0xff] }
 0x5a3   : > { %v15494_v42 = vpop.permute.xlu1 %6357  ;;  %v15496_v15 = vpop.permute.xlu0 %6355 }
 0x5a4   : > { %19643 = vst [vmem:[#allocation419_spill] sm:$0xff] %v15494_v42  ;;  %19644 = vst [vmem:[#allocation420_spill] sm:$0xff] %v15496_v15  ;;  %v19653_v15 = vld [vmem:[#allocation235_spill] sm:$0xff] }
 0x5a5   : > { %7181 = vrot.lane.b32.xlu1 %v19645_v60, %s11462_s9  ;;  %7179 = vrot.lane.b32.xlu0 %v19646_v16, %s11462_s9  ;;  %v19654_v60 = vld [vmem:[#allocation236_spill] sm:$0xff] }
 0x5a7   : > { %v15502_v1 = vpop.permute.xlu1 %6921  ;;  %v15504_v4 = vpop.permute.xlu0 %6919 }
 0x5a8   : > { %19647 = vst [vmem:[#allocation421_spill] sm:$0xff] %v15502_v1  ;;  %19648 = vst [vmem:[#allocation422_spill] sm:$0xff] %v15504_v4  ;;  %v19657_v4 = vld [vmem:[#allocation239_spill] sm:$0xff] }
 0x5a9   : > { %7185 = vrot.lane.b32.xlu1 %v19649_v44, %s11462_s9  ;;  %7183 = vrot.lane.b32.xlu0 %v19650_v53, %s11462_s9  ;;  %v19658_v44 = vld [vmem:[#allocation240_spill] sm:$0xff] }
 0x5ab   : > { %v15510_v12 = vpop.permute.xlu1 %6361  ;;  %v15512_v42 = vpop.permute.xlu0 %6359 }
 0x5ac   : > { %19651 = vst [vmem:[#allocation423_spill] sm:$0xff] %v15510_v12  ;;  %19652 = vst [vmem:[#allocation424_spill] sm:$0xff] %v15512_v42  ;;  %v19661_v42 = vld [vmem:[#allocation243_spill] sm:$0xff] }
 0x5ad   : > { %7189 = vrot.lane.b32.xlu1 %v19653_v15, %s11462_s9  ;;  %7187 = vrot.lane.b32.xlu0 %v19654_v60, %s11462_s9  ;;  %v19662_v15 = vld [vmem:[#allocation244_spill] sm:$0xff] }
 0x5af   : > { %v15518_v16 = vpop.permute.xlu1 %6365  ;;  %v15520_v1 = vpop.permute.xlu0 %6923 }
 0x5b0   : > { %19655 = vst [vmem:[#allocation425_spill] sm:$0xff] %v15518_v16  ;;  %19656 = vst [vmem:[#allocation426_spill] sm:$0xff] %v15520_v1  ;;  %v19665_v1 = vld [vmem:[#allocation190_spill] sm:$0xff] }
 0x5b1   : > { %7193 = vrot.lane.b32.xlu1 %v19657_v4, %s11462_s9  ;;  %7191 = vrot.lane.b32.xlu0 %v19658_v44, %s11462_s9  ;;  %v19666_v4 = vld [vmem:[#allocation191_spill] sm:$0xff] }
 0x5b3   : > { %v15526_v53 = vpop.permute.xlu1 %6369  ;;  %v15528_v12 = vpop.permute.xlu0 %6363 }
 0x5b4   : > { %19659 = vst [vmem:[#allocation427_spill] sm:$0xff] %v15526_v53  ;;  %19660 = vst [vmem:[#allocation428_spill] sm:$0xff] %v15528_v12  ;;  %v19669_v12 = vld [vmem:[#allocation194_spill] sm:$0xff] }
 0x5b5   : > { %7197 = vrot.lane.b32.xlu1 %v19661_v42, %s11462_s9  ;;  %7195 = vrot.lane.b32.xlu0 %v19662_v15, %s11462_s9  ;;  %v19670_v42 = vld [vmem:[#allocation195_spill] sm:$0xff] }
 0x5b7   : > { %v15534_v60 = vpop.permute.xlu1 %6373  ;;  %v15536_v16 = vpop.permute.xlu0 %6367 }
 0x5b8   : > { %19663 = vst [vmem:[#allocation429_spill] sm:$0xff] %v15534_v60  ;;  %19664 = vst [vmem:[#allocation430_spill] sm:$0xff] %v15536_v16  ;;  %v19673_v16 = vld [vmem:[#allocation198_spill] sm:$0xff] }
 0x5b9   : > { %7201 = vrot.lane.b32.xlu1 %v19665_v1, %s11462_s9  ;;  %7199 = vrot.lane.b32.xlu0 %v19666_v4, %s11462_s9  ;;  %v19674_v1 = vld [vmem:[#allocation256_spill] sm:$0xff] }
 0x5bb   : > { %v15542_v44 = vpop.permute.xlu1 %6377  ;;  %v15544_v53 = vpop.permute.xlu0 %6371 }
 0x5bc   : > { %19667 = vst [vmem:[#allocation431_spill] sm:$0xff] %v15542_v44  ;;  %19668 = vst [vmem:[#allocation432_spill] sm:$0xff] %v15544_v53  ;;  %v19677_v53 = vld [vmem:[#allocation259_spill] sm:$0xff] }
 0x5bd   : > { %7205 = vrot.lane.b32.xlu1 %v19669_v12, %s11462_s9  ;;  %7203 = vrot.lane.b32.xlu0 %v19670_v42, %s11462_s9  ;;  %v19678_v12 = vld [vmem:[#allocation260_spill] sm:$0xff] }
 0x5bf   : > { %v15550_v15 = vpop.permute.xlu1 %6381  ;;  %v15552_v60 = vpop.permute.xlu0 %6375 }
 0x5c0   : > { %19671 = vst [vmem:[#allocation433_spill] sm:$0xff] %v15550_v15  ;;  %19672 = vst [vmem:[#allocation434_spill] sm:$0xff] %v15552_v60  ;;  %v19681_v60 = vld [vmem:[#allocation263_spill] sm:$0xff] }
 0x5c1   : > { %7209 = vrot.lane.b32.xlu1 %v19673_v16, %s11462_s9  ;;  %7207 = vrot.lane.b32.xlu0 %v19674_v1, %s11462_s9  ;;  %v19682_v16 = vld [vmem:[#allocation264_spill] sm:$0xff] }
 0x5c3   : > { %v15558_v4 = vpop.permute.xlu1 %6385  ;;  %v15560_v44 = vpop.permute.xlu0 %6379 }
 0x5c4   : > { %19675 = vst [vmem:[#allocation435_spill] sm:$0xff] %v15558_v4  ;;  %19676 = vst [vmem:[#allocation436_spill] sm:$0xff] %v15560_v44  ;;  %v19685_v44 = vld [vmem:[#allocation266_spill] sm:$0xff] }
 0x5c5   : > { %7213 = vrot.lane.b32.xlu1 %v19677_v53, %s11462_s9  ;;  %7211 = vrot.lane.b32.xlu0 %v19678_v12, %s11462_s9  ;;  %v19686_v53 = vld [vmem:[#allocation267_spill] sm:$0xff] }
 0x5c7   : > { %v15566_v42 = vpop.permute.xlu1 %6389  ;;  %v15568_v15 = vpop.permute.xlu0 %6383 }
 0x5c8   : > { %19679 = vst [vmem:[#allocation437_spill] sm:$0xff] %v15566_v42  ;;  %19680 = vst [vmem:[#allocation438_spill] sm:$0xff] %v15568_v15  ;;  %v19689_v15 = vld [vmem:[#allocation268_spill] sm:$0xff] }
 0x5c9   : > { %7217 = vrot.lane.b32.xlu1 %v19681_v60, %s11462_s9  ;;  %7215 = vrot.lane.b32.xlu0 %v19682_v16, %s11462_s9  ;;  %v19690_v60 = vld [vmem:[#allocation269_spill] sm:$0xff] }
 0x5cb   : > { %v15574_v1 = vpop.permute.xlu1 %6393  ;;  %v15576_v4 = vpop.permute.xlu0 %6387 }
 0x5cc   : > { %19683 = vst [vmem:[#allocation439_spill] sm:$0xff] %v15574_v1  ;;  %19684 = vst [vmem:[#allocation440_spill] sm:$0xff] %v15576_v4  ;;  %v19693_v4 = vld [vmem:[#allocation128_spill] sm:$0xff] }
 0x5cd   : > { %7221 = vrot.lane.b32.xlu1 %v19685_v44, %s11462_s9  ;;  %7219 = vrot.lane.b32.xlu0 %v19686_v53, %s11462_s9  ;;  %v19694_v44 = vld [vmem:[#allocation213_spill] sm:$0xff] }
 0x5cf   : > { %v15582_v12 = vpop.permute.xlu1 %6397  ;;  %v15584_v42 = vpop.permute.xlu0 %6391 }
 0x5d0   : > { %19687 = vst [vmem:[#allocation441_spill] sm:$0xff] %v15582_v12  ;;  %19688 = vst [vmem:[#allocation442_spill] sm:$0xff] %v15584_v42  ;;  %v19697_v42 = vld [vmem:[#allocation270_spill] sm:$0xff] }
 0x5d1   : > { %7225 = vrot.lane.b32.xlu1 %v19689_v15, %s11462_s9  ;;  %7223 = vrot.lane.b32.xlu0 %v19690_v60, %s11462_s9  ;;  %v19698_v15 = vld [vmem:[#allocation141_spill] sm:$0xff] }
 0x5d3   : > { %v15590_v16 = vpop.permute.xlu1 %6925  ;;  %v15592_v1 = vpop.permute.xlu0 %6395 }
 0x5d4   : > { %19691 = vst [vmem:[#allocation443_spill] sm:$0xff] %v15590_v16  ;;  %19692 = vst [vmem:[#allocation444_spill] sm:$0xff] %v15592_v1  ;;  %v19701_v1 = vld [vmem:[#allocation132_spill] sm:$0xff] }
 0x5d5   : > { %7229 = vrot.lane.b32.xlu1 %v19693_v4, %s11462_s9  ;;  %7227 = vrot.lane.b32.xlu0 %v19694_v44, %s11462_s9  ;;  %v19702_v4 = vld [vmem:[#allocation215_spill] sm:$0xff] }
 0x5d7   : > { %v15598_v53 = vpop.permute.xlu1 %6929  ;;  %v15600_v12 = vpop.permute.xlu0 %6927 }
 0x5d8   : > { %19695 = vst [vmem:[#allocation445_spill] sm:$0xff] %v15598_v53  ;;  %19696 = vst [vmem:[#allocation446_spill] sm:$0xff] %v15600_v12  ;;  %v19705_v12 = vld [vmem:[#allocation217_spill] sm:$0xff] }
 0x5d9   : > { %7233 = vrot.lane.b32.xlu1 %v19697_v42, %s11462_s9  ;;  %7231 = vrot.lane.b32.xlu0 %v19698_v15, %s11462_s9  ;;  %v19706_v42 = vld [vmem:[#allocation133_spill] sm:$0xff] }
 0x5db   : > { %v15606_v60 = vpop.permute.xlu1 %6933  ;;  %v15608_v16 = vpop.permute.xlu0 %6931 }
 0x5dc   : > { %19699 = vst [vmem:[#allocation447_spill] sm:$0xff] %v15606_v60  ;;  %19700 = vst [vmem:[#allocation448_spill] sm:$0xff] %v15608_v16  ;;  %v19709_v16 = vld [vmem:[#allocation220_spill] sm:$0xff] }
 0x5dd   : > { %7237 = vrot.lane.b32.xlu1 %v19701_v1, %s11462_s9  ;;  %7235 = vrot.lane.b32.xlu0 %v19702_v4, %s11462_s9  ;;  %v19710_v1 = vld [vmem:[#allocation221_spill] sm:$0xff] }
 0x5df   : > { %v15614_v44 = vpop.permute.xlu1 %6937  ;;  %v15616_v53 = vpop.permute.xlu0 %6935 }
 0x5e0   : > { %19703 = vst [vmem:[#allocation449_spill] sm:$0xff] %v15614_v44  ;;  %19704 = vst [vmem:[#allocation450_spill] sm:$0xff] %v15616_v53  ;;  %v19713_v53 = vld [vmem:[#allocation158_spill] sm:$0xff] }
 0x5e1   : > { %7241 = vrot.lane.b32.xlu1 %v19705_v12, %s11462_s9  ;;  %7239 = vrot.lane.b32.xlu0 %v19706_v42, %s11462_s9  ;;  %v19714_v12 = vld [vmem:[#allocation222_spill] sm:$0xff] }
 0x5e3   : > { %v15622_v15 = vpop.permute.xlu1 %6941  ;;  %v15624_v60 = vpop.permute.xlu0 %6939 }
 0x5e4   : > { %19707 = vst [vmem:[#allocation451_spill] sm:$0xff] %v15622_v15  ;;  %19708 = vst [vmem:[#allocation452_spill] sm:$0xff] %v15624_v60  ;;  %v19717_v60 = vld [vmem:[#allocation223_spill] sm:$0xff] }
 0x5e5   : > { %7245 = vrot.lane.b32.xlu1 %v19709_v16, %s11462_s9  ;;  %7243 = vrot.lane.b32.xlu0 %v19710_v1, %s11462_s9  ;;  %v19718_v16 = vld [vmem:[#allocation143_spill] sm:$0xff] }
 0x5e7   : > { %v15630_v4 = vpop.permute.xlu1 %6945  ;;  %v15632_v44 = vpop.permute.xlu0 %6943 }
 0x5e8   : > { %19711 = vst [vmem:[#allocation453_spill] sm:$0xff] %v15630_v4  ;;  %19712 = vst [vmem:[#allocation454_spill] sm:$0xff] %v15632_v44  ;;  %v19721_v44 = vld [vmem:[#allocation146_spill] sm:$0xff] }
 0x5e9   : > { %7249 = vrot.lane.b32.xlu1 %v19713_v53, %s11462_s9  ;;  %7247 = vrot.lane.b32.xlu0 %v19714_v12, %s11462_s9  ;;  %v19722_v53 = vld [vmem:[#allocation227_spill] sm:$0xff] }
 0x5eb   : > { %v15638_v42 = vpop.permute.xlu1 %6949  ;;  %v15640_v15 = vpop.permute.xlu0 %6947 }
 0x5ec   : > { %19715 = vst [vmem:[#allocation455_spill] sm:$0xff] %v15638_v42  ;;  %19716 = vst [vmem:[#allocation456_spill] sm:$0xff] %v15640_v15  ;;  %v19725_v15 = vld [vmem:[#allocation228_spill] sm:$0xff] }
 0x5ed   : > { %7253 = vrot.lane.b32.xlu1 %v19717_v60, %s11462_s9  ;;  %7251 = vrot.lane.b32.xlu0 %v19718_v16, %s11462_s9  ;;  %v19726_v60 = vld [vmem:[#allocation229_spill] sm:$0xff] }
 0x5ef   : > { %v15646_v1 = vpop.permute.xlu1 %6953  ;;  %v15648_v4 = vpop.permute.xlu0 %6951 }
 0x5f0   : > { %19719 = vst [vmem:[#allocation457_spill] sm:$0xff] %v15646_v1  ;;  %19720 = vst [vmem:[#allocation458_spill] sm:$0xff] %v15648_v4  ;;  %v19729_v4 = vld [vmem:[#allocation230_spill] sm:$0xff] }
 0x5f1   : > { %7257 = vrot.lane.b32.xlu1 %v19721_v44, %s11462_s9  ;;  %7255 = vrot.lane.b32.xlu0 %v19722_v53, %s11462_s9  ;;  %v19730_v44 = vld [vmem:[#allocation233_spill] sm:$0xff] }
 0x5f3   : > { %v15654_v12 = vpop.permute.xlu1 %6957  ;;  %v15656_v42 = vpop.permute.xlu0 %6955 }
 0x5f4   : > { %19723 = vst [vmem:[#allocation459_spill] sm:$0xff] %v15654_v12  ;;  %19724 = vst [vmem:[#allocation460_spill] sm:$0xff] %v15656_v42 }
 0x5f5   : > { %7261 = vrot.lane.b32.xlu1 %v19725_v15, %s11462_s9  ;;  %7259 = vrot.lane.b32.xlu0 %v19726_v60, %s11462_s9  ;;  %v19733_v15 = vld [vmem:[#allocation234_spill] sm:$0xff] }
 0x5f6   : > { %v19734_v60 = vld [vmem:[#allocation154_spill] sm:$0xff] }
 0x5f7   : > { %v15662_v16 = vpop.permute.xlu1 %6961  ;;  %v15664_v1 = vpop.permute.xlu0 %6959 }
 0x5f8   : > { %19727 = vst [vmem:[#allocation461_spill] sm:$0xff] %v15662_v16  ;;  %19728 = vst [vmem:[#allocation462_spill] sm:$0xff] %v15664_v1 }
 0x5f9   : > { %7265 = vrot.lane.b32.xlu1 %v19729_v4, %s11462_s9  ;;  %7263 = vrot.lane.b32.xlu0 %v19730_v44, %s11462_s9  ;;  %v19735_v4 = vld [vmem:[#allocation98_spill] sm:$0xff]  ;;  %v19736_v44 = vld [vmem:[#allocation99_spill] sm:$0xff] }
 0x5fb   : > { %v7154_v53 = vpop.permute.xlu1 %7153  ;;  %v7152_v12 = vpop.permute.xlu0 %7151 }
 0x5fc   : > { %v7434_v42 = vsub.f32 %v19731_v17, %v7154_v53  ;;  %v7433_v18 = vsub.f32 %v19732_v48, %v7152_v12  ;;  %v19737_v53 = vld [vmem:[#allocation156_spill] sm:$0xff]  ;;  %v19738_v12 = vld [vmem:[#allocation271_spill] sm:$0xff] }
 0x5fd   : > { %7269 = vrot.lane.b32.xlu1 %v19733_v15, %s11462_s9  ;;  %7267 = vrot.lane.b32.xlu0 %v19734_v60, %s11462_s9 }
 0x5fe   : > { %v7529_v16 = vmul.f32 1.442695, %v7434_v42  ;;  %v7527_v1 = vmul.f32 1.442695, %v7433_v18  ;;  %v19739_v42 = vld [vmem:[#allocation100_spill] sm:$0xff] }
 0x5ff   : > { %v7158_v58 = vpop.permute.xlu1 %7157  ;;  %v7156_v52 = vpop.permute.xlu0 %7155 }
 0x600   : > { %10890 = vpow2.f32 %v7529_v16  ;;  %v7436_v31 = vsub.f32 %v19735_v4, %v7158_v58  ;;  %v7435_v45 = vsub.f32 %v19736_v44, %v7156_v52  ;;  %v19741_v58 = vld [vmem:[#allocation163_spill] sm:$0xff] }
 0x601   : > { %10892 = vpow2.f32 %v7527_v1  ;;  %7273 = vrot.lane.b32.xlu1 %v19737_v53, %s11462_s9  ;;  %7271 = vrot.lane.b32.xlu0 %v19738_v12, %s11462_s9  ;;  %v19742_v1 = vld [vmem:[#allocation164_spill] sm:$0xff]  ;;  %v19744_v4 = vld [vmem:[#allocation103_spill] sm:$0xff] }
 0x602   : > { %v7533_v15 = vmul.f32 1.442695, %v7436_v31  ;;  %v7531_v48 = vmul.f32 1.442695, %v7435_v45  ;;  %v19743_v31 = vld [vmem:[#allocation102_spill] sm:$0xff] }
 0x603   : > { %v7162_v17 = vpop.permute.xlu1 %7161  ;;  %v7160_v60 = vpop.permute.xlu0 %7159 }
 0x604   : > { %10894 = vpow2.f32 %v7533_v15  ;;  %v7438_v18 = vsub.f32 %v19739_v42, %v7162_v17  ;;  %v7437_v16 = vsub.f32 %v19740_v21, %v7160_v60  ;;  %v19745_v17 = vld [vmem:[#allocation241_spill] sm:$0xff]  ;;  %v19746_v60 = vld [vmem:[#allocation242_spill] sm:$0xff] }
 0x605   : > { %10896 = vpow2.f32 %v7531_v48  ;;  %7277 = vrot.lane.b32.xlu1 %v19741_v58, %s11462_s9  ;;  %7275 = vrot.lane.b32.xlu0 %v19742_v1, %s11462_s9 }
 0x606   : > { %v7537_v52 = vmul.f32 1.442695, %v7438_v18  ;;  %v7535_v53 = vmul.f32 1.442695, %v7437_v16 }
 0x607   : > { %v7166_v44 = vpop.permute.xlu1 %7165  ;;  %v7164_v12 = vpop.permute.xlu0 %7163 }
 0x608   : > { %10898 = vpow2.f32 %v7537_v52  ;;  %v7440_v45 = vsub.f32 %v19743_v31, %v7166_v44  ;;  %v7439_v15 = vsub.f32 %v19744_v4, %v7164_v12  ;;  %v19747_v52 = vld [vmem:[#allocation2_spill] sm:$0xff]  ;;  %v19750_v4 = vld [vmem:[#allocation105_spill] sm:$0xff]  ;;  %v19751_v31 = vld [vmem:[#allocation3_spill] sm:$0xff] }
 0x609   : > { %10900 = vpow2.f32 %v7535_v53  ;;  %7281 = vrot.lane.b32.xlu1 %v19745_v17, %s11462_s9  ;;  %7279 = vrot.lane.b32.xlu0 %v19746_v60, %s11462_s9  ;;  %v19749_v53 = vld [vmem:[#allocation104_spill] sm:$0xff] }
 0x60a   : > { %v15694_v48 = vpop.eup %10890  ;;  %v7541_v58 = vmul.f32 1.442695, %v7440_v45  ;;  %v7539_v1 = vmul.f32 1.442695, %v7439_v15  ;;  %v19753_v45 = vld [vmem:[#allocation247_spill] sm:$0xff]  ;;  %v19754_v15 = vld [vmem:[#allocation248_spill] sm:$0xff] }
 0x60b   : > { %v15696_v18 = vpop.eup %10892  ;;  %v7170_v16 = vpop.permute.xlu1 %7169  ;;  %v15700_v44 = vmul.f32 %v15694_v48, %v19747_v52 }
 0x60c   : > { %v7168_v21 = vpop.permute.xlu0 %7167  ;;  %10902 = vpow2.f32 %v7541_v58  ;;  %v7442_v12 = vsub.f32 %v19749_v53, %v7170_v16  ;;  %v15706_v60 = vmul.f32 %v15696_v18, %v19751_v31 }
 0x60d   : > { %19748 = vst [vmem:[#allocation463_spill] sm:$0xff] %v15700_v44  ;;  %v7441_v17 = vsub.f32 %v19750_v4, %v7168_v21  ;;  %10904 = vpow2.f32 %v7539_v1  ;;  %7285 = vrot.lane.b32.xlu1 %v19753_v45, %s11462_s9  ;;  %7283 = vrot.lane.b32.xlu0 %v19754_v15, %s11462_s9  ;;  %v19755_v21 = vld [vmem:[#allocation4_spill] sm:$0xff]  ;;  %v19757_v1 = vld [vmem:[#allocation106_spill] sm:$0xff] }
 0x60e   : > { %19752 = vst [vmem:[#allocation464_spill] sm:$0xff] %v15706_v60  ;;  %v15712_v42 = vpop.eup %10894  ;;  %v7545_v52 = vmul.f32 1.442695, %v7442_v12  ;;  %v19758_v60 = vld [vmem:[#allocation107_spill] sm:$0xff]  ;;  %v19762_v12 = vld [vmem:[#allocation252_spill] sm:$0xff] }
 0x60f   : > { %v7543_v44 = vmul.f32 1.442695, %v7441_v17  ;;  %v15714_v58 = vpop.eup %10896  ;;  %v7174_v16 = vpop.permute.xlu1 %7173  ;;  %v15718_v4 = vmul.f32 %v15712_v42, %v19755_v21  ;;  %v19761_v17 = vld [vmem:[#allocation251_spill] sm:$0xff] }
 0x610   : > { %v7172_v53 = vpop.permute.xlu0 %7171  ;;  %10906 = vpow2.f32 %v7545_v52  ;;  %v7444_v31 = vsub.f32 %v19757_v1, %v7174_v16  ;;  %v15724_v15 = vmul.f32 %v15714_v58, %v19759_v57 }
 0x611   : > { %19756 = vst [vmem:[#allocation465_spill] sm:$0xff] %v15718_v4  ;;  %v7443_v45 = vsub.f32 %v19758_v60, %v7172_v53  ;;  %10908 = vpow2.f32 %v7543_v44  ;;  %7289 = vrot.lane.b32.xlu1 %v19761_v17, %s11462_s9  ;;  %7287 = vrot.lane.b32.xlu0 %v19762_v12, %s11462_s9  ;;  %v19763_v53 = vld [vmem:[#allocation6_spill] sm:$0xff]  ;;  %v19765_v44 = vld [vmem:[#allocation108_spill] sm:$0xff] }
 0x612   : > { %19760 = vst [vmem:[#allocation466_spill] sm:$0xff] %v15724_v15  ;;  %v15730_v36 = vpop.eup %10898  ;;  %v7549_v21 = vmul.f32 1.442695, %v7444_v31  ;;  %v19766_v15 = vld [vmem:[#allocation109_spill] sm:$0xff]  ;;  %v19769_v31 = vld [vmem:[#allocation274_spill] sm:$0xff] }
 0x613   : > { %v7547_v4 = vmul.f32 1.442695, %v7443_v45  ;;  %v15732_v52 = vpop.eup %10900  ;;  %v7178_v16 = vpop.permute.xlu1 %7177  ;;  %v15736_v60 = vmul.f32 %v15730_v36, %v19763_v53  ;;  %v19770_v45 = vld [vmem:[#allocation275_spill] sm:$0xff] }
 0x614   : > { %v7176_v1 = vpop.permute.xlu0 %7175  ;;  %10910 = vpow2.f32 %v7549_v21  ;;  %v7446_v57 = vsub.f32 %v19765_v44, %v7178_v16  ;;  %v15742_v12 = vmul.f32 %v15732_v52, %v19767_v20 }
 0x615   : > { %19764 = vst [vmem:[#allocation467_spill] sm:$0xff] %v15736_v60  ;;  %v7445_v17 = vsub.f32 %v19766_v15, %v7176_v1  ;;  %10912 = vpow2.f32 %v7547_v4  ;;  %7293 = vrot.lane.b32.xlu1 %v19769_v31, %s11462_s9  ;;  %7291 = vrot.lane.b32.xlu0 %v19770_v45, %s11462_s9  ;;  %v19771_v1 = vld [vmem:[#allocation8_spill] sm:$0xff]  ;;  %v19773_v4 = vld [vmem:[#allocation110_spill] sm:$0xff] }
 0x616   : > { %19768 = vst [vmem:[#allocation468_spill] sm:$0xff] %v15742_v12  ;;  %v15748_v43 = vpop.eup %10902  ;;  %v7553_v53 = vmul.f32 1.442695, %v7446_v57  ;;  %v19774_v12 = vld [vmem:[#allocation111_spill] sm:$0xff]  ;;  %v19777_v57 = vld [vmem:[#allocation254_spill] sm:$0xff] }
 0x617   : > { %v7551_v60 = vmul.f32 1.442695, %v7445_v17  ;;  %v15750_v21 = vpop.eup %10904  ;;  %v7182_v16 = vpop.permute.xlu1 %7181  ;;  %v15754_v15 = vmul.f32 %v15748_v43, %v19771_v1  ;;  %v19778_v17 = vld [vmem:[#allocation255_spill] sm:$0xff] }
 0x618   : > { %v7180_v44 = vpop.permute.xlu0 %7179  ;;  %10914 = vpow2.f32 %v7553_v53  ;;  %v7448_v20 = vsub.f32 %v19773_v4, %v7182_v16  ;;  %v15760_v45 = vmul.f32 %v15750_v21, %v19775_v8 }
 0x619   : > { %19772 = vst [vmem:[#allocation469_spill] sm:$0xff] %v15754_v15  ;;  %v7447_v31 = vsub.f32 %v19774_v12, %v7180_v44  ;;  %10916 = vpow2.f32 %v7551_v60  ;;  %7297 = vrot.lane.b32.xlu1 %v19777_v57, %s11462_s9  ;;  %7295 = vrot.lane.b32.xlu0 %v19778_v17, %s11462_s9  ;;  %v19779_v44 = vld [vmem:[#allocation10_spill] sm:$0xff]  ;;  %v19781_v60 = vld [vmem:[#allocation112_spill] sm:$0xff] }
 0x61a   : > { %19776 = vst [vmem:[#allocation470_spill] sm:$0xff] %v15760_v45  ;;  %v15766_v13 = vpop.eup %10906  ;;  %v7557_v1 = vmul.f32 1.442695, %v7448_v20  ;;  %v19782_v45 = vld [vmem:[#allocation113_spill] sm:$0xff] }
 0x61b   : > { %v7555_v15 = vmul.f32 1.442695, %v7447_v31  ;;  %v15768_v53 = vpop.eup %10908  ;;  %v7186_v16 = vpop.permute.xlu1 %7185  ;;  %v15772_v12 = vmul.f32 %v15766_v13, %v19779_v44  ;;  %v19785_v20 = vld [vmem:[#allocation257_spill] sm:$0xff]  ;;  %v19786_v31 = vld [vmem:[#allocation258_spill] sm:$0xff] }
 0x61c   : > { %v7184_v4 = vpop.permute.xlu0 %7183  ;;  %10918 = vpow2.f32 %v7557_v1  ;;  %v7450_v8 = vsub.f32 %v19781_v60, %v7186_v16  ;;  %v15778_v17 = vmul.f32 %v15768_v53, %v19783_v33 }
 0x61d   : > { %19780 = vst [vmem:[#allocation471_spill] sm:$0xff] %v15772_v12  ;;  %v7449_v57 = vsub.f32 %v19782_v45, %v7184_v4  ;;  %10920 = vpow2.f32 %v7555_v15  ;;  %7301 = vrot.lane.b32.xlu1 %v19785_v20, %s11462_s9  ;;  %7299 = vrot.lane.b32.xlu0 %v19786_v31, %s11462_s9  ;;  %v19787_v4 = vld [vmem:[#allocation12_spill] sm:$0xff]  ;;  %v19789_v15 = vld [vmem:[#allocation114_spill] sm:$0xff] }
 0x61e   : > { %19784 = vst [vmem:[#allocation472_spill] sm:$0xff] %v15778_v17  ;;  %v15784_v23 = vpop.eup %10910  ;;  %v7561_v44 = vmul.f32 1.442695, %v7450_v8  ;;  %v19790_v17 = vld [vmem:[#allocation115_spill] sm:$0xff]  ;;  %v19793_v8 = vld [vmem:[#allocation262_spill] sm:$0xff] }
 0x61f   : > { %v7559_v12 = vmul.f32 1.442695, %v7449_v57  ;;  %v15786_v1 = vpop.eup %10912  ;;  %v7190_v16 = vpop.permute.xlu1 %7189  ;;  %v15790_v45 = vmul.f32 %v15784_v23, %v19787_v4  ;;  %v19794_v57 = vld [vmem:[#allocation279_spill] sm:$0xff] }
 0x620   : > { %v7188_v60 = vpop.permute.xlu0 %7187  ;;  %10922 = vpow2.f32 %v7561_v44  ;;  %v7452_v33 = vsub.f32 %v19789_v15, %v7190_v16  ;;  %v15796_v31 = vmul.f32 %v15786_v1, %v19791_v25 }
 0x621   : > { %19788 = vst [vmem:[#allocation473_spill] sm:$0xff] %v15790_v45  ;;  %v7451_v20 = vsub.f32 %v19790_v17, %v7188_v60  ;;  %10924 = vpow2.f32 %v7559_v12  ;;  %7305 = vrot.lane.b32.xlu1 %v19793_v8, %s11462_s9  ;;  %7303 = vrot.lane.b32.xlu0 %v19794_v57, %s11462_s9  ;;  %v19795_v60 = vld [vmem:[#allocation14_spill] sm:$0xff]  ;;  %v19797_v12 = vld [vmem:[#allocation116_spill] sm:$0xff] }
 0x622   : > { %19792 = vst [vmem:[#allocation474_spill] sm:$0xff] %v15796_v31  ;;  %v15802_v37 = vpop.eup %10914  ;;  %v7565_v4 = vmul.f32 1.442695, %v7452_v33  ;;  %v19798_v31 = vld [vmem:[#allocation117_spill] sm:$0xff]  ;;  %v19801_v33 = vld [vmem:[#allocation280_spill] sm:$0xff] }
 0x623   : > { %v7563_v45 = vmul.f32 1.442695, %v7451_v20  ;;  %v15804_v44 = vpop.eup %10916  ;;  %v7194_v16 = vpop.permute.xlu1 %7193  ;;  %v15808_v17 = vmul.f32 %v15802_v37, %v19795_v60  ;;  %v19802_v20 = vld [vmem:[#allocation281_spill] sm:$0xff] }
 0x624   : > { %v7192_v15 = vpop.permute.xlu0 %7191  ;;  %10926 = vpow2.f32 %v7565_v4  ;;  %v7454_v25 = vsub.f32 %v19797_v12, %v7194_v16  ;;  %v15814_v57 = vmul.f32 %v15804_v44, %v19799_v27 }
 0x625   : > { %19796 = vst [vmem:[#allocation475_spill] sm:$0xff] %v15808_v17  ;;  %v7453_v8 = vsub.f32 %v19798_v31, %v7192_v15  ;;  %10928 = vpow2.f32 %v7563_v45  ;;  %7309 = vrot.lane.b32.xlu1 %v19801_v33, %s11462_s9  ;;  %7307 = vrot.lane.b32.xlu0 %v19802_v20, %s11462_s9  ;;  %v19803_v15 = vld [vmem:[#allocation16_spill] sm:$0xff]  ;;  %v19805_v45 = vld [vmem:[#allocation118_spill] sm:$0xff] }
 0x626   : > { %19800 = vst [vmem:[#allocation476_spill] sm:$0xff] %v15814_v57  ;;  %v15820_v28 = vpop.eup %10918  ;;  %v7569_v60 = vmul.f32 1.442695, %v7454_v25  ;;  %v19806_v57 = vld [vmem:[#allocation17_spill] sm:$0xff]  ;;  %v19808_v25 = vld [vmem:[#allocation282_spill] sm:$0xff] }
 0x627   : > { %v7567_v17 = vmul.f32 1.442695, %v7453_v8  ;;  %v15822_v4 = vpop.eup %10920  ;;  %v7198_v16 = vpop.permute.xlu1 %7197  ;;  %v15826_v31 = vmul.f32 %v15820_v28, %v19803_v15  ;;  %v19809_v8 = vld [vmem:[#allocation283_spill] sm:$0xff] }
 0x628   : > { %v7196_v12 = vpop.permute.xlu0 %7195  ;;  %10930 = vpow2.f32 %v7569_v60  ;;  %v7456_v27 = vsub.f32 %v19805_v45, %v7198_v16  ;;  %v15832_v20 = vmul.f32 %v15822_v4, %v19806_v57 }
 0x629   : > { %19804 = vst [vmem:[#allocation477_spill] sm:$0xff] %v15826_v31  ;;  %v7455_v33 = vsub.f32 %v19319_v19, %v7196_v12  ;;  %10932 = vpow2.f32 %v7567_v17  ;;  %7313 = vrot.lane.b32.xlu1 %v19808_v25, %s11462_s9  ;;  %7311 = vrot.lane.b32.xlu0 %v19809_v8, %s11462_s9  ;;  %v19810_v12 = vld [vmem:[#allocation18_spill] sm:$0xff]  ;;  %v19812_v17 = vld [vmem:[#allocation120_spill] sm:$0xff] }
 0x62a   : > { %19807 = vst [vmem:[#allocation478_spill] sm:$0xff] %v15832_v20  ;;  %v15838_v2 = vpop.eup %10922  ;;  %v7573_v15 = vmul.f32 1.442695, %v7456_v27  ;;  %v19813_v20 = vld [vmem:[#allocation121_spill] sm:$0xff]  ;;  %v19816_v27 = vld [vmem:[#allocation284_spill] sm:$0xff] }
 0x62b   : > { %v7571_v31 = vmul.f32 1.442695, %v7455_v33  ;;  %v15840_v60 = vpop.eup %10924  ;;  %v7202_v16 = vpop.permute.xlu1 %7201  ;;  %v15844_v19 = vmul.f32 %v15838_v2, %v19810_v12  ;;  %v19817_v33 = vld [vmem:[#allocation285_spill] sm:$0xff] }
 0x62c   : > { %v7200_v45 = vpop.permute.xlu0 %7199  ;;  %10934 = vpow2.f32 %v7573_v15  ;;  %v7458_v57 = vsub.f32 %v19812_v17, %v7202_v16  ;;  %v15850_v8 = vmul.f32 %v15840_v60, %v19814_v6 }
 0x62d   : > { %19811 = vst [vmem:[#allocation479_spill] sm:$0xff] %v15844_v19  ;;  %v7457_v25 = vsub.f32 %v19813_v20, %v7200_v45  ;;  %10936 = vpow2.f32 %v7571_v31  ;;  %7317 = vrot.lane.b32.xlu1 %v19816_v27, %s11462_s9  ;;  %7315 = vrot.lane.b32.xlu0 %v19817_v33, %s11462_s9  ;;  %v19818_v45 = vld [vmem:[#allocation20_spill] sm:$0xff]  ;;  %v19820_v31 = vld [vmem:[#allocation122_spill] sm:$0xff] }
 0x62e   : > { %19815 = vst [vmem:[#allocation480_spill] sm:$0xff] %v15850_v8  ;;  %v15856_v47 = vpop.eup %10926  ;;  %v7577_v12 = vmul.f32 1.442695, %v7458_v57  ;;  %v19821_v8 = vld [vmem:[#allocation123_spill] sm:$0xff]  ;;  %v19824_v57 = vld [vmem:[#allocation286_spill] sm:$0xff] }
 0x62f   : > { %v7575_v19 = vmul.f32 1.442695, %v7457_v25  ;;  %v15858_v15 = vpop.eup %10928  ;;  %v7206_v16 = vpop.permute.xlu1 %7205  ;;  %v15862_v20 = vmul.f32 %v15856_v47, %v19818_v45  ;;  %v19825_v25 = vld [vmem:[#allocation287_spill] sm:$0xff] }
 0x630   : > { %v7204_v17 = vpop.permute.xlu0 %7203  ;;  %10938 = vpow2.f32 %v7577_v12  ;;  %v7460_v6 = vsub.f32 %v19820_v31, %v7206_v16  ;;  %v15868_v33 = vmul.f32 %v15858_v15, %v19822_v26 }
 0x631   : > { %19819 = vst [vmem:[#allocation481_spill] sm:$0xff] %v15862_v20  ;;  %v7459_v27 = vsub.f32 %v19821_v8, %v7204_v17  ;;  %10940 = vpow2.f32 %v7575_v19  ;;  %7321 = vrot.lane.b32.xlu1 %v19824_v57, %s11462_s9  ;;  %7319 = vrot.lane.b32.xlu0 %v19825_v25, %s11462_s9  ;;  %v19826_v17 = vld [vmem:[#allocation22_spill] sm:$0xff]  ;;  %v19828_v19 = vld [vmem:[#allocation124_spill] sm:$0xff] }
 0x632   : > { %19823 = vst [vmem:[#allocation482_spill] sm:$0xff] %v15868_v33  ;;  %v15874_v50 = vpop.eup %10930  ;;  %v7581_v45 = vmul.f32 1.442695, %v7460_v6  ;;  %v19829_v33 = vld [vmem:[#allocation125_spill] sm:$0xff]  ;;  %v19832_v6 = vld [vmem:[#allocation292_spill] sm:$0xff] }
 0x633   : > { %v7579_v20 = vmul.f32 1.442695, %v7459_v27  ;;  %v15876_v12 = vpop.eup %10932  ;;  %v7210_v16 = vpop.permute.xlu1 %7209  ;;  %v15880_v8 = vmul.f32 %v15874_v50, %v19826_v17  ;;  %v19833_v27 = vld [vmem:[#allocation293_spill] sm:$0xff] }
 0x634   : > { %v7208_v31 = vpop.permute.xlu0 %7207  ;;  %10942 = vpow2.f32 %v7581_v45  ;;  %v7462_v26 = vsub.f32 %v19828_v19, %v7210_v16  ;;  %v15886_v25 = vmul.f32 %v15876_v12, %v19830_v24 }
 0x635   : > { %19827 = vst [vmem:[#allocation483_spill] sm:$0xff] %v15880_v8  ;;  %v7461_v57 = vsub.f32 %v19829_v33, %v7208_v31  ;;  %10944 = vpow2.f32 %v7579_v20  ;;  %7325 = vrot.lane.b32.xlu1 %v19832_v6, %s11462_s9  ;;  %7323 = vrot.lane.b32.xlu0 %v19833_v27, %s11462_s9  ;;  %v19834_v31 = vld [vmem:[#allocation24_spill] sm:$0xff]  ;;  %v19836_v20 = vld [vmem:[#allocation126_spill] sm:$0xff] }
 0x636   : > { %19831 = vst [vmem:[#allocation484_spill] sm:$0xff] %v15886_v25  ;;  %v15892_v46 = vpop.eup %10934  ;;  %v7585_v17 = vmul.f32 1.442695, %v7462_v26  ;;  %v19837_v25 = vld [vmem:[#allocation127_spill] sm:$0xff]  ;;  %v19840_v26 = vld [vmem:[#allocation297_spill] sm:$0xff] }
 0x637   : > { %v7583_v8 = vmul.f32 1.442695, %v7461_v57  ;;  %v15894_v45 = vpop.eup %10936  ;;  %v7214_v16 = vpop.permute.xlu1 %7213  ;;  %v15898_v33 = vmul.f32 %v15892_v46, %v19834_v31  ;;  %v19841_v57 = vld [vmem:[#allocation298_spill] sm:$0xff] }
 0x638   : > { %v7212_v19 = vpop.permute.xlu0 %7211  ;;  %10946 = vpow2.f32 %v7585_v17  ;;  %v7464_v24 = vsub.f32 %v19836_v20, %v7214_v16  ;;  %v15904_v27 = vmul.f32 %v15894_v45, %v19838_v5 }
 0x639   : > { %19835 = vst [vmem:[#allocation485_spill] sm:$0xff] %v15898_v33  ;;  %v7463_v6 = vsub.f32 %v19837_v25, %v7212_v19  ;;  %10948 = vpow2.f32 %v7583_v8  ;;  %7329 = vrot.lane.b32.xlu1 %v19840_v26, %s11462_s9  ;;  %7327 = vrot.lane.b32.xlu0 %v19841_v57, %s11462_s9  ;;  %v19842_v19 = vld [vmem:[#allocation26_spill] sm:$0xff]  ;;  %v19844_v8 = vld [vmem:[#allocation129_spill] sm:$0xff] }
 0x63a   : > { %19839 = vst [vmem:[#allocation486_spill] sm:$0xff] %v15904_v27  ;;  %v15910_v55 = vpop.eup %10938  ;;  %v7589_v31 = vmul.f32 1.442695, %v7464_v24  ;;  %v19845_v27 = vld [vmem:[#allocation130_spill] sm:$0xff]  ;;  %v19848_v24 = vld [vmem:[#allocation299_spill] sm:$0xff] }
 0x63b   : > { %v7587_v33 = vmul.f32 1.442695, %v7463_v6  ;;  %v15912_v17 = vpop.eup %10940  ;;  %v7218_v16 = vpop.permute.xlu1 %7217  ;;  %v15916_v25 = vmul.f32 %v15910_v55, %v19842_v19  ;;  %v19849_v6 = vld [vmem:[#allocation300_spill] sm:$0xff] }
 0x63c   : > { %v7216_v20 = vpop.permute.xlu0 %7215  ;;  %10950 = vpow2.f32 %v7589_v31  ;;  %v7466_v5 = vsub.f32 %v19844_v8, %v7218_v16  ;;  %v15922_v57 = vmul.f32 %v15912_v17, %v19846_v35 }
 0x63d   : > { %19843 = vst [vmem:[#allocation487_spill] sm:$0xff] %v15916_v25  ;;  %v7465_v26 = vsub.f32 %v19845_v27, %v7216_v20  ;;  %10952 = vpow2.f32 %v7587_v33  ;;  %7333 = vrot.lane.b32.xlu1 %v19848_v24, %s11462_s9  ;;  %7331 = vrot.lane.b32.xlu0 %v19849_v6, %s11462_s9  ;;  %v19850_v20 = vld [vmem:[#allocation28_spill] sm:$0xff]  ;;  %v19852_v33 = vld [vmem:[#allocation135_spill] sm:$0xff] }
 0x63e   : > { %19847 = vst [vmem:[#allocation488_spill] sm:$0xff] %v15922_v57  ;;  %v15928_v3 = vpop.eup %10942  ;;  %v7593_v19 = vmul.f32 1.442695, %v7466_v5  ;;  %v19853_v57 = vld [vmem:[#allocation136_spill] sm:$0xff]  ;;  %v19856_v5 = vld [vmem:[#allocation303_spill] sm:$0xff] }
 0x63f   : > { %v7591_v25 = vmul.f32 1.442695, %v7465_v26  ;;  %v15930_v31 = vpop.eup %10944  ;;  %v7222_v16 = vpop.permute.xlu1 %7221  ;;  %v15934_v27 = vmul.f32 %v15928_v3, %v19850_v20  ;;  %v19857_v26 = vld [vmem:[#allocation304_spill] sm:$0xff] }
 0x640   : > { %v7220_v8 = vpop.permute.xlu0 %7219  ;;  %10954 = vpow2.f32 %v7593_v19  ;;  %v7468_v35 = vsub.f32 %v19852_v33, %v7222_v16  ;;  %v15940_v6 = vmul.f32 %v15930_v31, %v19854_v41  ;;  %v19860_v41 = vld [vmem:[#allocation145_spill] sm:$0xff] }
 0x641   : > { %19851 = vst [vmem:[#allocation489_spill] sm:$0xff] %v15934_v27  ;;  %v7467_v24 = vsub.f32 %v19853_v57, %v7220_v8  ;;  %10956 = vpow2.f32 %v7591_v25  ;;  %7337 = vrot.lane.b32.xlu1 %v19856_v5, %s11462_s9  ;;  %7335 = vrot.lane.b32.xlu0 %v19857_v26, %s11462_s9  ;;  %v19858_v8 = vld [vmem:[#allocation30_spill] sm:$0xff] }
 0x642   : > { %19855 = vst [vmem:[#allocation490_spill] sm:$0xff] %v15940_v6  ;;  %v15946_v10 = vpop.eup %10946  ;;  %v7597_v20 = vmul.f32 1.442695, %v7468_v35  ;;  %v19861_v6 = vld [vmem:[#allocation31_spill] sm:$0xff] }
 0x643   : > { %v7595_v27 = vmul.f32 1.442695, %v7467_v24  ;;  %v15948_v19 = vpop.eup %10948  ;;  %v7226_v16 = vpop.permute.xlu1 %7225  ;;  %v15952_v57 = vmul.f32 %v15946_v10, %v19858_v8 }
 0x644   : > { %v7224_v33 = vpop.permute.xlu0 %7223  ;;  %10958 = vpow2.f32 %v7597_v20  ;;  %v7470_v25 = vsub.f32 %v19392_v49, %v7226_v16  ;;  %v15958_v26 = vmul.f32 %v15948_v19, %v19861_v6 }
 0x645   : > { %19859 = vst [vmem:[#allocation491_spill] sm:$0xff] %v15952_v57  ;;  %v7469_v5 = vsub.f32 %v19860_v41, %v7224_v33  ;;  %10960 = vpow2.f32 %v7595_v27  ;;  %7811 = vrot.lane.b32.xlu1 %v15694_v48, %s11462_s9  ;;  %7809 = vrot.lane.b32.xlu0 %v15696_v18, %s11462_s9  ;;  %v19863_v33 = vld [vmem:[#allocation32_spill] sm:$0xff]  ;;  %v19867_v57 = vld [vmem:[#allocation33_spill] sm:$0xff] }
 0x646   : > { %19862 = vst [vmem:[#allocation492_spill] sm:$0xff] %v15958_v26  ;;  %v15964_v35 = vpop.eup %10950  ;;  %v7601_v24 = vmul.f32 1.442695, %v7470_v25  ;;  %v19865_v27 = vld [vmem:[#allocation152_spill] sm:$0xff]  ;;  %v19866_v26 = vld [vmem:[#allocation153_spill] sm:$0xff] }
 0x647   : > { %v7599_v8 = vmul.f32 1.442695, %v7469_v5  ;;  %v15966_v20 = vpop.eup %10952  ;;  %v7230_v16 = vpop.permute.xlu1 %7229  ;;  %v15970_v41 = vmul.f32 %v15964_v35, %v19863_v33 }
 0x648   : > { %v7228_v49 = vpop.permute.xlu0 %7227  ;;  %10962 = vpow2.f32 %v7601_v24  ;;  %v7472_v6 = vsub.f32 %v19865_v27, %v7230_v16  ;;  %v15976_v18 = vmul.f32 %v15966_v20, %v19867_v57 }
 0x649   : > { %19864 = vst [vmem:[#allocation493_spill] sm:$0xff] %v15970_v41  ;;  %v7471_v48 = vsub.f32 %v19866_v26, %v7228_v49  ;;  %10964 = vpow2.f32 %v7599_v8  ;;  %7815 = vrot.lane.b32.xlu1 %v15712_v42, %s11462_s9  ;;  %7813 = vrot.lane.b32.xlu0 %v15714_v58, %s11462_s9  ;;  %v19869_v49 = vld [vmem:[#allocation34_spill] sm:$0xff]  ;;  %v19870_v8 = vld [vmem:[#allocation160_spill] sm:$0xff]  ;;  %v19872_v41 = vld [vmem:[#allocation35_spill] sm:$0xff] }
 0x64a   : > { %19868 = vst [vmem:[#allocation494_spill] sm:$0xff] %v15976_v18  ;;  %v15982_v5 = vpop.eup %10954  ;;  %v7605_v25 = vmul.f32 1.442695, %v7472_v6  ;;  %v19871_v18 = vld [vmem:[#allocation161_spill] sm:$0xff] }
 0x64b   : > { %v7603_v33 = vmul.f32 1.442695, %v7471_v48  ;;  %v15984_v24 = vpop.eup %10956  ;;  %v7234_v16 = vpop.permute.xlu1 %7233  ;;  %v15988_v26 = vmul.f32 %v15982_v5, %v19869_v49 }
 0x64c   : > { %v7232_v27 = vpop.permute.xlu0 %7231  ;;  %10966 = vpow2.f32 %v7605_v25  ;;  %v7474_v57 = vsub.f32 %v19870_v8, %v7234_v16  ;;  %v15994_v58 = vmul.f32 %v15984_v24, %v19872_v41  ;;  %v19876_v41 = vld [vmem:[#allocation169_spill] sm:$0xff] }
 0x64d   : > { %v7473_v42 = vsub.f32 %v19871_v18, %v7232_v27  ;;  %10968 = vpow2.f32 %v7603_v33  ;;  %7819 = vrot.lane.b32.xlu1 %v15730_v36, %s11462_s9  ;;  %7817 = vrot.lane.b32.xlu0 %v15732_v52, %s11462_s9  ;;  %v19874_v27 = vld [vmem:[#allocation36_spill] sm:$0xff] }
 0x64e   : > { %19873 = vst [vmem:[#allocation495_spill] sm:$0xff] %v15994_v58  ;;  %v16000_v6 = vpop.eup %10958  ;;  %v7609_v48 = vmul.f32 1.442695, %v7474_v57  ;;  %v19877_v58 = vld [vmem:[#allocation37_spill] sm:$0xff] }
 0x64f   : > { %v7607_v49 = vmul.f32 1.442695, %v7473_v42  ;;  %v16002_v25 = vpop.eup %10960  ;;  %v7238_v16 = vpop.permute.xlu1 %7237  ;;  %v16006_v18 = vmul.f32 %v16000_v6, %v19874_v27 }
 0x650   : > { %v7236_v8 = vpop.permute.xlu0 %7235  ;;  %10970 = vpow2.f32 %v7609_v48  ;;  %v7476_v33 = vsub.f32 %v19413_v7, %v7238_v16  ;;  %v16012_v52 = vmul.f32 %v16002_v25, %v19877_v58 }
 0x651   : > { %19875 = vst [vmem:[#allocation496_spill] sm:$0xff] %v16006_v18  ;;  %v7475_v36 = vsub.f32 %v19876_v41, %v7236_v8  ;;  %10972 = vpow2.f32 %v7607_v49  ;;  %7823 = vrot.lane.b32.xlu1 %v15748_v43, %s11462_s9  ;;  %7821 = vrot.lane.b32.xlu0 %v15750_v21, %s11462_s9  ;;  %v19879_v8 = vld [vmem:[#allocation38_spill] sm:$0xff]  ;;  %v19881_v49 = vld [vmem:[#allocation175_spill] sm:$0xff] }
 0x652   : > { %19878 = vst [vmem:[#allocation497_spill] sm:$0xff] %v16012_v52  ;;  %v16018_v57 = vpop.eup %10962  ;;  %v7613_v42 = vmul.f32 1.442695, %v7476_v33  ;;  %v19882_v52 = vld [vmem:[#allocation176_spill] sm:$0xff]  ;;  %v19883_v18 = vld [vmem:[#allocation39_spill] sm:$0xff] }
 0x653   : > { %v7611_v27 = vmul.f32 1.442695, %v7475_v36  ;;  %v16020_v48 = vpop.eup %10964  ;;  %v7242_v16 = vpop.permute.xlu1 %7241  ;;  %v16024_v41 = vmul.f32 %v16018_v57, %v19879_v8 }
 0x654   : > { %v7240_v7 = vpop.permute.xlu0 %7239  ;;  %10974 = vpow2.f32 %v7613_v42  ;;  %v7478_v58 = vsub.f32 %v19881_v49, %v7242_v16  ;;  %v16030_v21 = vmul.f32 %v16020_v48, %v19883_v18 }
 0x655   : > { %19880 = vst [vmem:[#allocation498_spill] sm:$0xff] %v16024_v41  ;;  %v7477_v43 = vsub.f32 %v19882_v52, %v7240_v7  ;;  %10976 = vpow2.f32 %v7611_v27  ;;  %7827 = vrot.lane.b32.xlu1 %v15766_v13, %s11462_s9  ;;  %7825 = vrot.lane.b32.xlu0 %v15768_v53, %s11462_s9  ;;  %v19885_v7 = vld [vmem:[#allocation40_spill] sm:$0xff]  ;;  %v19886_v27 = vld [vmem:[#allocation182_spill] sm:$0xff]  ;;  %v19888_v41 = vld [vmem:[#allocation41_spill] sm:$0xff] }
 0x656   : > { %19884 = vst [vmem:[#allocation499_spill] sm:$0xff] %v16030_v21  ;;  %v16036_v33 = vpop.eup %10966  ;;  %v7617_v36 = vmul.f32 1.442695, %v7478_v58  ;;  %v19887_v21 = vld [vmem:[#allocation183_spill] sm:$0xff] }
 0x657   : > { %v7615_v8 = vmul.f32 1.442695, %v7477_v43  ;;  %v16038_v42 = vpop.eup %10968  ;;  %v7246_v16 = vpop.permute.xlu1 %7245  ;;  %v16042_v52 = vmul.f32 %v16036_v33, %v19885_v7 }
 0x658   : > { %v7244_v49 = vpop.permute.xlu0 %7243  ;;  %10978 = vpow2.f32 %v7617_v36  ;;  %v7480_v18 = vsub.f32 %v19886_v27, %v7246_v16  ;;  %v16048_v53 = vmul.f32 %v16038_v42, %v19888_v41  ;;  %v19892_v41 = vld [vmem:[#allocation185_spill] sm:$0xff] }
 0x659   : > { %v7479_v13 = vsub.f32 %v19887_v21, %v7244_v49  ;;  %10980 = vpow2.f32 %v7615_v8  ;;  %7831 = vrot.lane.b32.xlu1 %v15784_v23, %s11462_s9  ;;  %7829 = vrot.lane.b32.xlu0 %v15786_v1, %s11462_s9  ;;  %v19890_v49 = vld [vmem:[#allocation42_spill] sm:$0xff] }
 0x65a   : > { %19889 = vst [vmem:[#allocation500_spill] sm:$0xff] %v16048_v53  ;;  %v16054_v58 = vpop.eup %10970  ;;  %v7621_v43 = vmul.f32 1.442695, %v7480_v18  ;;  %v19893_v53 = vld [vmem:[#allocation43_spill] sm:$0xff] }
 0x65b   : > { %v7619_v7 = vmul.f32 1.442695, %v7479_v13  ;;  %v16056_v36 = vpop.eup %10972  ;;  %v7250_v16 = vpop.permute.xlu1 %7249  ;;  %v16060_v21 = vmul.f32 %v16054_v58, %v19890_v49 }
 0x65c   : > { %v7248_v27 = vpop.permute.xlu0 %7247  ;;  %10982 = vpow2.f32 %v7621_v43  ;;  %v7482_v8 = vsub.f32 %v19434_v9, %v7250_v16  ;;  %v16066_v1 = vmul.f32 %v16056_v36, %v19893_v53 }
 0x65d   : > { %19891 = vst [vmem:[#allocation501_spill] sm:$0xff] %v16060_v21  ;;  %v7481_v23 = vsub.f32 %v19892_v41, %v7248_v27  ;;  %10984 = vpow2.f32 %v7619_v7  ;;  %7835 = vrot.lane.b32.xlu1 %v15802_v37, %s11462_s9  ;;  %7833 = vrot.lane.b32.xlu0 %v15804_v44, %s11462_s9  ;;  %v19895_v27 = vld [vmem:[#allocation44_spill] sm:$0xff]  ;;  %v19897_v7 = vld [vmem:[#allocation186_spill] sm:$0xff]  ;;  %v19899_v21 = vld [vmem:[#allocation45_spill] sm:$0xff] }
 0x65e   : > { %19894 = vst [vmem:[#allocation502_spill] sm:$0xff] %v16066_v1  ;;  %v16072_v18 = vpop.eup %10974  ;;  %v7625_v13 = vmul.f32 1.442695, %v7482_v8  ;;  %v19898_v1 = vld [vmem:[#allocation187_spill] sm:$0xff] }
 0x65f   : > { %v7623_v49 = vmul.f32 1.442695, %v7481_v23  ;;  %v16074_v43 = vpop.eup %10976  ;;  %v7254_v16 = vpop.permute.xlu1 %7253  ;;  %v16078_v41 = vmul.f32 %v16072_v18, %v19895_v27 }
 0x660   : > { %v7252_v9 = vpop.permute.xlu0 %7251  ;;  %10986 = vpow2.f32 %v7625_v13  ;;  %v7484_v53 = vsub.f32 %v19897_v7, %v7254_v16  ;;  %v16084_v44 = vmul.f32 %v16074_v43, %v19899_v21 }
 0x661   : > { %19896 = vst [vmem:[#allocation503_spill] sm:$0xff] %v16078_v41  ;;  %v7483_v37 = vsub.f32 %v19898_v1, %v7252_v9  ;;  %10988 = vpow2.f32 %v7623_v49  ;;  %7839 = vrot.lane.b32.xlu1 %v15820_v28, %s11462_s9  ;;  %7837 = vrot.lane.b32.xlu0 %v15822_v4, %s11462_s9  ;;  %v19901_v9 = vld [vmem:[#allocation46_spill] sm:$0xff]  ;;  %v19903_v49 = vld [vmem:[#allocation188_spill] sm:$0xff]  ;;  %v19905_v41 = vld [vmem:[#allocation47_spill] sm:$0xff] }
 0x662   : > { %19900 = vst [vmem:[#allocation504_spill] sm:$0xff] %v16084_v44  ;;  %v16090_v8 = vpop.eup %10978  ;;  %v7629_v23 = vmul.f32 1.442695, %v7484_v53  ;;  %v19904_v44 = vld [vmem:[#allocation189_spill] sm:$0xff] }
 0x663   : > { %v7627_v27 = vmul.f32 1.442695, %v7483_v37  ;;  %v16092_v13 = vpop.eup %10980  ;;  %v7258_v16 = vpop.permute.xlu1 %7257  ;;  %v16096_v1 = vmul.f32 %v16090_v8, %v19901_v9 }
 0x664   : > { %v7256_v7 = vpop.permute.xlu0 %7255  ;;  %10990 = vpow2.f32 %v7629_v23  ;;  %v7486_v21 = vsub.f32 %v19903_v49, %v7258_v16  ;;  %v16102_v4 = vmul.f32 %v16092_v13, %v19905_v41  ;;  %v19908_v41 = vld [vmem:[#allocation49_spill] sm:$0xff] }
 0x665   : > { %19902 = vst [vmem:[#allocation505_spill] sm:$0xff] %v16096_v1  ;;  %v7485_v28 = vsub.f32 %v19904_v44, %v7256_v7  ;;  %10992 = vpow2.f32 %v7627_v27  ;;  %7843 = vrot.lane.b32.xlu1 %v15838_v2, %s11462_s9  ;;  %7841 = vrot.lane.b32.xlu0 %v15840_v60, %s11462_s9  ;;  %v19906_v7 = vld [vmem:[#allocation48_spill] sm:$0xff] }
 0x666   : > { %v16108_v53 = vpop.eup %10982  ;;  %v7633_v37 = vmul.f32 1.442695, %v7486_v21 }
 0x667   : > { %v7631_v9 = vmul.f32 1.442695, %v7485_v28  ;;  %v16110_v23 = vpop.eup %10984  ;;  %v7262_v16 = vpop.permute.xlu1 %7261  ;;  %v16114_v44 = vmul.f32 %v16108_v53, %v19906_v7 }
 0x668   : > { %v7260_v1 = vpop.permute.xlu0 %7259  ;;  %10994 = vpow2.f32 %v7633_v37  ;;  %v7488_v27 = vsub.f32 %v19455_v59, %v7262_v16  ;;  %v16120_v60 = vmul.f32 %v16110_v23, %v19908_v41  ;;  %v19914_v59 = vld [vmem:[#allocation51_spill] sm:$0xff] }
 0x669   : > { %19907 = vst [vmem:[#allocation188_spill] sm:$0xff] %v16114_v44  ;;  %v7487_v2 = vsub.f32 %v19457_v14, %v7260_v1  ;;  %10996 = vpow2.f32 %v7631_v9  ;;  %7847 = vrot.lane.b32.xlu1 %v15856_v47, %s11462_s9  ;;  %7845 = vrot.lane.b32.xlu0 %v15858_v15, %s11462_s9  ;;  %v19910_v1 = vld [vmem:[#allocation50_spill] sm:$0xff]  ;;  %v19912_v9 = vld [vmem:[#allocation196_spill] sm:$0xff] }
 0x66a   : > { %19909 = vst [vmem:[#allocation506_spill] sm:$0xff] %v16120_v60  ;;  %v16126_v21 = vpop.eup %10986  ;;  %v7637_v28 = vmul.f32 1.442695, %v7488_v27  ;;  %v19913_v60 = vld [vmem:[#allocation197_spill] sm:$0xff] }
 0x66b   : > { %v7635_v7 = vmul.f32 1.442695, %v7487_v2  ;;  %v16128_v37 = vpop.eup %10988  ;;  %v7266_v16 = vpop.permute.xlu1 %7265  ;;  %v16132_v14 = vmul.f32 %v16126_v21, %v19910_v1 }
 0x66c   : > { %v7264_v44 = vpop.permute.xlu0 %7263  ;;  %10998 = vpow2.f32 %v7637_v28  ;;  %v7490_v41 = vsub.f32 %v19912_v9, %v7266_v16  ;;  %v16138_v15 = vmul.f32 %v16128_v37, %v19914_v59  ;;  %v19920_v9 = vld [vmem:[#allocation53_spill] sm:$0xff] }
 0x66d   : > { %19911 = vst [vmem:[#allocation507_spill] sm:$0xff] %v16132_v14  ;;  %v7489_v47 = vsub.f32 %v19913_v60, %v7264_v44  ;;  %11000 = vpow2.f32 %v7635_v7  ;;  %7851 = vrot.lane.b32.xlu1 %v15874_v50, %s11462_s9  ;;  %7849 = vrot.lane.b32.xlu0 %v15876_v12, %s11462_s9  ;;  %v19916_v44 = vld [vmem:[#allocation52_spill] sm:$0xff]  ;;  %v19918_v7 = vld [vmem:[#allocation199_spill] sm:$0xff] }
 0x66e   : > { %19915 = vst [vmem:[#allocation508_spill] sm:$0xff] %v16138_v15  ;;  %v16144_v27 = vpop.eup %10990  ;;  %v7641_v2 = vmul.f32 1.442695, %v7490_v41  ;;  %v19919_v15 = vld [vmem:[#allocation200_spill] sm:$0xff] }
 0x66f   : > { %v7639_v1 = vmul.f32 1.442695, %v7489_v47  ;;  %v16146_v28 = vpop.eup %10992  ;;  %v7270_v16 = vpop.permute.xlu1 %7269  ;;  %v16150_v60 = vmul.f32 %v16144_v27, %v19916_v44 }
 0x670   : > { %v7268_v14 = vpop.permute.xlu0 %7267  ;;  %11002 = vpow2.f32 %v7641_v2  ;;  %v7492_v59 = vsub.f32 %v19918_v7, %v7270_v16  ;;  %v16156_v12 = vmul.f32 %v16146_v28, %v19920_v9  ;;  %v19924_v9 = vld [vmem:[#allocation55_spill] sm:$0xff] }
 0x671   : > { %19917 = vst [vmem:[#allocation509_spill] sm:$0xff] %v16150_v60  ;;  %v7491_v50 = vsub.f32 %v19919_v15, %v7268_v14  ;;  %11004 = vpow2.f32 %v7639_v1  ;;  %7855 = vrot.lane.b32.xlu1 %v15892_v46, %s11462_s9  ;;  %7853 = vrot.lane.b32.xlu0 %v15894_v45, %s11462_s9  ;;  %v19922_v14 = vld [vmem:[#allocation54_spill] sm:$0xff] }
 0x672   : > { %19921 = vst [vmem:[#allocation199_spill] sm:$0xff] %v16156_v12  ;;  %v16162_v41 = vpop.eup %10994  ;;  %v7645_v47 = vmul.f32 1.442695, %v7492_v59 }
 0x673   : > { %v7643_v44 = vmul.f32 1.442695, %v7491_v50  ;;  %v16164_v2 = vpop.eup %10996  ;;  %v7274_v16 = vpop.permute.xlu1 %7273  ;;  %v16168_v15 = vmul.f32 %v16162_v41, %v19922_v14 }
 0x674   : > { %v7272_v60 = vpop.permute.xlu0 %7271  ;;  %11006 = vpow2.f32 %v7645_v47  ;;  %v7494_v1 = vsub.f32 %v19476_v61, %v7274_v16  ;;  %v16174_v45 = vmul.f32 %v16164_v2, %v19924_v9  ;;  %v19928_v9 = vld [vmem:[#allocation57_spill] sm:$0xff] }
 0x675   : > { %19923 = vst [vmem:[#allocation510_spill] sm:$0xff] %v16168_v15  ;;  %v7493_v46 = vsub.f32 %v19477_v56, %v7272_v60  ;;  %11008 = vpow2.f32 %v7643_v44  ;;  %7859 = vrot.lane.b32.xlu1 %v15910_v55, %s11462_s9  ;;  %7857 = vrot.lane.b32.xlu0 %v15912_v17, %s11462_s9  ;;  %v19926_v60 = vld [vmem:[#allocation56_spill] sm:$0xff] }
 0x676   : > { %19925 = vst [vmem:[#allocation511_spill] sm:$0xff] %v16174_v45  ;;  %v16180_v59 = vpop.eup %10998  ;;  %v7649_v50 = vmul.f32 1.442695, %v7494_v1 }
 0x677   : > { %v7647_v14 = vmul.f32 1.442695, %v7493_v46  ;;  %v16182_v47 = vpop.eup %11000  ;;  %v7278_v16 = vpop.permute.xlu1 %7277  ;;  %v16186_v12 = vmul.f32 %v16180_v59, %v19926_v60 }
 0x678   : > { %v7276_v15 = vpop.permute.xlu0 %7275  ;;  %11010 = vpow2.f32 %v7649_v50  ;;  %v7496_v44 = vsub.f32 %v19484_v0, %v7278_v16  ;;  %v16192_v17 = vmul.f32 %v16182_v47, %v19928_v9  ;;  %v19932_v9 = vld [vmem:[#allocation59_spill] sm:$0xff] }
 0x679   : > { %19927 = vst [vmem:[#allocation512_spill] sm:$0xff] %v16186_v12  ;;  %v7495_v55 = vsub.f32 %v19485_v63, %v7276_v15  ;;  %11012 = vpow2.f32 %v7647_v14  ;;  %7863 = vrot.lane.b32.xlu1 %v15928_v3, %s11462_s9  ;;  %7861 = vrot.lane.b32.xlu0 %v15930_v31, %s11462_s9  ;;  %v19930_v15 = vld [vmem:[#allocation58_spill] sm:$0xff] }
 0x67a   : > { %19929 = vst [vmem:[#allocation513_spill] sm:$0xff] %v16192_v17  ;;  %v16198_v1 = vpop.eup %11002  ;;  %v7653_v46 = vmul.f32 1.442695, %v7496_v44 }
 0x67b   : > { %v7651_v60 = vmul.f32 1.442695, %v7495_v55  ;;  %v16200_v50 = vpop.eup %11004  ;;  %v7282_v16 = vpop.permute.xlu1 %7281  ;;  %v16204_v45 = vmul.f32 %v16198_v1, %v19930_v15 }
 0x67c   : > { %v7280_v12 = vpop.permute.xlu0 %7279  ;;  %11014 = vpow2.f32 %v7653_v46  ;;  %v7498_v14 = vsub.f32 %v19492_v11, %v7282_v16  ;;  %v16210_v31 = vmul.f32 %v16200_v50, %v19932_v9  ;;  %v19936_v9 = vld [vmem:[#allocation61_spill] sm:$0xff] }
 0x67d   : > { %19931 = vst [vmem:[#allocation514_spill] sm:$0xff] %v16204_v45  ;;  %v7497_v3 = vsub.f32 %v19493_v22, %v7280_v12  ;;  %11016 = vpow2.f32 %v7651_v60  ;;  %7867 = vrot.lane.b32.xlu1 %v15946_v10, %s11462_s9  ;;  %7865 = vrot.lane.b32.xlu0 %v15948_v19, %s11462_s9  ;;  %v19934_v12 = vld [vmem:[#allocation60_spill] sm:$0xff] }
 0x67e   : > { %19933 = vst [vmem:[#allocation515_spill] sm:$0xff] %v16210_v31  ;;  %v16216_v44 = vpop.eup %11006  ;;  %v7657_v55 = vmul.f32 1.442695, %v7498_v14 }
 0x67f   : > { %v7655_v15 = vmul.f32 1.442695, %v7497_v3  ;;  %v16218_v46 = vpop.eup %11008  ;;  %v7286_v16 = vpop.permute.xlu1 %7285  ;;  %v16222_v17 = vmul.f32 %v16216_v44, %v19934_v12 }
 0x680   : > { %v7284_v45 = vpop.permute.xlu0 %7283  ;;  %11018 = vpow2.f32 %v7657_v55  ;;  %v7500_v60 = vsub.f32 %v19500_v54, %v7286_v16  ;;  %v16228_v19 = vmul.f32 %v16218_v46, %v19936_v9  ;;  %v19939_v9 = vld [vmem:[#allocation63_spill] sm:$0xff] }
 0x681   : > { %19935 = vst [vmem:[#allocation516_spill] sm:$0xff] %v16222_v17  ;;  %v7499_v10 = vsub.f32 %v19501_v62, %v7284_v45  ;;  %11020 = vpow2.f32 %v7655_v15  ;;  %7871 = vrot.lane.b32.xlu1 %v15964_v35, %s11462_s9  ;;  %7869 = vrot.lane.b32.xlu0 %v15966_v20, %s11462_s9  ;;  %v19937_v45 = vld [vmem:[#allocation62_spill] sm:$0xff] }
 0x682   : > { %v16234_v14 = vpop.eup %11010  ;;  %v7661_v3 = vmul.f32 1.442695, %v7500_v60 }
 0x683   : > { %v7659_v12 = vmul.f32 1.442695, %v7499_v10  ;;  %v16236_v55 = vpop.eup %11012  ;;  %v7290_v16 = vpop.permute.xlu1 %7289  ;;  %v16240_v31 = vmul.f32 %v16234_v14, %v19937_v45 }
 0x684   : > { %v7288_v17 = vpop.permute.xlu0 %7287  ;;  %11022 = vpow2.f32 %v7661_v3  ;;  %v7502_v15 = vsub.f32 %v19508_v51, %v7290_v16  ;;  %v16246_v20 = vmul.f32 %v16236_v55, %v19939_v9  ;;  %v19942_v9 = vld [vmem:[#allocation65_spill] sm:$0xff] }
 0x685   : > { %19938 = vst [vmem:[#allocation517_spill] sm:$0xff] %v16240_v31  ;;  %v7501_v35 = vsub.f32 %v19509_v38, %v7288_v17  ;;  %11024 = vpow2.f32 %v7659_v12  ;;  %7875 = vrot.lane.b32.xlu1 %v15982_v5, %s11462_s9  ;;  %7873 = vrot.lane.b32.xlu0 %v15984_v24, %s11462_s9  ;;  %v19940_v17 = vld [vmem:[#allocation64_spill] sm:$0xff] }
 0x686   : > { %v16252_v60 = vpop.eup %11014  ;;  %v7665_v10 = vmul.f32 1.442695, %v7502_v15 }
 0x687   : > { %v7663_v45 = vmul.f32 1.442695, %v7501_v35  ;;  %v16254_v3 = vpop.eup %11016  ;;  %v7294_v16 = vpop.permute.xlu1 %7293  ;;  %v16258_v38 = vmul.f32 %v16252_v60, %v19940_v17 }
 0x688   : > { %v7292_v31 = vpop.permute.xlu0 %7291  ;;  %11026 = vpow2.f32 %v7665_v10  ;;  %v7504_v12 = vsub.f32 %v19516_v40, %v7294_v16  ;;  %v16264_v24 = vmul.f32 %v16254_v3, %v19942_v9  ;;  %v19946_v9 = vld [vmem:[#allocation67_spill] sm:$0xff] }
 0x689   : > { %19941 = vst [vmem:[#allocation518_spill] sm:$0xff] %v16258_v38  ;;  %v7503_v5 = vsub.f32 %v19517_v39, %v7292_v31  ;;  %11028 = vpow2.f32 %v7663_v45  ;;  %7879 = vrot.lane.b32.xlu1 %v16000_v6, %s11462_s9  ;;  %7877 = vrot.lane.b32.xlu0 %v16002_v25, %s11462_s9  ;;  %v19944_v31 = vld [vmem:[#allocation66_spill] sm:$0xff] }
 0x68a   : > { %19943 = vst [vmem:[#allocation519_spill] sm:$0xff] %v16264_v24  ;;  %v16270_v15 = vpop.eup %11018  ;;  %v7669_v35 = vmul.f32 1.442695, %v7504_v12 }
 0x68b   : > { %v7667_v17 = vmul.f32 1.442695, %v7503_v5  ;;  %v16272_v10 = vpop.eup %11020  ;;  %v7298_v16 = vpop.permute.xlu1 %7297  ;;  %v16276_v39 = vmul.f32 %v16270_v15, %v19944_v31 }
 0x68c   : > { %v7296_v40 = vpop.permute.xlu0 %7295  ;;  %11030 = vpow2.f32 %v7669_v35  ;;  %v7506_v45 = vsub.f32 %v19524_v32, %v7298_v16  ;;  %v16282_v25 = vmul.f32 %v16272_v10, %v19946_v9  ;;  %v19950_v9 = vld [vmem:[#allocation148_spill] sm:$0xff] }
 0x68d   : > { %19945 = vst [vmem:[#allocation520_spill] sm:$0xff] %v16276_v39  ;;  %v7505_v6 = vsub.f32 %v19525_v30, %v7296_v40  ;;  %11032 = vpow2.f32 %v7667_v17  ;;  %7883 = vrot.lane.b32.xlu1 %v16018_v57, %s11462_s9  ;;  %7881 = vrot.lane.b32.xlu0 %v16020_v48, %s11462_s9  ;;  %v19948_v40 = vld [vmem:[#allocation68_spill] sm:$0xff] }
 0x68e   : > { %19947 = vst [vmem:[#allocation521_spill] sm:$0xff] %v16282_v25  ;;  %v16288_v12 = vpop.eup %11022  ;;  %v7673_v5 = vmul.f32 1.442695, %v7506_v45  ;;  %v19951_v25 = vld [vmem:[#allocation69_spill] sm:$0xff] }
 0x68f   : > { %v7671_v31 = vmul.f32 1.442695, %v7505_v6  ;;  %v16290_v35 = vpop.eup %11024  ;;  %v7302_v16 = vpop.permute.xlu1 %7301  ;;  %v16294_v30 = vmul.f32 %v16288_v12, %v19948_v40 }
 0x690   : > { %v7300_v32 = vpop.permute.xlu0 %7299  ;;  %11034 = vpow2.f32 %v7673_v5  ;;  %v7508_v17 = vsub.f32 %v19532_v29, %v7302_v16  ;;  %v16300_v48 = vmul.f32 %v16290_v35, %v19951_v25 }
 0x691   : > { %19949 = vst [vmem:[#allocation522_spill] sm:$0xff] %v16294_v30  ;;  %v7507_v57 = vsub.f32 %v19950_v9, %v7300_v32  ;;  %11036 = vpow2.f32 %v7671_v31  ;;  %7887 = vrot.lane.b32.xlu1 %v16036_v33, %s11462_s9  ;;  %7885 = vrot.lane.b32.xlu0 %v16038_v42, %s11462_s9  ;;  %v19953_v32 = vld [vmem:[#allocation70_spill] sm:$0xff]  ;;  %v19955_v31 = vld [vmem:[#allocation149_spill] sm:$0xff] }
 0x692   : > { %19952 = vst [vmem:[#allocation523_spill] sm:$0xff] %v16300_v48  ;;  %v16306_v45 = vpop.eup %11026  ;;  %v7677_v6 = vmul.f32 1.442695, %v7508_v17  ;;  %v19956_v48 = vld [vmem:[#allocation71_spill] sm:$0xff]  ;;  %v20018_v30 = vld [vmem:[#allocation94_spill] sm:$0xff] }
 0x693   : > { %v7675_v40 = vmul.f32 1.442695, %v7507_v57  ;;  %v16308_v5 = vpop.eup %11028  ;;  %v7306_v16 = vpop.permute.xlu1 %7305  ;;  %v16312_v9 = vmul.f32 %v16306_v45, %v19953_v32 }
 0x694   : > { %v7304_v29 = vpop.permute.xlu0 %7303  ;;  %11038 = vpow2.f32 %v7677_v6  ;;  %v7510_v25 = vsub.f32 %v19955_v31, %v7306_v16  ;;  %v16318_v42 = vmul.f32 %v16308_v5, %v19956_v48 }
 0x695   : > { %19954 = vst [vmem:[#allocation524_spill] sm:$0xff] %v16312_v9  ;;  %v7509_v33 = vsub.f32 %v19541_v34, %v7304_v29  ;;  %11040 = vpow2.f32 %v7675_v40  ;;  %7891 = vrot.lane.b32.xlu1 %v16054_v58, %s11462_s9  ;;  %7889 = vrot.lane.b32.xlu0 %v16056_v36, %s11462_s9  ;;  %v19958_v29 = vld [vmem:[#allocation72_spill] sm:$0xff]  ;;  %v19960_v40 = vld [vmem:[#allocation237_spill] sm:$0xff] }
 0x696   : > { %19957 = vst [vmem:[#allocation525_spill] sm:$0xff] %v16318_v42  ;;  %v16324_v17 = vpop.eup %11030  ;;  %v7681_v57 = vmul.f32 1.442695, %v7510_v25  ;;  %v19961_v42 = vld [vmem:[#allocation238_spill] sm:$0xff]  ;;  %v19962_v9 = vld [vmem:[#allocation73_spill] sm:$0xff] }
 0x697   : > { %v7679_v32 = vmul.f32 1.442695, %v7509_v33  ;;  %v16326_v6 = vpop.eup %11032  ;;  %v7310_v16 = vpop.permute.xlu1 %7309  ;;  %v16330_v34 = vmul.f32 %v16324_v17, %v19958_v29 }
 0x698   : > { %v7308_v31 = vpop.permute.xlu0 %7307  ;;  %11042 = vpow2.f32 %v7681_v57  ;;  %v7512_v48 = vsub.f32 %v19960_v40, %v7310_v16  ;;  %v16336_v36 = vmul.f32 %v16326_v6, %v19962_v9 }
 0x699   : > { %19959 = vst [vmem:[#allocation526_spill] sm:$0xff] %v16330_v34  ;;  %v7511_v58 = vsub.f32 %v19961_v42, %v7308_v31  ;;  %11044 = vpow2.f32 %v7679_v32  ;;  %7895 = vrot.lane.b32.xlu1 %v16072_v18, %s11462_s9  ;;  %7893 = vrot.lane.b32.xlu0 %v16074_v43, %s11462_s9  ;;  %v19964_v31 = vld [vmem:[#allocation74_spill] sm:$0xff]  ;;  %v19966_v32 = vld [vmem:[#allocation159_spill] sm:$0xff] }
 0x69a   : > { %19963 = vst [vmem:[#allocation527_spill] sm:$0xff] %v16336_v36  ;;  %v16342_v25 = vpop.eup %11034  ;;  %v7685_v33 = vmul.f32 1.442695, %v7512_v48  ;;  %v19967_v36 = vld [vmem:[#allocation162_spill] sm:$0xff]  ;;  %v19968_v34 = vld [vmem:[#allocation75_spill] sm:$0xff] }
 0x69b   : > { %v7683_v29 = vmul.f32 1.442695, %v7511_v58  ;;  %v16344_v57 = vpop.eup %11036  ;;  %v7314_v16 = vpop.permute.xlu1 %7313  ;;  %v16348_v42 = vmul.f32 %v16342_v25, %v19964_v31 }
 0x69c   : > { %v7312_v40 = vpop.permute.xlu0 %7311  ;;  %11046 = vpow2.f32 %v7685_v33  ;;  %v7514_v9 = vsub.f32 %v19966_v32, %v7314_v16  ;;  %v16354_v43 = vmul.f32 %v16344_v57, %v19968_v34 }
 0x69d   : > { %19965 = vst [vmem:[#allocation528_spill] sm:$0xff] %v16348_v42  ;;  %v7513_v18 = vsub.f32 %v19967_v36, %v7312_v40  ;;  %11048 = vpow2.f32 %v7683_v29  ;;  %7899 = vrot.lane.b32.xlu1 %v16090_v8, %s11462_s9  ;;  %7897 = vrot.lane.b32.xlu0 %v16092_v13, %s11462_s9  ;;  %v19970_v40 = vld [vmem:[#allocation76_spill] sm:$0xff]  ;;  %v19972_v29 = vld [vmem:[#allocation245_spill] sm:$0xff] }
 0x69e   : > { %19969 = vst [vmem:[#allocation529_spill] sm:$0xff] %v16354_v43  ;;  %v16360_v48 = vpop.eup %11038  ;;  %v7689_v58 = vmul.f32 1.442695, %v7514_v9  ;;  %v19973_v43 = vld [vmem:[#allocation246_spill] sm:$0xff]  ;;  %v19974_v42 = vld [vmem:[#allocation77_spill] sm:$0xff] }
 0x69f   : > { %v7687_v31 = vmul.f32 1.442695, %v7513_v18  ;;  %v16362_v33 = vpop.eup %11040  ;;  %v7318_v16 = vpop.permute.xlu1 %7317  ;;  %v16366_v36 = vmul.f32 %v16360_v48, %v19970_v40 }
 0x6a0   : > { %v7316_v32 = vpop.permute.xlu0 %7315  ;;  %11050 = vpow2.f32 %v7689_v58  ;;  %v7516_v34 = vsub.f32 %v19972_v29, %v7318_v16  ;;  %v16372_v13 = vmul.f32 %v16362_v33, %v19974_v42 }
 0x6a1   : > { %19971 = vst [vmem:[#allocation530_spill] sm:$0xff] %v16366_v36  ;;  %v7515_v8 = vsub.f32 %v19973_v43, %v7316_v32  ;;  %11052 = vpow2.f32 %v7687_v31  ;;  %7903 = vrot.lane.b32.xlu1 %v16108_v53, %s11462_s9  ;;  %7901 = vrot.lane.b32.xlu0 %v16110_v23, %s11462_s9  ;;  %v19976_v32 = vld [vmem:[#allocation78_spill] sm:$0xff]  ;;  %v19978_v31 = vld [vmem:[#allocation249_spill] sm:$0xff]  ;;  %v19980_v36 = vld [vmem:[#allocation79_spill] sm:$0xff] }
 0x6a2   : > { %19975 = vst [vmem:[#allocation531_spill] sm:$0xff] %v16372_v13  ;;  %v16378_v9 = vpop.eup %11042  ;;  %v7693_v18 = vmul.f32 1.442695, %v7516_v34  ;;  %v19979_v13 = vld [vmem:[#allocation250_spill] sm:$0xff] }
 0x6a3   : > { %v7691_v40 = vmul.f32 1.442695, %v7515_v8  ;;  %v16380_v58 = vpop.eup %11044  ;;  %v7322_v16 = vpop.permute.xlu1 %7321  ;;  %v16384_v43 = vmul.f32 %v16378_v9, %v19976_v32 }
 0x6a4   : > { %v7320_v29 = vpop.permute.xlu0 %7319  ;;  %11054 = vpow2.f32 %v7693_v18  ;;  %v7518_v42 = vsub.f32 %v19978_v31, %v7322_v16  ;;  %v16390_v23 = vmul.f32 %v16380_v58, %v19980_v36 }
 0x6a5   : > { %19977 = vst [vmem:[#allocation532_spill] sm:$0xff] %v16384_v43  ;;  %v7517_v53 = vsub.f32 %v19979_v13, %v7320_v29  ;;  %11056 = vpow2.f32 %v7691_v40  ;;  %7907 = vrot.lane.b32.xlu1 %v16126_v21, %s11462_s9  ;;  %7905 = vrot.lane.b32.xlu0 %v16128_v37, %s11462_s9  ;;  %v19982_v29 = vld [vmem:[#allocation80_spill] sm:$0xff]  ;;  %v19986_v43 = vld [vmem:[#allocation81_spill] sm:$0xff] }
 0x6a6   : > { %19981 = vst [vmem:[#allocation533_spill] sm:$0xff] %v16390_v23  ;;  %v16396_v34 = vpop.eup %11046  ;;  %v7697_v8 = vmul.f32 1.442695, %v7518_v42  ;;  %v19984_v40 = vld [vmem:[#allocation172_spill] sm:$0xff]  ;;  %v19985_v23 = vld [vmem:[#allocation253_spill] sm:$0xff] }
 0x6a7   : > { %v7695_v32 = vmul.f32 1.442695, %v7517_v53  ;;  %v16398_v18 = vpop.eup %11048  ;;  %v7326_v16 = vpop.permute.xlu1 %7325  ;;  %v16402_v13 = vmul.f32 %v16396_v34, %v19982_v29 }
 0x6a8   : > { %v7324_v31 = vpop.permute.xlu0 %7323  ;;  %11058 = vpow2.f32 %v7697_v8  ;;  %v7520_v36 = vsub.f32 %v19984_v40, %v7326_v16  ;;  %v16408_v37 = vmul.f32 %v16398_v18, %v19986_v43 }
 0x6a9   : > { %19983 = vst [vmem:[#allocation534_spill] sm:$0xff] %v16402_v13  ;;  %v7519_v21 = vsub.f32 %v19985_v23, %v7324_v31  ;;  %11060 = vpow2.f32 %v7695_v32  ;;  %7911 = vrot.lane.b32.xlu1 %v16144_v27, %s11462_s9  ;;  %7909 = vrot.lane.b32.xlu0 %v16146_v28, %s11462_s9  ;;  %v19988_v31 = vld [vmem:[#allocation82_spill] sm:$0xff]  ;;  %v19992_v13 = vld [vmem:[#allocation83_spill] sm:$0xff] }
 0x6aa   : > { %19987 = vst [vmem:[#allocation535_spill] sm:$0xff] %v16408_v37  ;;  %v16414_v42 = vpop.eup %11050  ;;  %v7701_v53 = vmul.f32 1.442695, %v7520_v36  ;;  %v19990_v32 = vld [vmem:[#allocation174_spill] sm:$0xff]  ;;  %v19991_v37 = vld [vmem:[#allocation177_spill] sm:$0xff] }
 0x6ab   : > { %v7699_v29 = vmul.f32 1.442695, %v7519_v21  ;;  %v16416_v8 = vpop.eup %11052  ;;  %v7330_v16 = vpop.permute.xlu1 %7329  ;;  %v16420_v23 = vmul.f32 %v16414_v42, %v19988_v31 }
 0x6ac   : > { %v7328_v40 = vpop.permute.xlu0 %7327  ;;  %11062 = vpow2.f32 %v7701_v53  ;;  %v7522_v43 = vsub.f32 %v19990_v32, %v7330_v16  ;;  %v16426_v28 = vmul.f32 %v16416_v8, %v19992_v13 }
 0x6ad   : > { %19989 = vst [vmem:[#allocation536_spill] sm:$0xff] %v16420_v23  ;;  %v7521_v27 = vsub.f32 %v19991_v37, %v7328_v40  ;;  %11064 = vpow2.f32 %v7699_v29  ;;  %7915 = vrot.lane.b32.xlu1 %v16162_v41, %s11462_s9  ;;  %7913 = vrot.lane.b32.xlu0 %v16164_v2, %s11462_s9  ;;  %v19994_v40 = vld [vmem:[#allocation84_spill] sm:$0xff]  ;;  %v19996_v29 = vld [vmem:[#allocation178_spill] sm:$0xff]  ;;  %v19998_v23 = vld [vmem:[#allocation85_spill] sm:$0xff] }
 0x6ae   : > { %19993 = vst [vmem:[#allocation537_spill] sm:$0xff] %v16426_v28  ;;  %v16432_v36 = vpop.eup %11054  ;;  %v7705_v21 = vmul.f32 1.442695, %v7522_v43  ;;  %v19997_v28 = vld [vmem:[#allocation179_spill] sm:$0xff] }
 0x6af   : > { %v7703_v31 = vmul.f32 1.442695, %v7521_v27  ;;  %v16434_v53 = vpop.eup %11056  ;;  %v7334_v16 = vpop.permute.xlu1 %7333  ;;  %v16438_v37 = vmul.f32 %v16432_v36, %v19994_v40 }
 0x6b0   : > { %v7332_v32 = vpop.permute.xlu0 %7331  ;;  %11066 = vpow2.f32 %v7705_v21  ;;  %v7524_v13 = vsub.f32 %v19996_v29, %v7334_v16  ;;  %v16444_v2 = vmul.f32 %v16434_v53, %v19998_v23 }
 0x6b1   : > { %19995 = vst [vmem:[#allocation538_spill] sm:$0xff] %v16438_v37  ;;  %v7523_v41 = vsub.f32 %v19997_v28, %v7332_v32  ;;  %11068 = vpow2.f32 %v7703_v31  ;;  %7919 = vrot.lane.b32.xlu1 %v16180_v59, %s11462_s9  ;;  %7917 = vrot.lane.b32.xlu0 %v16182_v47, %s11462_s9  ;;  %v20000_v32 = vld [vmem:[#allocation86_spill] sm:$0xff]  ;;  %v20002_v31 = vld [vmem:[#allocation180_spill] sm:$0xff]  ;;  %v20004_v37 = vld [vmem:[#allocation87_spill] sm:$0xff] }
 0x6b2   : > { %19999 = vst [vmem:[#allocation539_spill] sm:$0xff] %v16444_v2  ;;  %v16450_v43 = vpop.eup %11058  ;;  %v7709_v27 = vmul.f32 1.442695, %v7524_v13  ;;  %v20003_v2 = vld [vmem:[#allocation181_spill] sm:$0xff] }
 0x6b3   : > { %v7707_v40 = vmul.f32 1.442695, %v7523_v41  ;;  %v16452_v21 = vpop.eup %11060  ;;  %v7338_v16 = vpop.permute.xlu1 %7337  ;;  %v16456_v28 = vmul.f32 %v16450_v43, %v20000_v32 }
 0x6b4   : > { %v7336_v29 = vpop.permute.xlu0 %7335  ;;  %11070 = vpow2.f32 %v7709_v27  ;;  %v7526_v23 = vsub.f32 %v20002_v31, %v7338_v16  ;;  %v16462_v47 = vmul.f32 %v16452_v21, %v20004_v37 }
 0x6b5   : > { %20001 = vst [vmem:[#allocation540_spill] sm:$0xff] %v16456_v28  ;;  %v7525_v59 = vsub.f32 %v20003_v2, %v7336_v29  ;;  %11072 = vpow2.f32 %v7707_v40  ;;  %7923 = vrot.lane.b32.xlu1 %v16198_v1, %s11462_s9  ;;  %7921 = vrot.lane.b32.xlu0 %v16200_v50, %s11462_s9  ;;  %v20006_v2 = vld [vmem:[#allocation88_spill] sm:$0xff]  ;;  %v20008_v40 = vld [vmem:[#allocation89_spill] sm:$0xff] }
 0x6b6   : > { %20005 = vst [vmem:[#allocation541_spill] sm:$0xff] %v16462_v47  ;;  %v16468_v13 = vpop.eup %11062  ;;  %v7713_v41 = vmul.f32 1.442695, %v7526_v23 }
 0x6b7   : > { %v7711_v32 = vmul.f32 1.442695, %v7525_v59  ;;  %v16470_v27 = vpop.eup %11064  ;;  %v16472_v16 = vpop.permute.xlu1 %7811  ;;  %v16478_v37 = vmul.f32 %v16468_v13, %v20006_v2 }
 0x6b8   : > { %v16474_v29 = vpop.permute.xlu0 %7809  ;;  %11074 = vpow2.f32 %v7713_v41  ;;  %v16482_v1 = vmul.f32 %v16470_v27, %v20008_v40  ;;  %v20010_v41 = vld [vmem:[#allocation90_spill] sm:$0xff]  ;;  %v20012_v40 = vld [vmem:[#allocation91_spill] sm:$0xff] }
 0x6b9   : > { %20007 = vst [vmem:[#allocation542_spill] sm:$0xff] %v16478_v37  ;;  %11076 = vpow2.f32 %v7711_v32  ;;  %7927 = vrot.lane.b32.xlu1 %v16216_v44, %s11462_s9  ;;  %7925 = vrot.lane.b32.xlu0 %v16218_v46, %s11462_s9 }
 0x6ba   : > { %20009 = vst [vmem:[#allocation543_spill] sm:$0xff] %v16482_v1  ;;  %v16488_v50 = vpop.eup %11066 }
 0x6bb   : > { %v16490_v23 = vpop.eup %11068  ;;  %v16492_v59 = vpop.permute.xlu1 %7815  ;;  %v16498_v31 = vmul.f32 %v16488_v50, %v20010_v41  ;;  %v20014_v41 = vld [vmem:[#allocation92_spill] sm:$0xff] }
 0x6bc   : > { %v16494_v2 = vpop.permute.xlu0 %7813  ;;  %v16502_v32 = vmul.f32 %v16490_v23, %v20012_v40  ;;  %v20016_v40 = vld [vmem:[#allocation93_spill] sm:$0xff] }
 0x6bd   : > { %20011 = vst [vmem:[#allocation544_spill] sm:$0xff] %v16498_v31  ;;  %7931 = vrot.lane.b32.xlu1 %v16234_v14, %s11462_s9  ;;  %7929 = vrot.lane.b32.xlu0 %v16236_v55, %s11462_s9 }
 0x6be   : > { %20013 = vst [vmem:[#allocation545_spill] sm:$0xff] %v16502_v32  ;;  %v16508_v44 = vpop.eup %11070 }
 0x6bf   : > { %v16510_v46 = vpop.eup %11072  ;;  %v16512_v1 = vpop.permute.xlu1 %7819  ;;  %v16518_v31 = vmul.f32 %v16508_v44, %v20014_v41  ;;  %v20020_v41 = vld [vmem:[#allocation95_spill] sm:$0xff] }
 0x6c0   : > { %v16514_v37 = vpop.permute.xlu0 %7817  ;;  %v16522_v32 = vmul.f32 %v16510_v46, %v20016_v40  ;;  %v20048_v40 = vld [vmem:[#allocation463_spill] sm:$0xff] }
 0x6c1   : > { %20015 = vst [vmem:[#allocation546_spill] sm:$0xff] %v16518_v31  ;;  %7935 = vrot.lane.b32.xlu1 %v16252_v60, %s11462_s9  ;;  %7933 = vrot.lane.b32.xlu0 %v16254_v3, %s11462_s9 }
 0x6c2   : > { %20017 = vst [vmem:[#allocation547_spill] sm:$0xff] %v16522_v32  ;;  %v11075_v14 = vpop.eup %11074 }
 0x6c3   : > { %v11077_v55 = vpop.eup %11076  ;;  %v16528_v47 = vpop.permute.xlu1 %7823  ;;  %v16533_v39 = vmul.f32 %v11075_v14, %v20018_v30 }
 0x6c4   : > { %v16530_v28 = vpop.permute.xlu0 %7821  ;;  %v16536_v31 = vmul.f32 %v11077_v55, %v20020_v41 }
 0x6c5   : > { %20019 = vst [vmem:[#allocation548_spill] sm:$0xff] %v16533_v39  ;;  %7939 = vrot.lane.b32.xlu1 %v16270_v15, %s11462_s9  ;;  %7937 = vrot.lane.b32.xlu0 %v16272_v10, %s11462_s9  ;;  %v20052_v39 = vld [vmem:[#allocation465_spill] sm:$0xff] }
 0x6c6   : > { %20021 = vst [vmem:[#allocation549_spill] sm:$0xff] %v16536_v31 }
 0x6c7   : > { %v16542_v60 = vpop.permute.xlu1 %7827 }
 0x6c8   : > { %v16544_v3 = vpop.permute.xlu0 %7825 }
 0x6c9   : > { %7943 = vrot.lane.b32.xlu1 %v16288_v12, %s11462_s9  ;;  %7941 = vrot.lane.b32.xlu0 %v16290_v35, %s11462_s9 }
 0x6cb   : > { %v16550_v30 = vpop.permute.xlu1 %7831 }
 0x6cc   : > { %v16552_v41 = vpop.permute.xlu0 %7829 }
 0x6cd   : > { %7947 = vrot.lane.b32.xlu1 %v16306_v45, %s11462_s9  ;;  %7945 = vrot.lane.b32.xlu0 %v16308_v5, %s11462_s9 }
 0x6cf   : > { %v16558_v15 = vpop.permute.xlu1 %7835 }
 0x6d0   : > { %20022 = vst [vmem:[#allocation550_spill] sm:$0xff] %v16558_v15  ;;  %v16560_v10 = vpop.permute.xlu0 %7833 }
 0x6d1   : > { %20023 = vst [vmem:[#allocation551_spill] sm:$0xff] %v16560_v10  ;;  %7951 = vrot.lane.b32.xlu1 %v16324_v17, %s11462_s9  ;;  %7949 = vrot.lane.b32.xlu0 %v16326_v6, %s11462_s9 }
 0x6d3   : > { %v16566_v12 = vpop.permute.xlu1 %7839 }
 0x6d4   : > { %20024 = vst [vmem:[#allocation552_spill] sm:$0xff] %v16566_v12  ;;  %v16568_v35 = vpop.permute.xlu0 %7837 }
 0x6d5   : > { %20025 = vst [vmem:[#allocation553_spill] sm:$0xff] %v16568_v35  ;;  %7955 = vrot.lane.b32.xlu1 %v16342_v25, %s11462_s9  ;;  %7953 = vrot.lane.b32.xlu0 %v16344_v57, %s11462_s9 }
 0x6d7   : > { %v16574_v45 = vpop.permute.xlu1 %7843 }
 0x6d8   : > { %20026 = vst [vmem:[#allocation554_spill] sm:$0xff] %v16574_v45  ;;  %v16576_v5 = vpop.permute.xlu0 %7841 }
 0x6d9   : > { %20027 = vst [vmem:[#allocation555_spill] sm:$0xff] %v16576_v5  ;;  %7959 = vrot.lane.b32.xlu1 %v16360_v48, %s11462_s9  ;;  %7957 = vrot.lane.b32.xlu0 %v16362_v33, %s11462_s9  ;;  %v20165_v5 = vld [vmem:[#allocation123_spill] sm:$0xff] }
 0x6db   : > { %v16582_v17 = vpop.permute.xlu1 %7847 }
 0x6dc   : > { %20028 = vst [vmem:[#allocation556_spill] sm:$0xff] %v16582_v17  ;;  %v16584_v6 = vpop.permute.xlu0 %7845 }
 0x6dd   : > { %20029 = vst [vmem:[#allocation557_spill] sm:$0xff] %v16584_v6  ;;  %7963 = vrot.lane.b32.xlu1 %v16378_v9, %s11462_s9  ;;  %7961 = vrot.lane.b32.xlu0 %v16380_v58, %s11462_s9 }
 0x6df   : > { %v16590_v25 = vpop.permute.xlu1 %7851 }
 0x6e0   : > { %20030 = vst [vmem:[#allocation558_spill] sm:$0xff] %v16590_v25  ;;  %v16592_v57 = vpop.permute.xlu0 %7849 }
 0x6e1   : > { %20031 = vst [vmem:[#allocation559_spill] sm:$0xff] %v16592_v57  ;;  %7967 = vrot.lane.b32.xlu1 %v16396_v34, %s11462_s9  ;;  %7965 = vrot.lane.b32.xlu0 %v16398_v18, %s11462_s9  ;;  %v20153_v57 = vld [vmem:[#allocation119_spill] sm:$0xff] }
 0x6e3   : > { %v16598_v48 = vpop.permute.xlu1 %7855 }
 0x6e4   : > { %20032 = vst [vmem:[#allocation560_spill] sm:$0xff] %v16598_v48  ;;  %v16600_v33 = vpop.permute.xlu0 %7853 }
 0x6e5   : > { %20033 = vst [vmem:[#allocation561_spill] sm:$0xff] %v16600_v33  ;;  %7971 = vrot.lane.b32.xlu1 %v16414_v42, %s11462_s9  ;;  %7969 = vrot.lane.b32.xlu0 %v16416_v8, %s11462_s9 }
 0x6e7   : > { %v16606_v9 = vpop.permute.xlu1 %7859 }
 0x6e8   : > { %20034 = vst [vmem:[#allocation562_spill] sm:$0xff] %v16606_v9  ;;  %v16608_v58 = vpop.permute.xlu0 %7857 }
 0x6e9   : > { %20035 = vst [vmem:[#allocation563_spill] sm:$0xff] %v16608_v58  ;;  %7975 = vrot.lane.b32.xlu1 %v16432_v36, %s11462_s9  ;;  %7973 = vrot.lane.b32.xlu0 %v16434_v53, %s11462_s9 }
 0x6eb   : > { %v16614_v34 = vpop.permute.xlu1 %7863 }
 0x6ec   : > { %20036 = vst [vmem:[#allocation564_spill] sm:$0xff] %v16614_v34  ;;  %v16616_v18 = vpop.permute.xlu0 %7861 }
 0x6ed   : > { %20037 = vst [vmem:[#allocation565_spill] sm:$0xff] %v16616_v18  ;;  %7979 = vrot.lane.b32.xlu1 %v16450_v43, %s11462_s9  ;;  %7977 = vrot.lane.b32.xlu0 %v16452_v21, %s11462_s9 }
 0x6ef   : > { %v16622_v42 = vpop.permute.xlu1 %7867 }
 0x6f0   : > { %20038 = vst [vmem:[#allocation566_spill] sm:$0xff] %v16622_v42  ;;  %v16624_v8 = vpop.permute.xlu0 %7865  ;;  %v20098_v42 = vld [vmem:[#allocation210_spill] sm:$0xff] }
 0x6f1   : > { %20039 = vst [vmem:[#allocation567_spill] sm:$0xff] %v16624_v8  ;;  %7983 = vrot.lane.b32.xlu1 %v16468_v13, %s11462_s9  ;;  %7981 = vrot.lane.b32.xlu0 %v16470_v27, %s11462_s9  ;;  %v20097_v8 = vld [vmem:[#allocation100_spill] sm:$0xff] }
 0x6f3   : > { %v16630_v36 = vpop.permute.xlu1 %7871 }
 0x6f4   : > { %20040 = vst [vmem:[#allocation568_spill] sm:$0xff] %v16630_v36  ;;  %v16632_v53 = vpop.permute.xlu0 %7869 }
 0x6f5   : > { %20041 = vst [vmem:[#allocation569_spill] sm:$0xff] %v16632_v53  ;;  %7987 = vrot.lane.b32.xlu1 %v16488_v50, %s11462_s9  ;;  %7985 = vrot.lane.b32.xlu0 %v16490_v23, %s11462_s9  ;;  %v20093_v53 = vld [vmem:[#allocation99_spill] sm:$0xff] }
 0x6f7   : > { %v16638_v43 = vpop.permute.xlu1 %7875 }
 0x6f8   : > { %20042 = vst [vmem:[#allocation570_spill] sm:$0xff] %v16638_v43  ;;  %v16640_v21 = vpop.permute.xlu0 %7873 }
 0x6f9   : > { %20043 = vst [vmem:[#allocation571_spill] sm:$0xff] %v16640_v21  ;;  %7991 = vrot.lane.b32.xlu1 %v16508_v44, %s11462_s9  ;;  %7989 = vrot.lane.b32.xlu0 %v16510_v46, %s11462_s9  ;;  %v20049_v44 = vld [vmem:[#allocation464_spill] sm:$0xff]  ;;  %v20091_v21 = vld [vmem:[#allocation98_spill] sm:$0xff] }
 0x6fb   : > { %v16646_v13 = vpop.permute.xlu1 %7879 }
 0x6fc   : > { %20044 = vst [vmem:[#allocation572_spill] sm:$0xff] %v16646_v13  ;;  %v16648_v27 = vpop.permute.xlu0 %7877  ;;  %v20087_v13 = vld [vmem:[#allocation97_spill] sm:$0xff] }
 0x6fd   : > { %20045 = vst [vmem:[#allocation573_spill] sm:$0xff] %v16648_v27  ;;  %7995 = vrot.lane.b32.xlu1 %v11075_v14, %s11462_s9  ;;  %7993 = vrot.lane.b32.xlu0 %v11077_v55, %s11462_s9  ;;  %v20053_v14 = vld [vmem:[#allocation466_spill] sm:$0xff] }
 0x6fe   : > { %v20086_v27 = vld [vmem:[#allocation202_spill] sm:$0xff] }
 0x6ff   : > { %v16652_v50 = vpop.permute.xlu1 %7883 }
 0x700   : > { %20046 = vst [vmem:[#allocation574_spill] sm:$0xff] %v16652_v50  ;;  %v16654_v23 = vpop.permute.xlu0 %7881  ;;  %v20085_v50 = vld [vmem:[#allocation96_spill] sm:$0xff] }
 0x701   : > { %20047 = vst [vmem:[#allocation575_spill] sm:$0xff] %v16654_v23  ;;  %8375 = vrot.lane.b32.xlu1 %v20048_v40, %s11462_s9  ;;  %8373 = vrot.lane.b32.xlu0 %v20049_v44, %s11462_s9  ;;  %v20056_v23 = vld [vmem:[#allocation467_spill] sm:$0xff]  ;;  %v20057_v40 = vld [vmem:[#allocation468_spill] sm:$0xff] }
 0x703   : > { %v16660_v31 = vpop.permute.xlu1 %7887 }
 0x704   : > { %20050 = vst [vmem:[#allocation463_spill] sm:$0xff] %v16660_v31  ;;  %v16662_v46 = vpop.permute.xlu0 %7885 }
 0x705   : > { %20051 = vst [vmem:[#allocation464_spill] sm:$0xff] %v16662_v46  ;;  %8379 = vrot.lane.b32.xlu1 %v20052_v39, %s11462_s9  ;;  %8377 = vrot.lane.b32.xlu0 %v20053_v14, %s11462_s9  ;;  %v20060_v46 = vld [vmem:[#allocation469_spill] sm:$0xff]  ;;  %v20061_v39 = vld [vmem:[#allocation470_spill] sm:$0xff] }
 0x707   : > { %v16668_v55 = vpop.permute.xlu1 %7891 }
 0x708   : > { %20054 = vst [vmem:[#allocation465_spill] sm:$0xff] %v16668_v55  ;;  %v16670_v32 = vpop.permute.xlu0 %7889 }
 0x709   : > { %20055 = vst [vmem:[#allocation466_spill] sm:$0xff] %v16670_v32  ;;  %8383 = vrot.lane.b32.xlu1 %v20056_v23, %s11462_s9  ;;  %8381 = vrot.lane.b32.xlu0 %v20057_v40, %s11462_s9  ;;  %v20064_v32 = vld [vmem:[#allocation471_spill] sm:$0xff]  ;;  %v20065_v23 = vld [vmem:[#allocation472_spill] sm:$0xff] }
 0x70b   : > { %v16676_v44 = vpop.permute.xlu1 %7895 }
 0x70c   : > { %20058 = vst [vmem:[#allocation467_spill] sm:$0xff] %v16676_v44  ;;  %v16678_v31 = vpop.permute.xlu0 %7893 }
 0x70d   : > { %20059 = vst [vmem:[#allocation468_spill] sm:$0xff] %v16678_v31  ;;  %8387 = vrot.lane.b32.xlu1 %v20060_v46, %s11462_s9  ;;  %8385 = vrot.lane.b32.xlu0 %v20061_v39, %s11462_s9  ;;  %v20068_v31 = vld [vmem:[#allocation473_spill] sm:$0xff]  ;;  %v20069_v46 = vld [vmem:[#allocation474_spill] sm:$0xff] }
 0x70f   : > { %v16684_v14 = vpop.permute.xlu1 %7899 }
 0x710   : > { %20062 = vst [vmem:[#allocation469_spill] sm:$0xff] %v16684_v14  ;;  %v16686_v55 = vpop.permute.xlu0 %7897 }
 0x711   : > { %20063 = vst [vmem:[#allocation470_spill] sm:$0xff] %v16686_v55  ;;  %8391 = vrot.lane.b32.xlu1 %v20064_v32, %s11462_s9  ;;  %8389 = vrot.lane.b32.xlu0 %v20065_v23, %s11462_s9  ;;  %v20072_v55 = vld [vmem:[#allocation475_spill] sm:$0xff]  ;;  %v20073_v32 = vld [vmem:[#allocation476_spill] sm:$0xff] }
 0x713   : > { %v16692_v40 = vpop.permute.xlu1 %7903 }
 0x714   : > { %20066 = vst [vmem:[#allocation471_spill] sm:$0xff] %v16692_v40  ;;  %v16694_v44 = vpop.permute.xlu0 %7901 }
 0x715   : > { %20067 = vst [vmem:[#allocation472_spill] sm:$0xff] %v16694_v44  ;;  %8395 = vrot.lane.b32.xlu1 %v20068_v31, %s11462_s9  ;;  %8393 = vrot.lane.b32.xlu0 %v20069_v46, %s11462_s9  ;;  %v20076_v44 = vld [vmem:[#allocation477_spill] sm:$0xff]  ;;  %v20077_v31 = vld [vmem:[#allocation478_spill] sm:$0xff] }
 0x717   : > { %v16700_v39 = vpop.permute.xlu1 %7907 }
 0x718   : > { %20070 = vst [vmem:[#allocation473_spill] sm:$0xff] %v16700_v39  ;;  %v16702_v14 = vpop.permute.xlu0 %7905 }
 0x719   : > { %20071 = vst [vmem:[#allocation474_spill] sm:$0xff] %v16702_v14  ;;  %8399 = vrot.lane.b32.xlu1 %v20072_v55, %s11462_s9  ;;  %8397 = vrot.lane.b32.xlu0 %v20073_v32, %s11462_s9  ;;  %v20080_v14 = vld [vmem:[#allocation479_spill] sm:$0xff]  ;;  %v20081_v55 = vld [vmem:[#allocation480_spill] sm:$0xff] }
 0x71b   : > { %v16708_v23 = vpop.permute.xlu1 %7911 }
 0x71c   : > { %20074 = vst [vmem:[#allocation475_spill] sm:$0xff] %v16708_v23  ;;  %v16710_v40 = vpop.permute.xlu0 %7909 }
 0x71d   : > { %20075 = vst [vmem:[#allocation476_spill] sm:$0xff] %v16710_v40  ;;  %8403 = vrot.lane.b32.xlu1 %v20076_v44, %s11462_s9  ;;  %8401 = vrot.lane.b32.xlu0 %v20077_v31, %s11462_s9  ;;  %v20084_v40 = vld [vmem:[#allocation201_spill] sm:$0xff]  ;;  %v4895_v31 = vsub.f32 %v20087_v13, %v20086_v27 }
 0x71e   : > { %v4896_v44 = vsub.f32 %v20085_v50, %v20084_v40  ;;  %v20096_v40 = vld [vmem:[#allocation209_spill] sm:$0xff] }
 0x71f   : > { %v16716_v46 = vpop.permute.xlu1 %7915  ;;  %v4900_v13 = vsub.f32 %v20097_v8, %v20096_v40  ;;  %v4989_v27 = vmul.f32 1.442695, %v4895_v31  ;;  %v20108_v31 = vld [vmem:[#allocation216_spill] sm:$0xff] }
 0x720   : > { %20078 = vst [vmem:[#allocation477_spill] sm:$0xff] %v16716_v46  ;;  %v16718_v39 = vpop.permute.xlu0 %7913  ;;  %v20088_v46 = vld [vmem:[#allocation481_spill] sm:$0xff]  ;;  %v4991_v50 = vmul.f32 1.442695, %v4896_v44  ;;  %v20105_v44 = vld [vmem:[#allocation103_spill] sm:$0xff]  ;;  %v20109_v40 = vld [vmem:[#allocation104_spill] sm:$0xff] }
 0x721   : > { %20079 = vst [vmem:[#allocation478_spill] sm:$0xff] %v16718_v39  ;;  %8407 = vrot.lane.b32.xlu1 %v20080_v14, %s11462_s9  ;;  %8405 = vrot.lane.b32.xlu0 %v20081_v55, %s11462_s9  ;;  %v20089_v39 = vld [vmem:[#allocation482_spill] sm:$0xff]  ;;  %v20090_v14 = vld [vmem:[#allocation205_spill] sm:$0xff] }
 0x722   : > { %v4898_v43 = vsub.f32 %v20091_v21, %v20090_v14  ;;  %v20092_v55 = vld [vmem:[#allocation206_spill] sm:$0xff]  ;;  %v20101_v21 = vld [vmem:[#allocation484_spill] sm:$0xff]  ;;  %11078 = vpow2.f32 %v4991_v50 }
 0x723   : > { %v16724_v32 = vpop.permute.xlu1 %7919  ;;  %11080 = vpow2.f32 %v4989_v27 }
 0x724   : > { %20082 = vst [vmem:[#allocation479_spill] sm:$0xff] %v16724_v32  ;;  %v16726_v23 = vpop.permute.xlu0 %7917  ;;  %v4897_v32 = vsub.f32 %v20093_v53, %v20092_v55  ;;  %v4995_v14 = vmul.f32 1.442695, %v4898_v43  ;;  %v20102_v53 = vld [vmem:[#allocation138_spill] sm:$0xff]  ;;  %v20111_v43 = vld [vmem:[#allocation105_spill] sm:$0xff] }
 0x725   : > { %20083 = vst [vmem:[#allocation480_spill] sm:$0xff] %v16726_v23  ;;  %8411 = vrot.lane.b32.xlu1 %v20088_v46, %s11462_s9  ;;  %8409 = vrot.lane.b32.xlu0 %v20089_v39, %s11462_s9  ;;  %v20099_v46 = vld [vmem:[#allocation101_spill] sm:$0xff]  ;;  %v20100_v39 = vld [vmem:[#allocation483_spill] sm:$0xff]  ;;  %v20103_v55 = vld [vmem:[#allocation102_spill] sm:$0xff] }
 0x726   : > { %v4899_v18 = vsub.f32 %v20099_v46, %v20098_v42  ;;  %v4993_v34 = vmul.f32 1.442695, %v4897_v32  ;;  %v4999_v42 = vmul.f32 1.442695, %v4900_v13  ;;  %v4904_v46 = vsub.f32 %v20109_v40, %v20108_v31  ;;  %v20113_v32 = vld [vmem:[#allocation486_spill] sm:$0xff]  ;;  %v20117_v31 = vld [vmem:[#allocation107_spill] sm:$0xff] }
 0x727   : > { %v16740_v36 = vpop.permute.xlu1 %7923  ;;  %11082 = vpow2.f32 %v4995_v14 }
 0x728   : > { %20094 = vst [vmem:[#allocation201_spill] sm:$0xff] %v16740_v36  ;;  %v16742_v23 = vpop.permute.xlu0 %7921  ;;  %v4902_v36 = vsub.f32 %v20103_v55, %v20102_v53  ;;  %v20112_v53 = vld [vmem:[#allocation485_spill] sm:$0xff]  ;;  %v20114_v55 = vld [vmem:[#allocation155_spill] sm:$0xff]  ;;  %11084 = vpow2.f32 %v4993_v34 }
 0x729   : > { %20095 = vst [vmem:[#allocation96_spill] sm:$0xff] %v16742_v23  ;;  %8415 = vrot.lane.b32.xlu1 %v20100_v39, %s11462_s9  ;;  %8413 = vrot.lane.b32.xlu0 %v20101_v21, %s11462_s9  ;;  %v20104_v23 = vld [vmem:[#allocation139_spill] sm:$0xff]  ;;  %v4997_v39 = vmul.f32 1.442695, %v4899_v18  ;;  %v20110_v21 = vld [vmem:[#allocation150_spill] sm:$0xff]  ;;  %11086 = vpow2.f32 %v4999_v42 }
 0x72a   : > { %v4901_v58 = vsub.f32 %v20105_v44, %v20104_v23  ;;  %v4903_v33 = vsub.f32 %v20111_v43, %v20110_v21  ;;  %v5003_v23 = vmul.f32 1.442695, %v4902_v36  ;;  %v20115_v44 = vld [vmem:[#allocation106_spill] sm:$0xff]  ;;  %v5007_v21 = vmul.f32 1.442695, %v4904_v46  ;;  %v20120_v43 = vld [vmem:[#allocation224_spill] sm:$0xff] }
 0x72b   : > { %v16756_v9 = vpop.permute.xlu1 %7927  ;;  %v4906_v50 = vsub.f32 %v20115_v44, %v20114_v55  ;;  %11088 = vpow2.f32 %v4997_v39  ;;  %v20122_v36 = vld [vmem:[#allocation166_spill] sm:$0xff]  ;;  %v20124_v34 = vld [vmem:[#allocation487_spill] sm:$0xff] }
 0x72c   : > { %20106 = vst [vmem:[#allocation202_spill] sm:$0xff] %v16756_v9  ;;  %v16758_v8 = vpop.permute.xlu0 %7925  ;;  %v5001_v13 = vmul.f32 1.442695, %v4901_v58  ;;  %v5005_v14 = vmul.f32 1.442695, %v4903_v33  ;;  %v20125_v58 = vld [vmem:[#allocation488_spill] sm:$0xff]  ;;  %11090 = vpow2.f32 %v5003_v23 }
 0x72d   : > { %20107 = vst [vmem:[#allocation97_spill] sm:$0xff] %v16758_v8  ;;  %8419 = vrot.lane.b32.xlu1 %v20112_v53, %s11462_s9  ;;  %8417 = vrot.lane.b32.xlu0 %v20113_v32, %s11462_s9  ;;  %v20116_v8 = vld [vmem:[#allocation157_spill] sm:$0xff]  ;;  %v20121_v53 = vld [vmem:[#allocation108_spill] sm:$0xff]  ;;  %v20126_v55 = vld [vmem:[#allocation171_spill] sm:$0xff] }
 0x72e   : > { %v4905_v27 = vsub.f32 %v20117_v31, %v20116_v8  ;;  %v4908_v9 = vsub.f32 %v20121_v53, %v20120_v43  ;;  %v20123_v32 = vld [vmem:[#allocation109_spill] sm:$0xff]  ;;  %v5011_v8 = vmul.f32 1.442695, %v4906_v50  ;;  %v20127_v44 = vld [vmem:[#allocation110_spill] sm:$0xff]  ;;  %11092 = vpow2.f32 %v5001_v13  ;;  %v20129_v43 = vld [vmem:[#allocation111_spill] sm:$0xff] }
 0x72f   : > { %v16772_v18 = vpop.permute.xlu1 %7931  ;;  %v4907_v48 = vsub.f32 %v20123_v32, %v20122_v36  ;;  %v4910_v42 = vsub.f32 %v20127_v44, %v20126_v55  ;;  %v20128_v31 = vld [vmem:[#allocation173_spill] sm:$0xff]  ;;  %11094 = vpow2.f32 %v5007_v21  ;;  %v20132_v32 = vld [vmem:[#allocation231_spill] sm:$0xff]  ;;  %v20134_v50 = vld [vmem:[#allocation232_spill] sm:$0xff]  ;;  %v16800_v55 = vpop.eup %11078 }
 0x730   : > { %20118 = vst [vmem:[#allocation481_spill] sm:$0xff] %v16772_v18  ;;  %v16774_v40 = vpop.permute.xlu0 %7929  ;;  %v5009_v46 = vmul.f32 1.442695, %v4905_v27  ;;  %v4909_v39 = vsub.f32 %v20129_v43, %v20128_v31  ;;  %v5015_v36 = vmul.f32 1.442695, %v4908_v9  ;;  %11096 = vpow2.f32 %v5005_v14  ;;  %v20136_v13 = vld [vmem:[#allocation489_spill] sm:$0xff]  ;;  %v16804_v43 = vpop.eup %11080 }
 0x731   : > { %20119 = vst [vmem:[#allocation482_spill] sm:$0xff] %v16774_v40  ;;  %8423 = vrot.lane.b32.xlu1 %v20124_v34, %s11462_s9  ;;  %8421 = vrot.lane.b32.xlu0 %v20125_v58, %s11462_s9  ;;  %v20133_v34 = vld [vmem:[#allocation112_spill] sm:$0xff]  ;;  %v5013_v23 = vmul.f32 1.442695, %v4907_v48  ;;  %v20135_v58 = vld [vmem:[#allocation113_spill] sm:$0xff]  ;;  %v20137_v27 = vld [vmem:[#allocation490_spill] sm:$0xff]  ;;  %11098 = vpow2.f32 %v5011_v8 }
 0x732   : > { %v4912_v40 = vsub.f32 %v20133_v34, %v20132_v32  ;;  %v4911_v18 = vsub.f32 %v20135_v58, %v20134_v50  ;;  %v5019_v44 = vmul.f32 1.442695, %v4910_v42  ;;  %v20138_v21 = vld [vmem:[#allocation235_spill] sm:$0xff]  ;;  %v20139_v9 = vld [vmem:[#allocation114_spill] sm:$0xff]  ;;  %11100 = vpow2.f32 %v5009_v46  ;;  %v20140_v14 = vld [vmem:[#allocation236_spill] sm:$0xff] }
 0x733   : > { %v16788_v33 = vpop.permute.xlu1 %7935  ;;  %v4914_v31 = vsub.f32 %v20139_v9, %v20138_v21  ;;  %v5017_v48 = vmul.f32 1.442695, %v4909_v39  ;;  %v20141_v32 = vld [vmem:[#allocation115_spill] sm:$0xff]  ;;  %11102 = vpow2.f32 %v5015_v36  ;;  %v20145_v42 = vld [vmem:[#allocation116_spill] sm:$0xff]  ;;  %v20147_v39 = vld [vmem:[#allocation117_spill] sm:$0xff] }
 0x734   : > { %20130 = vst [vmem:[#allocation205_spill] sm:$0xff] %v16788_v33  ;;  %v16790_v53 = vpop.permute.xlu0 %7933  ;;  %v4913_v34 = vsub.f32 %v20141_v32, %v20140_v14  ;;  %v20144_v8 = vld [vmem:[#allocation239_spill] sm:$0xff]  ;;  %11104 = vpow2.f32 %v5013_v23  ;;  %v5021_v21 = vmul.f32 1.442695, %v4911_v18  ;;  %v20146_v46 = vld [vmem:[#allocation240_spill] sm:$0xff] }
 0x735   : > { %20131 = vst [vmem:[#allocation98_spill] sm:$0xff] %v16790_v53  ;;  %8427 = vrot.lane.b32.xlu1 %v20136_v13, %s11462_s9  ;;  %8425 = vrot.lane.b32.xlu0 %v20137_v27, %s11462_s9  ;;  %v16812_v13 = vpop.eup %11082  ;;  %v5023_v27 = vmul.f32 1.442695, %v4912_v40  ;;  %v4916_v53 = vsub.f32 %v20145_v42, %v20144_v8  ;;  %v4915_v9 = vsub.f32 %v20147_v39, %v20146_v46  ;;  %v20148_v14 = vld [vmem:[#allocation491_spill] sm:$0xff]  ;;  %v20149_v32 = vld [vmem:[#allocation492_spill] sm:$0xff]  ;;  %11106 = vpow2.f32 %v5019_v44  ;;  %v20156_v44 = vld [vmem:[#allocation190_spill] sm:$0xff] }
 0x736   : > { %v16816_v33 = vpop.eup %11084  ;;  %v5027_v40 = vmul.f32 1.442695, %v4914_v31  ;;  %v20150_v36 = vld [vmem:[#allocation243_spill] sm:$0xff]  ;;  %11108 = vpow2.f32 %v5017_v48  ;;  %v5025_v18 = vmul.f32 1.442695, %v4913_v34  ;;  %v20152_v23 = vld [vmem:[#allocation244_spill] sm:$0xff] }
 0x737   : > { %v16808_v50 = vpop.permute.xlu1 %7939  ;;  %v4917_v46 = vsub.f32 %v20153_v57, %v20152_v23  ;;  %11110 = vpow2.f32 %v5023_v27  ;;  %v20157_v31 = vld [vmem:[#allocation120_spill] sm:$0xff]  ;;  %v20158_v48 = vld [vmem:[#allocation191_spill] sm:$0xff]  ;;  %v20159_v34 = vld [vmem:[#allocation121_spill] sm:$0xff] }
 0x738   : > { %20142 = vst [vmem:[#allocation206_spill] sm:$0xff] %v16808_v50  ;;  %v16810_v58 = vpop.permute.xlu0 %7937  ;;  %v20151_v50 = vld [vmem:[#allocation118_spill] sm:$0xff]  ;;  %v4920_v6 = vsub.f32 %v20157_v31, %v20156_v44  ;;  %11112 = vpow2.f32 %v5021_v21  ;;  %v20160_v57 = vld [vmem:[#allocation493_spill] sm:$0xff] }
 0x739   : > { %20143 = vst [vmem:[#allocation99_spill] sm:$0xff] %v16810_v58  ;;  %8431 = vrot.lane.b32.xlu1 %v20148_v14, %s11462_s9  ;;  %8429 = vrot.lane.b32.xlu0 %v20149_v32, %s11462_s9  ;;  %v16824_v58 = vpop.eup %11086  ;;  %v4918_v8 = vsub.f32 %v20151_v50, %v20150_v36  ;;  %v5031_v32 = vmul.f32 1.442695, %v4916_v53  ;;  %v5029_v50 = vmul.f32 1.442695, %v4915_v9  ;;  %v4919_v36 = vsub.f32 %v20159_v34, %v20158_v48  ;;  %v20161_v23 = vld [vmem:[#allocation494_spill] sm:$0xff] }
 0x73a   : > { %v16828_v42 = vpop.eup %11088  ;;  %11114 = vpow2.f32 %v5027_v40  ;;  %v20162_v27 = vld [vmem:[#allocation194_spill] sm:$0xff]  ;;  %v5033_v21 = vmul.f32 1.442695, %v4917_v46  ;;  %v20164_v9 = vld [vmem:[#allocation195_spill] sm:$0xff]  ;;  %v20171_v46 = vld [vmem:[#allocation125_spill] sm:$0xff] }
 0x73b   : > { %v16832_v39 = vpop.permute.xlu1 %7943  ;;  %v16836_v25 = vpop.eup %11090  ;;  %v5035_v53 = vmul.f32 1.442695, %v4918_v8  ;;  %11116 = vpow2.f32 %v5025_v18  ;;  %v4921_v48 = vsub.f32 %v20165_v5, %v20164_v9  ;;  %v20168_v40 = vld [vmem:[#allocation198_spill] sm:$0xff]  ;;  %v20169_v8 = vld [vmem:[#allocation124_spill] sm:$0xff]  ;;  %v20172_v5 = vld [vmem:[#allocation495_spill] sm:$0xff] }
 0x73c   : > { %20154 = vst [vmem:[#allocation209_spill] sm:$0xff] %v16832_v39  ;;  %v16834_v14 = vpop.permute.xlu0 %7941  ;;  %v16840_v17 = vpop.eup %11092  ;;  %v20163_v39 = vld [vmem:[#allocation122_spill] sm:$0xff]  ;;  %11118 = vpow2.f32 %v5031_v32  ;;  %v4924_v35 = vsub.f32 %v20169_v8, %v20168_v40  ;;  %v20170_v18 = vld [vmem:[#allocation256_spill] sm:$0xff]  ;;  %v20173_v32 = vld [vmem:[#allocation259_spill] sm:$0xff] }
 0x73d   : > { %20155 = vst [vmem:[#allocation100_spill] sm:$0xff] %v16834_v14  ;;  %8435 = vrot.lane.b32.xlu1 %v20160_v57, %s11462_s9  ;;  %8433 = vrot.lane.b32.xlu0 %v20161_v23, %s11462_s9  ;;  %v16848_v14 = vpop.eup %11094  ;;  %v4922_v44 = vsub.f32 %v20163_v39, %v20162_v27  ;;  %v5039_v23 = vmul.f32 1.442695, %v4920_v6  ;;  %11120 = vpow2.f32 %v5029_v50  ;;  %v5037_v39 = vmul.f32 1.442695, %v4919_v36  ;;  %v20175_v36 = vld [vmem:[#allocation260_spill] sm:$0xff] }
 0x73e   : > { %v16852_v31 = vpop.eup %11096  ;;  %v4923_v27 = vsub.f32 %v20171_v46, %v20170_v18  ;;  %11122 = vpow2.f32 %v5035_v53  ;;  %v5041_v50 = vmul.f32 1.442695, %v4921_v48  ;;  %v20180_v53 = vld [vmem:[#allocation263_spill] sm:$0xff]  ;;  %v20184_v48 = vld [vmem:[#allocation130_spill] sm:$0xff] }
 0x73f   : > { %v16856_v34 = vpop.permute.xlu1 %7947  ;;  %v16860_v45 = vpop.eup %11098  ;;  %v5043_v6 = vmul.f32 1.442695, %v4922_v44  ;;  %11124 = vpow2.f32 %v5033_v21  ;;  %v20181_v44 = vld [vmem:[#allocation129_spill] sm:$0xff]  ;;  %v20183_v21 = vld [vmem:[#allocation264_spill] sm:$0xff] }
 0x740   : > { %20166 = vst [vmem:[#allocation210_spill] sm:$0xff] %v16856_v34  ;;  %v16858_v57 = vpop.permute.xlu0 %7945  ;;  %v16864_v12 = vpop.eup %11100  ;;  %v20176_v34 = vld [vmem:[#allocation127_spill] sm:$0xff]  ;;  %11126 = vpow2.f32 %v5039_v23  ;;  %v4928_v15 = vsub.f32 %v20181_v44, %v20180_v53  ;;  %v20188_v23 = vld [vmem:[#allocation266_spill] sm:$0xff] }
 0x741   : > { %20167 = vst [vmem:[#allocation101_spill] sm:$0xff] %v16858_v57  ;;  %8439 = vrot.lane.b32.xlu1 %v15988_v26, %s11462_s9  ;;  %8437 = vrot.lane.b32.xlu0 %v20172_v5, %s11462_s9  ;;  %v16872_v9 = vpop.eup %11102  ;;  %v20174_v57 = vld [vmem:[#allocation126_spill] sm:$0xff]  ;;  %v4925_v18 = vsub.f32 %v20176_v34, %v20175_v36  ;;  %v5047_v5 = vmul.f32 1.442695, %v4924_v35  ;;  %11128 = vpow2.f32 %v5037_v39  ;;  %v20185_v34 = vld [vmem:[#allocation496_spill] sm:$0xff]  ;;  %v20186_v36 = vld [vmem:[#allocation497_spill] sm:$0xff] }
 0x742   : > { %v4926_v40 = vsub.f32 %v20174_v57, %v20173_v32  ;;  %v16876_v8 = vpop.eup %11104  ;;  %v5045_v57 = vmul.f32 1.442695, %v4923_v27  ;;  %v4927_v32 = vsub.f32 %v20184_v48, %v20183_v21  ;;  %11130 = vpow2.f32 %v5043_v6  ;;  %v20191_v27 = vld [vmem:[#allocation267_spill] sm:$0xff]  ;;  %v20196_v6 = vld [vmem:[#allocation268_spill] sm:$0xff] }
 0x743   : > { %v16880_v46 = vpop.permute.xlu1 %7951  ;;  %v16884_v10 = vpop.eup %11106  ;;  %11132 = vpow2.f32 %v5041_v50  ;;  %v5049_v39 = vmul.f32 1.442695, %v4925_v18  ;;  %v20199_v50 = vld [vmem:[#allocation269_spill] sm:$0xff] }
 0x744   : > { %20177 = vst [vmem:[#allocation483_spill] sm:$0xff] %v16880_v46  ;;  %v16882_v26 = vpop.permute.xlu0 %7949  ;;  %20179 = vst [vmem:[#allocation138_spill] sm:$0xff] %v16884_v10  ;;  %v16888_v24 = vpop.eup %11108  ;;  %v5051_v35 = vmul.f32 1.442695, %v4926_v40  ;;  %v20189_v46 = vld [vmem:[#allocation135_spill] sm:$0xff]  ;;  %11134 = vpow2.f32 %v5047_v5  ;;  %v20197_v40 = vld [vmem:[#allocation144_spill] sm:$0xff] }
 0x745   : > { %20178 = vst [vmem:[#allocation484_spill] sm:$0xff] %v16882_v26  ;;  %20182 = vst [vmem:[#allocation102_spill] sm:$0xff] %v16888_v24  ;;  %8443 = vrot.lane.b32.xlu1 %v20185_v34, %s11462_s9  ;;  %8441 = vrot.lane.b32.xlu0 %v20186_v36, %s11462_s9  ;;  %v16896_v26 = vpop.eup %11110  ;;  %v4930_v53 = vsub.f32 %v20189_v46, %v20188_v23  ;;  %v20192_v24 = vld [vmem:[#allocation136_spill] sm:$0xff]  ;;  %v5055_v36 = vmul.f32 1.442695, %v4928_v15  ;;  %11136 = vpow2.f32 %v5045_v57  ;;  %v20200_v18 = vld [vmem:[#allocation145_spill] sm:$0xff] }
 0x746   : > { %20187 = vst [vmem:[#allocation139_spill] sm:$0xff] %v16896_v26  ;;  %v16900_v44 = vpop.eup %11112  ;;  %v4929_v21 = vsub.f32 %v20192_v24, %v20191_v27  ;;  %v4932_v26 = vsub.f32 %v20197_v40, %v20196_v6  ;;  %v5053_v46 = vmul.f32 1.442695, %v4927_v32  ;;  %v4931_v23 = vsub.f32 %v20200_v18, %v20199_v50  ;;  %v20201_v24 = vld [vmem:[#allocation498_spill] sm:$0xff]  ;;  %v20202_v27 = vld [vmem:[#allocation499_spill] sm:$0xff]  ;;  %v20204_v5 = vld [vmem:[#allocation128_spill] sm:$0xff] }
 0x747   : > { %20190 = vst [vmem:[#allocation103_spill] sm:$0xff] %v16900_v44  ;;  %v16904_v48 = vpop.permute.xlu1 %7955  ;;  %v16908_v10 = vpop.eup %11114  ;;  %11138 = vpow2.f32 %v5051_v35  ;;  %v5059_v15 = vmul.f32 1.442695, %v4930_v53  ;;  %v20206_v32 = vld [vmem:[#allocation213_spill] sm:$0xff]  ;;  %v20211_v35 = vld [vmem:[#allocation270_spill] sm:$0xff]  ;;  %v20212_v53 = vld [vmem:[#allocation160_spill] sm:$0xff] }
 0x748   : > { %20193 = vst [vmem:[#allocation216_spill] sm:$0xff] %v16904_v48  ;;  %v16906_v34 = vpop.permute.xlu0 %7953  ;;  %20195 = vst [vmem:[#allocation150_spill] sm:$0xff] %v16908_v10  ;;  %v16912_v38 = vpop.eup %11116  ;;  %v20205_v48 = vld [vmem:[#allocation152_spill] sm:$0xff]  ;;  %11140 = vpow2.f32 %v5049_v39  ;;  %v5057_v57 = vmul.f32 1.442695, %v4929_v21  ;;  %v20214_v39 = vld [vmem:[#allocation141_spill] sm:$0xff] }
 0x749   : > { %20194 = vst [vmem:[#allocation104_spill] sm:$0xff] %v16906_v34  ;;  %20198 = vst [vmem:[#allocation105_spill] sm:$0xff] %v16912_v38  ;;  %8447 = vrot.lane.b32.xlu1 %v20201_v24, %s11462_s9  ;;  %8445 = vrot.lane.b32.xlu0 %v20202_v27, %s11462_s9  ;;  %v16920_v34 = vpop.eup %11118  ;;  %v4934_v6 = vsub.f32 %v20205_v48, %v20204_v5  ;;  %v20207_v38 = vld [vmem:[#allocation153_spill] sm:$0xff]  ;;  %11142 = vpow2.f32 %v5055_v36  ;;  %v5063_v27 = vmul.f32 1.442695, %v4932_v26  ;;  %v20218_v36 = vld [vmem:[#allocation132_spill] sm:$0xff] }
 0x74a   : > { %20203 = vst [vmem:[#allocation485_spill] sm:$0xff] %v16920_v34  ;;  %v16924_v40 = vpop.eup %11120  ;;  %v4933_v50 = vsub.f32 %v20207_v38, %v20206_v32  ;;  %v4936_v34 = vsub.f32 %v20212_v53, %v20211_v35  ;;  %11144 = vpow2.f32 %v5053_v46  ;;  %v5061_v48 = vmul.f32 1.442695, %v4931_v23  ;;  %v20215_v21 = vld [vmem:[#allocation161_spill] sm:$0xff]  ;;  %v20216_v38 = vld [vmem:[#allocation500_spill] sm:$0xff]  ;;  %v20221_v23 = vld [vmem:[#allocation215_spill] sm:$0xff] }
 0x74b   : > { %v16928_v18 = vpop.permute.xlu1 %7959  ;;  %v16932_v10 = vpop.eup %11122  ;;  %v4935_v5 = vsub.f32 %v20215_v21, %v20214_v39  ;;  %11146 = vpow2.f32 %v5059_v15  ;;  %v5067_v26 = vmul.f32 1.442695, %v4934_v6  ;;  %v20226_v15 = vld [vmem:[#allocation217_spill] sm:$0xff]  ;;  %v20227_v6 = vld [vmem:[#allocation175_spill] sm:$0xff] }
 0x74c   : > { %20208 = vst [vmem:[#allocation486_spill] sm:$0xff] %v16928_v18  ;;  %v16930_v24 = vpop.permute.xlu0 %7957  ;;  %20210 = vst [vmem:[#allocation106_spill] sm:$0xff] %v16932_v10  ;;  %v16936_v44 = vpop.eup %11124  ;;  %11148 = vpow2.f32 %v5057_v57  ;;  %v5065_v46 = vmul.f32 1.442695, %v4933_v50  ;;  %v20222_v18 = vld [vmem:[#allocation169_spill] sm:$0xff]  ;;  %v20230_v50 = vld [vmem:[#allocation176_spill] sm:$0xff] }
 0x74d   : > { %20209 = vst [vmem:[#allocation155_spill] sm:$0xff] %v16930_v24  ;;  %20213 = vst [vmem:[#allocation157_spill] sm:$0xff] %v16936_v44  ;;  %8451 = vrot.lane.b32.xlu1 %v16042_v52, %s11462_s9  ;;  %8449 = vrot.lane.b32.xlu0 %v20216_v38, %s11462_s9  ;;  %v16944_v32 = vpop.eup %11126  ;;  %v20219_v24 = vld [vmem:[#allocation168_spill] sm:$0xff]  ;;  %v4937_v39 = vsub.f32 %v20222_v18, %v20221_v23  ;;  %11150 = vpow2.f32 %v5063_v27  ;;  %v5071_v38 = vmul.f32 1.442695, %v4936_v34  ;;  %v20229_v57 = vld [vmem:[#allocation133_spill] sm:$0xff] }
 0x74e   : > { %20217 = vst [vmem:[#allocation107_spill] sm:$0xff] %v16944_v32  ;;  %v4938_v35 = vsub.f32 %v20219_v24, %v20218_v36  ;;  %v16948_v53 = vpop.eup %11128  ;;  %v4940_v32 = vsub.f32 %v20227_v6, %v20226_v15  ;;  %11152 = vpow2.f32 %v5061_v48  ;;  %v5069_v24 = vmul.f32 1.442695, %v4935_v5  ;;  %v20231_v18 = vld [vmem:[#allocation501_spill] sm:$0xff]  ;;  %v20232_v23 = vld [vmem:[#allocation502_spill] sm:$0xff]  ;;  %v20234_v27 = vld [vmem:[#allocation220_spill] sm:$0xff] }
 0x74f   : > { %20220 = vst [vmem:[#allocation224_spill] sm:$0xff] %v16948_v53  ;;  %v16952_v21 = vpop.permute.xlu1 %7963  ;;  %v16956_v44 = vpop.eup %11130  ;;  %v4939_v36 = vsub.f32 %v20230_v50, %v20229_v57  ;;  %11154 = vpow2.f32 %v5067_v26  ;;  %v5073_v48 = vmul.f32 1.442695, %v4937_v39  ;;  %v20236_v5 = vld [vmem:[#allocation221_spill] sm:$0xff]  ;;  %v20241_v26 = vld [vmem:[#allocation158_spill] sm:$0xff] }
 0x750   : > { %20223 = vst [vmem:[#allocation108_spill] sm:$0xff] %v16952_v21  ;;  %v16954_v52 = vpop.permute.xlu0 %7961  ;;  %20225 = vst [vmem:[#allocation109_spill] sm:$0xff] %v16956_v44  ;;  %v16960_v10 = vpop.eup %11132  ;;  %v5075_v34 = vmul.f32 1.442695, %v4938_v35  ;;  %v20235_v21 = vld [vmem:[#allocation182_spill] sm:$0xff]  ;;  %11156 = vpow2.f32 %v5065_v46  ;;  %v20242_v35 = vld [vmem:[#allocation184_spill] sm:$0xff] }
 0x751   : > { %20224 = vst [vmem:[#allocation166_spill] sm:$0xff] %v16954_v52  ;;  %20228 = vst [vmem:[#allocation487_spill] sm:$0xff] %v16960_v10  ;;  %8455 = vrot.lane.b32.xlu1 %v20231_v18, %s11462_s9  ;;  %8453 = vrot.lane.b32.xlu0 %v20232_v23, %s11462_s9  ;;  %v16968_v52 = vpop.eup %11134  ;;  %v4942_v15 = vsub.f32 %v20235_v21, %v20234_v27  ;;  %v20237_v10 = vld [vmem:[#allocation183_spill] sm:$0xff]  ;;  %11158 = vpow2.f32 %v5071_v38  ;;  %v5079_v23 = vmul.f32 1.442695, %v4940_v32  ;;  %v20244_v46 = vld [vmem:[#allocation222_spill] sm:$0xff] }
 0x752   : > { %20233 = vst [vmem:[#allocation488_spill] sm:$0xff] %v16968_v52  ;;  %v16972_v6 = vpop.eup %11136  ;;  %v4941_v57 = vsub.f32 %v20237_v10, %v20236_v5  ;;  %v4944_v52 = vsub.f32 %v20242_v35, %v20241_v26  ;;  %11160 = vpow2.f32 %v5069_v24  ;;  %v5077_v21 = vmul.f32 1.442695, %v4939_v36  ;;  %v20245_v39 = vld [vmem:[#allocation185_spill] sm:$0xff]  ;;  %v20246_v10 = vld [vmem:[#allocation503_spill] sm:$0xff]  ;;  %v20247_v5 = vld [vmem:[#allocation504_spill] sm:$0xff] }
 0x753   : > { %v16976_v50 = vpop.permute.xlu1 %7967  ;;  %v16980_v44 = vpop.eup %11138  ;;  %v4943_v27 = vsub.f32 %v20245_v39, %v20244_v46  ;;  %11162 = vpow2.f32 %v5075_v34  ;;  %v5083_v32 = vmul.f32 1.442695, %v4942_v15  ;;  %v20249_v38 = vld [vmem:[#allocation223_spill] sm:$0xff]  ;;  %v20256_v34 = vld [vmem:[#allocation146_spill] sm:$0xff] }
 0x754   : > { %20238 = vst [vmem:[#allocation171_spill] sm:$0xff] %v16976_v50  ;;  %v16978_v18 = vpop.permute.xlu0 %7965  ;;  %20240 = vst [vmem:[#allocation173_spill] sm:$0xff] %v16980_v44  ;;  %v16984_v53 = vpop.eup %11140  ;;  %v20250_v50 = vld [vmem:[#allocation186_spill] sm:$0xff]  ;;  %11164 = vpow2.f32 %v5073_v48  ;;  %v5081_v24 = vmul.f32 1.442695, %v4941_v57  ;;  %v20251_v36 = vld [vmem:[#allocation143_spill] sm:$0xff]  ;;  %v4948_v15 = vsub.f32 %v19903_v49, %v20256_v34 }
 0x755   : > { %20239 = vst [vmem:[#allocation110_spill] sm:$0xff] %v16978_v18  ;;  %20243 = vst [vmem:[#allocation111_spill] sm:$0xff] %v16984_v53  ;;  %8459 = vrot.lane.b32.xlu1 %v20246_v10, %s11462_s9  ;;  %8457 = vrot.lane.b32.xlu0 %v20247_v5, %s11462_s9  ;;  %v16992_v18 = vpop.eup %11142  ;;  %v4946_v26 = vsub.f32 %v20250_v50, %v20249_v38  ;;  %v20252_v53 = vld [vmem:[#allocation187_spill] sm:$0xff]  ;;  %11166 = vpow2.f32 %v5079_v23  ;;  %v5087_v5 = vmul.f32 1.442695, %v4944_v52  ;;  %v20259_v57 = vld [vmem:[#allocation189_spill] sm:$0xff] }
 0x756   : > { %20248 = vst [vmem:[#allocation231_spill] sm:$0xff] %v16992_v18  ;;  %v16996_v35 = vpop.eup %11144  ;;  %v4945_v46 = vsub.f32 %v20252_v53, %v20251_v36  ;;  %11168 = vpow2.f32 %v5077_v21  ;;  %v5085_v50 = vmul.f32 1.442695, %v4943_v27  ;;  %v20258_v48 = vld [vmem:[#allocation227_spill] sm:$0xff]  ;;  %v20260_v53 = vld [vmem:[#allocation505_spill] sm:$0xff]  ;;  %v20262_v23 = vld [vmem:[#allocation228_spill] sm:$0xff] }
 0x757   : > { %v17000_v39 = vpop.permute.xlu1 %7971  ;;  %v17004_v44 = vpop.eup %11146  ;;  %v4947_v38 = vsub.f32 %v20259_v57, %v20258_v48  ;;  %11170 = vpow2.f32 %v5083_v32  ;;  %v5091_v52 = vmul.f32 1.442695, %v4946_v26  ;;  %v20264_v27 = vld [vmem:[#allocation229_spill] sm:$0xff]  ;;  %v20268_v32 = vld [vmem:[#allocation230_spill] sm:$0xff]  ;;  %v20269_v26 = vld [vmem:[#allocation196_spill] sm:$0xff] }
 0x758   : > { %20253 = vst [vmem:[#allocation112_spill] sm:$0xff] %v17000_v39  ;;  %v17002_v10 = vpop.permute.xlu0 %7969  ;;  %20255 = vst [vmem:[#allocation113_spill] sm:$0xff] %v17004_v44  ;;  %v17008_v18 = vpop.eup %11148  ;;  %11172 = vpow2.f32 %v5081_v24  ;;  %v5089_v21 = vmul.f32 1.442695, %v4945_v46  ;;  %v20265_v39 = vld [vmem:[#allocation193_spill] sm:$0xff] }
 0x759   : > { %20254 = vst [vmem:[#allocation232_spill] sm:$0xff] %v17002_v10  ;;  %20257 = vst [vmem:[#allocation489_spill] sm:$0xff] %v17008_v18  ;;  %8463 = vrot.lane.b32.xlu1 %v20260_v53, %s11462_s9  ;;  %8461 = vrot.lane.b32.xlu0 %v16102_v4, %s11462_s9  ;;  %v17016_v36 = vpop.eup %11150  ;;  %v20263_v10 = vld [vmem:[#allocation192_spill] sm:$0xff]  ;;  %v4949_v48 = vsub.f32 %v20265_v39, %v20264_v27  ;;  %11174 = vpow2.f32 %v5087_v5  ;;  %v5095_v4 = vmul.f32 1.442695, %v4948_v15  ;;  %v20271_v24 = vld [vmem:[#allocation233_spill] sm:$0xff] }
 0x75a   : > { %20261 = vst [vmem:[#allocation490_spill] sm:$0xff] %v17016_v36  ;;  %v4950_v49 = vsub.f32 %v20263_v10, %v20262_v23  ;;  %v17020_v34 = vpop.eup %11152  ;;  %v4952_v36 = vsub.f32 %v20269_v26, %v20268_v32  ;;  %11176 = vpow2.f32 %v5085_v50  ;;  %v5093_v10 = vmul.f32 1.442695, %v4947_v38  ;;  %v20272_v46 = vld [vmem:[#allocation197_spill] sm:$0xff]  ;;  %v20273_v39 = vld [vmem:[#allocation188_spill] sm:$0xff]  ;;  %v20274_v27 = vld [vmem:[#allocation506_spill] sm:$0xff] }
 0x75b   : > { %v17024_v57 = vpop.permute.xlu1 %7975  ;;  %v17028_v18 = vpop.eup %11154  ;;  %v4951_v23 = vsub.f32 %v20272_v46, %v20271_v24  ;;  %11178 = vpow2.f32 %v5091_v52  ;;  %v20276_v15 = vld [vmem:[#allocation234_spill] sm:$0xff]  ;;  %v5097_v50 = vmul.f32 1.442695, %v4949_v48  ;;  %v20281_v52 = vld [vmem:[#allocation156_spill] sm:$0xff] }
 0x75c   : > { %20266 = vst [vmem:[#allocation235_spill] sm:$0xff] %v17024_v57  ;;  %v17026_v53 = vpop.permute.xlu0 %7973  ;;  %v17032_v44 = vpop.eup %11156  ;;  %v5099_v5 = vmul.f32 1.442695, %v4950_v49  ;;  %v4954_v32 = vsub.f32 %v19918_v7, %v20276_v15  ;;  %11180 = vpow2.f32 %v5089_v21  ;;  %v20277_v38 = vld [vmem:[#allocation154_spill] sm:$0xff]  ;;  %v20278_v57 = vld [vmem:[#allocation200_spill] sm:$0xff]  ;;  %v4956_v49 = vsub.f32 %v19476_v61, %v20281_v52  ;;  %v20282_v21 = vld [vmem:[#allocation271_spill] sm:$0xff] }
 0x75d   : > { %20267 = vst [vmem:[#allocation114_spill] sm:$0xff] %v17026_v53  ;;  %20270 = vst [vmem:[#allocation236_spill] sm:$0xff] %v17032_v44  ;;  %8467 = vrot.lane.b32.xlu1 %v20273_v39, %s11462_s9  ;;  %8465 = vrot.lane.b32.xlu0 %v20274_v27, %s11462_s9  ;;  %v17040_v53 = vpop.eup %11158  ;;  %v4953_v24 = vsub.f32 %v20278_v57, %v20277_v38  ;;  %11182 = vpow2.f32 %v5095_v4  ;;  %v5103_v27 = vmul.f32 1.442695, %v4952_v36  ;;  %v5101_v7 = vmul.f32 1.442695, %v4951_v23 }
 0x75e   : > { %20275 = vst [vmem:[#allocation115_spill] sm:$0xff] %v17040_v53  ;;  %v17044_v26 = vpop.eup %11160  ;;  %11184 = vpow2.f32 %v5093_v10  ;;  %v4955_v48 = vsub.f32 %v19477_v56, %v20282_v21  ;;  %v20283_v57 = vld [vmem:[#allocation507_spill] sm:$0xff]  ;;  %v20284_v15 = vld [vmem:[#allocation508_spill] sm:$0xff]  ;;  %v5107_v36 = vmul.f32 1.442695, %v4954_v32 }
 0x75f   : > { %v17048_v46 = vpop.permute.xlu1 %7979  ;;  %v17052_v44 = vpop.eup %11162  ;;  %11186 = vpow2.f32 %v5099_v5  ;;  %v5105_v61 = vmul.f32 1.442695, %v4953_v24  ;;  %v5111_v56 = vmul.f32 1.442695, %v4956_v49  ;;  %v20287_v21 = vld [vmem:[#allocation163_spill] sm:$0xff] }
 0x760   : > { %20279 = vst [vmem:[#allocation239_spill] sm:$0xff] %v17048_v46  ;;  %v17050_v39 = vpop.permute.xlu0 %7977  ;;  %v17056_v53 = vpop.eup %11164  ;;  %11188 = vpow2.f32 %v5097_v50  ;;  %v5109_v32 = vmul.f32 1.442695, %v4955_v48  ;;  %v20289_v50 = vld [vmem:[#allocation164_spill] sm:$0xff]  ;;  %v20291_v46 = vld [vmem:[#allocation509_spill] sm:$0xff] }
 0x761   : > { %20280 = vst [vmem:[#allocation116_spill] sm:$0xff] %v17050_v39  ;;  %8471 = vrot.lane.b32.xlu1 %v20283_v57, %s11462_s9  ;;  %8469 = vrot.lane.b32.xlu0 %v20284_v15, %s11462_s9  ;;  %v17064_v38 = vpop.eup %11166  ;;  %11190 = vpow2.f32 %v5103_v27  ;;  %v4958_v57 = vsub.f32 %v19484_v0, %v20287_v21  ;;  %v20288_v15 = vld [vmem:[#allocation288_spill] sm:$0xff]  ;;  %v4957_v24 = vsub.f32 %v19485_v63, %v20289_v50  ;;  %v20292_v27 = vld [vmem:[#allocation199_spill] sm:$0xff] }
 0x762   : > { %v17066_v4 = vpop.eup %11168  ;;  %v6494_v39 = vadd.f32 %v16800_v55, %v20288_v15  ;;  %11192 = vpow2.f32 %v5101_v7  ;;  %v20295_v15 = vld [vmem:[#allocation241_spill] sm:$0xff] }
 0x763   : > { %v17068_v52 = vpop.permute.xlu1 %7983  ;;  %v17072_v23 = vpop.eup %11170  ;;  %11194 = vpow2.f32 %v5107_v36  ;;  %v4960_v50 = vsub.f32 %v19492_v11, %v20295_v15 }
 0x764   : > { %20285 = vst [vmem:[#allocation240_spill] sm:$0xff] %v17068_v52  ;;  %v17070_v10 = vpop.permute.xlu0 %7981  ;;  %v17078_v5 = vpop.eup %11172  ;;  %v20290_v52 = vld [vmem:[#allocation289_spill] sm:$0xff]  ;;  %v8092_v49 = vadd.f32 %v16472_v16, %v6494_v39  ;;  %11196 = vpow2.f32 %v5105_v61  ;;  %v5113_v39 = vmul.f32 1.442695, %v4957_v24  ;;  %v20297_v61 = vld [vmem:[#allocation242_spill] sm:$0xff] }
 0x765   : > { %20286 = vst [vmem:[#allocation117_spill] sm:$0xff] %v17070_v10  ;;  %v6493_v10 = vadd.f32 %v16804_v43, %v20290_v52  ;;  %8475 = vrot.lane.b32.xlu1 %v20291_v46, %s11462_s9  ;;  %8473 = vrot.lane.b32.xlu0 %v20292_v27, %s11462_s9  ;;  %v17088_v0 = vpop.eup %11174  ;;  %11198 = vpow2.f32 %v5111_v56  ;;  %v5115_v46 = vmul.f32 1.442695, %v4958_v57  ;;  %v20296_v27 = vld [vmem:[#allocation272_spill] sm:$0xff]  ;;  %v20300_v56 = vld [vmem:[#allocation511_spill] sm:$0xff] }
 0x766   : > { %v17091_v21 = vpop.eup %11176  ;;  %v6496_v36 = vadd.f32 %v16812_v13, %v20296_v27  ;;  %11200 = vpow2.f32 %v5109_v32 }
 0x767   : > { %v8091_v7 = vadd.f32 %v16474_v29, %v6493_v10  ;;  %v17094_v63 = vpop.permute.xlu1 %7987  ;;  %v17098_v52 = vpop.eup %11178  ;;  %v4959_v29 = vsub.f32 %v19493_v22, %v20297_v61  ;;  %v20298_v10 = vld [vmem:[#allocation294_spill] sm:$0xff]  ;;  %11202 = vrcp.f32 %v8092_v49  ;;  %v20303_v61 = vld [vmem:[#allocation165_spill] sm:$0xff]  ;;  %v20304_v49 = vld [vmem:[#allocation247_spill] sm:$0xff] }
 0x768   : > { %20293 = vst [vmem:[#allocation491_spill] sm:$0xff] %v17094_v63  ;;  %v17096_v48 = vpop.permute.xlu0 %7985  ;;  %v17104_v16 = vpop.eup %11180  ;;  %v20299_v63 = vld [vmem:[#allocation510_spill] sm:$0xff]  ;;  %v8094_v57 = vadd.f32 %v16492_v59, %v6496_v36  ;;  %v20305_v36 = vld [vmem:[#allocation167_spill] sm:$0xff] }
 0x769   : > { %20294 = vst [vmem:[#allocation492_spill] sm:$0xff] %v17096_v48  ;;  %v6495_v48 = vadd.f32 %v16816_v33, %v20298_v10  ;;  %8479 = vrot.lane.b32.xlu1 %v20299_v63, %s11462_s9  ;;  %8477 = vrot.lane.b32.xlu0 %v20300_v56, %s11462_s9  ;;  %v17114_v11 = vpop.eup %11182  ;;  %11204 = vrcp.f32 %v8091_v7  ;;  %v5119_v63 = vmul.f32 1.442695, %v4960_v50  ;;  %v6498_v10 = vadd.f32 %v16824_v58, %v20303_v61 }
 0x76a   : > { %v17117_v15 = vpop.eup %11184  ;;  %11206 = vpow2.f32 %v5115_v46  ;;  %v5117_v59 = vmul.f32 1.442695, %v4959_v29  ;;  %v4962_v7 = vsub.f32 %v19500_v54, %v20304_v49 }
 0x76b   : > { %v8093_v32 = vadd.f32 %v16494_v2, %v6495_v48  ;;  %v17120_v22 = vpop.permute.xlu1 %7991  ;;  %v17124_v27 = vpop.eup %11186  ;;  %11208 = vpow2.f32 %v5113_v39  ;;  %v6497_v2 = vadd.f32 %v16828_v42, %v20305_v36  ;;  %v20306_v48 = vld [vmem:[#allocation512_spill] sm:$0xff]  ;;  %v8096_v50 = vadd.f32 %v16512_v1, %v6498_v10  ;;  %v20309_v39 = vld [vmem:[#allocation2_spill] sm:$0xff] }
 0x76c   : > { %20301 = vst [vmem:[#allocation243_spill] sm:$0xff] %v17120_v22  ;;  %v17122_v24 = vpop.permute.xlu0 %7989  ;;  %v17128_v56 = vpop.eup %11188  ;;  %11210 = vrcp.f32 %v8094_v57  ;;  %v5272_v29 = vmul.f32 %v16800_v55, %v20309_v39  ;;  %v20313_v22 = vld [vmem:[#allocation3_spill] sm:$0xff]  ;;  %v20314_v10 = vld [vmem:[#allocation170_spill] sm:$0xff]  ;;  %v20317_v39 = vld [vmem:[#allocation273_spill] sm:$0xff] }
 0x76d   : > { %20302 = vst [vmem:[#allocation118_spill] sm:$0xff] %v17122_v24  ;;  %8483 = vrot.lane.b32.xlu1 %v20306_v48, %s11462_s9  ;;  %v20307_v24 = vld [vmem:[#allocation513_spill] sm:$0xff]  ;;  %v17138_v46 = vpop.eup %11190  ;;  %11212 = vrcp.f32 %v8093_v32  ;;  %v8095_v54 = vadd.f32 %v16514_v37, %v6497_v2  ;;  %v5271_v1 = vmul.f32 %v16804_v43, %v20313_v22  ;;  %v5123_v37 = vmul.f32 1.442695, %v4962_v7  ;;  %v20316_v32 = vld [vmem:[#allocation4_spill] sm:$0xff]  ;;  %v20321_v22 = vld [vmem:[#allocation290_spill] sm:$0xff] }
 0x76e   : > { %8481 = vrot.lane.b32.xlu0 %v20307_v24, %s11462_s9  ;;  %v17141_v61 = vpop.eup %11192  ;;  %11214 = vpow2.f32 %v5119_v63  ;;  %v20312_v24 = vld [vmem:[#allocation248_spill] sm:$0xff]  ;;  %v5274_v2 = vmul.f32 %v16812_v13, %v20316_v32  ;;  %v20318_v63 = vld [vmem:[#allocation514_spill] sm:$0xff]  ;;  %v20323_v7 = vld [vmem:[#allocation5_spill] sm:$0xff] }
 0x76f   : > { %20308 = vst [vmem:[#allocation244_spill] sm:$0xff] %v17141_v61  ;;  %v17146_v49 = vpop.permute.xlu1 %7995  ;;  %v17150_v48 = vpop.eup %11194  ;;  %v4961_v57 = vsub.f32 %v19501_v62, %v20312_v24  ;;  %v6500_v61 = vadd.f32 %v16836_v25, %v20314_v10  ;;  %11216 = vpow2.f32 %v5117_v59  ;;  %v20319_v62 = vld [vmem:[#allocation515_spill] sm:$0xff]  ;;  %v7058_v24 = vadd.f32 %v20321_v22, %v5272_v29 }
 0x770   : > { %20310 = vst [vmem:[#allocation119_spill] sm:$0xff] %v17146_v49  ;;  %v17148_v36 = vpop.permute.xlu0 %7993  ;;  %v17158_v55 = vpop.eup %11196  ;;  %v20322_v10 = vld [vmem:[#allocation291_spill] sm:$0xff]  ;;  %11218 = vrcp.f32 %v8096_v50  ;;  %v5273_v32 = vmul.f32 %v16816_v33, %v20323_v7 }
 0x771   : > { %20311 = vst [vmem:[#allocation190_spill] sm:$0xff] %v17148_v36  ;;  %20315 = vst [vmem:[#allocation120_spill] sm:$0xff] %v17158_v55  ;;  %v6499_v36 = vadd.f32 %v16840_v17, %v20317_v39  ;;  %8487 = vrot.lane.b32.xlu1 %v20318_v63, %s11462_s9  ;;  %v17168_v43 = vpop.eup %11198  ;;  %v7057_v49 = vadd.f32 %v20322_v10, %v5271_v1  ;;  %v8098_v59 = vadd.f32 %v16528_v47, %v6500_v61  ;;  %v20324_v39 = vld [vmem:[#allocation6_spill] sm:$0xff]  ;;  %v20325_v1 = vld [vmem:[#allocation307_spill] sm:$0xff] }
 0x772   : > { %8485 = vrot.lane.b32.xlu0 %v20319_v62, %s11462_s9  ;;  %20320 = vst [vmem:[#allocation191_spill] sm:$0xff] %v17168_v43  ;;  %v17173_v13 = vpop.eup %11200  ;;  %v5276_v63 = vmul.f32 %v16824_v58, %v20324_v39  ;;  %11220 = vrcp.f32 %v8095_v54  ;;  %v5121_v22 = vmul.f32 1.442695, %v4961_v57  ;;  %v6502_v50 = vadd.f32 %v16848_v14, %v20325_v1  ;;  %v20326_v33 = vld [vmem:[#allocation295_spill] sm:$0xff]  ;;  %v20327_v54 = vld [vmem:[#allocation296_spill] sm:$0xff] }
 0x773   : > { %v8097_v62 = vadd.f32 %v16530_v28, %v6499_v36  ;;  %v8376_v43 = vpop.permute.xlu1 %8375  ;;  %v11203_v29 = vpop.eup %11202  ;;  %11222 = vpow2.f32 %v5123_v37  ;;  %v7060_v58 = vadd.f32 %v20326_v33, %v5274_v2  ;;  %v7059_v28 = vadd.f32 %v20327_v54, %v5273_v32  ;;  %v20328_v36 = vld [vmem:[#allocation308_spill] sm:$0xff] }
 0x774   : > { %v8374_v55 = vpop.permute.xlu0 %8373  ;;  %v8656_v10 = vadd.f32 %v8376_v43, %v7058_v24  ;;  %v11205_v61 = vpop.eup %11204  ;;  %v6501_v7 = vadd.f32 %v16852_v31, %v20328_v36  ;;  %v20329_v57 = vld [vmem:[#allocation516_spill] sm:$0xff]  ;;  %11224 = vrcp.f32 %v8098_v59  ;;  %v20330_v24 = vld [vmem:[#allocation7_spill] sm:$0xff] }
 0x775   : > { %v8655_v47 = vadd.f32 %v8374_v55, %v7057_v49  ;;  %8491 = vrot.lane.b32.xlu1 %v20329_v57, %s11462_s9  ;;  %v17196_v49 = vpop.eup %11206  ;;  %v8100_v55 = vadd.f32 %v16542_v60, %v6502_v50  ;;  %v5275_v32 = vmul.f32 %v16828_v42, %v20330_v24  ;;  %v20331_v39 = vld [vmem:[#allocation8_spill] sm:$0xff]  ;;  %11226 = vrcp.f32 %v8097_v62  ;;  %v20332_v57 = vld [vmem:[#allocation251_spill] sm:$0xff]  ;;  %v20333_v60 = vld [vmem:[#allocation278_spill] sm:$0xff] }
 0x776   : > { %8489 = vrot.lane.b32.xlu0 %v16228_v19, %s11462_s9  ;;  %v8844_v37 = vmul.f32 %v11203_v29, %v8656_v10  ;;  %v17199_v43 = vpop.eup %11208  ;;  %v5278_v1 = vmul.f32 %v16836_v25, %v20331_v39  ;;  %v8099_v19 = vadd.f32 %v16544_v3, %v6501_v7  ;;  %v4964_v59 = vsub.f32 %v19508_v51, %v20332_v57  ;;  %v20334_v25 = vld [vmem:[#allocation301_spill] sm:$0xff]  ;;  %v20335_v3 = vld [vmem:[#allocation302_spill] sm:$0xff] }
 0x777   : > { %v8843_v2 = vmul.f32 %v11205_v61, %v8655_v47  ;;  %v8380_v33 = vpop.permute.xlu1 %8379  ;;  %v11211_v36 = vpop.eup %11210  ;;  %v6504_v29 = vadd.f32 %v16860_v45, %v20333_v60  ;;  %11228 = vpow2.f32 %v5121_v22  ;;  %v7062_v62 = vadd.f32 %v20334_v25, %v5276_v63  ;;  %v20336_v61 = vld [vmem:[#allocation309_spill] sm:$0xff]  ;;  %v20340_v60 = vld [vmem:[#allocation252_spill] sm:$0xff] }
 0x778   : > { %v8378_v54 = vpop.permute.xlu0 %8377  ;;  %8938 = vst.msk [vmem:[%s17186_s10 + $0x8] sm:$0xff] %vm375_vm1, %v8844_v37  ;;  %v8658_v42 = vadd.f32 %v8380_v33, %v7060_v58  ;;  %v11213_v10 = vpop.eup %11212  ;;  %v7061_v47 = vadd.f32 %v20335_v3, %v5275_v32  ;;  %v6503_v7 = vadd.f32 %v16864_v12, %v20336_v61  ;;  %v20337_v51 = vld [vmem:[#allocation517_spill] sm:$0xff]  ;;  %11230 = vrcp.f32 %v8100_v55  ;;  %v20339_v32 = vld [vmem:[#allocation10_spill] sm:$0xff]  ;;  %v20341_v55 = vld [vmem:[#allocation219_spill] sm:$0xff] }
 0x779   : > { %8937 = vst.msk [vmem:[%s17186_s10] sm:$0xff] %vm375_vm1, %v8843_v2  ;;  %v8657_v50 = vadd.f32 %v8378_v54, %v7059_v28  ;;  %8495 = vrot.lane.b32.xlu1 %v20337_v51, %s11462_s9  ;;  %v17222_v37 = vpop.eup %11214  ;;  %v8102_v22 = vadd.f32 %v16550_v30, %v6504_v29  ;;  %v20338_v2 = vld [vmem:[#allocation9_spill] sm:$0xff]  ;;  %v5280_v39 = vmul.f32 %v16848_v14, %v20339_v32  ;;  %11232 = vrcp.f32 %v8099_v19  ;;  %v20342_v30 = vld [vmem:[#allocation311_spill] sm:$0xff]  ;;  %v20345_v3 = vld [vmem:[#allocation312_spill] sm:$0xff] }
 0x77a   : > { %8493 = vrot.lane.b32.xlu0 %v16246_v20, %s11462_s9  ;;  %v8846_v58 = vmul.f32 %v11211_v36, %v8658_v42  ;;  %v17225_v28 = vpop.eup %11216  ;;  %v5277_v24 = vmul.f32 %v16840_v17, %v20338_v2  ;;  %v8101_v20 = vadd.f32 %v16552_v41, %v6503_v7  ;;  %v4963_v25 = vsub.f32 %v20341_v55, %v20340_v60  ;;  %v20343_v19 = vld [vmem:[#allocation305_spill] sm:$0xff]  ;;  %v20344_v41 = vld [vmem:[#allocation306_spill] sm:$0xff]  ;;  %v20347_v51 = vld [vmem:[#allocation519_spill] sm:$0xff] }
 0x77b   : > { %v8845_v63 = vmul.f32 %v11213_v10, %v8657_v50  ;;  %v8384_v33 = vpop.permute.xlu1 %8383  ;;  %v11219_v57 = vpop.eup %11218  ;;  %v6506_v36 = vadd.f32 %v16872_v9, %v20342_v30  ;;  %v5127_v14 = vmul.f32 1.442695, %v4964_v59  ;;  %v7064_v50 = vadd.f32 %v20343_v19, %v5278_v1  ;;  %v20346_v7 = vld [vmem:[#allocation518_spill] sm:$0xff]  ;;  %v20349_v1 = vld [vmem:[#allocation11_spill] sm:$0xff] }
 0x77c   : > { %v8382_v54 = vpop.permute.xlu0 %8381  ;;  %8940 = vst.msk [vmem:[%s17186_s10 + $0x18] sm:$0xff] %vm375_vm1, %v8846_v58  ;;  %v8660_v17 = vadd.f32 %v8384_v33, %v7062_v62  ;;  %v11221_v42 = vpop.eup %11220  ;;  %v7063_v10 = vadd.f32 %v20344_v41, %v5277_v24  ;;  %v6505_v61 = vadd.f32 %v16876_v8, %v20345_v3  ;;  %11234 = vrcp.f32 %v8102_v22  ;;  %v20348_v62 = vld [vmem:[#allocation550_spill] sm:$0xff]  ;;  %v20350_v24 = vld [vmem:[#allocation12_spill] sm:$0xff]  ;;  %v20351_v33 = vld [vmem:[#allocation551_spill] sm:$0xff] }
 0x77d   : > { %8939 = vst.msk [vmem:[%s17186_s10 + $0x10] sm:$0xff] %vm375_vm1, %v8845_v63  ;;  %v8659_v29 = vadd.f32 %v8382_v54, %v7061_v47  ;;  %8499 = vrot.lane.b32.xlu1 %v20346_v7, %s11462_s9  ;;  %v8104_v47 = vadd.f32 %v20348_v62, %v6506_v36  ;;  %v17249_v63 = vpop.eup %11222  ;;  %v5279_v2 = vmul.f32 %v16852_v31, %v20349_v1  ;;  %11236 = vrcp.f32 %v8101_v20  ;;  %v20352_v22 = vld [vmem:[#allocation315_spill] sm:$0xff]  ;;  %v20353_v41 = vld [vmem:[#allocation138_spill] sm:$0xff]  ;;  %v20355_v20 = vld [vmem:[#allocation277_spill] sm:$0xff] }
 0x77e   : > { %8497 = vrot.lane.b32.xlu0 %v20347_v51, %s11462_s9  ;;  %v8848_v58 = vmul.f32 %v11219_v57, %v8660_v17  ;;  %v5282_v32 = vmul.f32 %v16860_v45, %v20350_v24  ;;  %v8103_v54 = vadd.f32 %v20351_v33, %v6505_v61  ;;  %v11225_v30 = vpop.eup %11224  ;;  %v5125_v19 = vmul.f32 1.442695, %v4963_v25  ;;  %v20356_v3 = vld [vmem:[#allocation316_spill] sm:$0xff]  ;;  %v20357_v61 = vld [vmem:[#allocation102_spill] sm:$0xff]  ;;  %v20359_v51 = vld [vmem:[#allocation521_spill] sm:$0xff] }
 0x77f   : > { %v8847_v59 = vmul.f32 %v11221_v42, %v8659_v29  ;;  %v8388_v60 = vpop.permute.xlu1 %8387  ;;  %v6508_v36 = vadd.f32 %v20353_v41, %v20352_v22  ;;  %v11227_v31 = vpop.eup %11226  ;;  %11238 = vpow2.f32 %v5127_v14  ;;  %v20354_v29 = vld [vmem:[#allocation276_spill] sm:$0xff]  ;;  %v7065_v42 = vadd.f32 %v20355_v20, %v5279_v2  ;;  %v20362_v1 = vld [vmem:[#allocation14_spill] sm:$0xff]  ;;  %v20363_v24 = vld [vmem:[#allocation553_spill] sm:$0xff] }
 0x780   : > { %v8386_v55 = vpop.permute.xlu0 %8385  ;;  %8942 = vst.msk [vmem:[%s17186_s10 + $0x28] sm:$0xff] %vm375_vm1, %v8848_v58  ;;  %v8662_v57 = vadd.f32 %v8388_v60, %v7064_v50  ;;  %v7066_v45 = vadd.f32 %v20354_v29, %v5280_v39  ;;  %v6507_v7 = vadd.f32 %v20357_v61, %v20356_v3  ;;  %v20358_v25 = vld [vmem:[#allocation520_spill] sm:$0xff]  ;;  %11240 = vrcp.f32 %v8104_v47  ;;  %v20361_v39 = vld [vmem:[#allocation13_spill] sm:$0xff]  ;;  %v20364_v29 = vld [vmem:[#allocation274_spill] sm:$0xff] }
 0x781   : > { %8941 = vst.msk [vmem:[%s17186_s10 + $0x20] sm:$0xff] %vm375_vm1, %v8847_v59  ;;  %v8661_v17 = vadd.f32 %v8386_v55, %v7063_v10  ;;  %8503 = vrot.lane.b32.xlu1 %v20358_v25, %s11462_s9  ;;  %v20360_v50 = vld [vmem:[#allocation552_spill] sm:$0xff]  ;;  %v17271_v58 = vpop.eup %11228  ;;  %v5281_v59 = vmul.f32 %v16864_v12, %v20361_v39  ;;  %v5284_v2 = vmul.f32 %v16872_v9, %v20362_v1  ;;  %11242 = vrcp.f32 %v8103_v54  ;;  %v20365_v47 = vld [vmem:[#allocation137_spill] sm:$0xff]  ;;  %v20369_v3 = vld [vmem:[#allocation310_spill] sm:$0xff] }
 0x782   : > { %8501 = vrot.lane.b32.xlu0 %v20359_v51, %s11462_s9  ;;  %v8106_v10 = vadd.f32 %v20360_v50, %v6508_v36  ;;  %v8850_v62 = vmul.f32 %v11225_v30, %v8662_v57  ;;  %v8105_v33 = vadd.f32 %v20363_v24, %v6507_v7  ;;  %v11231_v22 = vpop.eup %11230  ;;  %v4966_v20 = vsub.f32 %v20365_v47, %v20364_v29  ;;  %v20366_v36 = vld [vmem:[#allocation318_spill] sm:$0xff]  ;;  %v20367_v30 = vld [vmem:[#allocation139_spill] sm:$0xff]  ;;  %v20368_v9 = vld [vmem:[#allocation261_spill] sm:$0xff] }
 0x783   : > { %v8849_v14 = vmul.f32 %v11227_v31, %v8661_v17  ;;  %v8392_v60 = vpop.permute.xlu1 %8391  ;;  %v6510_v57 = vadd.f32 %v20367_v30, %v20366_v36  ;;  %v11233_v31 = vpop.eup %11232  ;;  %11244 = vpow2.f32 %v5125_v19  ;;  %v7068_v54 = vadd.f32 %v20368_v9, %v5282_v32  ;;  %v20370_v25 = vld [vmem:[#allocation319_spill] sm:$0xff]  ;;  %v20372_v39 = vld [vmem:[#allocation522_spill] sm:$0xff] }
 0x784   : > { %v8390_v55 = vpop.permute.xlu0 %8389  ;;  %8944 = vst.msk [vmem:[%s17186_s10 + $0x38] sm:$0xff] %vm375_vm1, %v8850_v62  ;;  %v8664_v12 = vadd.f32 %v8392_v60, %v7066_v45  ;;  %v7067_v7 = vadd.f32 %v20369_v3, %v5281_v59  ;;  %v20371_v51 = vld [vmem:[#allocation103_spill] sm:$0xff]  ;;  %11246 = vrcp.f32 %v8106_v10  ;;  %v20374_v45 = vld [vmem:[#allocation554_spill] sm:$0xff]  ;;  %v20376_v59 = vld [vmem:[#allocation16_spill] sm:$0xff] }
 0x785   : > { %8943 = vst.msk [vmem:[%s17186_s10 + $0x30] sm:$0xff] %vm375_vm1, %v8849_v14  ;;  %v8663_v17 = vadd.f32 %v8390_v55, %v7065_v42  ;;  %v6509_v50 = vadd.f32 %v20371_v51, %v20370_v25  ;;  %8507 = vrot.lane.b32.xlu1 %v20372_v39, %s11462_s9  ;;  %v20373_v1 = vld [vmem:[#allocation523_spill] sm:$0xff]  ;;  %v8108_v42 = vadd.f32 %v20374_v45, %v6510_v57  ;;  %11248 = vrcp.f32 %v8105_v33  ;;  %v20379_v3 = vld [vmem:[#allocation140_spill] sm:$0xff]  ;;  %v20380_v10 = vld [vmem:[#allocation322_spill] sm:$0xff] }
 0x786   : > { %8505 = vrot.lane.b32.xlu0 %v20373_v1, %s11462_s9  ;;  %v8852_v62 = vmul.f32 %v11231_v22, %v8664_v12  ;;  %v20375_v14 = vld [vmem:[#allocation15_spill] sm:$0xff]  ;;  %v5286_v24 = vmul.f32 %v20353_v41, %v20376_v59  ;;  %v11235_v36 = vpop.eup %11234  ;;  %v20381_v39 = vld [vmem:[#allocation150_spill] sm:$0xff]  ;;  %v5131_v41 = vmul.f32 1.442695, %v4966_v20  ;;  %v20382_v33 = vld [vmem:[#allocation313_spill] sm:$0xff] }
 0x787   : > { %v8851_v19 = vmul.f32 %v11233_v31, %v8663_v17  ;;  %v5283_v32 = vmul.f32 %v16876_v8, %v20375_v14  ;;  %v20377_v60 = vld [vmem:[#allocation555_spill] sm:$0xff]  ;;  %v8396_v29 = vpop.permute.xlu1 %8395  ;;  %v6512_v57 = vadd.f32 %v20381_v39, %v20380_v10  ;;  %v11237_v12 = vpop.eup %11236  ;;  %v7070_v17 = vadd.f32 %v20382_v33, %v5284_v2  ;;  %v20383_v31 = vld [vmem:[#allocation314_spill] sm:$0xff]  ;;  %v20385_v45 = vld [vmem:[#allocation105_spill] sm:$0xff] }
 0x788   : > { %v8107_v55 = vadd.f32 %v20377_v60, %v6509_v50  ;;  %v8394_v47 = vpop.permute.xlu0 %8393  ;;  %v20378_v9 = vld [vmem:[#allocation275_spill] sm:$0xff]  ;;  %8946 = vst.msk [vmem:[%s17186_s10 + $0x48] sm:$0xff] %vm375_vm1, %v8852_v62  ;;  %v8666_v8 = vadd.f32 %v8396_v29, %v7068_v54  ;;  %v20386_v59 = vld [vmem:[#allocation524_spill] sm:$0xff]  ;;  %v20387_v60 = vld [vmem:[#allocation525_spill] sm:$0xff]  ;;  %11250 = vrcp.f32 %v8108_v42 }
 0x789   : > { %v4965_v25 = vsub.f32 %v20379_v3, %v20378_v9  ;;  %8945 = vst.msk [vmem:[%s17186_s10 + $0x40] sm:$0xff] %vm375_vm1, %v8851_v19  ;;  %v8665_v22 = vadd.f32 %v8394_v47, %v7067_v7  ;;  %v7069_v50 = vadd.f32 %v20383_v31, %v5283_v32  ;;  %v20384_v1 = vld [vmem:[#allocation323_spill] sm:$0xff]  ;;  %8511 = vrot.lane.b32.xlu1 %v20386_v59, %s11462_s9  ;;  %v20388_v54 = vld [vmem:[#allocation556_spill] sm:$0xff]  ;;  %v17317_v19 = vpop.eup %11238  ;;  %v20389_v2 = vld [vmem:[#allocation17_spill] sm:$0xff] }
 0x78a   : > { %v6511_v14 = vadd.f32 %v20385_v45, %v20384_v1  ;;  %8509 = vrot.lane.b32.xlu0 %v20387_v60, %s11462_s9  ;;  %v8110_v7 = vadd.f32 %v20388_v54, %v6512_v57  ;;  %v8854_v62 = vmul.f32 %v11235_v36, %v8666_v8  ;;  %v5285_v32 = vmul.f32 %v20357_v61, %v20389_v2  ;;  %v20390_v29 = vld [vmem:[#allocation18_spill] sm:$0xff]  ;;  %v20391_v9 = vld [vmem:[#allocation557_spill] sm:$0xff]  ;;  %v11241_v31 = vpop.eup %11240  ;;  %v20398_v54 = vld [vmem:[#allocation527_spill] sm:$0xff] }
 0x78b   : > { %v8853_v20 = vmul.f32 %v11237_v12, %v8665_v22  ;;  %v5288_v47 = vmul.f32 %v20367_v30, %v20390_v29  ;;  %11252 = vrcp.f32 %v8107_v55  ;;  %v8400_v10 = vpop.permute.xlu1 %8399  ;;  %v5129_v1 = vmul.f32 1.442695, %v4965_v25  ;;  %v20392_v42 = vld [vmem:[#allocation325_spill] sm:$0xff]  ;;  %v11243_v61 = vpop.eup %11242  ;;  %v20397_v25 = vld [vmem:[#allocation526_spill] sm:$0xff] }
 0x78c   : > { %v8109_v3 = vadd.f32 %v20391_v9, %v6511_v14  ;;  %v8398_v33 = vpop.permute.xlu0 %8397  ;;  %v20393_v59 = vld [vmem:[#allocation485_spill] sm:$0xff]  ;;  %8948 = vst.msk [vmem:[%s17186_s10 + $0x58] sm:$0xff] %vm375_vm1, %v8854_v62  ;;  %v8668_v36 = vadd.f32 %v8400_v10, %v7070_v17  ;;  %11254 = vpow2.f32 %v5131_v41  ;;  %v20396_v14 = vld [vmem:[#allocation326_spill] sm:$0xff]  ;;  %v20402_v9 = vld [vmem:[#allocation559_spill] sm:$0xff] }
 0x78d   : > { %v6514_v57 = vadd.f32 %v20393_v59, %v20392_v42  ;;  %8947 = vst.msk [vmem:[%s17186_s10 + $0x50] sm:$0xff] %vm375_vm1, %v8853_v20  ;;  %v8667_v8 = vadd.f32 %v8398_v33, %v7069_v50  ;;  %v20394_v22 = vld [vmem:[#allocation265_spill] sm:$0xff]  ;;  %v6513_v60 = vadd.f32 %v16924_v40, %v20396_v14  ;;  %8515 = vrot.lane.b32.xlu1 %v20397_v25, %s11462_s9  ;;  %11256 = vrcp.f32 %v8110_v7  ;;  %v20399_v17 = vld [vmem:[#allocation558_spill] sm:$0xff]  ;;  %v17339_v20 = vpop.eup %11244 }
 0x78e   : > { %v7072_v30 = vadd.f32 %v20394_v22, %v5286_v24  ;;  %v20395_v55 = vld [vmem:[#allocation317_spill] sm:$0xff]  ;;  %8513 = vrot.lane.b32.xlu0 %v20398_v54, %s11462_s9  ;;  %v8856_v62 = vmul.f32 %v11241_v31, %v8668_v36  ;;  %v20400_v24 = vld [vmem:[#allocation19_spill] sm:$0xff]  ;;  %11258 = vrcp.f32 %v8109_v3  ;;  %v11247_v22 = vpop.eup %11246  ;;  %v20406_v31 = vld [vmem:[#allocation106_spill] sm:$0xff] }
 0x78f   : > { %v7071_v12 = vadd.f32 %v20395_v55, %v5285_v32  ;;  %v8112_v50 = vadd.f32 %v20399_v17, %v6514_v57  ;;  %v8855_v41 = vmul.f32 %v11243_v61, %v8667_v8  ;;  %v5287_v2 = vmul.f32 %v20371_v51, %v20400_v24  ;;  %v20401_v32 = vld [vmem:[#allocation20_spill] sm:$0xff]  ;;  %v8404_v33 = vpop.permute.xlu1 %8403  ;;  %v20403_v55 = vld [vmem:[#allocation254_spill] sm:$0xff]  ;;  %v20404_v7 = vld [vmem:[#allocation225_spill] sm:$0xff]  ;;  %v11249_v61 = vpop.eup %11248 }
 0x790   : > { %v5290_v29 = vmul.f32 %v20381_v39, %v20401_v32  ;;  %v8111_v10 = vadd.f32 %v20402_v9, %v6513_v60  ;;  %v8402_v42 = vpop.permute.xlu0 %8401  ;;  %v4968_v14 = vsub.f32 %v20404_v7, %v20403_v55  ;;  %v20405_v57 = vld [vmem:[#allocation329_spill] sm:$0xff]  ;;  %8950 = vst.msk [vmem:[%s17186_s10 + $0x68] sm:$0xff] %vm375_vm1, %v8856_v62  ;;  %v8670_v51 = vadd.f32 %v8404_v33, %v7072_v30  ;;  %v20407_v39 = vld [vmem:[#allocation320_spill] sm:$0xff]  ;;  %v20409_v54 = vld [vmem:[#allocation330_spill] sm:$0xff] }
 0x791   : > { %v6516_v36 = vadd.f32 %v20406_v31, %v20405_v57  ;;  %8949 = vst.msk [vmem:[%s17186_s10 + $0x60] sm:$0xff] %vm375_vm1, %v8855_v41  ;;  %v8669_v8 = vadd.f32 %v8402_v42, %v7071_v12  ;;  %11260 = vpow2.f32 %v5129_v1  ;;  %v7074_v3 = vadd.f32 %v20407_v39, %v5288_v47  ;;  %v20408_v60 = vld [vmem:[#allocation321_spill] sm:$0xff]  ;;  %v20411_v32 = vld [vmem:[#allocation528_spill] sm:$0xff] }
 0x792   : > { %v7073_v25 = vadd.f32 %v20408_v60, %v5287_v2  ;;  %v20410_v17 = vld [vmem:[#allocation157_spill] sm:$0xff]  ;;  %8519 = vrot.lane.b32.xlu1 %v20411_v32, %s11462_s9  ;;  %11262 = vrcp.f32 %v8112_v50  ;;  %v20413_v30 = vld [vmem:[#allocation560_spill] sm:$0xff]  ;;  %v8858_v62 = vmul.f32 %v11247_v22, %v8670_v51  ;;  %v20415_v2 = vld [vmem:[#allocation22_spill] sm:$0xff]  ;;  %v11251_v39 = vpop.eup %11250 }
 0x793   : > { %v6515_v24 = vadd.f32 %v20410_v17, %v20409_v54  ;;  %v20412_v9 = vld [vmem:[#allocation529_spill] sm:$0xff]  ;;  %v8114_v12 = vadd.f32 %v20413_v30, %v6516_v36  ;;  %v8857_v1 = vmul.f32 %v11249_v61, %v8669_v8  ;;  %v5292_v33 = vmul.f32 %v20393_v59, %v20415_v2  ;;  %v8408_v7 = vpop.permute.xlu1 %8407  ;;  %v20417_v60 = vld [vmem:[#allocation255_spill] sm:$0xff]  ;;  %v20418_v54 = vld [vmem:[#allocation226_spill] sm:$0xff] }
 0x794   : > { %8517 = vrot.lane.b32.xlu0 %v20412_v9, %s11462_s9  ;;  %v20414_v41 = vld [vmem:[#allocation21_spill] sm:$0xff]  ;;  %11264 = vrcp.f32 %v8111_v10  ;;  %v8406_v57 = vpop.permute.xlu0 %8405  ;;  %v4967_v32 = vsub.f32 %v20418_v54, %v20417_v60  ;;  %v20419_v50 = vld [vmem:[#allocation332_spill] sm:$0xff]  ;;  %v20420_v9 = vld [vmem:[#allocation107_spill] sm:$0xff]  ;;  %8952 = vst.msk [vmem:[%s17186_s10 + $0x78] sm:$0xff] %vm375_vm1, %v8858_v62  ;;  %v5135_v59 = vmul.f32 1.442695, %v4968_v14 }
 0x795   : > { %v5289_v47 = vmul.f32 %v20385_v45, %v20414_v41  ;;  %v20416_v42 = vld [vmem:[#allocation561_spill] sm:$0xff]  ;;  %v6518_v36 = vadd.f32 %v20420_v9, %v20419_v50  ;;  %8951 = vst.msk [vmem:[%s17186_s10 + $0x70] sm:$0xff] %vm375_vm1, %v8857_v1  ;;  %v8672_v45 = vadd.f32 %v8408_v7, %v7074_v3  ;;  %v8671_v22 = vadd.f32 %v8406_v57, %v7073_v25  ;;  %v11253_v51 = vpop.eup %11252  ;;  %v20421_v10 = vld [vmem:[#allocation214_spill] sm:$0xff]  ;;  %v20422_v61 = vld [vmem:[#allocation324_spill] sm:$0xff] }
 0x796   : > { %v8113_v55 = vadd.f32 %v20416_v42, %v6515_v24  ;;  %v7076_v8 = vadd.f32 %v20421_v10, %v5290_v29  ;;  %v20423_v30 = vld [vmem:[#allocation333_spill] sm:$0xff]  ;;  %v20424_v41 = vld [vmem:[#allocation224_spill] sm:$0xff]  ;;  %v20425_v42 = vld [vmem:[#allocation530_spill] sm:$0xff]  ;;  %11266 = vrcp.f32 %v8114_v12  ;;  %v17385_v1 = vpop.eup %11254 }
 0x797   : > { %v7075_v24 = vadd.f32 %v20422_v61, %v5289_v47  ;;  %v6517_v2 = vadd.f32 %v20424_v41, %v20423_v30  ;;  %8523 = vrot.lane.b32.xlu1 %v20425_v42, %s11462_s9  ;;  %v20426_v60 = vld [vmem:[#allocation531_spill] sm:$0xff]  ;;  %v20427_v3 = vld [vmem:[#allocation562_spill] sm:$0xff]  ;;  %v8860_v62 = vmul.f32 %v11251_v39, %v8672_v45  ;;  %v8859_v14 = vmul.f32 %v11253_v51, %v8671_v22  ;;  %v20429_v7 = vld [vmem:[#allocation24_spill] sm:$0xff]  ;;  %v8412_v10 = vpop.permute.xlu1 %8411  ;;  %v11257_v30 = vpop.eup %11256 }
 0x798   : > { %8521 = vrot.lane.b32.xlu0 %v20426_v60, %s11462_s9  ;;  %v8116_v25 = vadd.f32 %v20427_v3, %v6518_v36  ;;  %v20428_v29 = vld [vmem:[#allocation23_spill] sm:$0xff]  ;;  %v5294_v57 = vmul.f32 %v20406_v31, %v20429_v7  ;;  %11268 = vrcp.f32 %v8113_v55  ;;  %v8410_v61 = vpop.permute.xlu0 %8409  ;;  %v5133_v42 = vmul.f32 1.442695, %v4967_v32  ;;  %v20431_v12 = vld [vmem:[#allocation336_spill] sm:$0xff]  ;;  %v20432_v60 = vld [vmem:[#allocation109_spill] sm:$0xff] }
 0x799   : > { %v5291_v47 = vmul.f32 %v16924_v40, %v20428_v29  ;;  %v20430_v54 = vld [vmem:[#allocation563_spill] sm:$0xff]  ;;  %v6520_v36 = vadd.f32 %v20432_v60, %v20431_v12  ;;  %8954 = vst.msk [vmem:[%s17186_s10 + $0x88] sm:$0xff] %vm375_vm1, %v8860_v62  ;;  %8953 = vst.msk [vmem:[%s17186_s10 + $0x80] sm:$0xff] %vm375_vm1, %v8859_v14  ;;  %v8674_v39 = vadd.f32 %v8412_v10, %v7076_v8  ;;  %v11259_v40 = vpop.eup %11258  ;;  %11270 = vpow2.f32 %v5135_v59  ;;  %v20434_v55 = vld [vmem:[#allocation328_spill] sm:$0xff] }
 0x79a   : > { %v8115_v50 = vadd.f32 %v20430_v54, %v6517_v2  ;;  %v8673_v45 = vadd.f32 %v8410_v61, %v7075_v24  ;;  %v20433_v22 = vld [vmem:[#allocation327_spill] sm:$0xff]  ;;  %v20435_v2 = vld [vmem:[#allocation337_spill] sm:$0xff]  ;;  %v20437_v32 = vld [vmem:[#allocation532_spill] sm:$0xff]  ;;  %11272 = vrcp.f32 %v8116_v25 }
 0x79b   : > { %v7078_v31 = vadd.f32 %v20433_v22, %v5292_v33  ;;  %v7077_v51 = vadd.f32 %v20434_v55, %v5291_v47  ;;  %v20436_v3 = vld [vmem:[#allocation487_spill] sm:$0xff]  ;;  %8527 = vrot.lane.b32.xlu1 %v20437_v32, %s11462_s9  ;;  %v20438_v7 = vld [vmem:[#allocation533_spill] sm:$0xff]  ;;  %v20439_v8 = vld [vmem:[#allocation564_spill] sm:$0xff]  ;;  %v8862_v62 = vmul.f32 %v11257_v30, %v8674_v39  ;;  %v17407_v14 = vpop.eup %11260  ;;  %v8416_v22 = vpop.permute.xlu1 %8415 }
 0x79c   : > { %v6519_v29 = vadd.f32 %v20436_v3, %v20435_v2  ;;  %8525 = vrot.lane.b32.xlu0 %v20438_v7, %s11462_s9  ;;  %v8118_v24 = vadd.f32 %v20439_v8, %v6520_v36  ;;  %v8861_v59 = vmul.f32 %v11259_v40, %v8673_v45  ;;  %20440 = vst [vmem:[#allocation121_spill] sm:$0xff] %v17407_v14  ;;  %v20441_v33 = vld [vmem:[#allocation25_spill] sm:$0xff]  ;;  %v20442_v54 = vld [vmem:[#allocation26_spill] sm:$0xff]  ;;  %11274 = vrcp.f32 %v8115_v50  ;;  %v8414_v55 = vpop.permute.xlu0 %8413  ;;  %v11263_v2 = vpop.eup %11262  ;;  %v20445_v25 = vld [vmem:[#allocation147_spill] sm:$0xff] }
 0x79d   : > { %v5293_v47 = vmul.f32 %v20410_v17, %v20441_v33  ;;  %v5296_v10 = vmul.f32 %v20420_v9, %v20442_v54  ;;  %v20443_v61 = vld [vmem:[#allocation565_spill] sm:$0xff]  ;;  %v20446_v36 = vld [vmem:[#allocation338_spill] sm:$0xff]  ;;  %v20447_v30 = vld [vmem:[#allocation488_spill] sm:$0xff]  ;;  %8956 = vst.msk [vmem:[%s17186_s10 + $0x98] sm:$0xff] %vm375_vm1, %v8862_v62  ;;  %v8676_v17 = vadd.f32 %v8416_v22, %v7078_v31  ;;  %v8675_v45 = vadd.f32 %v8414_v55, %v7077_v51 }
 0x79e   : > { %v8117_v12 = vadd.f32 %v20443_v61, %v6519_v29  ;;  %v20444_v32 = vld [vmem:[#allocation257_spill] sm:$0xff]  ;;  %v6522_v39 = vadd.f32 %v20447_v30, %v20446_v36  ;;  %8955 = vst.msk [vmem:[%s17186_s10 + $0x90] sm:$0xff] %vm375_vm1, %v8861_v59  ;;  %v11265_v40 = vpop.eup %11264  ;;  %11276 = vpow2.f32 %v5133_v42  ;;  %v20448_v9 = vld [vmem:[#allocation134_spill] sm:$0xff]  ;;  %v20449_v29 = vld [vmem:[#allocation331_spill] sm:$0xff] }
 0x79f   : > { %v4970_v7 = vsub.f32 %v20445_v25, %v20444_v32  ;;  %v7080_v50 = vadd.f32 %v20448_v9, %v5294_v57  ;;  %v7079_v8 = vadd.f32 %v20449_v29, %v5293_v47  ;;  %v20450_v33 = vld [vmem:[#allocation339_spill] sm:$0xff]  ;;  %v20451_v61 = vld [vmem:[#allocation534_spill] sm:$0xff]  ;;  %11278 = vrcp.f32 %v8118_v24  ;;  %v20455_v47 = vld [vmem:[#allocation28_spill] sm:$0xff]  ;;  %v8420_v36 = vpop.permute.xlu1 %8419 }
 0x7a0   : > { %v6521_v54 = vadd.f32 %v16972_v6, %v20450_v33  ;;  %8531 = vrot.lane.b32.xlu1 %v20451_v61, %s11462_s9  ;;  %v20452_v32 = vld [vmem:[#allocation535_spill] sm:$0xff]  ;;  %v20453_v31 = vld [vmem:[#allocation566_spill] sm:$0xff]  ;;  %v8864_v62 = vmul.f32 %v11263_v2, %v8676_v17  ;;  %v8863_v42 = vmul.f32 %v11265_v40, %v8675_v45  ;;  %v5298_v22 = vmul.f32 %v20432_v60, %v20455_v47  ;;  %v8418_v9 = vpop.permute.xlu0 %8417  ;;  %v11267_v29 = vpop.eup %11266  ;;  %v20458_v61 = vld [vmem:[#allocation148_spill] sm:$0xff] }
 0x7a1   : > { %8529 = vrot.lane.b32.xlu0 %v20452_v32, %s11462_s9  ;;  %v8120_v51 = vadd.f32 %v20453_v31, %v6522_v39  ;;  %v20454_v59 = vld [vmem:[#allocation27_spill] sm:$0xff]  ;;  %11280 = vrcp.f32 %v8117_v12  ;;  %v20457_v33 = vld [vmem:[#allocation258_spill] sm:$0xff]  ;;  %v20459_v24 = vld [vmem:[#allocation340_spill] sm:$0xff]  ;;  %v8677_v2 = vadd.f32 %v8418_v9, %v7079_v8  ;;  %v5139_v60 = vmul.f32 1.442695, %v4970_v7 }
 0x7a2   : > { %v5295_v57 = vmul.f32 %v20424_v41, %v20454_v59  ;;  %v20456_v55 = vld [vmem:[#allocation567_spill] sm:$0xff]  ;;  %v4969_v32 = vsub.f32 %v20458_v61, %v20457_v33  ;;  %v20460_v14 = vld [vmem:[#allocation173_spill] sm:$0xff]  ;;  %8958 = vst.msk [vmem:[%s17186_s10 + $0xa8] sm:$0xff] %vm375_vm1, %v8864_v62  ;;  %8957 = vst.msk [vmem:[%s17186_s10 + $0xa0] sm:$0xff] %vm375_vm1, %v8863_v42  ;;  %v8678_v41 = vadd.f32 %v8420_v36, %v7080_v50  ;;  %v11269_v17 = vpop.eup %11268 }
 0x7a3   : > { %v8119_v25 = vadd.f32 %v20456_v55, %v6521_v54  ;;  %v6524_v39 = vadd.f32 %v20460_v14, %v20459_v24  ;;  %v20461_v12 = vld [vmem:[#allocation334_spill] sm:$0xff]  ;;  %v20462_v40 = vld [vmem:[#allocation335_spill] sm:$0xff]  ;;  %v20463_v31 = vld [vmem:[#allocation341_spill] sm:$0xff]  ;;  %11282 = vrcp.f32 %v8120_v51  ;;  %v8865_v7 = vmul.f32 %v11269_v17, %v8677_v2  ;;  %v17453_v42 = vpop.eup %11270 }
 0x7a4   : > { %v7082_v45 = vadd.f32 %v20461_v12, %v5296_v10  ;;  %v7081_v54 = vadd.f32 %v20462_v40, %v5295_v57  ;;  %v20464_v59 = vld [vmem:[#allocation111_spill] sm:$0xff]  ;;  %v20465_v55 = vld [vmem:[#allocation536_spill] sm:$0xff]  ;;  %v20466_v33 = vld [vmem:[#allocation537_spill] sm:$0xff]  ;;  %v8866_v62 = vmul.f32 %v11267_v29, %v8678_v41  ;;  %v8424_v12 = vpop.permute.xlu1 %8423  ;;  %v8422_v40 = vpop.permute.xlu0 %8421 }
 0x7a5   : > { %v6523_v47 = vadd.f32 %v20464_v59, %v20463_v31  ;;  %8535 = vrot.lane.b32.xlu1 %v20465_v55, %s11462_s9  ;;  %8533 = vrot.lane.b32.xlu0 %v20466_v33, %s11462_s9  ;;  %v20467_v50 = vld [vmem:[#allocation568_spill] sm:$0xff]  ;;  %v20468_v10 = vld [vmem:[#allocation29_spill] sm:$0xff]  ;;  %v20469_v36 = vld [vmem:[#allocation30_spill] sm:$0xff]  ;;  %11284 = vrcp.f32 %v8119_v25  ;;  %v11273_v31 = vpop.eup %11272  ;;  %v5137_v55 = vmul.f32 1.442695, %v4969_v32  ;;  %8959 = vst.msk [vmem:[%s17186_s10 + $0xb0] sm:$0xff] %vm375_vm1, %v8865_v7 }
 0x7a6   : > { %v8122_v8 = vadd.f32 %v20467_v50, %v6524_v39  ;;  %v5297_v57 = vmul.f32 %v20436_v3, %v20468_v10  ;;  %v5300_v9 = vmul.f32 %v20447_v30, %v20469_v36  ;;  %v20470_v61 = vld [vmem:[#allocation569_spill] sm:$0xff]  ;;  %v20471_v51 = vld [vmem:[#allocation342_spill] sm:$0xff]  ;;  %v20472_v33 = vld [vmem:[#allocation231_spill] sm:$0xff]  ;;  %8960 = vst.msk [vmem:[%s17186_s10 + $0xb8] sm:$0xff] %vm375_vm1, %v8866_v62  ;;  %v8680_v29 = vadd.f32 %v8424_v12, %v7082_v45  ;;  %v11275_v3 = vpop.eup %11274 }
 0x7a7   : > { %v8121_v24 = vadd.f32 %v20470_v61, %v6523_v47  ;;  %v6526_v39 = vadd.f32 %v20472_v33, %v20471_v51  ;;  %v8679_v41 = vadd.f32 %v8422_v40, %v7081_v54  ;;  %11286 = vpow2.f32 %v5139_v60  ;;  %v20473_v2 = vld [vmem:[#allocation203_spill] sm:$0xff]  ;;  %v20474_v25 = vld [vmem:[#allocation204_spill] sm:$0xff]  ;;  %v20476_v32 = vld [vmem:[#allocation538_spill] sm:$0xff] }
 0x7a8   : > { %v7084_v30 = vadd.f32 %v20473_v2, %v5298_v22  ;;  %v7083_v17 = vadd.f32 %v20474_v25, %v5297_v57  ;;  %v20475_v47 = vld [vmem:[#allocation343_spill] sm:$0xff]  ;;  %11288 = vrcp.f32 %v8122_v8  ;;  %v20478_v45 = vld [vmem:[#allocation570_spill] sm:$0xff]  ;;  %v8868_v62 = vmul.f32 %v11273_v31, %v8680_v29  ;;  %v17475_v7 = vpop.eup %11276  ;;  %v20481_v36 = vld [vmem:[#allocation32_spill] sm:$0xff]  ;;  %v8428_v51 = vpop.permute.xlu1 %8427 }
 0x7a9   : > { %v6525_v50 = vadd.f32 %v16996_v35, %v20475_v47  ;;  %8539 = vrot.lane.b32.xlu1 %v20476_v32, %s11462_s9  ;;  %v20477_v10 = vld [vmem:[#allocation539_spill] sm:$0xff]  ;;  %v8124_v54 = vadd.f32 %v20478_v45, %v6526_v39  ;;  %v8867_v60 = vmul.f32 %v11275_v3, %v8679_v41  ;;  %20479 = vst [vmem:[#allocation493_spill] sm:$0xff] %v17475_v7  ;;  %11290 = vrcp.f32 %v8121_v24  ;;  %v8426_v2 = vpop.permute.xlu0 %8425  ;;  %v11279_v25 = vpop.eup %11278  ;;  %v20483_v47 = vld [vmem:[#allocation262_spill] sm:$0xff]  ;;  %v20484_v8 = vld [vmem:[#allocation149_spill] sm:$0xff] }
 0x7aa   : > { %8537 = vrot.lane.b32.xlu0 %v20477_v10, %s11462_s9  ;;  %v20480_v22 = vld [vmem:[#allocation31_spill] sm:$0xff]  ;;  %v5302_v61 = vmul.f32 %v20460_v14, %v20481_v36  ;;  %v4972_v32 = vsub.f32 %v20484_v8, %v20483_v47  ;;  %v20485_v39 = vld [vmem:[#allocation344_spill] sm:$0xff]  ;;  %v20486_v31 = vld [vmem:[#allocation113_spill] sm:$0xff]  ;;  %8962 = vst.msk [vmem:[%s17186_s10 + $0xc8] sm:$0xff] %vm375_vm1, %v8868_v62  ;;  %v8681_v41 = vadd.f32 %v8426_v2, %v7083_v17  ;;  %11292 = vpow2.f32 %v5137_v55 }
 0x7ab   : > { %v5299_v57 = vmul.f32 %v16972_v6, %v20480_v22  ;;  %v20482_v12 = vld [vmem:[#allocation571_spill] sm:$0xff]  ;;  %v6528_v29 = vadd.f32 %v20486_v31, %v20485_v39  ;;  %8961 = vst.msk [vmem:[%s17186_s10 + $0xc0] sm:$0xff] %vm375_vm1, %v8867_v60  ;;  %v8682_v6 = vadd.f32 %v8428_v51, %v7084_v30  ;;  %v11281_v3 = vpop.eup %11280  ;;  %v20489_v45 = vld [vmem:[#allocation345_spill] sm:$0xff]  ;;  %11294 = vrcp.f32 %v8124_v54  ;;  %v20493_v30 = vld [vmem:[#allocation572_spill] sm:$0xff] }
 0x7ac   : > { %v8123_v40 = vadd.f32 %v20482_v12, %v6525_v50  ;;  %v20487_v14 = vld [vmem:[#allocation207_spill] sm:$0xff]  ;;  %v20488_v50 = vld [vmem:[#allocation208_spill] sm:$0xff]  ;;  %v20490_v22 = vld [vmem:[#allocation489_spill] sm:$0xff]  ;;  %v8869_v55 = vmul.f32 %v11281_v3, %v8681_v41  ;;  %v8432_v39 = vpop.permute.xlu1 %8431 }
 0x7ad   : > { %v7086_v24 = vadd.f32 %v20487_v14, %v5300_v9  ;;  %v7085_v10 = vadd.f32 %v20488_v50, %v5299_v57  ;;  %v6527_v36 = vadd.f32 %v20490_v22, %v20489_v45  ;;  %v20491_v12 = vld [vmem:[#allocation540_spill] sm:$0xff]  ;;  %v20492_v47 = vld [vmem:[#allocation541_spill] sm:$0xff]  ;;  %v8126_v17 = vadd.f32 %v20493_v30, %v6528_v29  ;;  %v20495_v57 = vld [vmem:[#allocation34_spill] sm:$0xff]  ;;  %v8430_v14 = vpop.permute.xlu0 %8429  ;;  %v11283_v50 = vpop.eup %11282 }
 0x7ae   : > { %8543 = vrot.lane.b32.xlu1 %v20491_v12, %s11462_s9  ;;  %8541 = vrot.lane.b32.xlu0 %v20492_v47, %s11462_s9  ;;  %v8870_v62 = vmul.f32 %v11279_v25, %v8682_v6  ;;  %v20494_v60 = vld [vmem:[#allocation33_spill] sm:$0xff]  ;;  %v5304_v51 = vmul.f32 %v20472_v33, %v20495_v57  ;;  %11296 = vrcp.f32 %v8123_v40  ;;  %v20497_v45 = vld [vmem:[#allocation279_spill] sm:$0xff]  ;;  %v20500_v7 = vld [vmem:[#allocation490_spill] sm:$0xff]  ;;  %8963 = vst.msk [vmem:[%s17186_s10 + $0xd0] sm:$0xff] %vm375_vm1, %v8869_v55  ;;  %v5143_v33 = vmul.f32 1.442695, %v4972_v32 }
 0x7af   : > { %v5301_v9 = vmul.f32 %v20464_v59, %v20494_v60  ;;  %v20496_v2 = vld [vmem:[#allocation573_spill] sm:$0xff]  ;;  %v20498_v12 = vld [vmem:[#allocation151_spill] sm:$0xff]  ;;  %v8684_v59 = vadd.f32 %v8432_v39, %v7086_v24  ;;  %v8683_v25 = vadd.f32 %v8430_v14, %v7085_v10  ;;  %v11285_v6 = vpop.eup %11284  ;;  %v20502_v3 = vld [vmem:[#allocation212_spill] sm:$0xff]  ;;  %11298 = vrcp.f32 %v8126_v17 }
 0x7b0   : > { %v8125_v8 = vadd.f32 %v20496_v2, %v6527_v36  ;;  %v4971_v47 = vsub.f32 %v20498_v12, %v20497_v45  ;;  %v20499_v54 = vld [vmem:[#allocation347_spill] sm:$0xff]  ;;  %8964 = vst.msk [vmem:[%s17186_s10 + $0xd8] sm:$0xff] %vm375_vm1, %v8870_v62  ;;  %v20503_v30 = vld [vmem:[#allocation348_spill] sm:$0xff]  ;;  %v20504_v57 = vld [vmem:[#allocation542_spill] sm:$0xff] }
 0x7b1   : > { %v6530_v29 = vadd.f32 %v20500_v7, %v20499_v54  ;;  %v20501_v40 = vld [vmem:[#allocation211_spill] sm:$0xff]  ;;  %v7087_v36 = vadd.f32 %v20502_v3, %v5301_v9  ;;  %v6529_v60 = vadd.f32 %v17020_v34, %v20503_v30  ;;  %v20506_v24 = vld [vmem:[#allocation574_spill] sm:$0xff]  ;;  %v8872_v62 = vmul.f32 %v11283_v50, %v8684_v59  ;;  %v17521_v55 = vpop.eup %11286  ;;  %v20508_v39 = vld [vmem:[#allocation36_spill] sm:$0xff]  ;;  %v8436_v54 = vpop.permute.xlu1 %8435 }
 0x7b2   : > { %v7088_v41 = vadd.f32 %v20501_v40, %v5302_v61  ;;  %8547 = vrot.lane.b32.xlu1 %v20504_v57, %s11462_s9  ;;  %v20505_v2 = vld [vmem:[#allocation543_spill] sm:$0xff]  ;;  %v8871_v32 = vmul.f32 %v11285_v6, %v8683_v25  ;;  %v5306_v14 = vmul.f32 %v20486_v31, %v20508_v39  ;;  %11300 = vrcp.f32 %v8125_v8  ;;  %v8434_v40 = vpop.permute.xlu0 %8433  ;;  %v11289_v3 = vpop.eup %11288  ;;  %v20511_v25 = vld [vmem:[#allocation142_spill] sm:$0xff]  ;;  %v20514_v57 = vld [vmem:[#allocation236_spill] sm:$0xff] }
 0x7b3   : > { %8545 = vrot.lane.b32.xlu0 %v20505_v2, %s11462_s9  ;;  %v8128_v10 = vadd.f32 %v20506_v24, %v6530_v29  ;;  %v20507_v61 = vld [vmem:[#allocation35_spill] sm:$0xff]  ;;  %v5141_v30 = vmul.f32 1.442695, %v4971_v47  ;;  %8966 = vst.msk [vmem:[%s17186_s10 + $0xe8] sm:$0xff] %vm375_vm1, %v8872_v62  ;;  %v8685_v59 = vadd.f32 %v8434_v40, %v7087_v36  ;;  %11302 = vpow2.f32 %v5143_v33  ;;  %v20515_v47 = vld [vmem:[#allocation544_spill] sm:$0xff]  ;;  %v20516_v24 = vld [vmem:[#allocation545_spill] sm:$0xff] }
 0x7b4   : > { %v5303_v9 = vmul.f32 %v16996_v35, %v20507_v61  ;;  %v20509_v45 = vld [vmem:[#allocation575_spill] sm:$0xff]  ;;  %8965 = vst.msk [vmem:[%s17186_s10 + $0xe0] sm:$0xff] %vm375_vm1, %v8871_v32  ;;  %v8686_v50 = vadd.f32 %v8436_v54, %v7088_v41  ;;  %v11291_v35 = vpop.eup %11290  ;;  %v7090_v31 = vadd.f32 %v20511_v25, %v5304_v51  ;;  %v20518_v51 = vld [vmem:[#allocation280_spill] sm:$0xff]  ;;  %v20519_v61 = vld [vmem:[#allocation237_spill] sm:$0xff] }
 0x7b5   : > { %v8127_v12 = vadd.f32 %v20509_v45, %v6529_v60  ;;  %v20510_v17 = vld [vmem:[#allocation351_spill] sm:$0xff]  ;;  %v20513_v60 = vld [vmem:[#allocation352_spill] sm:$0xff]  ;;  %11304 = vrcp.f32 %v8128_v10  ;;  %v8873_v33 = vmul.f32 %v11291_v35, %v8685_v59  ;;  %v17543_v32 = vpop.eup %11292  ;;  %v20520_v39 = vld [vmem:[#allocation37_spill] sm:$0xff] }
 0x7b6   : > { %v6532_v29 = vadd.f32 %v17028_v18, %v20510_v17  ;;  %v20512_v8 = vld [vmem:[#allocation131_spill] sm:$0xff]  ;;  %v6531_v2 = vadd.f32 %v20514_v57, %v20513_v60  ;;  %8551 = vrot.lane.b32.xlu1 %v20515_v47, %s11462_s9  ;;  %v8874_v62 = vmul.f32 %v11289_v3, %v8686_v50  ;;  %v5305_v45 = vmul.f32 %v20490_v22, %v20520_v39  ;;  %v20521_v54 = vld [vmem:[#allocation464_spill] sm:$0xff]  ;;  %v8440_v17 = vpop.permute.xlu1 %8439  ;;  %v8438_v25 = vpop.permute.xlu0 %8437  ;;  %v20522_v60 = vld [vmem:[#allocation281_spill] sm:$0xff] }
 0x7b7   : > { %v7089_v6 = vadd.f32 %v20512_v8, %v5303_v9  ;;  %8549 = vrot.lane.b32.xlu0 %v20516_v24, %s11462_s9  ;;  %v20517_v41 = vld [vmem:[#allocation463_spill] sm:$0xff]  ;;  %v4974_v9 = vsub.f32 %v20519_v61, %v20518_v51  ;;  %11306 = vrcp.f32 %v8127_v12  ;;  %v11295_v8 = vpop.eup %11294  ;;  %v20523_v10 = vld [vmem:[#allocation238_spill] sm:$0xff]  ;;  %8967 = vst.msk [vmem:[%s17186_s10 + $0xf0] sm:$0xff] %vm375_vm1, %v8873_v33  ;;  %v8688_v59 = vadd.f32 %v8440_v17, %v7090_v31  ;;  %v20528_v51 = vld [vmem:[#allocation356_spill] sm:$0xff] }
 0x7b8   : > { %v8130_v36 = vadd.f32 %v20517_v41, %v6532_v29  ;;  %v8129_v40 = vadd.f32 %v20521_v54, %v6531_v2  ;;  %v4973_v47 = vsub.f32 %v20523_v10, %v20522_v60  ;;  %v20524_v29 = vld [vmem:[#allocation355_spill] sm:$0xff]  ;;  %8968 = vst.msk [vmem:[%s17186_s10 + $0xf8] sm:$0xff] %vm375_vm1, %v8874_v62  ;;  %v11297_v24 = vpop.eup %11296  ;;  %11308 = vpow2.f32 %v5141_v30  ;;  %v20526_v22 = vld [vmem:[#allocation218_spill] sm:$0xff]  ;;  %v20531_v31 = vld [vmem:[#allocation465_spill] sm:$0xff] }
 0x7b9   : > { %v20525_v3 = vld [vmem:[#allocation115_spill] sm:$0xff]  ;;  %v8687_v35 = vadd.f32 %v8438_v25, %v7089_v6  ;;  %v7092_v12 = vadd.f32 %v20526_v22, %v5306_v14  ;;  %v20527_v2 = vld [vmem:[#allocation346_spill] sm:$0xff]  ;;  %v6533_v61 = vadd.f32 %v17044_v26, %v20528_v51  ;;  %v8876_v62 = vmul.f32 %v11295_v8, %v8688_v59  ;;  %v11299_v22 = vpop.eup %11298 }
 0x7ba   : > { %v6534_v50 = vadd.f32 %v20525_v3, %v20524_v29  ;;  %v7091_v41 = vadd.f32 %v20527_v2, %v5305_v45  ;;  %v20529_v39 = vld [vmem:[#allocation546_spill] sm:$0xff]  ;;  %v20530_v54 = vld [vmem:[#allocation547_spill] sm:$0xff]  ;;  %11310 = vrcp.f32 %v8130_v36  ;;  %v8444_v10 = vpop.permute.xlu1 %8443  ;;  %v8442_v29 = vpop.permute.xlu0 %8441  ;;  %v5147_v2 = vmul.f32 1.442695, %v4974_v9  ;;  %v20539_v9 = vld [vmem:[#allocation548_spill] sm:$0xff] }
 0x7bb   : > { %8555 = vrot.lane.b32.xlu1 %v20529_v39, %s11462_s9  ;;  %8553 = vrot.lane.b32.xlu0 %v20530_v54, %s11462_s9  ;;  %v8875_v30 = vmul.f32 %v11297_v24, %v8687_v35  ;;  %v20532_v33 = vld [vmem:[#allocation38_spill] sm:$0xff]  ;;  %v20533_v45 = vld [vmem:[#allocation39_spill] sm:$0xff]  ;;  %11312 = vrcp.f32 %v8129_v40  ;;  %8970 = vst.msk [vmem:[%s17186_s10 + $0x108] sm:$0xff] %vm375_vm1, %v8876_v62  ;;  %v8690_v8 = vadd.f32 %v8444_v10, %v7092_v12  ;;  %v5145_v59 = vmul.f32 1.442695, %v4973_v47  ;;  %v20536_v35 = vld [vmem:[#allocation349_spill] sm:$0xff] }
 0x7bc   : > { %v8132_v6 = vadd.f32 %v20531_v31, %v6534_v50  ;;  %v5308_v14 = vmul.f32 %v20500_v7, %v20532_v33  ;;  %v5307_v17 = vmul.f32 %v17020_v34, %v20533_v45  ;;  %v20534_v25 = vld [vmem:[#allocation466_spill] sm:$0xff]  ;;  %v20535_v51 = vld [vmem:[#allocation359_spill] sm:$0xff]  ;;  %v8689_v50 = vadd.f32 %v8442_v29, %v7091_v41  ;;  %v11301_v7 = vpop.eup %11300  ;;  %v20540_v54 = vld [vmem:[#allocation549_spill] sm:$0xff] }
 0x7bd   : > { %v8131_v60 = vadd.f32 %v20534_v25, %v6533_v61  ;;  %v6536_v36 = vadd.f32 %v17052_v44, %v20535_v51  ;;  %8969 = vst.msk [vmem:[%s17186_s10 + $0x100] sm:$0xff] %vm375_vm1, %v8875_v30  ;;  %v20537_v40 = vld [vmem:[#allocation350_spill] sm:$0xff]  ;;  %v20538_v61 = vld [vmem:[#allocation360_spill] sm:$0xff]  ;;  %v20541_v12 = vld [vmem:[#allocation467_spill] sm:$0xff]  ;;  %v8878_v31 = vmul.f32 %v11299_v22, %v8690_v8  ;;  %v17587_v62 = vpop.eup %11302 }
 0x7be   : > { %v7094_v34 = vadd.f32 %v20536_v35, %v5308_v14  ;;  %v7093_v24 = vadd.f32 %v20537_v40, %v5307_v17  ;;  %v6535_v39 = vadd.f32 %v17056_v53, %v20538_v61  ;;  %11314 = vrcp.f32 %v8132_v6  ;;  %v20542_v30 = vld [vmem:[#allocation40_spill] sm:$0xff]  ;;  %v20543_v14 = vld [vmem:[#allocation41_spill] sm:$0xff]  ;;  %v8448_v10 = vpop.permute.xlu1 %8447  ;;  %v8446_v29 = vpop.permute.xlu0 %8445  ;;  %v20545_v6 = vld [vmem:[#allocation363_spill] sm:$0xff] }
 0x7bf   : > { %8559 = vrot.lane.b32.xlu1 %v20539_v9, %s11462_s9  ;;  %8557 = vrot.lane.b32.xlu0 %v20540_v54, %s11462_s9  ;;  %v8134_v41 = vadd.f32 %v20541_v12, %v6536_v36  ;;  %v8877_v47 = vmul.f32 %v11301_v7, %v8689_v50  ;;  %v5310_v33 = vmul.f32 %v17028_v18, %v20542_v30  ;;  %11316 = vrcp.f32 %v8131_v60  ;;  %v20544_v17 = vld [vmem:[#allocation468_spill] sm:$0xff]  ;;  %v11305_v51 = vpop.eup %11304  ;;  %v20546_v50 = vld [vmem:[#allocation353_spill] sm:$0xff]  ;;  %v20547_v60 = vld [vmem:[#allocation354_spill] sm:$0xff] }
 0x7c0   : > { %v5309_v45 = vmul.f32 %v20514_v57, %v20543_v14  ;;  %v8133_v25 = vadd.f32 %v20544_v17, %v6535_v39  ;;  %11318 = vpow2.f32 %v5147_v2  ;;  %v6538_v36 = vadd.f32 %v17064_v38, %v20545_v6  ;;  %8972 = vst.msk [vmem:[%s17186_s10 + $0x118] sm:$0xff] %vm375_vm1, %v8878_v31  ;;  %v20548_v35 = vld [vmem:[#allocation364_spill] sm:$0xff]  ;;  %v20549_v2 = vld [vmem:[#allocation469_spill] sm:$0xff]  ;;  %v20552_v31 = vld [vmem:[#allocation470_spill] sm:$0xff] }
 0x7c1   : > { %8971 = vst.msk [vmem:[%s17186_s10 + $0x110] sm:$0xff] %vm375_vm1, %v8877_v47  ;;  %v8692_v22 = vadd.f32 %v8448_v10, %v7094_v34  ;;  %v8691_v8 = vadd.f32 %v8446_v29, %v7093_v24  ;;  %v11307_v18 = vpop.eup %11306  ;;  %11320 = vpow2.f32 %v5145_v59  ;;  %v7096_v57 = vadd.f32 %v20546_v50, %v5310_v33  ;;  %v20550_v34 = vld [vmem:[#allocation42_spill] sm:$0xff]  ;;  %v20551_v59 = vld [vmem:[#allocation43_spill] sm:$0xff] }
 0x7c2   : > { %v7095_v7 = vadd.f32 %v20547_v60, %v5309_v45  ;;  %v6537_v40 = vadd.f32 %v17066_v4, %v20548_v35  ;;  %11322 = vrcp.f32 %v8134_v41  ;;  %v8136_v61 = vadd.f32 %v20549_v2, %v6538_v36  ;;  %v17605_v54 = vpop.eup %11308  ;;  %v8452_v30 = vpop.permute.xlu1 %8451  ;;  %v20553_v45 = vld [vmem:[#allocation282_spill] sm:$0xff]  ;;  %v20554_v41 = vld [vmem:[#allocation159_spill] sm:$0xff]  ;;  %v20560_v60 = vld [vmem:[#allocation368_spill] sm:$0xff] }
 0x7c3   : > { %v8880_v39 = vmul.f32 %v11305_v51, %v8692_v22  ;;  %v8879_v9 = vmul.f32 %v11307_v18, %v8691_v8  ;;  %v5312_v24 = vmul.f32 %v20525_v3, %v20550_v34  ;;  %v5311_v12 = vmul.f32 %v17044_v26, %v20551_v59  ;;  %v8450_v33 = vpop.permute.xlu0 %8449  ;;  %v20555_v10 = vld [vmem:[#allocation367_spill] sm:$0xff]  ;;  %v20558_v22 = vld [vmem:[#allocation357_spill] sm:$0xff]  ;;  %v20559_v18 = vld [vmem:[#allocation358_spill] sm:$0xff] }
 0x7c4   : > { %11324 = vrcp.f32 %v8133_v25  ;;  %v8135_v47 = vadd.f32 %v20552_v31, %v6537_v40  ;;  %v11311_v14 = vpop.eup %11310  ;;  %v4976_v17 = vsub.f32 %v20554_v41, %v20553_v45  ;;  %v6540_v29 = vadd.f32 %v17072_v23, %v20555_v10  ;;  %v20556_v26 = vld [vmem:[#allocation283_spill] sm:$0xff]  ;;  %v20557_v25 = vld [vmem:[#allocation162_spill] sm:$0xff]  ;;  %v20563_v34 = vld [vmem:[#allocation45_spill] sm:$0xff] }
 0x7c5   : > { %8974 = vst.msk [vmem:[%s17186_s10 + $0x128] sm:$0xff] %vm375_vm1, %v8880_v39  ;;  %8973 = vst.msk [vmem:[%s17186_s10 + $0x120] sm:$0xff] %vm375_vm1, %v8879_v9  ;;  %v8694_v3 = vadd.f32 %v8452_v30, %v7096_v57  ;;  %v8693_v51 = vadd.f32 %v8450_v33, %v7095_v7  ;;  %v11313_v6 = vpop.eup %11312  ;;  %v4975_v36 = vsub.f32 %v20557_v25, %v20556_v26  ;;  %11326 = vrcp.f32 %v8136_v61  ;;  %v20561_v40 = vld [vmem:[#allocation471_spill] sm:$0xff]  ;;  %v20562_v57 = vld [vmem:[#allocation44_spill] sm:$0xff] }
 0x7c6   : > { %v7098_v8 = vadd.f32 %v20558_v22, %v5312_v24  ;;  %v7097_v50 = vadd.f32 %v20559_v18, %v5311_v12  ;;  %v6539_v35 = vadd.f32 %v17078_v5, %v20560_v60  ;;  %v8138_v2 = vadd.f32 %v20561_v40, %v6540_v29  ;;  %v20564_v24 = vld [vmem:[#allocation472_spill] sm:$0xff]  ;;  %v8456_v30 = vpop.permute.xlu1 %8455  ;;  %v20565_v41 = vld [vmem:[#allocation371_spill] sm:$0xff]  ;;  %v20569_v25 = vld [vmem:[#allocation473_spill] sm:$0xff] }
 0x7c7   : > { %v8882_v39 = vmul.f32 %v11311_v14, %v8694_v3  ;;  %v8881_v9 = vmul.f32 %v11313_v6, %v8693_v51  ;;  %v5314_v7 = vmul.f32 %v17052_v44, %v20562_v57  ;;  %v5313_v59 = vmul.f32 %v17056_v53, %v20563_v34  ;;  %v8454_v12 = vpop.permute.xlu0 %8453  ;;  %v20566_v3 = vld [vmem:[#allocation361_spill] sm:$0xff]  ;;  %v20568_v6 = vld [vmem:[#allocation372_spill] sm:$0xff] }
 0x7c8   : > { %11328 = vrcp.f32 %v8135_v47  ;;  %v8137_v31 = vadd.f32 %v20564_v24, %v6539_v35  ;;  %v11315_v33 = vpop.eup %11314  ;;  %v5151_v45 = vmul.f32 1.442695, %v4976_v17  ;;  %v6542_v61 = vadd.f32 %v17088_v0, %v20565_v41  ;;  %v20567_v47 = vld [vmem:[#allocation362_spill] sm:$0xff]  ;;  %v20571_v35 = vld [vmem:[#allocation47_spill] sm:$0xff]  ;;  %v20576_v41 = vld [vmem:[#allocation376_spill] sm:$0xff] }
 0x7c9   : > { %8976 = vst.msk [vmem:[%s17186_s10 + $0x138] sm:$0xff] %vm375_vm1, %v8882_v39  ;;  %8975 = vst.msk [vmem:[%s17186_s10 + $0x130] sm:$0xff] %vm375_vm1, %v8881_v9  ;;  %v8696_v14 = vadd.f32 %v8456_v30, %v7098_v8  ;;  %v8695_v10 = vadd.f32 %v8454_v12, %v7097_v50  ;;  %v11317_v44 = vpop.eup %11316  ;;  %v5149_v29 = vmul.f32 1.442695, %v4975_v36  ;;  %v7100_v53 = vadd.f32 %v20566_v3, %v5314_v7  ;;  %v20570_v50 = vld [vmem:[#allocation46_spill] sm:$0xff]  ;;  %v20574_v12 = vld [vmem:[#allocation365_spill] sm:$0xff] }
 0x7ca   : > { %v7099_v51 = vadd.f32 %v20567_v47, %v5313_v59  ;;  %v6541_v26 = vadd.f32 %v17091_v21, %v20568_v6  ;;  %v17642_v17 = vpop.eup %11318  ;;  %11330 = vrcp.f32 %v8138_v2  ;;  %v8140_v22 = vadd.f32 %v20569_v25, %v6542_v61  ;;  %v20572_v39 = vld [vmem:[#allocation474_spill] sm:$0xff]  ;;  %v8460_v57 = vpop.permute.xlu1 %8459  ;;  %v20573_v2 = vld [vmem:[#allocation375_spill] sm:$0xff]  ;;  %v20578_v3 = vld [vmem:[#allocation48_spill] sm:$0xff] }
 0x7cb   : > { %v8884_v18 = vmul.f32 %v11315_v33, %v8696_v14  ;;  %v8883_v60 = vmul.f32 %v11317_v44, %v8695_v10  ;;  %v17645_v8 = vpop.eup %11320  ;;  %v5316_v36 = vmul.f32 %v17064_v38, %v20570_v50  ;;  %v5315_v40 = vmul.f32 %v17066_v4, %v20571_v35  ;;  %v8458_v7 = vpop.permute.xlu0 %8457  ;;  %v20577_v61 = vld [vmem:[#allocation475_spill] sm:$0xff]  ;;  %v20579_v47 = vld [vmem:[#allocation49_spill] sm:$0xff] }
 0x7cc   : > { %11332 = vrcp.f32 %v8137_v31  ;;  %v8139_v9 = vadd.f32 %v20572_v39, %v6541_v26  ;;  %v11323_v34 = vpop.eup %11322  ;;  %v6544_v59 = vadd.f32 %v17098_v52, %v20573_v2  ;;  %v8698_v24 = vadd.f32 %v8460_v57, %v7100_v53  ;;  %v20575_v31 = vld [vmem:[#allocation366_spill] sm:$0xff]  ;;  %v20582_v50 = vld [vmem:[#allocation245_spill] sm:$0xff] }
 0x7cd   : > { %11334 = vpow2.f32 %v5151_v45  ;;  %8978 = vst.msk [vmem:[%s17186_s10 + $0x148] sm:$0xff] %vm375_vm1, %v8884_v18  ;;  %8977 = vst.msk [vmem:[%s17186_s10 + $0x140] sm:$0xff] %vm375_vm1, %v8883_v60  ;;  %v8697_v30 = vadd.f32 %v8458_v7, %v7099_v51  ;;  %v7102_v4 = vadd.f32 %v20574_v12, %v5316_v36  ;;  %v7101_v33 = vadd.f32 %v20575_v31, %v5315_v40  ;;  %v20580_v51 = vld [vmem:[#allocation476_spill] sm:$0xff]  ;;  %v20586_v7 = vld [vmem:[#allocation369_spill] sm:$0xff] }
 0x7ce   : > { %v11325_v38 = vpop.eup %11324  ;;  %11336 = vpow2.f32 %v5149_v29  ;;  %v6543_v45 = vadd.f32 %v17104_v16, %v20576_v41  ;;  %v8142_v14 = vadd.f32 %v20577_v61, %v6544_v59  ;;  %v8886_v10 = vmul.f32 %v11323_v34, %v8698_v24  ;;  %v8464_v26 = vpop.permute.xlu1 %8463  ;;  %v20581_v60 = vld [vmem:[#allocation284_spill] sm:$0xff]  ;;  %v20587_v2 = vld [vmem:[#allocation370_spill] sm:$0xff] }
 0x7cf   : > { %11338 = vrcp.f32 %v8140_v22  ;;  %v8885_v44 = vmul.f32 %v11325_v38, %v8697_v30  ;;  %v5318_v53 = vmul.f32 %v17072_v23, %v20578_v3  ;;  %v5317_v29 = vmul.f32 %v17078_v5, %v20579_v47  ;;  %v8462_v25 = vpop.permute.xlu0 %8461  ;;  %v11327_v18 = vpop.eup %11326  ;;  %v20583_v22 = vld [vmem:[#allocation379_spill] sm:$0xff]  ;;  %v20584_v5 = vld [vmem:[#allocation285_spill] sm:$0xff]  ;;  %v20588_v24 = vld [vmem:[#allocation380_spill] sm:$0xff] }
 0x7d0   : > { %11340 = vrcp.f32 %v8139_v9  ;;  %v8141_v6 = vadd.f32 %v20580_v51, %v6543_v45  ;;  %v4978_v36 = vsub.f32 %v20582_v50, %v20581_v60  ;;  %v6546_v35 = vadd.f32 %v17114_v11, %v20583_v22  ;;  %8980 = vst.msk [vmem:[%s17186_s10 + $0x158] sm:$0xff] %vm375_vm1, %v8886_v10  ;;  %v20585_v9 = vld [vmem:[#allocation246_spill] sm:$0xff]  ;;  %v20589_v38 = vld [vmem:[#allocation477_spill] sm:$0xff]  ;;  %v20591_v45 = vld [vmem:[#allocation51_spill] sm:$0xff] }
 0x7d1   : > { %8979 = vst.msk [vmem:[%s17186_s10 + $0x150] sm:$0xff] %vm375_vm1, %v8885_v44  ;;  %v8700_v23 = vadd.f32 %v8464_v26, %v7102_v4  ;;  %v8699_v40 = vadd.f32 %v8462_v25, %v7101_v33  ;;  %v4977_v57 = vsub.f32 %v20585_v9, %v20584_v5  ;;  %v7104_v34 = vadd.f32 %v20586_v7, %v5318_v53  ;;  %v20590_v4 = vld [vmem:[#allocation50_spill] sm:$0xff]  ;;  %v20593_v51 = vld [vmem:[#allocation383_spill] sm:$0xff]  ;;  %v20594_v60 = vld [vmem:[#allocation373_spill] sm:$0xff] }
 0x7d2   : > { %v11329_v39 = vpop.eup %11328  ;;  %v7103_v59 = vadd.f32 %v20587_v2, %v5317_v29  ;;  %v6545_v30 = vadd.f32 %v17117_v15, %v20588_v24  ;;  %11342 = vrcp.f32 %v8142_v14  ;;  %v8144_v12 = vadd.f32 %v20589_v38, %v6546_v35  ;;  %v20592_v10 = vld [vmem:[#allocation478_spill] sm:$0xff]  ;;  %v8468_v3 = vpop.permute.xlu1 %8467  ;;  %v20596_v22 = vld [vmem:[#allocation384_spill] sm:$0xff] }
 0x7d3   : > { %v8888_v31 = vmul.f32 %v11327_v18, %v8700_v23  ;;  %v8887_v41 = vmul.f32 %v11329_v39, %v8699_v40  ;;  %v5320_v33 = vmul.f32 %v17088_v0, %v20590_v4  ;;  %v5319_v61 = vmul.f32 %v17091_v21, %v20591_v45  ;;  %v8466_v53 = vpop.permute.xlu0 %8465  ;;  %v20597_v23 = vld [vmem:[#allocation479_spill] sm:$0xff]  ;;  %v20598_v7 = vld [vmem:[#allocation52_spill] sm:$0xff]  ;;  %v20602_v45 = vld [vmem:[#allocation377_spill] sm:$0xff] }
 0x7d4   : > { %11344 = vrcp.f32 %v8141_v6  ;;  %v8143_v44 = vadd.f32 %v20592_v10, %v6545_v30  ;;  %v11331_v47 = vpop.eup %11330  ;;  %v5155_v29 = vmul.f32 1.442695, %v4978_v36  ;;  %v6548_v14 = vadd.f32 %v17124_v27, %v20593_v51  ;;  %v20595_v6 = vld [vmem:[#allocation374_spill] sm:$0xff] }
 0x7d5   : > { %8982 = vst.msk [vmem:[%s17186_s10 + $0x168] sm:$0xff] %vm375_vm1, %v8888_v31  ;;  %8981 = vst.msk [vmem:[%s17186_s10 + $0x160] sm:$0xff] %vm375_vm1, %v8887_v41  ;;  %v8702_v26 = vadd.f32 %v8468_v3, %v7104_v34  ;;  %v8701_v25 = vadd.f32 %v8466_v53, %v7103_v59  ;;  %v5153_v18 = vmul.f32 1.442695, %v4977_v57  ;;  %v7106_v21 = vadd.f32 %v20594_v60, %v5320_v33  ;;  %v20599_v34 = vld [vmem:[#allocation53_spill] sm:$0xff]  ;;  %v20600_v59 = vld [vmem:[#allocation480_spill] sm:$0xff] }
 0x7d6   : > { %v11333_v0 = vpop.eup %11332  ;;  %v7105_v50 = vadd.f32 %v20595_v6, %v5319_v61  ;;  %v6547_v35 = vadd.f32 %v17128_v56, %v20596_v22  ;;  %11346 = vrcp.f32 %v8144_v12  ;;  %v8146_v40 = vadd.f32 %v20597_v23, %v6548_v14  ;;  %v8472_v30 = vpop.permute.xlu1 %8471  ;;  %v20601_v12 = vld [vmem:[#allocation387_spill] sm:$0xff]  ;;  %v20603_v61 = vld [vmem:[#allocation378_spill] sm:$0xff]  ;;  %v20605_v3 = vld [vmem:[#allocation244_spill] sm:$0xff] }
 0x7d7   : > { %v17698_v36 = vpop.eup %11334  ;;  %v8890_v39 = vmul.f32 %v11331_v47, %v8702_v26  ;;  %v8889_v5 = vmul.f32 %v11333_v0, %v8701_v25  ;;  %v5322_v57 = vmul.f32 %v17098_v52, %v20598_v7  ;;  %v5321_v2 = vmul.f32 %v17104_v16, %v20599_v34  ;;  %v8470_v38 = vpop.permute.xlu0 %8469  ;;  %v20606_v47 = vld [vmem:[#allocation201_spill] sm:$0xff]  ;;  %v20607_v26 = vld [vmem:[#allocation54_spill] sm:$0xff]  ;;  %v20608_v0 = vld [vmem:[#allocation55_spill] sm:$0xff] }
 0x7d8   : > { %v17701_v9 = vpop.eup %11336  ;;  %11348 = vrcp.f32 %v8143_v44  ;;  %v8145_v24 = vadd.f32 %v20600_v59, %v6547_v35  ;;  %v6550_v41 = vadd.f32 %v17138_v46, %v20601_v12  ;;  %v8704_v4 = vadd.f32 %v8472_v30, %v7106_v21  ;;  %v20604_v44 = vld [vmem:[#allocation388_spill] sm:$0xff]  ;;  %v20610_v35 = vld [vmem:[#allocation286_spill] sm:$0xff]  ;;  %v20611_v23 = vld [vmem:[#allocation249_spill] sm:$0xff] }
 0x7d9   : > { %v11339_v31 = vpop.eup %11338  ;;  %11350 = vpow2.f32 %v5155_v29  ;;  %8984 = vst.msk [vmem:[%s17186_s10 + $0x178] sm:$0xff] %vm375_vm1, %v8890_v39  ;;  %8983 = vst.msk [vmem:[%s17186_s10 + $0x170] sm:$0xff] %vm375_vm1, %v8889_v5  ;;  %v8703_v33 = vadd.f32 %v8470_v38, %v7105_v50  ;;  %v7108_v16 = vadd.f32 %v20602_v45, %v5322_v57  ;;  %v7107_v10 = vadd.f32 %v20603_v61, %v5321_v2  ;;  %v20609_v60 = vld [vmem:[#allocation96_spill] sm:$0xff]  ;;  %v20614_v34 = vld [vmem:[#allocation250_spill] sm:$0xff] }
 0x7da   : > { %v11341_v52 = vpop.eup %11340  ;;  %11352 = vpow2.f32 %v5153_v18  ;;  %v6549_v53 = vadd.f32 %v20605_v3, %v20604_v44  ;;  %v8148_v29 = vadd.f32 %v20606_v47, %v6550_v41  ;;  %v8892_v51 = vmul.f32 %v11339_v31, %v8704_v4  ;;  %v8476_v6 = vpop.permute.xlu1 %8475  ;;  %v20615_v59 = vld [vmem:[#allocation381_spill] sm:$0xff]  ;;  %v20616_v30 = vld [vmem:[#allocation382_spill] sm:$0xff]  ;;  %v20617_v31 = vld [vmem:[#allocation392_spill] sm:$0xff] }
 0x7db   : > { %11354 = vrcp.f32 %v8146_v40  ;;  %v8891_v14 = vmul.f32 %v11341_v52, %v8703_v33  ;;  %v5324_v25 = vmul.f32 %v17114_v11, %v20607_v26  ;;  %v5323_v18 = vmul.f32 %v17117_v15, %v20608_v0  ;;  %v8474_v50 = vpop.permute.xlu0 %8473  ;;  %v20612_v40 = vld [vmem:[#allocation391_spill] sm:$0xff]  ;;  %v20618_v12 = vld [vmem:[#allocation120_spill] sm:$0xff]  ;;  %v20619_v4 = vld [vmem:[#allocation202_spill] sm:$0xff] }
 0x7dc   : > { %11356 = vrcp.f32 %v8145_v24  ;;  %v8147_v21 = vadd.f32 %v20609_v60, %v6549_v53  ;;  %v11343_v22 = vpop.eup %11342  ;;  %v4980_v39 = vsub.f32 %v20611_v23, %v20610_v35  ;;  %v6552_v5 = vadd.f32 %v17150_v48, %v20612_v40  ;;  %8986 = vst.msk [vmem:[%s17186_s10 + $0x188] sm:$0xff] %vm375_vm1, %v8892_v51  ;;  %v20613_v15 = vld [vmem:[#allocation287_spill] sm:$0xff]  ;;  %v20622_v53 = vld [vmem:[#allocation97_spill] sm:$0xff]  ;;  %v20627_v23 = vld [vmem:[#allocation396_spill] sm:$0xff] }
 0x7dd   : > { %8985 = vst.msk [vmem:[%s17186_s10 + $0x180] sm:$0xff] %vm375_vm1, %v8891_v14  ;;  %v8706_v11 = vadd.f32 %v8476_v6, %v7108_v16  ;;  %v8705_v7 = vadd.f32 %v8474_v50, %v7107_v10  ;;  %v4979_v2 = vsub.f32 %v20614_v34, %v20613_v15  ;;  %v7110_v24 = vadd.f32 %v20615_v59, %v5324_v25  ;;  %v20620_v16 = vld [vmem:[#allocation56_spill] sm:$0xff]  ;;  %v20621_v10 = vld [vmem:[#allocation57_spill] sm:$0xff]  ;;  %v20623_v0 = vld [vmem:[#allocation395_spill] sm:$0xff] }
 0x7de   : > { %v11345_v57 = vpop.eup %11344  ;;  %v7109_v38 = vadd.f32 %v20616_v30, %v5323_v18  ;;  %v6551_v41 = vadd.f32 %v20618_v12, %v20617_v31  ;;  %11358 = vrcp.f32 %v8148_v29  ;;  %v8150_v33 = vadd.f32 %v20619_v4, %v6552_v5  ;;  %v8480_v51 = vpop.permute.xlu1 %8479  ;;  %v20624_v18 = vld [vmem:[#allocation191_spill] sm:$0xff]  ;;  %v20628_v5 = vld [vmem:[#allocation481_spill] sm:$0xff]  ;;  %v20629_v34 = vld [vmem:[#allocation58_spill] sm:$0xff] }
 0x7df   : > { %v8894_v52 = vmul.f32 %v11343_v22, %v8706_v11  ;;  %v8893_v45 = vmul.f32 %v11345_v57, %v8705_v7  ;;  %v5326_v61 = vmul.f32 %v17124_v27, %v20620_v16  ;;  %v5325_v44 = vmul.f32 %v17128_v56, %v20621_v10  ;;  %v8478_v14 = vpop.permute.xlu0 %8477  ;;  %v20625_v22 = vld [vmem:[#allocation385_spill] sm:$0xff]  ;;  %v20630_v59 = vld [vmem:[#allocation59_spill] sm:$0xff]  ;;  %v20631_v30 = vld [vmem:[#allocation482_spill] sm:$0xff] }
 0x7e0   : > { %11360 = vrcp.f32 %v8147_v21  ;;  %v8149_v47 = vadd.f32 %v20622_v53, %v6551_v41  ;;  %v11347_v26 = vpop.eup %11346  ;;  %v5159_v25 = vmul.f32 1.442695, %v4980_v39  ;;  %v6554_v29 = vadd.f32 %v20624_v18, %v20623_v0  ;;  %v20626_v21 = vld [vmem:[#allocation386_spill] sm:$0xff]  ;;  %v20635_v53 = vld [vmem:[#allocation400_spill] sm:$0xff] }
 0x7e1   : > { %8988 = vst.msk [vmem:[%s17186_s10 + $0x198] sm:$0xff] %vm375_vm1, %v8894_v52  ;;  %8987 = vst.msk [vmem:[%s17186_s10 + $0x190] sm:$0xff] %vm375_vm1, %v8893_v45  ;;  %v8708_v60 = vadd.f32 %v8480_v51, %v7110_v24  ;;  %v8707_v6 = vadd.f32 %v8478_v14, %v7109_v38  ;;  %v5157_v50 = vmul.f32 1.442695, %v4979_v2  ;;  %v7112_v56 = vadd.f32 %v20625_v22, %v5326_v61  ;;  %v20633_v61 = vld [vmem:[#allocation389_spill] sm:$0xff]  ;;  %v20634_v10 = vld [vmem:[#allocation390_spill] sm:$0xff] }
 0x7e2   : > { %v11349_v27 = vpop.eup %11348  ;;  %v7111_v35 = vadd.f32 %v20626_v21, %v5325_v44  ;;  %v6553_v40 = vadd.f32 %v17173_v13, %v20627_v23  ;;  %11362 = vrcp.f32 %v8150_v33  ;;  %v8152_v11 = vadd.f32 %v20628_v5, %v6554_v29  ;;  %v8484_v31 = vpop.permute.xlu1 %8483  ;;  %v20632_v33 = vld [vmem:[#allocation399_spill] sm:$0xff]  ;;  %v20636_v51 = vld [vmem:[#allocation205_spill] sm:$0xff]  ;;  %v20637_v0 = vld [vmem:[#allocation60_spill] sm:$0xff] }
 0x7e3   : > { %v17754_v39 = vpop.eup %11350  ;;  %v8896_v7 = vmul.f32 %v11347_v26, %v8708_v60  ;;  %v8895_v57 = vmul.f32 %v11349_v27, %v8707_v6  ;;  %v5328_v2 = vmul.f32 %v17138_v46, %v20629_v34  ;;  %v5327_v24 = vmul.f32 %v20605_v3, %v20630_v59  ;;  %v8482_v41 = vpop.permute.xlu0 %8481  ;;  %v20638_v60 = vld [vmem:[#allocation61_spill] sm:$0xff]  ;;  %v20639_v27 = vld [vmem:[#allocation98_spill] sm:$0xff]  ;;  %v20641_v23 = vld [vmem:[#allocation172_spill] sm:$0xff] }
 0x7e4   : > { %v17757_v15 = vpop.eup %11352  ;;  %11364 = vrcp.f32 %v8149_v47  ;;  %v8151_v38 = vadd.f32 %v20631_v30, %v6553_v40  ;;  %v6556_v52 = vadd.f32 %v17196_v49, %v20632_v33  ;;  %v8710_v45 = vadd.f32 %v8484_v31, %v7112_v56  ;;  %v20642_v5 = vld [vmem:[#allocation403_spill] sm:$0xff]  ;;  %v20644_v34 = vld [vmem:[#allocation253_spill] sm:$0xff]  ;;  %v20646_v30 = vld [vmem:[#allocation394_spill] sm:$0xff] }
 0x7e5   : > { %v11355_v4 = vpop.eup %11354  ;;  %11366 = vpow2.f32 %v5159_v25  ;;  %8990 = vst.msk [vmem:[%s17186_s10 + $0x1a8] sm:$0xff] %vm375_vm1, %v8896_v7  ;;  %8989 = vst.msk [vmem:[%s17186_s10 + $0x1a0] sm:$0xff] %vm375_vm1, %v8895_v57  ;;  %v8709_v16 = vadd.f32 %v8482_v41, %v7111_v35  ;;  %v7114_v3 = vadd.f32 %v20633_v61, %v5328_v2  ;;  %v7113_v44 = vadd.f32 %v20634_v10, %v5327_v24  ;;  %v20640_v35 = vld [vmem:[#allocation292_spill] sm:$0xff]  ;;  %v20645_v59 = vld [vmem:[#allocation393_spill] sm:$0xff] }
 0x7e6   : > { %v11357_v46 = vpop.eup %11356  ;;  %11368 = vpow2.f32 %v5157_v50  ;;  %v6555_v47 = vadd.f32 %v17199_v43, %v20635_v53  ;;  %v8154_v14 = vadd.f32 %v20636_v51, %v6556_v52  ;;  %v8898_v26 = vmul.f32 %v11355_v4, %v8710_v45  ;;  %v8488_v22 = vpop.permute.xlu1 %8487  ;;  %v20647_v31 = vld [vmem:[#allocation404_spill] sm:$0xff]  ;;  %v20648_v4 = vld [vmem:[#allocation206_spill] sm:$0xff]  ;;  %v20650_v61 = vld [vmem:[#allocation63_spill] sm:$0xff] }
 0x7e7   : > { %11370 = vrcp.f32 %v8152_v11  ;;  %v8897_v25 = vmul.f32 %v11357_v46, %v8709_v16  ;;  %v5330_v29 = vmul.f32 %v17150_v48, %v20637_v0  ;;  %v5329_v6 = vmul.f32 %v20618_v12, %v20638_v60  ;;  %v8486_v56 = vpop.permute.xlu0 %8485  ;;  %v20643_v12 = vld [vmem:[#allocation293_spill] sm:$0xff]  ;;  %v20649_v16 = vld [vmem:[#allocation62_spill] sm:$0xff]  ;;  %v20651_v10 = vld [vmem:[#allocation99_spill] sm:$0xff] }
 0x7e8   : > { %11372 = vrcp.f32 %v8151_v38  ;;  %v8153_v50 = vadd.f32 %v20639_v27, %v6555_v47  ;;  %v11359_v21 = vpop.eup %11358  ;;  %v4982_v40 = vsub.f32 %v20641_v23, %v20640_v35  ;;  %v6558_v11 = vadd.f32 %v17222_v37, %v20642_v5  ;;  %8992 = vst.msk [vmem:[%s17186_s10 + $0x1b8] sm:$0xff] %vm375_vm1, %v8898_v26  ;;  %v20654_v27 = vld [vmem:[#allocation398_spill] sm:$0xff]  ;;  %v20656_v35 = vld [vmem:[#allocation209_spill] sm:$0xff] }
 0x7e9   : > { %8991 = vst.msk [vmem:[%s17186_s10 + $0x1b0] sm:$0xff] %vm375_vm1, %v8897_v25  ;;  %v8712_v48 = vadd.f32 %v8488_v22, %v7114_v3  ;;  %v8711_v7 = vadd.f32 %v8486_v56, %v7113_v44  ;;  %v4981_v2 = vsub.f32 %v20644_v34, %v20643_v12  ;;  %v7116_v24 = vadd.f32 %v20645_v59, %v5330_v29  ;;  %v20652_v25 = vld [vmem:[#allocation407_spill] sm:$0xff]  ;;  %v20655_v22 = vld [vmem:[#allocation408_spill] sm:$0xff] }
 0x7ea   : > { %v11361_v57 = vpop.eup %11360  ;;  %v7115_v38 = vadd.f32 %v20646_v30, %v5329_v6  ;;  %v6557_v41 = vadd.f32 %v17225_v28, %v20647_v31  ;;  %11374 = vrcp.f32 %v8154_v14  ;;  %v8156_v33 = vadd.f32 %v20648_v4, %v6558_v11  ;;  %v8492_v53 = vpop.permute.xlu1 %8491  ;;  %v20653_v6 = vld [vmem:[#allocation397_spill] sm:$0xff]  ;;  %v20659_v34 = vld [vmem:[#allocation100_spill] sm:$0xff] }
 0x7eb   : > { %v8900_v52 = vmul.f32 %v11359_v21, %v8712_v48  ;;  %v8899_v45 = vmul.f32 %v11361_v57, %v8711_v7  ;;  %v5332_v46 = vmul.f32 %v20624_v18, %v20649_v16  ;;  %v5331_v3 = vmul.f32 %v17173_v13, %v20650_v61  ;;  %v8490_v47 = vpop.permute.xlu0 %8489  ;;  %v20657_v48 = vld [vmem:[#allocation64_spill] sm:$0xff]  ;;  %v20658_v57 = vld [vmem:[#allocation65_spill] sm:$0xff]  ;;  %v20664_v61 = vld [vmem:[#allocation210_spill] sm:$0xff] }
 0x7ec   : > { %11376 = vrcp.f32 %v8153_v50  ;;  %v8155_v44 = vadd.f32 %v20651_v10, %v6557_v41  ;;  %v11363_v51 = vpop.eup %11362  ;;  %v5163_v26 = vmul.f32 1.442695, %v4982_v40  ;;  %v6560_v14 = vadd.f32 %v17249_v63, %v20652_v25  ;;  %v20663_v16 = vld [vmem:[#allocation412_spill] sm:$0xff]  ;;  %v20667_v25 = vld [vmem:[#allocation101_spill] sm:$0xff] }
 0x7ed   : > { %8994 = vst.msk [vmem:[%s17186_s10 + $0x1c8] sm:$0xff] %vm375_vm1, %v8900_v52  ;;  %8993 = vst.msk [vmem:[%s17186_s10 + $0x1c0] sm:$0xff] %vm375_vm1, %v8899_v45  ;;  %v8714_v0 = vadd.f32 %v8492_v53, %v7116_v24  ;;  %v8713_v29 = vadd.f32 %v8490_v47, %v7115_v38  ;;  %v5161_v60 = vmul.f32 1.442695, %v4981_v2  ;;  %v7118_v13 = vadd.f32 %v20653_v6, %v5332_v46  ;;  %v20660_v38 = vld [vmem:[#allocation411_spill] sm:$0xff]  ;;  %v20662_v52 = vld [vmem:[#allocation402_spill] sm:$0xff] }
 0x7ee   : > { %v11365_v18 = vpop.eup %11364  ;;  %v7117_v50 = vadd.f32 %v20654_v27, %v5331_v3  ;;  %v6559_v56 = vadd.f32 %v17271_v58, %v20655_v22  ;;  %11378 = vrcp.f32 %v8156_v33  ;;  %v8158_v23 = vadd.f32 %v20656_v35, %v6560_v14  ;;  %v8496_v59 = vpop.permute.xlu1 %8495  ;;  %v20661_v33 = vld [vmem:[#allocation401_spill] sm:$0xff]  ;;  %v20665_v53 = vld [vmem:[#allocation66_spill] sm:$0xff]  ;;  %v20670_v27 = vld [vmem:[#allocation415_spill] sm:$0xff] }
 0x7ef   : > { %v17810_v21 = vpop.eup %11366  ;;  %v8902_v40 = vmul.f32 %v11363_v51, %v8714_v0  ;;  %v8901_v5 = vmul.f32 %v11365_v18, %v8713_v29  ;;  %v5334_v7 = vmul.f32 %v17196_v49, %v20657_v48  ;;  %v5333_v12 = vmul.f32 %v17199_v43, %v20658_v57  ;;  %v8494_v24 = vpop.permute.xlu0 %8493  ;;  %v20666_v51 = vld [vmem:[#allocation67_spill] sm:$0xff]  ;;  %v20669_v6 = vld [vmem:[#allocation174_spill] sm:$0xff]  ;;  %v20672_v35 = vld [vmem:[#allocation177_spill] sm:$0xff] }
 0x7f0   : > { %v17813_v11 = vpop.eup %11368  ;;  %11380 = vrcp.f32 %v8155_v44  ;;  %v8157_v2 = vadd.f32 %v20659_v34, %v6559_v56  ;;  %v6562_v31 = vadd.f32 %v17317_v19, %v20660_v38  ;;  %v8716_v41 = vadd.f32 %v8496_v59, %v7118_v13  ;;  %v20674_v48 = vld [vmem:[#allocation406_spill] sm:$0xff]  ;;  %v20675_v57 = vld [vmem:[#allocation416_spill] sm:$0xff] }
 0x7f1   : > { %v11371_v30 = vpop.eup %11370  ;;  %11382 = vpow2.f32 %v5163_v26  ;;  %8996 = vst.msk [vmem:[%s17186_s10 + $0x1d8] sm:$0xff] %vm375_vm1, %v8902_v40  ;;  %8995 = vst.msk [vmem:[%s17186_s10 + $0x1d0] sm:$0xff] %vm375_vm1, %v8901_v5  ;;  %v8715_v4 = vadd.f32 %v8494_v24, %v7117_v50  ;;  %v7120_v43 = vadd.f32 %v20661_v33, %v5334_v7  ;;  %v7119_v45 = vadd.f32 %v20662_v52, %v5333_v12  ;;  %v20673_v40 = vld [vmem:[#allocation405_spill] sm:$0xff]  ;;  %v20678_v38 = vld [vmem:[#allocation68_spill] sm:$0xff] }
 0x7f2   : > { %v11373_v49 = vpop.eup %11372  ;;  %11384 = vpow2.f32 %v5161_v60  ;;  %v6561_v46 = vadd.f32 %v17339_v20, %v20663_v16  ;;  %v8160_v3 = vadd.f32 %v20664_v61, %v6562_v31  ;;  %v8904_v10 = vmul.f32 %v11371_v30, %v8716_v41  ;;  %v8500_v0 = vpop.permute.xlu1 %8499  ;;  %v20668_v60 = vld [vmem:[#allocation297_spill] sm:$0xff] }
 0x7f3   : > { %11386 = vrcp.f32 %v8158_v23  ;;  %v8903_v44 = vmul.f32 %v11373_v49, %v8715_v4  ;;  %v5336_v47 = vmul.f32 %v17222_v37, %v20665_v53  ;;  %v5335_v26 = vmul.f32 %v17225_v28, %v20666_v51  ;;  %v8498_v29 = vpop.permute.xlu0 %8497  ;;  %v20671_v28 = vld [vmem:[#allocation298_spill] sm:$0xff]  ;;  %v20676_v12 = vld [vmem:[#allocation121_spill] sm:$0xff]  ;;  %v20680_v49 = vld [vmem:[#allocation484_spill] sm:$0xff] }
 0x7f4   : > { %11388 = vrcp.f32 %v8157_v2  ;;  %v8159_v14 = vadd.f32 %v20667_v25, %v6561_v46  ;;  %v11375_v18 = vpop.eup %11374  ;;  %v4984_v13 = vsub.f32 %v20669_v6, %v20668_v60  ;;  %v6564_v50 = vadd.f32 %v17385_v1, %v20670_v27  ;;  %8998 = vst.msk [vmem:[%s17186_s10 + $0x1e8] sm:$0xff] %vm375_vm1, %v8904_v10  ;;  %v20677_v2 = vld [vmem:[#allocation483_spill] sm:$0xff]  ;;  %v20679_v41 = vld [vmem:[#allocation69_spill] sm:$0xff]  ;;  %v20687_v27 = vld [vmem:[#allocation70_spill] sm:$0xff] }
 0x7f5   : > { %8997 = vst.msk [vmem:[%s17186_s10 + $0x1e0] sm:$0xff] %vm375_vm1, %v8903_v44  ;;  %v8718_v37 = vadd.f32 %v8500_v0, %v7120_v43  ;;  %v8717_v22 = vadd.f32 %v8498_v29, %v7119_v45  ;;  %v4983_v23 = vsub.f32 %v20672_v35, %v20671_v28  ;;  %v7122_v5 = vadd.f32 %v20673_v40, %v5336_v47  ;;  %v20681_v46 = vld [vmem:[#allocation419_spill] sm:$0xff]  ;;  %v20682_v53 = vld [vmem:[#allocation409_spill] sm:$0xff]  ;;  %v20683_v47 = vld [vmem:[#allocation410_spill] sm:$0xff] }
 0x7f6   : > { %v11377_v56 = vpop.eup %11376  ;;  %v7121_v7 = vadd.f32 %v20674_v48, %v5335_v26  ;;  %v6563_v34 = vadd.f32 %v20676_v12, %v20675_v57  ;;  %11390 = vrcp.f32 %v8160_v3  ;;  %v8162_v59 = vadd.f32 %v20677_v2, %v6564_v50  ;;  %v8504_v43 = vpop.permute.xlu1 %8503  ;;  %v20684_v26 = vld [vmem:[#allocation420_spill] sm:$0xff]  ;;  %v20685_v25 = vld [vmem:[#allocation493_spill] sm:$0xff]  ;;  %v20692_v2 = vld [vmem:[#allocation414_spill] sm:$0xff] }
 0x7f7   : > { %v8906_v24 = vmul.f32 %v11375_v18, %v8718_v37  ;;  %v8905_v30 = vmul.f32 %v11377_v56, %v8717_v22  ;;  %v5338_v31 = vmul.f32 %v17249_v63, %v20678_v38  ;;  %v5337_v4 = vmul.f32 %v17271_v58, %v20679_v41  ;;  %v8502_v52 = vpop.permute.xlu0 %8501  ;;  %v20686_v29 = vld [vmem:[#allocation216_spill] sm:$0xff]  ;;  %v20688_v37 = vld [vmem:[#allocation71_spill] sm:$0xff]  ;;  %v20694_v38 = vld [vmem:[#allocation486_spill] sm:$0xff] }
 0x7f8   : > { %11392 = vrcp.f32 %v8159_v14  ;;  %v8161_v33 = vadd.f32 %v20680_v49, %v6563_v34  ;;  %v11379_v45 = vpop.eup %11378  ;;  %v5167_v16 = vmul.f32 1.442695, %v4984_v13  ;;  %v6566_v61 = vadd.f32 %v17453_v42, %v20681_v46  ;;  %v20689_v56 = vld [vmem:[#allocation104_spill] sm:$0xff]  ;;  %v20691_v34 = vld [vmem:[#allocation413_spill] sm:$0xff] }
 0x7f9   : > { %9000 = vst.msk [vmem:[%s17186_s10 + $0x1f8] sm:$0xff] %vm375_vm1, %v8906_v24  ;;  %8999 = vst.msk [vmem:[%s17186_s10 + $0x1f0] sm:$0xff] %vm375_vm1, %v8905_v30  ;;  %v8720_v3 = vadd.f32 %v8504_v43, %v7122_v5  ;;  %v8719_v10 = vadd.f32 %v8502_v52, %v7121_v7  ;;  %v5165_v44 = vmul.f32 1.442695, %v4983_v23  ;;  %v7124_v58 = vadd.f32 %v20682_v53, %v5338_v31  ;;  %v20690_v5 = vld [vmem:[#allocation423_spill] sm:$0xff]  ;;  %v20693_v24 = vld [vmem:[#allocation424_spill] sm:$0xff] }
 0x7fa   : > { %v11381_v63 = vpop.eup %11380  ;;  %v7123_v51 = vadd.f32 %v20683_v47, %v5337_v4  ;;  %v6565_v14 = vadd.f32 %v20685_v25, %v20684_v26  ;;  %11394 = vrcp.f32 %v8162_v59  ;;  %v8164_v18 = vadd.f32 %v20686_v29, %v6566_v61  ;;  %v8508_v35 = vpop.permute.xlu1 %8507  ;;  %v20695_v49 = vld [vmem:[#allocation72_spill] sm:$0xff]  ;;  %v20696_v43 = vld [vmem:[#allocation73_spill] sm:$0xff]  ;;  %v20702_v26 = vld [vmem:[#allocation179_spill] sm:$0xff] }
 0x7fb   : > { %v17866_v0 = vpop.eup %11382  ;;  %v8908_v60 = vmul.f32 %v11379_v45, %v8720_v3  ;;  %v8907_v6 = vmul.f32 %v11381_v63, %v8719_v10  ;;  %v5340_v50 = vmul.f32 %v17317_v19, %v20687_v27  ;;  %v5339_v22 = vmul.f32 %v17339_v20, %v20688_v37  ;;  %v8506_v23 = vpop.permute.xlu0 %8505  ;;  %v20697_v45 = vld [vmem:[#allocation155_spill] sm:$0xff]  ;;  %v20699_v63 = vld [vmem:[#allocation178_spill] sm:$0xff]  ;;  %v20700_v53 = vld [vmem:[#allocation425_spill] sm:$0xff] }
 0x7fc   : > { %v17869_v13 = vpop.eup %11384  ;;  %11396 = vrcp.f32 %v8161_v33  ;;  %v8163_v28 = vadd.f32 %v20689_v56, %v6565_v14  ;;  %v6568_v48 = vadd.f32 %v17521_v55, %v20690_v5  ;;  %v8722_v7 = vadd.f32 %v8508_v35, %v7124_v58  ;;  %v20698_v10 = vld [vmem:[#allocation299_spill] sm:$0xff]  ;;  %v20703_v29 = vld [vmem:[#allocation417_spill] sm:$0xff]  ;;  %v20705_v27 = vld [vmem:[#allocation428_spill] sm:$0xff] }
 0x7fd   : > { %v11387_v40 = vpop.eup %11386  ;;  %11398 = vpow2.f32 %v5167_v16  ;;  %9002 = vst.msk [vmem:[%s17186_s10 + $0x208] sm:$0xff] %vm375_vm1, %v8908_v60  ;;  %9001 = vst.msk [vmem:[%s17186_s10 + $0x200] sm:$0xff] %vm375_vm1, %v8907_v6  ;;  %v8721_v57 = vadd.f32 %v8506_v23, %v7123_v51  ;;  %v7126_v20 = vadd.f32 %v20691_v34, %v5340_v50  ;;  %v7125_v59 = vadd.f32 %v20692_v2, %v5339_v22  ;;  %v20704_v60 = vld [vmem:[#allocation418_spill] sm:$0xff]  ;;  %v20706_v37 = vld [vmem:[#allocation108_spill] sm:$0xff] }
 0x7fe   : > { %v11389_v19 = vpop.eup %11388  ;;  %11400 = vpow2.f32 %v5165_v44  ;;  %v6567_v30 = vadd.f32 %v17543_v32, %v20693_v24  ;;  %v8166_v31 = vadd.f32 %v20694_v38, %v6568_v48  ;;  %v8910_v41 = vmul.f32 %v11387_v40, %v8722_v7  ;;  %v8512_v46 = vpop.permute.xlu1 %8511  ;;  %v20707_v35 = vld [vmem:[#allocation74_spill] sm:$0xff]  ;;  %v20708_v40 = vld [vmem:[#allocation75_spill] sm:$0xff] }
 0x7ff   : > { %11402 = vrcp.f32 %v8164_v18  ;;  %v8909_v4 = vmul.f32 %v11389_v19, %v8721_v57  ;;  %v5342_v33 = vmul.f32 %v17385_v1, %v20695_v49  ;;  %v5341_v52 = vmul.f32 %v20676_v12, %v20696_v43  ;;  %v8510_v61 = vpop.permute.xlu0 %8509  ;;  %v20701_v12 = vld [vmem:[#allocation300_spill] sm:$0xff]  ;;  %v20709_v48 = vld [vmem:[#allocation166_spill] sm:$0xff]  ;;  %v20710_v2 = vld [vmem:[#allocation427_spill] sm:$0xff] }
 0x800   : > { %11404 = vrcp.f32 %v8163_v28  ;;  %v8165_v16 = vadd.f32 %v20697_v45, %v6567_v30  ;;  %v11391_v3 = vpop.eup %11390  ;;  %v4986_v44 = vsub.f32 %v20699_v63, %v20698_v10  ;;  %v6570_v58 = vadd.f32 %v17587_v62, %v20700_v53  ;;  %9004 = vst.msk [vmem:[%s17186_s10 + $0x218] sm:$0xff] %vm375_vm1, %v8910_v41  ;;  %v20712_v41 = vld [vmem:[#allocation422_spill] sm:$0xff]  ;;  %v20716_v63 = vld [vmem:[#allocation76_spill] sm:$0xff] }
 0x801   : > { %9003 = vst.msk [vmem:[%s17186_s10 + $0x210] sm:$0xff] %vm375_vm1, %v8909_v4  ;;  %v8724_v1 = vadd.f32 %v8512_v46, %v7126_v20  ;;  %v8723_v47 = vadd.f32 %v8510_v61, %v7125_v59  ;;  %v4985_v14 = vsub.f32 %v20702_v26, %v20701_v12  ;;  %v7128_v18 = vadd.f32 %v20703_v29, %v5342_v33  ;;  %v20713_v49 = vld [vmem:[#allocation430_spill] sm:$0xff]  ;;  %v20718_v12 = vld [vmem:[#allocation429_spill] sm:$0xff] }
 0x802   : > { %v11393_v51 = vpop.eup %11392  ;;  %v7127_v6 = vadd.f32 %v20704_v60, %v5341_v52  ;;  %v6569_v50 = vadd.f32 %v17605_v54, %v20705_v27  ;;  %11406 = vrcp.f32 %v8166_v31  ;;  %v8168_v22 = vadd.f32 %v20706_v37, %v6570_v58  ;;  %v8516_v57 = vpop.permute.xlu1 %8515  ;;  %v20711_v31 = vld [vmem:[#allocation421_spill] sm:$0xff]  ;;  %v20714_v52 = vld [vmem:[#allocation171_spill] sm:$0xff]  ;;  %v20717_v53 = vld [vmem:[#allocation110_spill] sm:$0xff] }
 0x803   : > { %v8912_v56 = vmul.f32 %v11391_v3, %v8724_v1  ;;  %v8911_v28 = vmul.f32 %v11393_v51, %v8723_v47  ;;  %v5344_v23 = vmul.f32 %v17453_v42, %v20707_v35  ;;  %v5343_v5 = vmul.f32 %v20685_v25, %v20708_v40  ;;  %v8514_v19 = vpop.permute.xlu0 %8513  ;;  %v20715_v3 = vld [vmem:[#allocation77_spill] sm:$0xff]  ;;  %v20720_v60 = vld [vmem:[#allocation432_spill] sm:$0xff]  ;;  %v20721_v27 = vld [vmem:[#allocation443_spill] sm:$0xff] }
 0x804   : > { %11408 = vrcp.f32 %v8165_v16  ;;  %v8167_v7 = vadd.f32 %v20709_v48, %v6569_v50  ;;  %v11395_v34 = vpop.eup %11394  ;;  %v5171_v20 = vmul.f32 1.442695, %v4986_v44  ;;  %v6572_v59 = vadd.f32 %v17642_v17, %v20710_v2  ;;  %v20722_v37 = vld [vmem:[#allocation112_spill] sm:$0xff]  ;;  %v20723_v35 = vld [vmem:[#allocation78_spill] sm:$0xff]  ;;  %v20724_v40 = vld [vmem:[#allocation79_spill] sm:$0xff] }
 0x805   : > { %9006 = vst.msk [vmem:[%s17186_s10 + $0x228] sm:$0xff] %vm375_vm1, %v8912_v56  ;;  %9005 = vst.msk [vmem:[%s17186_s10 + $0x220] sm:$0xff] %vm375_vm1, %v8911_v28  ;;  %v8726_v24 = vadd.f32 %v8516_v57, %v7128_v18  ;;  %v8725_v30 = vadd.f32 %v8514_v19, %v7127_v6  ;;  %v5169_v38 = vmul.f32 1.442695, %v4985_v14  ;;  %v7130_v25 = vadd.f32 %v20711_v31, %v5344_v23  ;;  %v20719_v18 = vld [vmem:[#allocation426_spill] sm:$0xff]  ;;  %v20725_v48 = vld [vmem:[#allocation232_spill] sm:$0xff] }
 0x806   : > { %v11397_v42 = vpop.eup %11396  ;;  %v7129_v4 = vadd.f32 %v20712_v41, %v5343_v5  ;;  %v6571_v33 = vadd.f32 %v17645_v8, %v20713_v49  ;;  %11410 = vrcp.f32 %v8168_v22  ;;  %v8170_v45 = vadd.f32 %v20714_v52, %v6572_v59  ;;  %v8520_v1 = vpop.permute.xlu1 %8519  ;;  %v20727_v2 = vld [vmem:[#allocation180_spill] sm:$0xff]  ;;  %v20730_v31 = vld [vmem:[#allocation181_spill] sm:$0xff]  ;;  %v20731_v41 = vld [vmem:[#allocation434_spill] sm:$0xff] }
 0x807   : > { %v17922_v43 = vpop.eup %11398  ;;  %v8914_v16 = vmul.f32 %v11395_v34, %v8726_v24  ;;  %v8913_v46 = vmul.f32 %v11397_v42, %v8725_v30  ;;  %v5345_v10 = vmul.f32 %v17543_v32, %v20715_v3  ;;  %v5346_v44 = vmul.f32 %v17521_v55, %v20716_v63  ;;  %v8518_v47 = vpop.permute.xlu0 %8517  ;;  %v20728_v24 = vld [vmem:[#allocation431_spill] sm:$0xff]  ;;  %v20732_v49 = vld [vmem:[#allocation445_spill] sm:$0xff]  ;;  %v20733_v52 = vld [vmem:[#allocation446_spill] sm:$0xff] }
 0x808   : > { %v17925_v61 = vpop.eup %11400  ;;  %11412 = vrcp.f32 %v8167_v7  ;;  %v8169_v58 = vadd.f32 %v20717_v53, %v6571_v33  ;;  %v6574_v26 = vadd.f32 %v17698_v36, %v20718_v12  ;;  %v8728_v14 = vadd.f32 %v8520_v1, %v7130_v25  ;;  %v20735_v63 = vld [vmem:[#allocation80_spill] sm:$0xff]  ;;  %v20736_v53 = vld [vmem:[#allocation81_spill] sm:$0xff]  ;;  %v20737_v1 = vld [vmem:[#allocation114_spill] sm:$0xff] }
 0x809   : > { %v11403_v51 = vpop.eup %11402  ;;  %11414 = vpow2.f32 %v5171_v20  ;;  %9008 = vst.msk [vmem:[%s17186_s10 + $0x238] sm:$0xff] %vm375_vm1, %v8914_v16  ;;  %9007 = vst.msk [vmem:[%s17186_s10 + $0x230] sm:$0xff] %vm375_vm1, %v8913_v46  ;;  %v8727_v29 = vadd.f32 %v8518_v47, %v7129_v4  ;;  %v7131_v55 = vadd.f32 %v20719_v18, %v5345_v10  ;;  %v6573_v6 = vadd.f32 %v17701_v9, %v20720_v60  ;;  %v20726_v20 = vld [vmem:[#allocation303_spill] sm:$0xff] }
 0x80a   : > { %v11405_v32 = vpop.eup %11404  ;;  %11416 = vpow2.f32 %v5169_v38  ;;  %v7132_v50 = vadd.f32 %v20721_v27, %v5346_v44  ;;  %v8172_v22 = vadd.f32 %v20722_v37, %v6574_v26  ;;  %v8916_v56 = vmul.f32 %v11403_v51, %v8728_v14  ;;  %v8524_v57 = vpop.permute.xlu1 %8523  ;;  %v20734_v16 = vld [vmem:[#allocation235_spill] sm:$0xff]  ;;  %v20741_v37 = vld [vmem:[#allocation448_spill] sm:$0xff] }
 0x80b   : > { %11418 = vrcp.f32 %v8170_v45  ;;  %v8915_v28 = vmul.f32 %v11405_v32, %v8727_v29  ;;  %v5348_v23 = vmul.f32 %v17587_v62, %v20723_v35  ;;  %v5347_v5 = vmul.f32 %v17605_v54, %v20724_v40  ;;  %v8522_v19 = vpop.permute.xlu0 %8521  ;;  %v20729_v54 = vld [vmem:[#allocation304_spill] sm:$0xff]  ;;  %v20738_v29 = vld [vmem:[#allocation433_spill] sm:$0xff]  ;;  %v20740_v27 = vld [vmem:[#allocation447_spill] sm:$0xff] }
 0x80c   : > { %11420 = vrcp.f32 %v8169_v58  ;;  %v8171_v7 = vadd.f32 %v20725_v48, %v6573_v6  ;;  %v11407_v34 = vpop.eup %11406  ;;  %v4988_v59 = vsub.f32 %v20727_v2, %v20726_v20  ;;  %v6576_v30 = vadd.f32 %v17754_v39, %v20728_v24  ;;  %9010 = vst.msk [vmem:[%s17186_s10 + $0x248] sm:$0xff] %vm375_vm1, %v8916_v56  ;;  %v20739_v6 = vld [vmem:[#allocation436_spill] sm:$0xff]  ;;  %v20743_v48 = vld [vmem:[#allocation82_spill] sm:$0xff] }
 0x80d   : > { %9009 = vst.msk [vmem:[%s17186_s10 + $0x240] sm:$0xff] %vm375_vm1, %v8915_v28  ;;  %v8730_v62 = vadd.f32 %v8524_v57, %v7132_v50  ;;  %v8729_v42 = vadd.f32 %v8522_v19, %v7131_v55  ;;  %v4987_v25 = vsub.f32 %v20730_v31, %v20729_v54  ;;  %v6575_v4 = vadd.f32 %v17757_v15, %v20731_v41  ;;  %v20742_v28 = vld [vmem:[#allocation239_spill] sm:$0xff]  ;;  %v20747_v54 = vld [vmem:[#allocation438_spill] sm:$0xff]  ;;  %v20748_v31 = vld [vmem:[#allocation449_spill] sm:$0xff] }
 0x80e   : > { %v11409_v38 = vpop.eup %11408  ;;  %v7134_v33 = vadd.f32 %v20732_v49, %v5348_v23  ;;  %v7133_v45 = vadd.f32 %v20733_v52, %v5347_v5  ;;  %11422 = vrcp.f32 %v8172_v22  ;;  %v8174_v46 = vadd.f32 %v20734_v16, %v6576_v30  ;;  %v8528_v51 = vpop.permute.xlu1 %8527  ;;  %v20744_v57 = vld [vmem:[#allocation83_spill] sm:$0xff]  ;;  %v20749_v41 = vld [vmem:[#allocation450_spill] sm:$0xff]  ;;  %v20750_v49 = vld [vmem:[#allocation240_spill] sm:$0xff] }
 0x80f   : > { %v8918_v3 = vmul.f32 %v11407_v34, %v8730_v62  ;;  %v8917_v10 = vmul.f32 %v11409_v38, %v8729_v42  ;;  %v5350_v44 = vmul.f32 %v17642_v17, %v20735_v63  ;;  %v5349_v58 = vmul.f32 %v17645_v8, %v20736_v53  ;;  %v8526_v12 = vpop.permute.xlu0 %8525  ;;  %v20745_v34 = vld [vmem:[#allocation116_spill] sm:$0xff]  ;;  %v20746_v30 = vld [vmem:[#allocation435_spill] sm:$0xff]  ;;  %v20753_v63 = vld [vmem:[#allocation117_spill] sm:$0xff] }
 0x810   : > { %11424 = vrcp.f32 %v8171_v7  ;;  %v8173_v47 = vadd.f32 %v20737_v1, %v6575_v4  ;;  %v11411_v26 = vpop.eup %11410  ;;  %v5175_v14 = vmul.f32 1.442695, %v4988_v59  ;;  %v6578_v32 = vadd.f32 %v17810_v21, %v20738_v29  ;;  %v20751_v16 = vld [vmem:[#allocation84_spill] sm:$0xff]  ;;  %v20756_v29 = vld [vmem:[#allocation451_spill] sm:$0xff] }
 0x811   : > { %9012 = vst.msk [vmem:[%s17186_s10 + $0x258] sm:$0xff] %vm375_vm1, %v8918_v3  ;;  %9011 = vst.msk [vmem:[%s17186_s10 + $0x250] sm:$0xff] %vm375_vm1, %v8917_v10  ;;  %v8732_v18 = vadd.f32 %v8528_v51, %v7134_v33  ;;  %v8731_v55 = vadd.f32 %v8526_v12, %v7133_v45  ;;  %v5173_v60 = vmul.f32 1.442695, %v4987_v25  ;;  %v6577_v8 = vadd.f32 %v17813_v11, %v20739_v6  ;;  %v20752_v3 = vld [vmem:[#allocation85_spill] sm:$0xff] }
 0x812   : > { %v11413_v17 = vpop.eup %11412  ;;  %v7136_v50 = vadd.f32 %v20740_v27, %v5350_v44  ;;  %v7135_v22 = vadd.f32 %v20741_v37, %v5349_v58  ;;  %11426 = vrcp.f32 %v8174_v46  ;;  %v8176_v35 = vadd.f32 %v20742_v28, %v6578_v32  ;;  %v8532_v2 = vpop.permute.xlu1 %8531  ;;  %v20759_v27 = vld [vmem:[#allocation86_spill] sm:$0xff]  ;;  %v20760_v37 = vld [vmem:[#allocation87_spill] sm:$0xff]  ;;  %v20761_v28 = vld [vmem:[#allocation492_spill] sm:$0xff] }
 0x813   : > { %v17978_v56 = vpop.eup %11414  ;;  %v8920_v23 = vmul.f32 %v11411_v26, %v8732_v18  ;;  %v8919_v40 = vmul.f32 %v11413_v17, %v8731_v55  ;;  %v5352_v7 = vmul.f32 %v17698_v36, %v20743_v48  ;;  %v5351_v19 = vmul.f32 %v17701_v9, %v20744_v57  ;;  %v8530_v59 = vpop.permute.xlu0 %8529  ;;  %v20757_v18 = vld [vmem:[#allocation452_spill] sm:$0xff]  ;;  %v20758_v17 = vld [vmem:[#allocation491_spill] sm:$0xff] }
 0x814   : > { %v17981_v5 = vpop.eup %11416  ;;  %11428 = vrcp.f32 %v8173_v47  ;;  %v8175_v20 = vadd.f32 %v20745_v34, %v6577_v8  ;;  %v6580_v62 = vadd.f32 %v17866_v0, %v20746_v30  ;;  %v8734_v42 = vadd.f32 %v8532_v2, %v7136_v50  ;;  %v20754_v47 = vld [vmem:[#allocation437_spill] sm:$0xff] }
 0x815   : > { %v11419_v24 = vpop.eup %11418  ;;  %11430 = vpow2.f32 %v5175_v14  ;;  %9014 = vst.msk [vmem:[%s17186_s10 + $0x268] sm:$0xff] %vm375_vm1, %v8920_v23  ;;  %9013 = vst.msk [vmem:[%s17186_s10 + $0x260] sm:$0xff] %vm375_vm1, %v8919_v40  ;;  %v8733_v38 = vadd.f32 %v8530_v59, %v7135_v22  ;;  %v6579_v9 = vadd.f32 %v17869_v13, %v20747_v54  ;;  %v7138_v25 = vadd.f32 %v20748_v31, %v5352_v7  ;;  %v20762_v7 = vld [vmem:[#allocation439_spill] sm:$0xff]  ;;  %v20767_v31 = vld [vmem:[#allocation88_spill] sm:$0xff] }
 0x816   : > { %v11421_v36 = vpop.eup %11420  ;;  %11432 = vpow2.f32 %v5173_v60  ;;  %v7137_v4 = vadd.f32 %v20749_v41, %v5351_v19  ;;  %v8178_v33 = vadd.f32 %v20750_v49, %v6580_v62  ;;  %v8922_v52 = vmul.f32 %v11419_v24, %v8734_v42  ;;  %v20765_v24 = vld [vmem:[#allocation454_spill] sm:$0xff]  ;;  %v20766_v42 = vld [vmem:[#allocation243_spill] sm:$0xff]  ;;  %v20768_v41 = vld [vmem:[#allocation89_spill] sm:$0xff] }
 0x817   : > { %11434 = vrcp.f32 %v8176_v35  ;;  %v8921_v45 = vmul.f32 %v11421_v36, %v8733_v38  ;;  %v5354_v46 = vmul.f32 %v17754_v39, %v20751_v16  ;;  %v5353_v10 = vmul.f32 %v17757_v15, %v20752_v3  ;;  %v8536_v53 = vpop.permute.xlu1 %8535  ;;  %v8534_v58 = vpop.permute.xlu0 %8533  ;;  %v20755_v39 = vld [vmem:[#allocation440_spill] sm:$0xff]  ;;  %v20769_v49 = vld [vmem:[#allocation118_spill] sm:$0xff] }
 0x818   : > { %11436 = vrcp.f32 %v8175_v20  ;;  %v8177_v44 = vadd.f32 %v20753_v63, %v6579_v9  ;;  %v11423_v1 = vpop.eup %11422  ;;  %v6582_v51 = vadd.f32 %v17922_v43, %v20754_v47  ;;  %9016 = vst.msk [vmem:[%s17186_s10 + $0x278] sm:$0xff] %vm375_vm1, %v8922_v52  ;;  %v8736_v12 = vadd.f32 %v8536_v53, %v7138_v25 }
 0x819   : > { %9015 = vst.msk [vmem:[%s17186_s10 + $0x270] sm:$0xff] %vm375_vm1, %v8921_v45  ;;  %v8735_v26 = vadd.f32 %v8534_v58, %v7137_v4  ;;  %v6581_v15 = vadd.f32 %v17925_v61, %v20755_v39  ;;  %v7140_v32 = vadd.f32 %v20756_v29, %v5354_v46  ;;  %v7139_v55 = vadd.f32 %v20757_v18, %v5353_v10  ;;  %v20770_v46 = vld [vmem:[#allocation441_spill] sm:$0xff]  ;;  %v20775_v39 = vld [vmem:[#allocation90_spill] sm:$0xff] }
 0x81a   : > { %v11425_v14 = vpop.eup %11424  ;;  %11438 = vrcp.f32 %v8178_v33  ;;  %v8180_v60 = vadd.f32 %v20758_v17, %v6582_v51  ;;  %v8924_v6 = vmul.f32 %v11423_v1, %v8736_v12  ;;  %v5356_v50 = vmul.f32 %v17810_v21, %v20759_v27  ;;  %v20763_v21 = vld [vmem:[#allocation442_spill] sm:$0xff]  ;;  %v20773_v1 = vld [vmem:[#allocation456_spill] sm:$0xff]  ;;  %v20774_v51 = vld [vmem:[#allocation119_spill] sm:$0xff] }
 0x81b   : > { %v8923_v8 = vmul.f32 %v11425_v14, %v8735_v26  ;;  %v5355_v22 = vmul.f32 %v17813_v11, %v20760_v37  ;;  %11440 = vrcp.f32 %v8177_v44  ;;  %v8179_v35 = vadd.f32 %v20761_v28, %v6581_v15  ;;  %v8540_v23 = vpop.permute.xlu1 %8539  ;;  %v20764_v11 = vld [vmem:[#allocation453_spill] sm:$0xff]  ;;  %v20776_v29 = vld [vmem:[#allocation190_spill] sm:$0xff] }
 0x81c   : > { %v8538_v40 = vpop.permute.xlu0 %8537  ;;  %v11427_v48 = vpop.eup %11426  ;;  %v6584_v57 = vadd.f32 %v17978_v56, %v20762_v7  ;;  %9018 = vst.msk [vmem:[%s17186_s10 + $0x288] sm:$0xff] %vm375_vm1, %v8924_v6  ;;  %v8738_v19 = vadd.f32 %v8540_v23, %v7140_v32  ;;  %v6583_v2 = vadd.f32 %v17981_v5, %v20763_v21  ;;  %v7142_v59 = vadd.f32 %v20764_v11, %v5356_v50  ;;  %v20778_v37 = vld [vmem:[#allocation457_spill] sm:$0xff]  ;;  %v20780_v7 = vld [vmem:[#allocation92_spill] sm:$0xff]  ;;  %v20782_v11 = vld [vmem:[#allocation459_spill] sm:$0xff] }
 0x81d   : > { %9017 = vst.msk [vmem:[%s17186_s10 + $0x280] sm:$0xff] %vm375_vm1, %v8923_v8  ;;  %v8737_v34 = vadd.f32 %v8538_v40, %v7139_v55  ;;  %v7141_v30 = vadd.f32 %v20765_v24, %v5355_v22  ;;  %11442 = vrcp.f32 %v8180_v60  ;;  %v5358_v25 = vmul.f32 %v17866_v0, %v20767_v31  ;;  %v20771_v0 = vld [vmem:[#allocation444_spill] sm:$0xff]  ;;  %v20777_v60 = vld [vmem:[#allocation91_spill] sm:$0xff]  ;;  %v20779_v22 = vld [vmem:[#allocation458_spill] sm:$0xff] }
 0x81e   : > { %v11429_v20 = vpop.eup %11428  ;;  %v8182_v38 = vadd.f32 %v20766_v42, %v6584_v57  ;;  %v8926_v36 = vmul.f32 %v11427_v48, %v8738_v19  ;;  %v5357_v4 = vmul.f32 %v17869_v13, %v20768_v41  ;;  %11444 = vrcp.f32 %v8179_v35  ;;  %v20772_v13 = vld [vmem:[#allocation455_spill] sm:$0xff]  ;;  %v20781_v19 = vld [vmem:[#allocation93_spill] sm:$0xff]  ;;  %v20783_v24 = vld [vmem:[#allocation460_spill] sm:$0xff] }
 0x81f   : > { %v11431_v62 = vpop.eup %11430  ;;  %v8925_v54 = vmul.f32 %v11429_v20, %v8737_v34  ;;  %v8181_v33 = vadd.f32 %v20769_v49, %v6583_v2  ;;  %v7144_v58 = vadd.f32 %v20772_v13, %v5358_v25  ;;  %v5360_v15 = vmul.f32 %v17922_v43, %v20775_v39  ;;  %v20784_v31 = vld [vmem:[#allocation94_spill] sm:$0xff]  ;;  %v20785_v25 = vld [vmem:[#allocation95_spill] sm:$0xff] }
 0x820   : > { %v11433_v9 = vpop.eup %11432  ;;  %v8544_v52 = vpop.permute.xlu1 %8543  ;;  %v6586_v3 = vadd.f32 %v11431_v62, %v20770_v46  ;;  %9020 = vst.msk [vmem:[%s17186_s10 + $0x298] sm:$0xff] %vm375_vm1, %v8926_v36  ;;  %v7143_v47 = vadd.f32 %v20773_v1, %v5357_v4  ;;  %11446 = vrcp.f32 %v8182_v38  ;;  %v5359_v6 = vmul.f32 %v17925_v61, %v20777_v60 }
 0x821   : > { %v8542_v45 = vpop.permute.xlu0 %8541  ;;  %v11435_v16 = vpop.eup %11434  ;;  %9019 = vst.msk [vmem:[%s17186_s10 + $0x290] sm:$0xff] %vm375_vm1, %v8925_v54  ;;  %v8740_v10 = vadd.f32 %v8544_v52, %v7142_v59  ;;  %v6585_v53 = vadd.f32 %v11433_v9, %v20771_v0  ;;  %11448 = vrcp.f32 %v8181_v33  ;;  %v7146_v43 = vadd.f32 %v20778_v37, %v5360_v15  ;;  %v20786_v52 = vld [vmem:[#allocation461_spill] sm:$0xff] }
 0x822   : > { %v8739_v63 = vadd.f32 %v8542_v45, %v7141_v30  ;;  %v11437_v44 = vpop.eup %11436  ;;  %v8184_v12 = vadd.f32 %v20774_v51, %v6586_v3  ;;  %v7145_v28 = vadd.f32 %v20779_v22, %v5359_v6  ;;  %v5362_v57 = vmul.f32 %v17978_v56, %v20780_v7 }
 0x823   : > { %v8928_v26 = vmul.f32 %v11435_v16, %v8740_v10  ;;  %v8183_v32 = vadd.f32 %v20776_v29, %v6585_v53  ;;  %v5361_v34 = vmul.f32 %v17981_v5, %v20781_v19  ;;  %v5364_v5 = vmul.f32 %v11431_v62, %v20784_v31  ;;  %v20787_v16 = vld [vmem:[#allocation462_spill] sm:$0xff] }
 0x824   : > { %v8927_v14 = vmul.f32 %v11437_v44, %v8739_v63  ;;  %v8548_v18 = vpop.permute.xlu1 %8547  ;;  %v11439_v17 = vpop.eup %11438  ;;  %11450 = vrcp.f32 %v8184_v12  ;;  %v7148_v59 = vadd.f32 %v20782_v11, %v5362_v57  ;;  %v5363_v41 = vmul.f32 %v11433_v9, %v20785_v25 }
 0x825   : > { %v8546_v55 = vpop.permute.xlu0 %8545  ;;  %9022 = vst.msk [vmem:[%s17186_s10 + $0x2a8] sm:$0xff] %vm375_vm1, %v8928_v26  ;;  %v8742_v8 = vadd.f32 %v8548_v18, %v7144_v58  ;;  %v11441_v50 = vpop.eup %11440  ;;  %11452 = vrcp.f32 %v8183_v32  ;;  %v7147_v30 = vadd.f32 %v20783_v24, %v5361_v34  ;;  %v7150_v45 = vadd.f32 %v20786_v52, %v5364_v5 }
 0x826   : > { %9021 = vst.msk [vmem:[%s17186_s10 + $0x2a0] sm:$0xff] %vm375_vm1, %v8927_v14  ;;  %v8741_v27 = vadd.f32 %v8546_v55, %v7143_v47  ;;  %v7149_v46 = vadd.f32 %v20787_v16, %v5363_v41 }
 0x827   : > { %v8930_v35 = vmul.f32 %v11439_v17, %v8742_v8  ;;  %v11443_v61 = vpop.eup %11442 }
 0x828   : > { %v8929_v23 = vmul.f32 %v11441_v50, %v8741_v27  ;;  %v8552_v40 = vpop.permute.xlu1 %8551  ;;  %v11445_v2 = vpop.eup %11444 }
 0x829   : > { %v8550_v48 = vpop.permute.xlu0 %8549  ;;  %9024 = vst.msk [vmem:[%s17186_s10 + $0x2b8] sm:$0xff] %vm375_vm1, %v8930_v35  ;;  %v8744_v20 = vadd.f32 %v8552_v40, %v7146_v43 }
 0x82a   : > { %9023 = vst.msk [vmem:[%s17186_s10 + $0x2b0] sm:$0xff] %vm375_vm1, %v8929_v23  ;;  %v8743_v21 = vadd.f32 %v8550_v48, %v7145_v28  ;;  %v11447_v54 = vpop.eup %11446 }
 0x82b   : > { %v8932_v42 = vmul.f32 %v11443_v61, %v8744_v20  ;;  %v11449_v33 = vpop.eup %11448 }
 0x82c   : > { %v8931_v38 = vmul.f32 %v11445_v2, %v8743_v21 }
 0x82d   : > { %v8556_v36 = vpop.permute.xlu1 %8555  ;;  %v8554_v56 = vpop.permute.xlu0 %8553  ;;  %9026 = vst.msk [vmem:[%s17186_s10 + $0x2c8] sm:$0xff] %vm375_vm1, %v8932_v42 }
 0x82e   : > { %9025 = vst.msk [vmem:[%s17186_s10 + $0x2c0] sm:$0xff] %vm375_vm1, %v8931_v38  ;;  %v8746_v4 = vadd.f32 %v8556_v36, %v7148_v59  ;;  %v8745_v49 = vadd.f32 %v8554_v56, %v7147_v30  ;;  %v11451_v62 = vpop.eup %11450 }
 0x82f   : > { %v11453_v53 = vpop.eup %11452 }
 0x830   : > { %v8934_v3 = vmul.f32 %v11447_v54, %v8746_v4  ;;  %v8933_v10 = vmul.f32 %v11449_v33, %v8745_v49 }
 0x831   : > { %v8560_v63 = vpop.permute.xlu1 %8559  ;;  %v8558_v44 = vpop.permute.xlu0 %8557 }
 0x832   : > { %9028 = vst.msk [vmem:[%s17186_s10 + $0x2d8] sm:$0xff] %vm375_vm1, %v8934_v3  ;;  %9027 = vst.msk [vmem:[%s17186_s10 + $0x2d0] sm:$0xff] %vm375_vm1, %v8933_v10  ;;  %v8748_v9 = vadd.f32 %v8560_v63, %v7150_v45  ;;  %v8747_v0 = vadd.f32 %v8558_v44, %v7149_v46 }
 0x834   : > { %v8936_v13 = vmul.f32 %v11451_v62, %v8748_v9  ;;  %v8935_v58 = vmul.f32 %v11453_v53, %v8747_v0 }
 0x836   : > { %9030 = vst.msk [vmem:[%s17186_s10 + $0x2e8] sm:$0xff] %vm375_vm1, %v8936_v13  ;;  %9029 = vst.msk [vmem:[%s17186_s10 + $0x2e0] sm:$0xff] %vm375_vm1, %v8935_v58 }
 0x837 PF: > { %s16_s21 = sadd.s32 1, %s11460_s21  }
 0x838   : > { %p13_p4 = scmp.ge.s32.totalorder %s16_s21, 4  }
 0x83a   :  { %15 = sbr.rel (!%p13_p4) target bundleno = 1 (0x1), region = 77 }

</bundles_post_ra>
